<compile_context>
chip_gen: v6e
topology: v6e:2x2x1
jax: 0.10.0
libtpu: 0.0.40
codegen_flags: <defaults>
</compile_context>

<pallas_src>
import jax
import jax.numpy as jnp
import numpy as np
from jax import lax
from jax.experimental import pallas as pl
from jax.experimental.pallas import tpu as pltpu

_EPS = 1e-5
_LANE = 128
_MXU_DTYPE = jnp.bfloat16


def _round_up(x, m):
    return ((x + m - 1) // m) * m


def _pad_last(a, target):
    pad = target - a.shape[-1]
    if pad == 0:
        return a
    cfg = [(0, 0)] * (a.ndim - 1) + [(0, pad)]
    return jnp.pad(a, cfg)


def _vmem_limit_bytes():
    """Per-generation VMEM limit: generous on 128 MiB parts, bounded on v7x."""
    cap = 64 * 1024 * 1024
    try:
        cap = int(getattr(pltpu.get_tpu_info(), "vmem_capacity_bytes", cap))
    except Exception:
        pass
    return int(max(32 * 1024 * 1024,
                   min(cap - 16 * 1024 * 1024, 100 * 1024 * 1024)))


def _conv3x3_w_flat(w_oihw, cin_p, cout_p):
    """OIHW (O,I,3,3) -> (9*cin_p, cout_p) bf16, row blocks ordered (kh, kw)."""
    o, i = w_oihw.shape[0], w_oihw.shape[1]
    w = jnp.transpose(w_oihw, (2, 3, 1, 0))                      # (3, 3, I, O)
    w = jnp.pad(w, ((0, 0), (0, 0), (0, cin_p - i), (0, cout_p - o)))
    return w.reshape(9 * cin_p, cout_p).astype(_MXU_DTYPE)


def _fill_padded(pad_ref, act_3d, H, W, C):
    """Store act (H, W, C) into the spatially padded bf16 scratch; only the
    1-wide halo is zeroed (interior fully overwritten)."""
    dt = _MXU_DTYPE
    pad_ref[0:1, :, :] = jnp.zeros((1, W + 2, C), dt)
    pad_ref[H + 1:H + 2, :, :] = jnp.zeros((1, W + 2, C), dt)
    pad_ref[:, 0:1, :] = jnp.zeros((H + 2, 1, C), dt)
    pad_ref[:, W + 1:W + 2, :] = jnp.zeros((H + 2, 1, C), dt)
    pad_ref[1:H + 1, 1:W + 1, :] = act_3d.astype(dt)


def _conv3x3_accum(pad_ref, w_ref, acc_ref, H, W, cin, cout):
    """3x3 conv as 9 accumulating K=cin matmuls over shifted views of pad_ref.
    Accumulates into the (H*W, cout) f32 VMEM scratch (one RMW per kh)."""
    HW = H * W
    for kh in range(3):
        part = None
        for kw in range(3):
            t = kh * 3 + kw
            tap = pad_ref[kh:kh + H, kw:kw + W, :].reshape(HW, cin)
            p = jnp.dot(tap, w_ref[t * cin:(t + 1) * cin, :],
                        preferred_element_type=jnp.float32)
            part = p if part is None else part + p
        if kh == 0:
            acc_ref[...] = part
        else:
            acc_ref[...] += part


def _make_conv1_kernel(H, W, cin_p, cout_p):
    def kernel(x_ref, s1_ref, t1_ref, w1_ref, c1b_ref,
               y1_ref, st_ref, pad_ref, acc_ref):
        # BN1 (precomputed affine from global batch stats) + ReLU, f32 math
        x = x_ref[0].astype(jnp.float32)                          # (H, W, cin_p)
        a = jnp.maximum(x * s1_ref[...].reshape(1, 1, cin_p)
                        + t1_ref[...].reshape(1, 1, cin_p), 0.0)

        # conv1: 9 accumulating taps, bf16 MXU operands, f32 accumulation
        _fill_padded(pad_ref, a, H, W, cin_p)
        _conv3x3_accum(pad_ref, w1_ref, acc_ref, H, W, cin_p, cout_p)
        y = acc_ref[...] + c1b_ref[...]                           # (HW, cout_p) f32

        # y1 stored as bf16 (halves HBM traffic); BN2 partial sums from f32
        y1_ref[0] = y.reshape(H, W, cout_p).astype(y1_ref.dtype)
        st_ref[0] = jnp.concatenate(
            [jnp.sum(y, axis=0, keepdims=True),
             jnp.sum(y * y, axis=0, keepdims=True)], axis=0)

    return kernel


def _make_conv2_kernel(H, W, cin_p, cout_p, has_skip_conv):
    HW = H * W

    def kernel(x_ref, y1_ref, s2_ref, t2_ref, w2_ref, c2b_ref, *rest):
        if has_skip_conv:
            ws_ref, bs_ref, out_ref, pad_ref, acc_ref = rest
        else:
            out_ref, pad_ref, acc_ref = rest

        # BN2 (precomputed affine from global batch stats) + ReLU, f32 math
        y1 = y1_ref[0].astype(jnp.float32)                        # (H, W, cout_p)
        a = jnp.maximum(y1 * s2_ref[...].reshape(1, 1, cout_p)
                        + t2_ref[...].reshape(1, 1, cout_p), 0.0)

        # conv2: 9 accumulating taps
        _fill_padded(pad_ref, a, H, W, cout_p)
        _conv3x3_accum(pad_ref, w2_ref, acc_ref, H, W, cout_p, cout_p)
        y = acc_ref[...] + c2b_ref[...]                           # (HW, cout_p) f32

        # skip branch (fused add); bf16 MXU operands for the 1x1 conv
        x_flat = x_ref[0].reshape(HW, cin_p)                      # bf16
        if has_skip_conv:
            skip = jnp.dot(x_flat, ws_ref[...],
                           preferred_element_type=jnp.float32) + bs_ref[...]
        else:
            skip = x_flat.astype(jnp.float32)                     # cin_p == cout_p

        out_ref[0] = (skip + y).reshape(H, W, cout_p)

    return kernel


def resnet_v2_block_bn(x_nchw, params):
    """Forward pass of ResNetV2BlockBN. x_nchw: (N, Cin, H, W) float32."""
    N, Cin, H, W = x_nchw.shape
    Cout = params["w1"].shape[0]
    has_skip_conv = "ws" in params
    cin_p = _round_up(Cin, _LANE)
    cout_p = _round_up(Cout, _LANE)

    # BN1 affine from batch stats, computed straight on the NCHW input
    # (training-mode, biased variance) -- cheap XLA reduction, no extra transpose.
    mu1 = jnp.mean(x_nchw, axis=(0, 2, 3))
    var1 = jnp.mean(jnp.square(x_nchw - mu1.reshape(1, Cin, 1, 1)), axis=(0, 2, 3))
    s1 = params["g1"] * lax.rsqrt(var1 + _EPS)
    t1 = params["b1"] - mu1 * s1

    # NHWC, channel-padded (lane-dense), bf16 -- single fused XLA relayout pass.
    x_p = _pad_last(jnp.transpose(x_nchw, (0, 2, 3, 1)), cin_p).astype(_MXU_DTYPE)

    cparams = pltpu.CompilerParams(
        dimension_semantics=("parallel",),        # dual-TC split on v7x
        vmem_limit_bytes=_vmem_limit_bytes(),     # per-generation limit
    )

    # ---------- stage 1: BN1+ReLU -> conv1 (+ per-sample BN2 partial stats) ----------
    k1 = _make_conv1_kernel(H, W, cin_p, cout_p)
    y1, stats = pl.pallas_call(
        k1,
        grid=(N,),
        out_shape=(jax.ShapeDtypeStruct((N, H, W, cout_p), _MXU_DTYPE),
                   jax.ShapeDtypeStruct((N, 2, cout_p), jnp.float32)),
        in_specs=[
            pl.BlockSpec((1, H, W, cin_p), lambda n: (n, 0, 0, 0)),
            pl.BlockSpec((1, cin_p), lambda n: (0, 0)),
            pl.BlockSpec((1, cin_p), lambda n: (0, 0)),
            pl.BlockSpec((9 * cin_p, cout_p), lambda n: (0, 0)),
            pl.BlockSpec((1, cout_p), lambda n: (0, 0)),
        ],
        out_specs=[
            pl.BlockSpec((1, H, W, cout_p), lambda n: (n, 0, 0, 0)),
            pl.BlockSpec((1, 2, cout_p), lambda n: (n, 0, 0)),
        ],
        scratch_shapes=[
            pltpu.VMEM((H + 2, W + 2, cin_p), _MXU_DTYPE),   # padded activation
            pltpu.VMEM((H * W, cout_p), jnp.float32),        # f32 conv accumulator
        ],
        compiler_params=cparams,
    )(
        x_p,
        _pad_last(s1.reshape(1, Cin).astype(jnp.float32), cin_p),
        _pad_last(t1.reshape(1, Cin).astype(jnp.float32), cin_p),
        _conv3x3_w_flat(params["w1"], cin_p, cout_p),
        _pad_last(params["c1b"].reshape(1, Cout).astype(jnp.float32), cout_p),
    )

    # BN2 affine from the accumulated partial sums (global over N, H, W; biased var)
    count = float(N * H * W)
    ssum = jnp.sum(stats[:, 0, :Cout], axis=0)
    ssq = jnp.sum(stats[:, 1, :Cout], axis=0)
    mu2 = ssum / count
    var2 = jnp.maximum(ssq / count - mu2 * mu2, 0.0)
    s2 = params["g2"] * lax.rsqrt(var2 + _EPS)
    t2 = params["b2"] - mu2 * s2

    # ---------- stage 2: BN2+ReLU -> conv2, fused with skip + add ----------
    args2 = [
        x_p, y1,
        _pad_last(s2.reshape(1, Cout).astype(jnp.float32), cout_p),
        _pad_last(t2.reshape(1, Cout).astype(jnp.float32), cout_p),
        _conv3x3_w_flat(params["w2"], cout_p, cout_p),
        _pad_last(params["c2b"].reshape(1, Cout).astype(jnp.float32), cout_p),
    ]
    in_specs2 = [
        pl.BlockSpec((1, H, W, cin_p), lambda n: (n, 0, 0, 0)),
        pl.BlockSpec((1, H, W, cout_p), lambda n: (n, 0, 0, 0)),
        pl.BlockSpec((1, cout_p), lambda n: (0, 0)),
        pl.BlockSpec((1, cout_p), lambda n: (0, 0)),
        pl.BlockSpec((9 * cout_p, cout_p), lambda n: (0, 0)),
        pl.BlockSpec((1, cout_p), lambda n: (0, 0)),
    ]
    if has_skip_conv:
        ws = jnp.transpose(params["ws"].reshape(Cout, Cin), (1, 0))       # (Cin, Cout)
        ws_p = jnp.pad(ws, ((0, cin_p - Cin), (0, cout_p - Cout))).astype(_MXU_DTYPE)
        args2 += [ws_p, _pad_last(params["bs"].reshape(1, Cout).astype(jnp.float32), cout_p)]
        in_specs2 += [
            pl.BlockSpec((cin_p, cout_p), lambda n: (0, 0)),
            pl.BlockSpec((1, cout_p), lambda n: (0, 0)),
        ]

    k2 = _make_conv2_kernel(H, W, cin_p, cout_p, has_skip_conv)
    out_p = pl.pallas_call(
        k2,
        grid=(N,),
        out_shape=jax.ShapeDtypeStruct((N, H, W, cout_p), jnp.float32),
        in_specs=in_specs2,
        out_specs=pl.BlockSpec((1, H, W, cout_p), lambda n: (n, 0, 0, 0)),
        scratch_shapes=[
            pltpu.VMEM((H + 2, W + 2, cout_p), _MXU_DTYPE),
            pltpu.VMEM((H * W, cout_p), jnp.float32),
        ],
        compiler_params=cparams,
    )(*args2)

    out = out_p[..., :Cout]                       # drop channel padding
    return jnp.transpose(out, (0, 3, 1, 2))       # NHWC -> NCHW (module contract)


def _reference(x, p):
    """Pure-JAX f32 reference (NCHW, lax conv) for verification."""
    def bn_relu(z, g, b):
        mu = z.mean(axis=(0, 2, 3), keepdims=True)
        var = ((z - mu) ** 2).mean(axis=(0, 2, 3), keepdims=True)
        y = (z - mu) * lax.rsqrt(var + _EPS) * g.reshape(1, -1, 1, 1) + b.reshape(1, -1, 1, 1)
        return jnp.maximum(y, 0.0)

    def conv(z, w, b, pad):
        y = lax.conv_general_dilated(z, w, (1, 1), ((pad, pad), (pad, pad)),
                                     dimension_numbers=("NCHW", "OIHW", "NCHW"))
        return y + b.reshape(1, -1, 1, 1)

    a = bn_relu(x, p["g1"], p["b1"])
    y = conv(a, p["w1"], p["c1b"], 1)
    a = bn_relu(y, p["g2"], p["b2"])
    y = conv(a, p["w2"], p["c2b"], 1)
    skip = conv(x, p["ws"], p["bs"], 0) if "ws" in p else x
    return skip + y


def _init_params(key, in_maps, out_maps):
    ks = jax.random.split(key, 10)
    p = {
        "g1": 1.0 + 0.1 * jax.random.normal(ks[0], (in_maps,), jnp.float32),
        "b1": 0.1 * jax.random.normal(ks[1], (in_maps,), jnp.float32),
        "w1": 0.2 * jax.random.normal(ks[2], (out_maps, in_maps, 3, 3), jnp.float32),
        "c1b": 0.1 * jax.random.normal(ks[3], (out_maps,), jnp.float32),
        "g2": 1.0 + 0.1 * jax.random.normal(ks[4], (out_maps,), jnp.float32),
        "b2": 0.1 * jax.random.normal(ks[5], (out_maps,), jnp.float32),
        "w2": 0.2 * jax.random.normal(ks[6], (out_maps, out_maps, 3, 3), jnp.float32),
        "c2b": 0.1 * jax.random.normal(ks[7], (out_maps,), jnp.float32),
    }
    if in_maps != out_maps:
        p["ws"] = 0.2 * jax.random.normal(ks[8], (out_maps, in_maps, 1, 1), jnp.float32)
        p["bs"] = 0.1 * jax.random.normal(ks[9], (out_maps,), jnp.float32)
    return p


if __name__ == "__main__":
    key = jax.random.PRNGKey(0)
    kx, kp, kx2, kp2 = jax.random.split(key, 4)

    # Case 1: in_maps != out_maps (skip is a 1x1 conv)
    N, Cin, H, W, Cout = 2, 4, 16, 16, 8
    x = jax.random.normal(kx, (N, Cin, H, W), jnp.float32)
    params = _init_params(kp, Cin, Cout)
    out = jax.block_until_ready(jax.jit(resnet_v2_block_bn)(x, params))
    ref = jax.block_until_ready(_reference(x, params))
    assert out.shape == (N, Cout, H, W), out.shape
    # tolerance sized for bf16 MXU operands / bf16 activations (f32 accumulation)
    np.testing.assert_allclose(np.asarray(out), np.asarray(ref), rtol=5e-2, atol=5e-2)

    # Case 2: in_maps == out_maps (identity skip)
    x2 = jax.random.normal(kx2, (2, 8, 16, 16), jnp.float32)
    params2 = _init_params(kp2, 8, 8)
    out2 = jax.block_until_ready(jax.jit(resnet_v2_block_bn)(x2, params2))
    ref2 = jax.block_until_ready(_reference(x2, params2))
    np.testing.assert_allclose(np.asarray(out2), np.asarray(ref2), rtol=5e-2, atol=5e-2)

    print("KERNEL_OK")
</pallas_src>

<mosaic_0001>
module attributes {stable_mosaic.version = 11 : i64} {
  func.func @kernel(%arg0: i32, %arg1: memref<1x16x16x128xbf16, #tpu.memory_space<vmem>>, %arg2: memref<1x128xf32, #tpu.memory_space<vmem>>, %arg3: memref<1x128xf32, #tpu.memory_space<vmem>>, %arg4: memref<1152x128xbf16, #tpu.memory_space<vmem>>, %arg5: memref<1x128xf32, #tpu.memory_space<vmem>>, %arg6: memref<1x16x16x128xbf16, #tpu.memory_space<vmem>>, %arg7: memref<1x2x128xf32, #tpu.memory_space<vmem>>, %arg8: memref<18x18x128xbf16, #tpu.memory_space<vmem>>, %arg9: memref<256x128xf32, #tpu.memory_space<vmem>>) attributes {dimension_semantics = [#tpu.dimension_semantics<parallel>], iteration_bounds = array<i64: 2>, scalar_prefetch = 0 : i64, scratch_operands = 2 : i64, tpu.core_type = #tpu.core_type<tc>, window_params = [{transform_indices = @transform_0, window_bounds = array<i64: 1, 16, 16, 128>}, {pipeline_mode = #tpu.pipeline_mode<synchronous>, transform_indices = @transform_1, window_bounds = array<i64: 1, 128>}, {pipeline_mode = #tpu.pipeline_mode<synchronous>, transform_indices = @transform_2, window_bounds = array<i64: 1, 128>}, {pipeline_mode = #tpu.pipeline_mode<synchronous>, transform_indices = @transform_3, window_bounds = array<i64: 1152, 128>}, {pipeline_mode = #tpu.pipeline_mode<synchronous>, transform_indices = @transform_4, window_bounds = array<i64: 1, 128>}, {transform_indices = @transform_5, window_bounds = array<i64: 1, 16, 16, 128>}, {transform_indices = @transform_6, window_bounds = array<i64: 1, 2, 128>}]} {
    %c0 = arith.constant 0 : index
    %c0_0 = arith.constant 0 : index
    %c0_1 = arith.constant 0 : index
    %c0_2 = arith.constant 0 : index
    %0 = vector.load %arg1[%c0, %c0_0, %c0_1, %c0_2] : memref<1x16x16x128xbf16, #tpu.memory_space<vmem>>, vector<1x16x16x128xbf16>
    %1 = vector.shape_cast %0 : vector<1x16x16x128xbf16> to vector<16x16x128xbf16>
    %2 = arith.extf %1 : vector<16x16x128xbf16> to vector<16x16x128xf32>
    %c0_3 = arith.constant 0 : index
    %c0_4 = arith.constant 0 : index
    %3 = vector.load %arg2[%c0_3, %c0_4] : memref<1x128xf32, #tpu.memory_space<vmem>>, vector<1x128xf32>
    %4 = vector.shape_cast %3 : vector<1x128xf32> to vector<1x1x128xf32>
    %5 = vector.broadcast %4 : vector<1x1x128xf32> to vector<16x16x128xf32>
    %6 = arith.mulf %2, %5 : vector<16x16x128xf32>
    %c0_5 = arith.constant 0 : index
    %c0_6 = arith.constant 0 : index
    %7 = vector.load %arg3[%c0_5, %c0_6] : memref<1x128xf32, #tpu.memory_space<vmem>>, vector<1x128xf32>
    %8 = vector.shape_cast %7 : vector<1x128xf32> to vector<1x1x128xf32>
    %9 = vector.broadcast %8 : vector<1x1x128xf32> to vector<16x16x128xf32>
    %10 = arith.addf %6, %9 : vector<16x16x128xf32>
    %cst = arith.constant 0.000000e+00 : f32
    %11 = vector.broadcast %cst : f32 to vector<16x16x128xf32>
    %12 = arith.maximumf %10, %11 : vector<16x16x128xf32>
    %cst_7 = arith.constant 0.000000e+00 : bf16
    %13 = vector.broadcast %cst_7 : bf16 to vector<1x18x128xbf16>
    %c0_8 = arith.constant 0 : index
    %c0_9 = arith.constant 0 : index
    %c0_10 = arith.constant 0 : index
    %14 = vector.load %arg8[%c0_8, %c0_9, %c0_10] : memref<18x18x128xbf16, #tpu.memory_space<vmem>>, vector<1x18x128xbf16>
    tpu.vector_store %arg8[%c0_8, %c0_9, %c0_10], %13 {strides = array<i32>} : memref<18x18x128xbf16, #tpu.memory_space<vmem>>, vector<1x18x128xbf16>,
    %cst_11 = arith.constant 0.000000e+00 : bf16
    %15 = vector.broadcast %cst_11 : bf16 to vector<1x18x128xbf16>
    %c17 = arith.constant 17 : index
    %c0_12 = arith.constant 0 : index
    %c0_13 = arith.constant 0 : index
    %16 = vector.load %arg8[%c17, %c0_12, %c0_13] : memref<18x18x128xbf16, #tpu.memory_space<vmem>>, vector<1x18x128xbf16>
    tpu.vector_store %arg8[%c17, %c0_12, %c0_13], %15 {strides = array<i32>} : memref<18x18x128xbf16, #tpu.memory_space<vmem>>, vector<1x18x128xbf16>,
    %cst_14 = arith.constant 0.000000e+00 : bf16
    %17 = vector.broadcast %cst_14 : bf16 to vector<18x1x128xbf16>
    %c0_15 = arith.constant 0 : index
    %c0_16 = arith.constant 0 : index
    %c0_17 = arith.constant 0 : index
    %18 = vector.load %arg8[%c0_15, %c0_16, %c0_17] : memref<18x18x128xbf16, #tpu.memory_space<vmem>>, vector<18x1x128xbf16>
    tpu.vector_store %arg8[%c0_15, %c0_16, %c0_17], %17 {strides = array<i32>} : memref<18x18x128xbf16, #tpu.memory_space<vmem>>, vector<18x1x128xbf16>,
    %cst_18 = arith.constant 0.000000e+00 : bf16
    %19 = vector.broadcast %cst_18 : bf16 to vector<18x1x128xbf16>
    %c0_19 = arith.constant 0 : index
    %c17_20 = arith.constant 17 : index
    %c0_21 = arith.constant 0 : index
    %20 = vector.load %arg8[%c0_19, %c17_20, %c0_21] : memref<18x18x128xbf16, #tpu.memory_space<vmem>>, vector<18x1x128xbf16>
    tpu.vector_store %arg8[%c0_19, %c17_20, %c0_21], %19 {strides = array<i32>} : memref<18x18x128xbf16, #tpu.memory_space<vmem>>, vector<18x1x128xbf16>,
    %21 = arith.truncf %12 : vector<16x16x128xf32> to vector<16x16x128xbf16>
    %c1 = arith.constant 1 : index
    %c1_22 = arith.constant 1 : index
    %c0_23 = arith.constant 0 : index
    %22 = vector.load %arg8[%c1, %c1_22, %c0_23] : memref<18x18x128xbf16, #tpu.memory_space<vmem>>, vector<16x16x128xbf16>
    tpu.vector_store %arg8[%c1, %c1_22, %c0_23], %21 {strides = array<i32>} : memref<18x18x128xbf16, #tpu.memory_space<vmem>>, vector<16x16x128xbf16>,
    %c0_24 = arith.constant 0 : index
    %c0_25 = arith.constant 0 : index
    %c0_26 = arith.constant 0 : index
    %23 = vector.load %arg8[%c0_24, %c0_25, %c0_26] : memref<18x18x128xbf16, #tpu.memory_space<vmem>>, vector<16x16x128xbf16>
    %24 = vector.shape_cast %23 : vector<16x16x128xbf16> to vector<256x128xbf16>
    %c0_27 = arith.constant 0 : index
    %c0_28 = arith.constant 0 : index
    %25 = vector.load %arg4[%c0_27, %c0_28] : memref<1152x128xbf16, #tpu.memory_space<vmem>>, vector<128x128xbf16>
    %cst_29 = arith.constant dense<0.000000e+00> : vector<256x128xf32>
    %26 = tpu.matmul %24, %25, %cst_29 {dimension_numbers = #tpu.dot_dimension_numbers<[1], [0], [0], [1], [0, 0, 1, 1], [], []>} : vector<256x128xbf16>, vector<128x128xbf16>, vector<256x128xf32> -> vector<256x128xf32>
    %c0_30 = arith.constant 0 : index
    %c1_31 = arith.constant 1 : index
    %c0_32 = arith.constant 0 : index
    %27 = vector.load %arg8[%c0_30, %c1_31, %c0_32] : memref<18x18x128xbf16, #tpu.memory_space<vmem>>, vector<16x16x128xbf16>
    %28 = vector.shape_cast %27 : vector<16x16x128xbf16> to vector<256x128xbf16>
    %c128 = arith.constant 128 : index
    %c0_33 = arith.constant 0 : index
    %29 = vector.load %arg4[%c128, %c0_33] : memref<1152x128xbf16, #tpu.memory_space<vmem>>, vector<128x128xbf16>
    %cst_34 = arith.constant dense<0.000000e+00> : vector<256x128xf32>
    %30 = tpu.matmul %28, %29, %cst_34 {dimension_numbers = #tpu.dot_dimension_numbers<[1], [0], [0], [1], [0, 0, 1, 1], [], []>} : vector<256x128xbf16>, vector<128x128xbf16>, vector<256x128xf32> -> vector<256x128xf32>
    %31 = arith.addf %26, %30 : vector<256x128xf32>
    %c0_35 = arith.constant 0 : index
    %c2 = arith.constant 2 : index
    %c0_36 = arith.constant 0 : index
    %32 = vector.load %arg8[%c0_35, %c2, %c0_36] : memref<18x18x128xbf16, #tpu.memory_space<vmem>>, vector<16x16x128xbf16>
    %33 = vector.shape_cast %32 : vector<16x16x128xbf16> to vector<256x128xbf16>
    %c256 = arith.constant 256 : index
    %c0_37 = arith.constant 0 : index
    %34 = vector.load %arg4[%c256, %c0_37] : memref<1152x128xbf16, #tpu.memory_space<vmem>>, vector<128x128xbf16>
    %cst_38 = arith.constant dense<0.000000e+00> : vector<256x128xf32>
    %35 = tpu.matmul %33, %34, %cst_38 {dimension_numbers = #tpu.dot_dimension_numbers<[1], [0], [0], [1], [0, 0, 1, 1], [], []>} : vector<256x128xbf16>, vector<128x128xbf16>, vector<256x128xf32> -> vector<256x128xf32>
    %36 = arith.addf %31, %35 : vector<256x128xf32>
    %c0_39 = arith.constant 0 : index
    %c0_40 = arith.constant 0 : index
    %37 = vector.load %arg9[%c0_39, %c0_40] : memref<256x128xf32, #tpu.memory_space<vmem>>, vector<256x128xf32>
    tpu.vector_store %arg9[%c0_39, %c0_40], %36 {strides = array<i32>} : memref<256x128xf32, #tpu.memory_space<vmem>>, vector<256x128xf32>,
    %c1_41 = arith.constant 1 : index
    %c0_42 = arith.constant 0 : index
    %c0_43 = arith.constant 0 : index
    %38 = vector.load %arg8[%c1_41, %c0_42, %c0_43] : memref<18x18x128xbf16, #tpu.memory_space<vmem>>, vector<16x16x128xbf16>
    %39 = vector.shape_cast %38 : vector<16x16x128xbf16> to vector<256x128xbf16>
    %c384 = arith.constant 384 : index
    %c0_44 = arith.constant 0 : index
    %40 = vector.load %arg4[%c384, %c0_44] : memref<1152x128xbf16, #tpu.memory_space<vmem>>, vector<128x128xbf16>
    %cst_45 = arith.constant dense<0.000000e+00> : vector<256x128xf32>
    %41 = tpu.matmul %39, %40, %cst_45 {dimension_numbers = #tpu.dot_dimension_numbers<[1], [0], [0], [1], [0, 0, 1, 1], [], []>} : vector<256x128xbf16>, vector<128x128xbf16>, vector<256x128xf32> -> vector<256x128xf32>
    %c1_46 = arith.constant 1 : index
    %c1_47 = arith.constant 1 : index
    %c0_48 = arith.constant 0 : index
    %42 = vector.load %arg8[%c1_46, %c1_47, %c0_48] : memref<18x18x128xbf16, #tpu.memory_space<vmem>>, vector<16x16x128xbf16>
    %43 = vector.shape_cast %42 : vector<16x16x128xbf16> to vector<256x128xbf16>
    %c512 = arith.constant 512 : index
    %c0_49 = arith.constant 0 : index
    %44 = vector.load %arg4[%c512, %c0_49] : memref<1152x128xbf16, #tpu.memory_space<vmem>>, vector<128x128xbf16>
    %cst_50 = arith.constant dense<0.000000e+00> : vector<256x128xf32>
    %45 = tpu.matmul %43, %44, %cst_50 {dimension_numbers = #tpu.dot_dimension_numbers<[1], [0], [0], [1], [0, 0, 1, 1], [], []>} : vector<256x128xbf16>, vector<128x128xbf16>, vector<256x128xf32> -> vector<256x128xf32>
    %46 = arith.addf %41, %45 : vector<256x128xf32>
    %c1_51 = arith.constant 1 : index
    %c2_52 = arith.constant 2 : index
    %c0_53 = arith.constant 0 : index
    %47 = vector.load %arg8[%c1_51, %c2_52, %c0_53] : memref<18x18x128xbf16, #tpu.memory_space<vmem>>, vector<16x16x128xbf16>
    %48 = vector.shape_cast %47 : vector<16x16x128xbf16> to vector<256x128xbf16>
    %c640 = arith.constant 640 : index
    %c0_54 = arith.constant 0 : index
    %49 = vector.load %arg4[%c640, %c0_54] : memref<1152x128xbf16, #tpu.memory_space<vmem>>, vector<128x128xbf16>
    %cst_55 = arith.constant dense<0.000000e+00> : vector<256x128xf32>
    %50 = tpu.matmul %48, %49, %cst_55 {dimension_numbers = #tpu.dot_dimension_numbers<[1], [0], [0], [1], [0, 0, 1, 1], [], []>} : vector<256x128xbf16>, vector<128x128xbf16>, vector<256x128xf32> -> vector<256x128xf32>
    %51 = arith.addf %46, %50 : vector<256x128xf32>
    %c0_56 = arith.constant 0 : index
    %c0_57 = arith.constant 0 : index
    %52 = vector.load %arg9[%c0_56, %c0_57] : memref<256x128xf32, #tpu.memory_space<vmem>>, vector<256x128xf32>
    %53 = arith.addf %52, %51 : vector<256x128xf32>
    %c0_58 = arith.constant 0 : index
    %c0_59 = arith.constant 0 : index
    %54 = vector.load %arg9[%c0_58, %c0_59] : memref<256x128xf32, #tpu.memory_space<vmem>>, vector<256x128xf32>
    tpu.vector_store %arg9[%c0_58, %c0_59], %53 {strides = array<i32>} : memref<256x128xf32, #tpu.memory_space<vmem>>, vector<256x128xf32>,
    %c2_60 = arith.constant 2 : index
    %c0_61 = arith.constant 0 : index
    %c0_62 = arith.constant 0 : index
    %55 = vector.load %arg8[%c2_60, %c0_61, %c0_62] : memref<18x18x128xbf16, #tpu.memory_space<vmem>>, vector<16x16x128xbf16>
    %56 = vector.shape_cast %55 : vector<16x16x128xbf16> to vector<256x128xbf16>
    %c768 = arith.constant 768 : index
    %c0_63 = arith.constant 0 : index
    %57 = vector.load %arg4[%c768, %c0_63] : memref<1152x128xbf16, #tpu.memory_space<vmem>>, vector<128x128xbf16>
    %cst_64 = arith.constant dense<0.000000e+00> : vector<256x128xf32>
    %58 = tpu.matmul %56, %57, %cst_64 {dimension_numbers = #tpu.dot_dimension_numbers<[1], [0], [0], [1], [0, 0, 1, 1], [], []>} : vector<256x128xbf16>, vector<128x128xbf16>, vector<256x128xf32> -> vector<256x128xf32>
    %c2_65 = arith.constant 2 : index
    %c1_66 = arith.constant 1 : index
    %c0_67 = arith.constant 0 : index
    %59 = vector.load %arg8[%c2_65, %c1_66, %c0_67] : memref<18x18x128xbf16, #tpu.memory_space<vmem>>, vector<16x16x128xbf16>
    %60 = vector.shape_cast %59 : vector<16x16x128xbf16> to vector<256x128xbf16>
    %c896 = arith.constant 896 : index
    %c0_68 = arith.constant 0 : index
    %61 = vector.load %arg4[%c896, %c0_68] : memref<1152x128xbf16, #tpu.memory_space<vmem>>, vector<128x128xbf16>
    %cst_69 = arith.constant dense<0.000000e+00> : vector<256x128xf32>
    %62 = tpu.matmul %60, %61, %cst_69 {dimension_numbers = #tpu.dot_dimension_numbers<[1], [0], [0], [1], [0, 0, 1, 1], [], []>} : vector<256x128xbf16>, vector<128x128xbf16>, vector<256x128xf32> -> vector<256x128xf32>
    %63 = arith.addf %58, %62 : vector<256x128xf32>
    %c2_70 = arith.constant 2 : index
    %c2_71 = arith.constant 2 : index
    %c0_72 = arith.constant 0 : index
    %64 = vector.load %arg8[%c2_70, %c2_71, %c0_72] : memref<18x18x128xbf16, #tpu.memory_space<vmem>>, vector<16x16x128xbf16>
    %65 = vector.shape_cast %64 : vector<16x16x128xbf16> to vector<256x128xbf16>
    %c1024 = arith.constant 1024 : index
    %c0_73 = arith.constant 0 : index
    %66 = vector.load %arg4[%c1024, %c0_73] : memref<1152x128xbf16, #tpu.memory_space<vmem>>, vector<128x128xbf16>
    %cst_74 = arith.constant dense<0.000000e+00> : vector<256x128xf32>
    %67 = tpu.matmul %65, %66, %cst_74 {dimension_numbers = #tpu.dot_dimension_numbers<[1], [0], [0], [1], [0, 0, 1, 1], [], []>} : vector<256x128xbf16>, vector<128x128xbf16>, vector<256x128xf32> -> vector<256x128xf32>
    %68 = arith.addf %63, %67 : vector<256x128xf32>
    %c0_75 = arith.constant 0 : index
    %c0_76 = arith.constant 0 : index
    %69 = vector.load %arg9[%c0_75, %c0_76] : memref<256x128xf32, #tpu.memory_space<vmem>>, vector<256x128xf32>
    %70 = arith.addf %69, %68 : vector<256x128xf32>
    %c0_77 = arith.constant 0 : index
    %c0_78 = arith.constant 0 : index
    %71 = vector.load %arg9[%c0_77, %c0_78] : memref<256x128xf32, #tpu.memory_space<vmem>>, vector<256x128xf32>
    tpu.vector_store %arg9[%c0_77, %c0_78], %70 {strides = array<i32>} : memref<256x128xf32, #tpu.memory_space<vmem>>, vector<256x128xf32>,
    %c0_79 = arith.constant 0 : index
    %c0_80 = arith.constant 0 : index
    %72 = vector.load %arg9[%c0_79, %c0_80] : memref<256x128xf32, #tpu.memory_space<vmem>>, vector<256x128xf32>
    %c0_81 = arith.constant 0 : index
    %c0_82 = arith.constant 0 : index
    %73 = vector.load %arg5[%c0_81, %c0_82] : memref<1x128xf32, #tpu.memory_space<vmem>>, vector<1x128xf32>
    %74 = vector.broadcast %73 : vector<1x128xf32> to vector<256x128xf32>
    %75 = arith.addf %72, %74 : vector<256x128xf32>
    %76 = vector.shape_cast %75 : vector<256x128xf32> to vector<16x16x128xf32>
    %77 = arith.truncf %76 : vector<16x16x128xf32> to vector<16x16x128xbf16>
    %c0_83 = arith.constant 0 : index
    %c0_84 = arith.constant 0 : index
    %c0_85 = arith.constant 0 : index
    %c0_86 = arith.constant 0 : index
    %78 = vector.load %arg6[%c0_83, %c0_84, %c0_85, %c0_86] : memref<1x16x16x128xbf16, #tpu.memory_space<vmem>>, vector<1x16x16x128xbf16>
    %79 = vector.shape_cast %78 : vector<1x16x16x128xbf16> to vector<16x16x128xbf16>
    %80 = vector.shape_cast %77 : vector<16x16x128xbf16> to vector<1x16x16x128xbf16>
    tpu.vector_store %arg6[%c0_83, %c0_84, %c0_85, %c0_86], %80 {strides = array<i32>} : memref<1x16x16x128xbf16, #tpu.memory_space<vmem>>, vector<1x16x16x128xbf16>,
    %cst_87 = arith.constant dense<0.000000e+00> : vector<128xf32>
    %81 = vector.multi_reduction <add>, %75, %cst_87 [0] : vector<256x128xf32> to vector<128xf32>
    %82 = vector.shape_cast %81 : vector<128xf32> to vector<1x128xf32>
    %83 = arith.mulf %75, %75 : vector<256x128xf32>
    %cst_88 = arith.constant dense<0.000000e+00> : vector<128xf32>
    %84 = vector.multi_reduction <add>, %83, %cst_88 [0] : vector<256x128xf32> to vector<128xf32>
    %85 = vector.shape_cast %84 : vector<128xf32> to vector<1x128xf32>
    %86 = tpu.concatenate %82, %85 in 0 : vector<1x128xf32>, vector<1x128xf32> -> vector<2x128xf32>
    %c0_89 = arith.constant 0 : index
    %c0_90 = arith.constant 0 : index
    %c0_91 = arith.constant 0 : index
    %87 = vector.load %arg7[%c0_89, %c0_90, %c0_91] : memref<1x2x128xf32, #tpu.memory_space<vmem>>, vector<1x2x128xf32>
    %88 = vector.shape_cast %87 : vector<1x2x128xf32> to vector<2x128xf32>
    %89 = vector.shape_cast %86 : vector<2x128xf32> to vector<1x2x128xf32>
    tpu.vector_store %arg7[%c0_89, %c0_90, %c0_91], %89 {strides = array<i32>} : memref<1x2x128xf32, #tpu.memory_space<vmem>>, vector<1x2x128xf32>,
    return
  }
  func.func @transform_0(%arg0: i32) -> (i32, i32, i32, i32) {
    %c0_i32 = arith.constant 0 : i32
    %c0_i32_0 = arith.constant 0 : i32
    %c0_i32_1 = arith.constant 0 : i32
    %c0_i32_2 = arith.constant 0 : i32
    return %arg0, %c0_i32, %c0_i32_0, %c0_i32_1 : i32, i32, i32, i32
  }
  func.func @transform_1(%arg0: i32) -> (i32, i32) {
    %c0_i32 = arith.constant 0 : i32
    %c0_i32_0 = arith.constant 0 : i32
    %c0_i32_1 = arith.constant 0 : i32
    return %c0_i32, %c0_i32_0 : i32, i32
  }
  func.func @transform_2(%arg0: i32) -> (i32, i32) {
    %c0_i32 = arith.constant 0 : i32
    %c0_i32_0 = arith.constant 0 : i32
    %c0_i32_1 = arith.constant 0 : i32
    return %c0_i32, %c0_i32_0 : i32, i32
  }
  func.func @transform_3(%arg0: i32) -> (i32, i32) {
    %c0_i32 = arith.constant 0 : i32
    %c0_i32_0 = arith.constant 0 : i32
    %c0_i32_1 = arith.constant 0 : i32
    return %c0_i32, %c0_i32_0 : i32, i32
  }
  func.func @transform_4(%arg0: i32) -> (i32, i32) {
    %c0_i32 = arith.constant 0 : i32
    %c0_i32_0 = arith.constant 0 : i32
    %c0_i32_1 = arith.constant 0 : i32
    return %c0_i32, %c0_i32_0 : i32, i32
  }
  func.func @transform_5(%arg0: i32) -> (i32, i32, i32, i32) {
    %c0_i32 = arith.constant 0 : i32
    %c0_i32_0 = arith.constant 0 : i32
    %c0_i32_1 = arith.constant 0 : i32
    %c0_i32_2 = arith.constant 0 : i32
    return %arg0, %c0_i32, %c0_i32_0, %c0_i32_1 : i32, i32, i32, i32
  }
  func.func @transform_6(%arg0: i32) -> (i32, i32, i32) {
    %c0_i32 = arith.constant 0 : i32
    %c0_i32_0 = arith.constant 0 : i32
    %c0_i32_1 = arith.constant 0 : i32
    return %arg0, %c0_i32, %c0_i32_0 : i32, i32, i32
  }
}

module attributes {stable_mosaic.version = 11 : i64} {
  func.func @kernel(%arg0: i32, %arg1: memref<1x16x16x128xbf16, #tpu.memory_space<vmem>>, %arg2: memref<1x16x16x128xbf16, #tpu.memory_space<vmem>>, %arg3: memref<1x128xf32, #tpu.memory_space<vmem>>, %arg4: memref<1x128xf32, #tpu.memory_space<vmem>>, %arg5: memref<1152x128xbf16, #tpu.memory_space<vmem>>, %arg6: memref<1x128xf32, #tpu.memory_space<vmem>>, %arg7: memref<128x128xbf16, #tpu.memory_space<vmem>>, %arg8: memref<1x128xf32, #tpu.memory_space<vmem>>, %arg9: memref<1x16x16x128xf32, #tpu.memory_space<vmem>>, %arg10: memref<18x18x128xbf16, #tpu.memory_space<vmem>>, %arg11: memref<256x128xf32, #tpu.memory_space<vmem>>) attributes {dimension_semantics = [#tpu.dimension_semantics<parallel>], iteration_bounds = array<i64: 2>, scalar_prefetch = 0 : i64, scratch_operands = 2 : i64, tpu.core_type = #tpu.core_type<tc>, window_params = [{transform_indices = @transform_0, window_bounds = array<i64: 1, 16, 16, 128>}, {transform_indices = @transform_1, window_bounds = array<i64: 1, 16, 16, 128>}, {pipeline_mode = #tpu.pipeline_mode<synchronous>, transform_indices = @transform_2, window_bounds = array<i64: 1, 128>}, {pipeline_mode = #tpu.pipeline_mode<synchronous>, transform_indices = @transform_3, window_bounds = array<i64: 1, 128>}, {pipeline_mode = #tpu.pipeline_mode<synchronous>, transform_indices = @transform_4, window_bounds = array<i64: 1152, 128>}, {pipeline_mode = #tpu.pipeline_mode<synchronous>, transform_indices = @transform_5, window_bounds = array<i64: 1, 128>}, {pipeline_mode = #tpu.pipeline_mode<synchronous>, transform_indices = @transform_6, window_bounds = array<i64: 128, 128>}, {pipeline_mode = #tpu.pipeline_mode<synchronous>, transform_indices = @transform_7, window_bounds = array<i64: 1, 128>}, {transform_indices = @transform_8, window_bounds = array<i64: 1, 16, 16, 128>}]} {
    %c0 = arith.constant 0 : index
    %c0_0 = arith.constant 0 : index
    %c0_1 = arith.constant 0 : index
    %c0_2 = arith.constant 0 : index
    %0 = vector.load %arg2[%c0, %c0_0, %c0_1, %c0_2] : memref<1x16x16x128xbf16, #tpu.memory_space<vmem>>, vector<1x16x16x128xbf16>
    %1 = vector.shape_cast %0 : vector<1x16x16x128xbf16> to vector<16x16x128xbf16>
    %2 = arith.extf %1 : vector<16x16x128xbf16> to vector<16x16x128xf32>
    %c0_3 = arith.constant 0 : index
    %c0_4 = arith.constant 0 : index
    %3 = vector.load %arg3[%c0_3, %c0_4] : memref<1x128xf32, #tpu.memory_space<vmem>>, vector<1x128xf32>
    %4 = vector.shape_cast %3 : vector<1x128xf32> to vector<1x1x128xf32>
    %5 = vector.broadcast %4 : vector<1x1x128xf32> to vector<16x16x128xf32>
    %6 = arith.mulf %2, %5 : vector<16x16x128xf32>
    %c0_5 = arith.constant 0 : index
    %c0_6 = arith.constant 0 : index
    %7 = vector.load %arg4[%c0_5, %c0_6] : memref<1x128xf32, #tpu.memory_space<vmem>>, vector<1x128xf32>
    %8 = vector.shape_cast %7 : vector<1x128xf32> to vector<1x1x128xf32>
    %9 = vector.broadcast %8 : vector<1x1x128xf32> to vector<16x16x128xf32>
    %10 = arith.addf %6, %9 : vector<16x16x128xf32>
    %cst = arith.constant 0.000000e+00 : f32
    %11 = vector.broadcast %cst : f32 to vector<16x16x128xf32>
    %12 = arith.maximumf %10, %11 : vector<16x16x128xf32>
    %cst_7 = arith.constant 0.000000e+00 : bf16
    %13 = vector.broadcast %cst_7 : bf16 to vector<1x18x128xbf16>
    %c0_8 = arith.constant 0 : index
    %c0_9 = arith.constant 0 : index
    %c0_10 = arith.constant 0 : index
    %14 = vector.load %arg10[%c0_8, %c0_9, %c0_10] : memref<18x18x128xbf16, #tpu.memory_space<vmem>>, vector<1x18x128xbf16>
    tpu.vector_store %arg10[%c0_8, %c0_9, %c0_10], %13 {strides = array<i32>} : memref<18x18x128xbf16, #tpu.memory_space<vmem>>, vector<1x18x128xbf16>,
    %cst_11 = arith.constant 0.000000e+00 : bf16
    %15 = vector.broadcast %cst_11 : bf16 to vector<1x18x128xbf16>
    %c17 = arith.constant 17 : index
    %c0_12 = arith.constant 0 : index
    %c0_13 = arith.constant 0 : index
    %16 = vector.load %arg10[%c17, %c0_12, %c0_13] : memref<18x18x128xbf16, #tpu.memory_space<vmem>>, vector<1x18x128xbf16>
    tpu.vector_store %arg10[%c17, %c0_12, %c0_13], %15 {strides = array<i32>} : memref<18x18x128xbf16, #tpu.memory_space<vmem>>, vector<1x18x128xbf16>,
    %cst_14 = arith.constant 0.000000e+00 : bf16
    %17 = vector.broadcast %cst_14 : bf16 to vector<18x1x128xbf16>
    %c0_15 = arith.constant 0 : index
    %c0_16 = arith.constant 0 : index
    %c0_17 = arith.constant 0 : index
    %18 = vector.load %arg10[%c0_15, %c0_16, %c0_17] : memref<18x18x128xbf16, #tpu.memory_space<vmem>>, vector<18x1x128xbf16>
    tpu.vector_store %arg10[%c0_15, %c0_16, %c0_17], %17 {strides = array<i32>} : memref<18x18x128xbf16, #tpu.memory_space<vmem>>, vector<18x1x128xbf16>,
    %cst_18 = arith.constant 0.000000e+00 : bf16
    %19 = vector.broadcast %cst_18 : bf16 to vector<18x1x128xbf16>
    %c0_19 = arith.constant 0 : index
    %c17_20 = arith.constant 17 : index
    %c0_21 = arith.constant 0 : index
    %20 = vector.load %arg10[%c0_19, %c17_20, %c0_21] : memref<18x18x128xbf16, #tpu.memory_space<vmem>>, vector<18x1x128xbf16>
    tpu.vector_store %arg10[%c0_19, %c17_20, %c0_21], %19 {strides = array<i32>} : memref<18x18x128xbf16, #tpu.memory_space<vmem>>, vector<18x1x128xbf16>,
    %21 = arith.truncf %12 : vector<16x16x128xf32> to vector<16x16x128xbf16>
    %c1 = arith.constant 1 : index
    %c1_22 = arith.constant 1 : index
    %c0_23 = arith.constant 0 : index
    %22 = vector.load %arg10[%c1, %c1_22, %c0_23] : memref<18x18x128xbf16, #tpu.memory_space<vmem>>, vector<16x16x128xbf16>
    tpu.vector_store %arg10[%c1, %c1_22, %c0_23], %21 {strides = array<i32>} : memref<18x18x128xbf16, #tpu.memory_space<vmem>>, vector<16x16x128xbf16>,
    %c0_24 = arith.constant 0 : index
    %c0_25 = arith.constant 0 : index
    %c0_26 = arith.constant 0 : index
    %23 = vector.load %arg10[%c0_24, %c0_25, %c0_26] : memref<18x18x128xbf16, #tpu.memory_space<vmem>>, vector<16x16x128xbf16>
    %24 = vector.shape_cast %23 : vector<16x16x128xbf16> to vector<256x128xbf16>
    %c0_27 = arith.constant 0 : index
    %c0_28 = arith.constant 0 : index
    %25 = vector.load %arg5[%c0_27, %c0_28] : memref<1152x128xbf16, #tpu.memory_space<vmem>>, vector<128x128xbf16>
    %cst_29 = arith.constant dense<0.000000e+00> : vector<256x128xf32>
    %26 = tpu.matmul %24, %25, %cst_29 {dimension_numbers = #tpu.dot_dimension_numbers<[1], [0], [0], [1], [0, 0, 1, 1], [], []>} : vector<256x128xbf16>, vector<128x128xbf16>, vector<256x128xf32> -> vector<256x128xf32>
    %c0_30 = arith.constant 0 : index
    %c1_31 = arith.constant 1 : index
    %c0_32 = arith.constant 0 : index
    %27 = vector.load %arg10[%c0_30, %c1_31, %c0_32] : memref<18x18x128xbf16, #tpu.memory_space<vmem>>, vector<16x16x128xbf16>
    %28 = vector.shape_cast %27 : vector<16x16x128xbf16> to vector<256x128xbf16>
    %c128 = arith.constant 128 : index
    %c0_33 = arith.constant 0 : index
    %29 = vector.load %arg5[%c128, %c0_33] : memref<1152x128xbf16, #tpu.memory_space<vmem>>, vector<128x128xbf16>
    %cst_34 = arith.constant dense<0.000000e+00> : vector<256x128xf32>
    %30 = tpu.matmul %28, %29, %cst_34 {dimension_numbers = #tpu.dot_dimension_numbers<[1], [0], [0], [1], [0, 0, 1, 1], [], []>} : vector<256x128xbf16>, vector<128x128xbf16>, vector<256x128xf32> -> vector<256x128xf32>
    %31 = arith.addf %26, %30 : vector<256x128xf32>
    %c0_35 = arith.constant 0 : index
    %c2 = arith.constant 2 : index
    %c0_36 = arith.constant 0 : index
    %32 = vector.load %arg10[%c0_35, %c2, %c0_36] : memref<18x18x128xbf16, #tpu.memory_space<vmem>>, vector<16x16x128xbf16>
    %33 = vector.shape_cast %32 : vector<16x16x128xbf16> to vector<256x128xbf16>
    %c256 = arith.constant 256 : index
    %c0_37 = arith.constant 0 : index
    %34 = vector.load %arg5[%c256, %c0_37] : memref<1152x128xbf16, #tpu.memory_space<vmem>>, vector<128x128xbf16>
    %cst_38 = arith.constant dense<0.000000e+00> : vector<256x128xf32>
    %35 = tpu.matmul %33, %34, %cst_38 {dimension_numbers = #tpu.dot_dimension_numbers<[1], [0], [0], [1], [0, 0, 1, 1], [], []>} : vector<256x128xbf16>, vector<128x128xbf16>, vector<256x128xf32> -> vector<256x128xf32>
    %36 = arith.addf %31, %35 : vector<256x128xf32>
    %c0_39 = arith.constant 0 : index
    %c0_40 = arith.constant 0 : index
    %37 = vector.load %arg11[%c0_39, %c0_40] : memref<256x128xf32, #tpu.memory_space<vmem>>, vector<256x128xf32>
    tpu.vector_store %arg11[%c0_39, %c0_40], %36 {strides = array<i32>} : memref<256x128xf32, #tpu.memory_space<vmem>>, vector<256x128xf32>,
    %c1_41 = arith.constant 1 : index
    %c0_42 = arith.constant 0 : index
    %c0_43 = arith.constant 0 : index
    %38 = vector.load %arg10[%c1_41, %c0_42, %c0_43] : memref<18x18x128xbf16, #tpu.memory_space<vmem>>, vector<16x16x128xbf16>
    %39 = vector.shape_cast %38 : vector<16x16x128xbf16> to vector<256x128xbf16>
    %c384 = arith.constant 384 : index
    %c0_44 = arith.constant 0 : index
    %40 = vector.load %arg5[%c384, %c0_44] : memref<1152x128xbf16, #tpu.memory_space<vmem>>, vector<128x128xbf16>
    %cst_45 = arith.constant dense<0.000000e+00> : vector<256x128xf32>
    %41 = tpu.matmul %39, %40, %cst_45 {dimension_numbers = #tpu.dot_dimension_numbers<[1], [0], [0], [1], [0, 0, 1, 1], [], []>} : vector<256x128xbf16>, vector<128x128xbf16>, vector<256x128xf32> -> vector<256x128xf32>
    %c1_46 = arith.constant 1 : index
    %c1_47 = arith.constant 1 : index
    %c0_48 = arith.constant 0 : index
    %42 = vector.load %arg10[%c1_46, %c1_47, %c0_48] : memref<18x18x128xbf16, #tpu.memory_space<vmem>>, vector<16x16x128xbf16>
    %43 = vector.shape_cast %42 : vector<16x16x128xbf16> to vector<256x128xbf16>
    %c512 = arith.constant 512 : index
    %c0_49 = arith.constant 0 : index
    %44 = vector.load %arg5[%c512, %c0_49] : memref<1152x128xbf16, #tpu.memory_space<vmem>>, vector<128x128xbf16>
    %cst_50 = arith.constant dense<0.000000e+00> : vector<256x128xf32>
    %45 = tpu.matmul %43, %44, %cst_50 {dimension_numbers = #tpu.dot_dimension_numbers<[1], [0], [0], [1], [0, 0, 1, 1], [], []>} : vector<256x128xbf16>, vector<128x128xbf16>, vector<256x128xf32> -> vector<256x128xf32>
    %46 = arith.addf %41, %45 : vector<256x128xf32>
    %c1_51 = arith.constant 1 : index
    %c2_52 = arith.constant 2 : index
    %c0_53 = arith.constant 0 : index
    %47 = vector.load %arg10[%c1_51, %c2_52, %c0_53] : memref<18x18x128xbf16, #tpu.memory_space<vmem>>, vector<16x16x128xbf16>
    %48 = vector.shape_cast %47 : vector<16x16x128xbf16> to vector<256x128xbf16>
    %c640 = arith.constant 640 : index
    %c0_54 = arith.constant 0 : index
    %49 = vector.load %arg5[%c640, %c0_54] : memref<1152x128xbf16, #tpu.memory_space<vmem>>, vector<128x128xbf16>
    %cst_55 = arith.constant dense<0.000000e+00> : vector<256x128xf32>
    %50 = tpu.matmul %48, %49, %cst_55 {dimension_numbers = #tpu.dot_dimension_numbers<[1], [0], [0], [1], [0, 0, 1, 1], [], []>} : vector<256x128xbf16>, vector<128x128xbf16>, vector<256x128xf32> -> vector<256x128xf32>
    %51 = arith.addf %46, %50 : vector<256x128xf32>
    %c0_56 = arith.constant 0 : index
    %c0_57 = arith.constant 0 : index
    %52 = vector.load %arg11[%c0_56, %c0_57] : memref<256x128xf32, #tpu.memory_space<vmem>>, vector<256x128xf32>
    %53 = arith.addf %52, %51 : vector<256x128xf32>
    %c0_58 = arith.constant 0 : index
    %c0_59 = arith.constant 0 : index
    %54 = vector.load %arg11[%c0_58, %c0_59] : memref<256x128xf32, #tpu.memory_space<vmem>>, vector<256x128xf32>
    tpu.vector_store %arg11[%c0_58, %c0_59], %53 {strides = array<i32>} : memref<256x128xf32, #tpu.memory_space<vmem>>, vector<256x128xf32>,
    %c2_60 = arith.constant 2 : index
    %c0_61 = arith.constant 0 : index
    %c0_62 = arith.constant 0 : index
    %55 = vector.load %arg10[%c2_60, %c0_61, %c0_62] : memref<18x18x128xbf16, #tpu.memory_space<vmem>>, vector<16x16x128xbf16>
    %56 = vector.shape_cast %55 : vector<16x16x128xbf16> to vector<256x128xbf16>
    %c768 = arith.constant 768 : index
    %c0_63 = arith.constant 0 : index
    %57 = vector.load %arg5[%c768, %c0_63] : memref<1152x128xbf16, #tpu.memory_space<vmem>>, vector<128x128xbf16>
    %cst_64 = arith.constant dense<0.000000e+00> : vector<256x128xf32>
    %58 = tpu.matmul %56, %57, %cst_64 {dimension_numbers = #tpu.dot_dimension_numbers<[1], [0], [0], [1], [0, 0, 1, 1], [], []>} : vector<256x128xbf16>, vector<128x128xbf16>, vector<256x128xf32> -> vector<256x128xf32>
    %c2_65 = arith.constant 2 : index
    %c1_66 = arith.constant 1 : index
    %c0_67 = arith.constant 0 : index
    %59 = vector.load %arg10[%c2_65, %c1_66, %c0_67] : memref<18x18x128xbf16, #tpu.memory_space<vmem>>, vector<16x16x128xbf16>
    %60 = vector.shape_cast %59 : vector<16x16x128xbf16> to vector<256x128xbf16>
    %c896 = arith.constant 896 : index
    %c0_68 = arith.constant 0 : index
    %61 = vector.load %arg5[%c896, %c0_68] : memref<1152x128xbf16, #tpu.memory_space<vmem>>, vector<128x128xbf16>
    %cst_69 = arith.constant dense<0.000000e+00> : vector<256x128xf32>
    %62 = tpu.matmul %60, %61, %cst_69 {dimension_numbers = #tpu.dot_dimension_numbers<[1], [0], [0], [1], [0, 0, 1, 1], [], []>} : vector<256x128xbf16>, vector<128x128xbf16>, vector<256x128xf32> -> vector<256x128xf32>
    %63 = arith.addf %58, %62 : vector<256x128xf32>
    %c2_70 = arith.constant 2 : index
    %c2_71 = arith.constant 2 : index
    %c0_72 = arith.constant 0 : index
    %64 = vector.load %arg10[%c2_70, %c2_71, %c0_72] : memref<18x18x128xbf16, #tpu.memory_space<vmem>>, vector<16x16x128xbf16>
    %65 = vector.shape_cast %64 : vector<16x16x128xbf16> to vector<256x128xbf16>
    %c1024 = arith.constant 1024 : index
    %c0_73 = arith.constant 0 : index
    %66 = vector.load %arg5[%c1024, %c0_73] : memref<1152x128xbf16, #tpu.memory_space<vmem>>, vector<128x128xbf16>
    %cst_74 = arith.constant dense<0.000000e+00> : vector<256x128xf32>
    %67 = tpu.matmul %65, %66, %cst_74 {dimension_numbers = #tpu.dot_dimension_numbers<[1], [0], [0], [1], [0, 0, 1, 1], [], []>} : vector<256x128xbf16>, vector<128x128xbf16>, vector<256x128xf32> -> vector<256x128xf32>
    %68 = arith.addf %63, %67 : vector<256x128xf32>
    %c0_75 = arith.constant 0 : index
    %c0_76 = arith.constant 0 : index
    %69 = vector.load %arg11[%c0_75, %c0_76] : memref<256x128xf32, #tpu.memory_space<vmem>>, vector<256x128xf32>
    %70 = arith.addf %69, %68 : vector<256x128xf32>
    %c0_77 = arith.constant 0 : index
    %c0_78 = arith.constant 0 : index
    %71 = vector.load %arg11[%c0_77, %c0_78] : memref<256x128xf32, #tpu.memory_space<vmem>>, vector<256x128xf32>
    tpu.vector_store %arg11[%c0_77, %c0_78], %70 {strides = array<i32>} : memref<256x128xf32, #tpu.memory_space<vmem>>, vector<256x128xf32>,
    %c0_79 = arith.constant 0 : index
    %c0_80 = arith.constant 0 : index
    %72 = vector.load %arg11[%c0_79, %c0_80] : memref<256x128xf32, #tpu.memory_space<vmem>>, vector<256x128xf32>
    %c0_81 = arith.constant 0 : index
    %c0_82 = arith.constant 0 : index
    %73 = vector.load %arg6[%c0_81, %c0_82] : memref<1x128xf32, #tpu.memory_space<vmem>>, vector<1x128xf32>
    %74 = vector.broadcast %73 : vector<1x128xf32> to vector<256x128xf32>
    %75 = arith.addf %72, %74 : vector<256x128xf32>
    %c0_83 = arith.constant 0 : index
    %c0_84 = arith.constant 0 : index
    %c0_85 = arith.constant 0 : index
    %c0_86 = arith.constant 0 : index
    %76 = vector.load %arg1[%c0_83, %c0_84, %c0_85, %c0_86] : memref<1x16x16x128xbf16, #tpu.memory_space<vmem>>, vector<1x16x16x128xbf16>
    %77 = vector.shape_cast %76 : vector<1x16x16x128xbf16> to vector<16x16x128xbf16>
    %78 = vector.shape_cast %77 : vector<16x16x128xbf16> to vector<256x128xbf16>
    %c0_87 = arith.constant 0 : index
    %c0_88 = arith.constant 0 : index
    %79 = vector.load %arg7[%c0_87, %c0_88] : memref<128x128xbf16, #tpu.memory_space<vmem>>, vector<128x128xbf16>
    %cst_89 = arith.constant dense<0.000000e+00> : vector<256x128xf32>
    %80 = tpu.matmul %78, %79, %cst_89 {dimension_numbers = #tpu.dot_dimension_numbers<[1], [0], [0], [1], [0, 0, 1, 1], [], []>} : vector<256x128xbf16>, vector<128x128xbf16>, vector<256x128xf32> -> vector<256x128xf32>
    %c0_90 = arith.constant 0 : index
    %c0_91 = arith.constant 0 : index
    %81 = vector.load %arg8[%c0_90, %c0_91] : memref<1x128xf32, #tpu.memory_space<vmem>>, vector<1x128xf32>
    %82 = vector.broadcast %81 : vector<1x128xf32> to vector<256x128xf32>
    %83 = arith.addf %80, %82 : vector<256x128xf32>
    %84 = arith.addf %83, %75 : vector<256x128xf32>
    %85 = vector.shape_cast %84 : vector<256x128xf32> to vector<16x16x128xf32>
    %c0_92 = arith.constant 0 : index
    %c0_93 = arith.constant 0 : index
    %c0_94 = arith.constant 0 : index
    %c0_95 = arith.constant 0 : index
    %86 = vector.load %arg9[%c0_92, %c0_93, %c0_94, %c0_95] : memref<1x16x16x128xf32, #tpu.memory_space<vmem>>, vector<1x16x16x128xf32>
    %87 = vector.shape_cast %86 : vector<1x16x16x128xf32> to vector<16x16x128xf32>
    %88 = vector.shape_cast %85 : vector<16x16x128xf32> to vector<1x16x16x128xf32>
    tpu.vector_store %arg9[%c0_92, %c0_93, %c0_94, %c0_95], %88 {strides = array<i32>} : memref<1x16x16x128xf32, #tpu.memory_space<vmem>>, vector<1x16x16x128xf32>,
    return
  }
  func.func @transform_0(%arg0: i32) -> (i32, i32, i32, i32) {
    %c0_i32 = arith.constant 0 : i32
    %c0_i32_0 = arith.constant 0 : i32
    %c0_i32_1 = arith.constant 0 : i32
    %c0_i32_2 = arith.constant 0 : i32
    return %arg0, %c0_i32, %c0_i32_0, %c0_i32_1 : i32, i32, i32, i32
  }
  func.func @transform_1(%arg0: i32) -> (i32, i32, i32, i32) {
    %c0_i32 = arith.constant 0 : i32
    %c0_i32_0 = arith.constant 0 : i32
    %c0_i32_1 = arith.constant 0 : i32
    %c0_i32_2 = arith.constant 0 : i32
    return %arg0, %c0_i32, %c0_i32_0, %c0_i32_1 : i32, i32, i32, i32
  }
  func.func @transform_2(%arg0: i32) -> (i32, i32) {
    %c0_i32 = arith.constant 0 : i32
    %c0_i32_0 = arith.constant 0 : i32
    %c0_i32_1 = arith.constant 0 : i32
    return %c0_i32, %c0_i32_0 : i32, i32
  }
  func.func @transform_3(%arg0: i32) -> (i32, i32) {
    %c0_i32 = arith.constant 0 : i32
    %c0_i32_0 = arith.constant 0 : i32
    %c0_i32_1 = arith.constant 0 : i32
    return %c0_i32, %c0_i32_0 : i32, i32
  }
  func.func @transform_4(%arg0: i32) -> (i32, i32) {
    %c0_i32 = arith.constant 0 : i32
    %c0_i32_0 = arith.constant 0 : i32
    %c0_i32_1 = arith.constant 0 : i32
    return %c0_i32, %c0_i32_0 : i32, i32
  }
  func.func @transform_5(%arg0: i32) -> (i32, i32) {
    %c0_i32 = arith.constant 0 : i32
    %c0_i32_0 = arith.constant 0 : i32
    %c0_i32_1 = arith.constant 0 : i32
    return %c0_i32, %c0_i32_0 : i32, i32
  }
  func.func @transform_6(%arg0: i32) -> (i32, i32) {
    %c0_i32 = arith.constant 0 : i32
    %c0_i32_0 = arith.constant 0 : i32
    %c0_i32_1 = arith.constant 0 : i32
    return %c0_i32, %c0_i32_0 : i32, i32
  }
  func.func @transform_7(%arg0: i32) -> (i32, i32) {
    %c0_i32 = arith.constant 0 : i32
    %c0_i32_0 = arith.constant 0 : i32
    %c0_i32_1 = arith.constant 0 : i32
    return %c0_i32, %c0_i32_0 : i32, i32
  }
  func.func @transform_8(%arg0: i32) -> (i32, i32, i32, i32) {
    %c0_i32 = arith.constant 0 : i32
    %c0_i32_0 = arith.constant 0 : i32
    %c0_i32_1 = arith.constant 0 : i32
    %c0_i32_2 = arith.constant 0 : i32
    return %arg0, %c0_i32, %c0_i32_0, %c0_i32_1 : i32, i32, i32, i32
  }
}

</mosaic_0001>

<bundles_post_ra>
// kernel: resnet_v2_block_bn.2
= control target key start
LH: loop header
LB: loop body
LE: loop exit
PB: predicated region body
PF: predicated region fallthrough
CT: control target
= control target key end

     0   :  { %s7812_s21 = smov 0   ;;  %s10467_s0 = inlined_call_operand.vmem [shape: bf16[2,16,16,128], index: 0, kind: input, shape index: {}]   ;;  %s10468_s1 = inlined_call_operand.vmem [shape: f32[1,128], index: 1, kind: input, shape index: {}]   ;;  %s10469_s2 = inlined_call_operand.vmem [shape: f32[1,128], index: 2, kind: input, shape index: {}]   ;;  %s10470_s3 = inlined_call_operand.vmem [shape: bf16[1152,128], index: 3, kind: input, shape index: {}]   ;;  %s10471_s4 = inlined_call_operand.vmem [shape: f32[1,128], index: 4, kind: input, shape index: {}]   ;;  %s10472_s5 = inlined_call_operand.vmem [shape: bf16[2,16,16,128], index: 5, kind: output, shape index: {0}]   ;;  %s10473_s6 = inlined_call_operand.vmem [shape: f32[2,2,128], index: 6, kind: output, shape index: {1}]  }
   0x1 LB: > { %s6317_s22 = sadd.s32 4294967295, %s7774_s21   ;;  %p6321_p0 = scmp.ge.s32.totalorder %s7774_s21, 1  ;;  %s7774_s21 = sphi %s7812_s21, %s17_s21  }
   0x2   : > { %p215_p1 = scmp.lt.s32.totalorder %s7774_s21, 3 }
   0x4   : > { %p216_p2 = pnand %p6321_p0, %p215_p1 }
   0x6   : > { %219 = sbr.rel (%p216_p2) target bundleno = 697 (0x2b9), region = 40 }
   0xb   : > { %v7573_v0 = vld [vmem:[%s10470_s3 + $0x78] sm:$0xff]   ;;  %v7574_v1 = vld [vmem:[%s10470_s3 + $0x70] sm:$0xff]   ;;  %v7776_v2 = vmov 0   ;;  %p249_p3 = scmp.lt.s32.totalorder %s6317_s22, 1  ;;  %v7575_v3 = vld [vmem:[%s10470_s3 + $0x68] sm:$0xff]   ;;  %vm445_vm0 = vcmask 1040384  }
   0xc   : > { %438 = vst [vmem:[#allocation2] sm:$0xf] %v7776_v2  ;;  %439 = vst [vmem:[#allocation2 + $0x4] sm:$0xf] %v7776_v2  ;;  %7116 = vmatprep.subr.bf16.mxu0 %v7573_v0  ;;  %7548 = vmatprep.subr.bf16.mxu1 %v7573_v0  ;;  %v7576_v4 = vld [vmem:[%s10470_s3 + $0x60] sm:$0xff]   ;;  %v10511_v6 = vmov 0 }
   0xd   : > { %440 = vst [vmem:[#allocation2 + $0x8] sm:$0x1] %v7776_v2  ;;  %442 = vst [vmem:[#allocation2 + $0xcc] sm:$0xf] %v7776_v2  ;;  %7117 = vmatpush3.bf16.msra.mxu0 %v7573_v0  ;;  %7556 = vmatpush3.bf16.msra.mxu1 %v7573_v0  ;;  %s10733_s22 = smov (!%p249_p3, %s6317_s22), 1  ;;  %v10514_v10 = vmov 0 }
   0xe   : > { %443 = vst [vmem:[#allocation2 + $0xd0] sm:$0xf] %v7776_v2  ;;  %444 = vst [vmem:[#allocation2 + $0xd4] sm:$0x1] %v7776_v2  ;;  %7118 = vmatprep.subr.bf16.mxu0 %v7574_v1  ;;  %7549 = vmatprep.subr.bf16.mxu1 %v7574_v1  ;;  %s6660_s29 = sshll.u32 %s10733_s22, 7  ;;  %v7577_v14 = vld [vmem:[%s10470_s3 + $0x58] sm:$0xff]  }
   0xf   : > { %s7840_s10 = scalar_lea.vmem %s10467_s0, %s6660_s29  ;;  %vm446_vm1 = vsmask.f32 256  ;;  %vm502_vm2 = vsmask.f32 7938  ;;  %vm1155_vm5 = vsmask.f32 3328  ;;  %s10358_s26 = scalar_lea.vmem %s10472_s5, %s6660_s29 }
  0x10   : > { %vm7844_vm3 = vmand %vm445_vm0, %vm446_vm1  ;;  %v6727_v13 = vld [vmem:[%s7840_s10] sm:$0xff]   ;;  %v451_v22 = vld [vmem:[#allocation2 + $0xc] sm:$0x1]  ;;  %vm977_vm6 = vcmask 1043456   ;;  %vm1156_vm7 = vsmask.f32 7440 }
  0x11   : > { %7119 = vmatpush3.bf16.msra.mxu0 %v7574_v1  ;;  %7557 = vmatpush3.bf16.msra.mxu1 %v7574_v1  ;;  %v10512_v6 = vsel %vm7844_vm3, 4294967295, %v10511_v6  ;;  %vm7852_vm4 = vmand %vm445_vm0, %vm502_vm2  ;;  %v6728_v16 = vunpack.c.l.bf16 %v6727_v13  ;;  %v6729_v17 = vunpack.c.h.bf16 %v6727_v13  ;;  %v7865_v18 = vld [vmem:[%s10468_s1] ss:$0 sm:$0xff]  ;;  %v507_v23 = vld [vmem:[#allocation2 + $0x14] sm:$0x1]  ;;  %v452_v26 = vsel %vm7844_vm3, 0, %v451_v22 }
  0x12   : > { %7120 = vmatprep.subr.bf16.mxu0 %v7575_v3  ;;  %7550 = vmatprep.subr.bf16.mxu1 %v7575_v3  ;;  %10513 = vst [vmem:[#allocation4_spill] sm:$0xff] %v10512_v6  ;;  %v10515_v10 = vsel %vm7852_vm4, 4294967295, %v10514_v10  ;;  %v7870_v19 = vld [vmem:[%s10469_s2] ss:$0 sm:$0xff]  ;;  %v508_v27 = vsel %vm7852_vm4, 0, %v507_v23  ;;  %v6876_v28 = vld [vmem:[%s7840_s10 + $0x38] sm:$0xff]   ;;  %vm7915_vm9 = vmor %vm1155_vm5, %vm1156_vm7 }
  0x13   : > { %v448_v5 = vld [vmem:[#allocation2] sm:$0x1]  ;;  %v1092_v8 = vld [vmem:[#allocation2 + $0x4] sm:$0xf]  ;;  %10516 = vst [vmem:[#allocation5_spill] sm:$0xff] %v10515_v10  ;;  %v335_v24 = vmul.f32 %v6728_v16, %v7865_v18  ;;  %v336_v25 = vmul.f32 %v6729_v17, %v7865_v18  ;;  %v7578_v30 = vld [vmem:[%s10470_s3 + $0x50] sm:$0xff]   ;;  %v6756_v32 = vunpack.c.l.bf16 %v6876_v28  ;;  %v6757_v33 = vunpack.c.h.bf16 %v6876_v28 }
  0x14   : > { %v504_v7 = vld [vmem:[#allocation2 + $0x8] sm:$0x1]  ;;  %v449_v9 = vsel %vm7844_vm3, 0, %v448_v5  ;;  %v1168_v11 = vshll.u32 %v1092_v8, 16  ;;  %v1172_v12 = vshrl.u32 %v1092_v8, 16  ;;  %v7896_v42 = vld [vmem:[%s7840_s10 + $0x40] sm:$0xff]   ;;  %vm7928_vm10 = vmand %vm977_vm6, %vm502_vm2 }
  0x15   : > { %7121 = vmatpush3.bf16.msra.mxu0 %v7575_v3  ;;  %7558 = vmatpush3.bf16.msra.mxu1 %v7575_v3  ;;  %450 = vst [vmem:[#allocation2] sm:$0x1] %v449_v9  ;;  %v505_v15 = vsel %vm7852_vm4, 0, %v504_v7  ;;  %v472_v29 = vld [vmem:[#allocation2 + $0x60] sm:$0x1]  ;;  %v374_v35 = vadd.f32 %v7870_v19, %v335_v24  ;;  %v375_v36 = vadd.f32 %v7870_v19, %v336_v25  ;;  %v6760_v45 = vunpack.c.l.bf16 %v7896_v42  ;;  %v7579_v59 = vld [vmem:[%s10470_s3 + $0x48] sm:$0xff]  }
  0x16   : > { %7122 = vmatprep.subr.bf16.mxu0 %v7576_v4  ;;  %7551 = vmatprep.subr.bf16.mxu1 %v7576_v4  ;;  %506 = vst [vmem:[#allocation2 + $0x8] sm:$0x1] %v505_v15  ;;  %v7872_v20 = vrot.slane %v1168_v11, 5  ;;  %v1174_v21 = vrot.slane %v1172_v12, 4  ;;  %453 = vst [vmem:[#allocation2 + $0xc] sm:$0x1] %v452_v26  ;;  %v349_v40 = vmul.f32 %v6756_v32, %v7865_v18  ;;  %v6761_v46 = vunpack.c.h.bf16 %v7896_v42 }
  0x17   : > { %509 = vst [vmem:[#allocation2 + $0x14] sm:$0x1] %v508_v27  ;;  %v528_v34 = vld [vmem:[#allocation2 + $0x68] sm:$0x1]  ;;  %v473_v37 = vsel %vm7844_vm3, 0, %v472_v29  ;;  %v350_v41 = vmul.f32 %v6757_v33, %v7865_v18  ;;  %v406_v43 = vmax.f32 %v374_v35, 0.0  ;;  %v351_v16 = vmul.f32 %v6760_v45, %v7865_v18 }
  0x18   : > { %v1175_v31 = vor.u32 %v1174_v21, %v7872_v20  ;;  %v529_v38 = vsel %vm7852_vm4, 0, %v528_v34  ;;  %vm654_vm8 = vsmask.f32 4368  ;;  %474 = vst [vmem:[#allocation2 + $0x60] sm:$0x1] %v473_v37  ;;  %v407_v44 = vmax.f32 %v375_v36, 0.0 }
  0x19   : > { %7123 = vmatpush3.bf16.msra.mxu0 %v7576_v4  ;;  %7559 = vmatpush3.bf16.msra.mxu1 %v7576_v4  ;;  %530 = vst [vmem:[#allocation2 + $0x68] sm:$0x1] %v529_v38  ;;  %v475_v47 = vld [vmem:[#allocation2 + $0x6c] sm:$0x1]  ;;  %v531_v48 = vld [vmem:[#allocation2 + $0x74] sm:$0x1]  ;;  %v388_v50 = vadd.f32 %v7870_v19, %v349_v40  ;;  %v389_v51 = vadd.f32 %v7870_v19, %v350_v41  ;;  %vm7934_vm11 = vmor %vm446_vm1, %vm654_vm8 }
  0x1a   : > { %7124 = vmatprep.subr.bf16.mxu0 %v7577_v14  ;;  %7552 = vmatprep.subr.bf16.mxu1 %v7577_v14  ;;  %v7891_v39 = vrot.slane %v1175_v31, 4  ;;  %v476_v52 = vsel %vm7844_vm3, 0, %v475_v47  ;;  %v532_v53 = vsel %vm7852_vm4, 0, %v531_v48  ;;  %v6662_v57 = vpack.c.bf16 %v406_v43, %v406_v43  ;;  %v7580_v17 = vld [vmem:[%s10470_s3 + $0x40] sm:$0xff]   ;;  %v7946_v38 = vld [vmem:[%s10470_s3 + $0x38] sm:$0xff]   ;;  %v6870_v40 = vld [vmem:[%s7840_s10 + $0x8] sm:$0xff]  }
  0x1b   : > { %v6663_v58 = vpack.c.bf16 %v407_v44, %v407_v44  ;;  %477 = vst [vmem:[#allocation2 + $0x6c] sm:$0x1] %v476_v52  ;;  %533 = vst [vmem:[#allocation2 + $0x74] sm:$0x1] %v532_v53  ;;  %v420_v62 = vmax.f32 %v388_v50, 0.0  ;;  %v421_v63 = vmax.f32 %v389_v51, 0.0  ;;  %v390_v51 = vadd.f32 %v7870_v19, %v351_v16 }
  0x1c   : > { %v1091_v49 = vld [vmem:[#allocation2] sm:$0xf]  ;;  %v657_v3 = vshrl.u32 %v6662_v57, 16  ;;  %v660_v4 = vshll.u32 %v6662_v57, 16  ;;  %v10519_v23 = vmov 0  ;;  %v10522_v27 = vmov 0 }
  0x1d   : > { %7125 = vmatpush3.bf16.msra.mxu0 %v7577_v14  ;;  %7560 = vmatpush3.bf16.msra.mxu1 %v7577_v14  ;;  %v7906_v54 = vld [vmem:[#allocation2 + $0x8] sm:$0x1]  ;;  %v1159_v55 = vshrl.u32 %v1091_v49, 16  ;;  %v1162_v56 = vshll.u32 %v1091_v49, 16  ;;  %v665_v7 = vshrl.u32 %v6663_v58, 16  ;;  %v668_v8 = vshll.u32 %v6663_v58, 16 }
  0x1e   : > { %7126 = vmatprep.subr.bf16.mxu0 %v7578_v30  ;;  %7553 = vmatprep.subr.bf16.mxu1 %v7578_v30  ;;  %v1178_v60 = vshll.u32 %v7906_v54, 16  ;;  %v2192_v61 = vrot.slane %v7906_v54, 5  ;;  %v6676_v9 = vpack.c.bf16 %v420_v62, %v420_v62  ;;  %v659_v12 = vrot.slane %v657_v3, 7  ;;  %v979_v13 = vld [vmem:[#allocation2 + $0xc] sm:$0xf]  ;;  %v7959_v42 = vld [vmem:[%s10470_s3 + $0xb8] sm:$0xff]  }
  0x1f   : > { %v1161_v1 = vrot.slane %v1159_v55, 4  ;;  %v1164_v2 = vrot.slane %v1162_v56, 5  ;;  %v983_v14 = vld [vmem:[#allocation2 + $0x14] sm:$0x1]  ;;  %v6677_v15 = vpack.c.bf16 %v421_v63, %v421_v63  ;;  %v667_v22 = vrot.slane %v665_v7, 7  ;;  %s6326_s29 = sshll.u32 %s10733_s22, 1 }
  0x20   : > { %v1180_v5 = vrot.slane %v1178_v60, 5  ;;  %v10520_v23 = vsel %vm7928_vm10, 4294967295, %v10519_v23  ;;  %v776_v24 = vshrl.u32 %v6676_v9, 16  ;;  %v779_v25 = vshll.u32 %v6676_v9, 16  ;;  %v454_v41 = vld [vmem:[#allocation2 + $0x18] sm:$0x1]  ;;  %s262_s30 = scalar_lea.vmem %s10473_s6, %s6326_s29 }
  0x21   : > { %7127 = vmatpush3.bf16.msra.mxu0 %v7578_v30  ;;  %7561 = vmatpush3.bf16.msra.mxu1 %v7578_v30  ;;  %v1165_v11 = vor.u32 %v1164_v2, %v1161_v1  ;;  %10521 = vst [vmem:[#allocation6_spill] sm:$0xff] %v10520_v23  ;;  %v10523_v27 = vsel %vm7934_vm11, 4294967295, %v10522_v27  ;;  %v662_v28 = vor.u32 %v660_v4, %v659_v12  ;;  %v663_v29 = vrot.slane %v659_v12, 4  ;;  %v1028_v47 = vld [vmem:[#allocation2 + $0x60] sm:$0xf]  ;;  %v7618_v23 = vld [vmem:[%s10470_s3 + $0x110] sm:$0xff]  }
  0x22   : > { %7128 = vmatprep.subr.bf16.mxu0 %v7579_v59  ;;  %7554 = vmatprep.subr.bf16.mxu1 %v7579_v59  ;;  %v1181_v21 = vsel %vm7915_vm9, %v7891_v39, %v1180_v5  ;;  %10524 = vst [vmem:[#allocation7_spill] sm:$0xff] %v10523_v27  ;;  %v784_v30 = vshrl.u32 %v6677_v15, 16  ;;  %v670_v31 = vor.u32 %v668_v8, %v667_v22  ;;  %v672_v32 = vrot.slane %v667_v22, 4  ;;  %v1032_v48 = vld [vmem:[#allocation2 + $0x68] sm:$0x1] }
  0x23   : > { %v1166_v26 = vrot.slane %v1165_v11, 4  ;;  %v778_v33 = vrot.slane %v776_v24, 7  ;;  %v787_v34 = vshll.u32 %v6677_v15, 16  ;;  %v980_v36 = vsel %vm7928_vm10, %v662_v28, %v979_v13  ;;  %v510_v52 = vld [vmem:[#allocation2 + $0x20] sm:$0x1]  ;;  %v7983_v15 = vld [vmem:[%s7840_s10 + $0x48] sm:$0xff]  }
  0x24   : > { %v786_v37 = vrot.slane %v784_v30, 7  ;;  %v352_v39 = vmul.f32 %v6761_v46, %v7865_v18  ;;  %981 = vst [vmem:[#allocation2 + $0xc] sm:$0xf] %v980_v36  ;;  %v984_v44 = vsel %vm7844_vm3, %v672_v32, %v983_v14  ;;  %v457_v53 = vld [vmem:[#allocation2 + $0x24] sm:$0x1]  ;;  %v6732_v56 = vunpack.c.l.bf16 %v6870_v40 }
  0x25   : > { %7129 = vmatpush3.bf16.msra.mxu0 %v7579_v59  ;;  %7562 = vmatpush3.bf16.msra.mxu1 %v7579_v59  ;;  %v1171_v35 = vsel %vm7915_vm9, %v1166_v26, %v7872_v20  ;;  %v671_v20 = vsel %vm7934_vm11, %v663_v29, %v670_v31  ;;  %v782_v45 = vrot.slane %v778_v33, 4  ;;  %985 = vst [vmem:[#allocation2 + $0x14] sm:$0x1] %v984_v44  ;;  %v6733_v57 = vunpack.c.h.bf16 %v6870_v40  ;;  %v6871_v59 = vld [vmem:[%s7840_s10 + $0x10] sm:$0xff]   ;;  %v513_v60 = vld [vmem:[#allocation2 + $0x2c] sm:$0x1] }
  0x26   : > { %7130 = vmatprep.subr.bf16.mxu0 %v7580_v17  ;;  %7555 = vmatprep.subr.bf16.mxu1 %v7580_v17  ;;  %v6361_v43 = vcombine.low %v1171_v35, %v1181_v21  ;;  %982 = vst [vmem:[#allocation2 + $0x10] sm:$0xf] %v671_v20  ;;  %v781_v46 = vor.u32 %v779_v25, %v778_v33  ;;  %v791_v50 = vrot.slane %v786_v37, 4  ;;  %v455_v58 = vsel %vm7844_vm3, 0, %v454_v41 }
  0x27   : > { %v789_v49 = vor.u32 %v787_v34, %v786_v37  ;;  %v391_v55 = vadd.f32 %v7870_v19, %v352_v39  ;;  %v422_v2 = vmax.f32 %v390_v51, 0.0  ;;  %456 = vst [vmem:[#allocation2 + $0x18] sm:$0x1] %v455_v58  ;;  %v337_v4 = vmul.f32 %v6732_v56, %v7865_v18 }
  0x28   : > { %7132 = vmatprep.mubr.bf16.mxu0 %v6361_v43  ;;  %v1029_v63 = vsel %vm7928_vm10, %v781_v46, %v1028_v47  ;;  %v1033_v1 = vsel %vm7844_vm3, %v791_v50, %v1032_v48  ;;  %v338_v5 = vmul.f32 %v6733_v57, %v7865_v18  ;;  %v511_v7 = vsel %vm7852_vm4, 0, %v510_v52 }
  0x29   : > { %7131 = vmatpush3.bf16.msra.mxu0 %v7580_v17  ;;  %7563 = vmatpush3.bf16.msra.mxu1 %v7580_v17  ;;  %v790_v62 = vsel %vm7934_vm11, %v782_v45, %v789_v49  ;;  %1030 = vst [vmem:[#allocation2 + $0x60] sm:$0xf] %v1029_v63  ;;  %1034 = vst [vmem:[#allocation2 + $0x68] sm:$0x1] %v1033_v1  ;;  %v423_v3 = vmax.f32 %v391_v55, 0.0  ;;  %v6678_v8 = vpack.c.bf16 %v422_v2, %v422_v2  ;;  %vm2184_vm12 = vcmask 1042432  }
  0x2a   : > { %1031 = vst [vmem:[#allocation2 + $0x64] sm:$0xf] %v790_v62  ;;  %7164 = vmatprep.subr.bf16.mxu1 %v7946_v38  ;;  %7212 = vmatprep.subr.bf16.mxu0 %v7959_v42  ;;  %512 = vst [vmem:[#allocation2 + $0x20] sm:$0x1] %v511_v7  ;;  %v6736_v9 = vunpack.c.l.bf16 %v6871_v59  ;;  %v6737_v11 = vunpack.c.h.bf16 %v6871_v59  ;;  %v458_v12 = vsel %vm7844_vm3, 0, %v457_v53  ;;  %v514_v14 = vsel %vm7852_vm4, 0, %v513_v60 }
  0x2b   : > { %v6679_v13 = vpack.c.bf16 %v423_v3, %v423_v3  ;;  %459 = vst [vmem:[#allocation2 + $0x24] sm:$0x1] %v458_v12  ;;  %v1093_v16 = vld [vmem:[#allocation2 + $0xc] sm:$0xf]  ;;  %v793_v17 = vshrl.u32 %v6678_v8, 16  ;;  %v796_v21 = vshll.u32 %v6678_v8, 16  ;;  %v376_v22 = vadd.f32 %v7870_v19, %v337_v4 }
  0x2c   : > { %v7987_v24 = vadd.f32 %v7870_v19, %v338_v5  ;;  %515 = vst [vmem:[#allocation2 + $0x2c] sm:$0x1] %v514_v14  ;;  %v1140_v26 = vld [vmem:[#allocation2 + $0x14] sm:$0x1]  ;;  %v1183_v28 = vshrl.u32 %v1093_v16, 16  ;;  %v1186_v29 = vshll.u32 %v1093_v16, 16  ;;  %v339_v30 = vmul.f32 %v6736_v9, %v7865_v18 }
  0x2d   : > { %v1094_v25 = vld [vmem:[#allocation2 + $0x10] sm:$0xf]  ;;  %v340_v31 = vmul.f32 %v6737_v11, %v7865_v18  ;;  %v1202_v34 = vshll.u32 %v1140_v26, 16  ;;  %v6764_v35 = vunpack.c.l.bf16 %v7983_v15  ;;  %v795_v39 = vrot.slane %v793_v17, 7  ;;  %v1035_v62 = vld [vmem:[#allocation2 + $0x6c] sm:$0xf] }
  0x2e   : > { %v1192_v32 = vshll.u32 %v1094_v25, 16  ;;  %v1196_v33 = vshrl.u32 %v1094_v25, 16  ;;  %v1185_v36 = vrot.slane %v1183_v28, 4  ;;  %v1188_v37 = vrot.slane %v1186_v29, 5  ;;  %v1039_v14 = vld [vmem:[#allocation2 + $0x74] sm:$0x1] }
  0x2f   : > { %v6765_v40 = vunpack.c.h.bf16 %v7983_v15  ;;  %v1204_v20 = vrot.slane %v1202_v34, 5  ;;  %v801_v45 = vshrl.u32 %v6679_v13, 16  ;;  %v798_v51 = vor.u32 %v796_v21, %v795_v39  ;;  %v7584_v26 = vld [vmem:[%s10470_s3 + $0xb0] sm:$0xff]  }
  0x30   : > { %v1194_v41 = vrot.slane %v1192_v32, 5  ;;  %v1198_v43 = vrot.slane %v1196_v33, 4  ;;  %v1107_v44 = vld [vmem:[#allocation2 + $0x60] sm:$0xf]  ;;  %v1189_v47 = vor.u32 %v1188_v37, %v1185_v36  ;;  %v1147_v46 = vld [vmem:[#allocation2 + $0x68] sm:$0x1]  ;;  %v378_v33 = vadd.f32 %v7870_v19, %v339_v30 }
  0x31   : > { %v1108_v48 = vld [vmem:[#allocation2 + $0x64] sm:$0xf]  ;;  %v1351_v49 = vshrl.u32 %v1107_v44, 16  ;;  %v1354_v50 = vshll.u32 %v1107_v44, 16  ;;  %v1370_v56 = vshll.u32 %v1147_v46, 16  ;;  %v804_v60 = vshll.u32 %v6679_v13, 16 }
  0x32   : > { %v1199_v52 = vor.u32 %v1198_v43, %v1194_v41  ;;  %v1360_v53 = vshll.u32 %v1108_v48, 16  ;;  %v1364_v55 = vshrl.u32 %v1108_v48, 16  ;;  %v1190_v57 = vrot.slane %v1189_v47, 4  ;;  %v8032_v15 = vld [vmem:[%s7840_s10 + $0x50] sm:$0xff]  }
  0x33   : > { %v1353_v58 = vrot.slane %v1351_v49, 4  ;;  %v1356_v59 = vrot.slane %v1354_v50, 5  ;;  %v1372_v3 = vrot.slane %v1370_v56, 5  ;;  %v799_v7 = vrot.slane %v795_v39, 4  ;;  %v478_v39 = vld [vmem:[#allocation2 + $0x78] sm:$0x1] }
  0x34   : > { %v1200_v63 = vrot.slane %v1199_v52, 4  ;;  %v1362_v1 = vrot.slane %v1360_v53, 5  ;;  %v1366_v2 = vrot.slane %v1364_v55, 4  ;;  %v1195_v4 = vsel %vm7915_vm9, %v1190_v57, %v1194_v41  ;;  %v986_v50 = vld [vmem:[#allocation2 + $0x18] sm:$0xf] }
  0x35   : > { %v1357_v5 = vor.u32 %v1356_v59, %v1353_v58  ;;  %v803_v8 = vrot.slane %v801_v45, 7  ;;  %v1036_v12 = vsel %vm7928_vm10, %v798_v51, %v1035_v62  ;;  %v408_v13 = vmax.f32 %v376_v22, 0.0 }
  0x36   : > { %v1205_v9 = vsel %vm7915_vm9, %v1200_v63, %v1204_v20  ;;  %v1367_v11 = vor.u32 %v1366_v2, %v1362_v1  ;;  %1037 = vst [vmem:[#allocation2 + $0x6c] sm:$0xf] %v1036_v12  ;;  %v409_v29 = vmax.f32 %v7987_v24, 0.0  ;;  %v379_v37 = vadd.f32 %v7870_v19, %v340_v31  ;;  %v7586_v31 = vld [vmem:[%s10470_s3 + $0xa8] sm:$0xff]  }
  0x37   : > { %v6362_v16 = vcombine.low %v1195_v4, %v1205_v9  ;;  %v1358_v17 = vrot.slane %v1357_v5, 4  ;;  %v806_v21 = vor.u32 %v804_v60, %v803_v8  ;;  %v808_v25 = vrot.slane %v803_v8, 4  ;;  %v990_v5 = vld [vmem:[#allocation2 + $0x20] sm:$0x1] }
  0x38   : > { %v1368_v28 = vrot.slane %v1367_v11, 4  ;;  %v6664_v32 = vpack.c.bf16 %v408_v13, %v408_v13  ;;  %v6665_v24 = vpack.c.bf16 %v409_v29, %v409_v29  ;;  %v410_v44 = vmax.f32 %v378_v33, 0.0  ;;  %v534_v29 = vld [vmem:[#allocation2 + $0x80] sm:$0x1] }
  0x39   : > { %7133 = vmatmul.mubr.bf16.vlgmr.msra.gmra.mxu0 %v6362_v16  ;;  %v1363_v34 = vsel %vm7915_vm9, %v1358_v17, %v1362_v1  ;;  %v807_v22 = vsel %vm7934_vm11, %v799_v7, %v806_v21  ;;  %v1040_v36 = vsel %vm7844_vm3, %v808_v25, %v1039_v14  ;;  %v411_v45 = vmax.f32 %v379_v37, 0.0  ;;  %v7588_v1 = vld [vmem:[%s10470_s3 + $0xa0] sm:$0xff]  }
  0x3a   : > { %v1373_v41 = vsel %vm7915_vm9, %v1368_v28, %v1372_v3  ;;  %1038 = vst [vmem:[#allocation2 + $0x70] sm:$0xf] %v807_v22  ;;  %1041 = vst [vmem:[#allocation2 + $0x74] sm:$0x1] %v1040_v36  ;;  %7213 = vmatpush3.bf16.msra.mxu0 %v7959_v42  ;;  %v674_v30 = vshrl.u32 %v6664_v32, 16  ;;  %v677_v43 = vshll.u32 %v6664_v32, 16  ;;  %v353_v47 = vmul.f32 %v6764_v35, %v7865_v18 }
  0x3b   : > { %v6369_v20 = vcombine.low %v1363_v34, %v1373_v41  ;;  %7214 = vmatprep.subr.bf16.mxu0 %v7584_v26  ;;  %v682_v46 = vshrl.u32 %v6665_v24, 16  ;;  %v685_v49 = vshll.u32 %v6665_v24, 16  ;;  %v354_v42 = vmul.f32 %v6765_v40, %v7865_v18  ;;  %v997_v28 = vld [vmem:[#allocation2 + $0x2c] sm:$0x1]  ;;  %v7590_v32 = vld [vmem:[%s10470_s3 + $0x98] sm:$0xff]  }
  0x3c   : > { %v676_v48 = vrot.slane %v674_v30, 7  ;;  %v6666_v51 = vpack.c.bf16 %v410_v44, %v410_v44  ;;  %v6667_v52 = vpack.c.bf16 %v411_v45, %v411_v45  ;;  %v8024_v53 = vadd.f32 %v7870_v19, %v353_v47 }
  0x3d   : > { %7148 = vmatprep.mubr.bf16.mxu1 %v6369_v20  ;;  %v479_v35 = vsel %vm7844_vm3, 0, %v478_v39  ;;  %v1109_v55 = vld [vmem:[#allocation2 + $0x6c] sm:$0xf]  ;;  %v684_v58 = vrot.slane %v682_v46, 7  ;;  %v8029_v59 = vadd.f32 %v7870_v19, %v354_v42  ;;  %v6768_v14 = vunpack.c.l.bf16 %v8032_v15 }
  0x3e   : > { %7215 = vmatpush3.bf16.msra.mxu0 %v7584_v26  ;;  %v679_v56 = vor.u32 %v677_v43, %v676_v48  ;;  %v680_v57 = vrot.slane %v676_v48, 4  ;;  %480 = vst [vmem:[#allocation2 + $0x78] sm:$0x1] %v479_v35  ;;  %v1375_v40 = vshrl.u32 %v1109_v55, 16  ;;  %v1378_v60 = vshll.u32 %v1109_v55, 16 }
  0x3f   : > { %v691_v62 = vshrl.u32 %v6666_v51, 16  ;;  %v694_v63 = vshll.u32 %v6666_v51, 16  ;;  %7216 = vmatprep.subr.bf16.mxu0 %v7586_v31  ;;  %v687_v2 = vor.u32 %v685_v49, %v684_v58  ;;  %v689_v3 = vrot.slane %v684_v58, 4  ;;  %v993_v26 = vld [vmem:[#allocation2 + $0x24] sm:$0xf]  ;;  %v7592_v51 = vld [vmem:[%s10470_s3 + $0x90] sm:$0xff]  }
  0x40   : > { %v987_v4 = vsel %vm7928_vm10, %v679_v56, %v986_v50  ;;  %v699_v7 = vshrl.u32 %v6667_v52, 16  ;;  %v1377_v11 = vrot.slane %v1375_v40, 4  ;;  %v1380_v12 = vrot.slane %v1378_v60, 5  ;;  %v7583_v60 = vld [vmem:[%s10470_s3 + $0x30] sm:$0xff]  }
  0x41   : > { %v1110_v8 = vld [vmem:[#allocation2 + $0x70] sm:$0xf]  ;;  %v1148_v9 = vld [vmem:[#allocation2 + $0x74] sm:$0x1]  ;;  %988 = vst [vmem:[#allocation2 + $0x18] sm:$0xf] %v987_v4  ;;  %v6769_v13 = vunpack.c.h.bf16 %v8032_v15  ;;  %v688_v25 = vsel %vm7934_vm11, %v680_v57, %v687_v2  ;;  %v991_v34 = vsel %vm7844_vm3, %v689_v3, %v990_v5 }
  0x42   : > { %v1384_v16 = vshll.u32 %v1110_v8, 16  ;;  %v1388_v17 = vshrl.u32 %v1110_v8, 16  ;;  %v1394_v21 = vshll.u32 %v1148_v9, 16  ;;  %7217 = vmatpush3.bf16.msra.mxu0 %v7586_v31  ;;  %v1381_v33 = vor.u32 %v1380_v12, %v1377_v11  ;;  %989 = vst [vmem:[#allocation2 + $0x1c] sm:$0xf] %v688_v25  ;;  %v7594_v9 = vld [vmem:[%s10470_s3 + $0x88] sm:$0xff]  }
  0x43   : > { %v693_v22 = vrot.slane %v691_v62, 7  ;;  %v701_v36 = vrot.slane %v699_v7, 7  ;;  %7218 = vmatprep.subr.bf16.mxu0 %v7588_v1  ;;  %992 = vst [vmem:[#allocation2 + $0x20] sm:$0x1] %v991_v34  ;;  %v702_v24 = vshll.u32 %v6667_v52, 16  ;;  %v424_v31 = vmax.f32 %v8024_v53, 0.0 }
  0x44   : > { %v1386_v37 = vrot.slane %v1384_v16, 5  ;;  %v1390_v39 = vrot.slane %v1388_v17, 4  ;;  %v1396_v41 = vrot.slane %v1394_v21, 5  ;;  %v1382_v30 = vrot.slane %v1381_v33, 4  ;;  %v8076_v25 = vld [vmem:[%s10470_s3 + $0x28] sm:$0xff]  }
  0x45   : > { %v696_v43 = vor.u32 %v694_v63, %v693_v22  ;;  %v697_v20 = vrot.slane %v693_v22, 4  ;;  %v706_v44 = vrot.slane %v701_v36, 4  ;;  %v704_v47 = vor.u32 %v702_v24, %v701_v36  ;;  %v1042_v34 = vld [vmem:[#allocation2 + $0x78] sm:$0xf]  ;;  %v7596_v22 = vld [vmem:[%s10470_s3 + $0x80] sm:$0xff]  }
  0x46   : > { %v1391_v45 = vor.u32 %v1390_v39, %v1386_v37  ;;  %v425_v48 = vmax.f32 %v8029_v59, 0.0  ;;  %7219 = vmatpush3.bf16.msra.mxu0 %v7588_v1  ;;  %v1387_v46 = vsel %vm7915_vm9, %v1382_v30, %v1386_v37  ;;  %v535_v50 = vsel %vm7852_vm4, 0, %v534_v29 }
  0x47   : > { %v994_v49 = vsel %vm7928_vm10, %v696_v43, %v993_v26  ;;  %v998_v42 = vsel %vm7844_vm3, %v706_v44, %v997_v28  ;;  %7220 = vmatprep.subr.bf16.mxu0 %v7590_v32  ;;  %v705_v35 = vsel %vm7934_vm11, %v697_v20, %v704_v47  ;;  %536 = vst [vmem:[#allocation2 + $0x80] sm:$0x1] %v535_v50  ;;  %v481_v47 = vld [vmem:[#allocation2 + $0x84] sm:$0x1]  ;;  %vm2185_vm13 = vcmask 1046532  }
  0x48   : > { %v1392_v52 = vrot.slane %v1391_v45, 4  ;;  %v1095_v53 = vld [vmem:[#allocation2 + $0x18] sm:$0xf]  ;;  %995 = vst [vmem:[#allocation2 + $0x24] sm:$0xf] %v994_v49  ;;  %v6680_v55 = vpack.c.bf16 %v424_v31, %v424_v31  ;;  %v6681_v56 = vpack.c.bf16 %v425_v48, %v425_v48  ;;  %v355_v59 = vmul.f32 %v6768_v14, %v7865_v18  ;;  %vm8375_vm14 = vmor %vm2184_vm12, %vm2185_vm13 }
  0x49   : > { %999 = vst [vmem:[#allocation2 + $0x2c] sm:$0x1] %v998_v42  ;;  %v1207_v57 = vshrl.u32 %v1095_v53, 16  ;;  %v1210_v58 = vshll.u32 %v1095_v53, 16  ;;  %996 = vst [vmem:[#allocation2 + $0x28] sm:$0xf] %v705_v35  ;;  %v356_v15 = vmul.f32 %v6769_v13, %v7865_v18 }
  0x4a   : > { %v1397_v40 = vsel %vm7915_vm9, %v1392_v52, %v1396_v41  ;;  %v1096_v62 = vld [vmem:[#allocation2 + $0x1c] sm:$0xf]  ;;  %v810_v63 = vshrl.u32 %v6680_v55, 16  ;;  %v813_v1 = vshll.u32 %v6680_v55, 16  ;;  %v818_v2 = vshrl.u32 %v6681_v56, 16  ;;  %7221 = vmatpush3.bf16.msra.mxu0 %v7590_v32 }
  0x4b   : > { %v6370_v3 = vcombine.low %v1387_v46, %v1397_v40  ;;  %v1141_v4 = vld [vmem:[#allocation2 + $0x20] sm:$0x1]  ;;  %v1209_v5 = vrot.slane %v1207_v57, 4  ;;  %v1212_v7 = vrot.slane %v1210_v58, 5  ;;  %v1216_v8 = vshll.u32 %v1096_v62, 16  ;;  %7222 = vmatprep.subr.bf16.mxu0 %v7592_v51  ;;  %v6872_v40 = vld [vmem:[%s7840_s10 + $0x18] sm:$0xff]  }
  0x4c   : > { %v1220_v11 = vshrl.u32 %v1096_v62, 16  ;;  %v1226_v12 = vshll.u32 %v1141_v4, 16  ;;  %v812_v14 = vrot.slane %v810_v63, 7  ;;  %v820_v13 = vrot.slane %v818_v2, 7  ;;  %v537_v31 = vld [vmem:[#allocation2 + $0x8c] sm:$0x1] }
  0x4d   : > { %7149 = vmatmul.mubr.bf16.vlgmr.msra.gmra.mxu1 %v6370_v3  ;;  %v1213_v16 = vor.u32 %v1212_v7, %v1209_v5  ;;  %v1218_v17 = vrot.slane %v1216_v8, 5  ;;  %v821_v21 = vshll.u32 %v6681_v56, 16  ;;  %v394_v26 = vadd.f32 %v7870_v19, %v355_v59  ;;  %v460_v56 = vld [vmem:[#allocation2 + $0x30] sm:$0x1]  ;;  %v516_v62 = vld [vmem:[#allocation2 + $0x38] sm:$0x1] }
  0x4e   : > { %7165 = vmatpush3.bf16.msra.mxu1 %v7946_v38  ;;  %v1222_v28 = vrot.slane %v1220_v11, 4  ;;  %v1228_v29 = vrot.slane %v1226_v12, 5  ;;  %v815_v32 = vor.u32 %v813_v1, %v812_v14  ;;  %v816_v33 = vrot.slane %v812_v14, 4  ;;  %7223 = vmatpush3.bf16.msra.mxu0 %v7592_v51  ;;  %v1046_v50 = vld [vmem:[#allocation2 + $0x80] sm:$0x1] }
  0x4f   : > { %7166 = vmatprep.subr.bf16.mxu1 %v7583_v60  ;;  %v1214_v36 = vrot.slane %v1213_v16, 4  ;;  %v1097_v37 = vld [vmem:[#allocation2 + $0x24] sm:$0xf]  ;;  %v823_v41 = vor.u32 %v821_v21, %v820_v13  ;;  %v825_v24 = vrot.slane %v820_v13, 4  ;;  %v395_v30 = vadd.f32 %v7870_v19, %v356_v15  ;;  %7224 = vmatprep.subr.bf16.mxu0 %v7594_v9 }
  0x50   : > { %v1142_v39 = vld [vmem:[#allocation2 + $0x2c] sm:$0x1]  ;;  %v1223_v38 = vor.u32 %v1222_v28, %v1218_v17  ;;  %v1098_v43 = vld [vmem:[#allocation2 + $0x28] sm:$0xf]  ;;  %v1231_v20 = vshrl.u32 %v1097_v37, 16  ;;  %v1234_v44 = vshll.u32 %v1097_v37, 16  ;;  %v1043_v59 = vsel %vm7928_vm10, %v815_v32, %v1042_v34 }
  0x51   : > { %v1250_v45 = vshll.u32 %v1142_v39, 16  ;;  %v1219_v48 = vsel %vm7915_vm9, %v1214_v36, %v1218_v17  ;;  %v1240_v46 = vshll.u32 %v1098_v43, 16  ;;  %v1244_v49 = vshrl.u32 %v1098_v43, 16  ;;  %v7587_v51 = vld [vmem:[%s10470_s3 + $0x20] sm:$0xff]   ;;  %1044 = vst [vmem:[#allocation2 + $0x78] sm:$0xf] %v1043_v59 }
  0x52   : > { %v824_v42 = vsel %vm7934_vm11, %v816_v33, %v823_v41  ;;  %7167 = vmatpush3.bf16.msra.mxu1 %v7583_v60  ;;  %v1224_v52 = vrot.slane %v1223_v38, 4  ;;  %v1233_v53 = vrot.slane %v1231_v20, 4  ;;  %v1236_v35 = vrot.slane %v1234_v44, 5  ;;  %7225 = vmatpush3.bf16.msra.mxu0 %v7594_v9  ;;  %v7600_v60 = vld [vmem:[%s10470_s3 + $0xf8] sm:$0xff]   ;;  %v8117_v33 = vld [vmem:[%s7840_s10 + $0x20] sm:$0xff]  }
  0x53   : > { %v1252_v55 = vrot.slane %v1250_v45, 5  ;;  %1045 = vst [vmem:[#allocation2 + $0x7c] sm:$0xf] %v824_v42  ;;  %v1242_v57 = vrot.slane %v1240_v46, 5  ;;  %v1246_v58 = vrot.slane %v1244_v49, 4  ;;  %v1047_v15 = vsel %vm7844_vm3, %v825_v24, %v1046_v50  ;;  %7168 = vmatprep.subr.bf16.mxu1 %v8076_v25  ;;  %7226 = vmatprep.subr.bf16.mxu0 %v7596_v22 }
  0x54   : > { %v1229_v63 = vsel %vm7915_vm9, %v1224_v52, %v1228_v29  ;;  %v1237_v1 = vor.u32 %v1236_v35, %v1233_v53  ;;  %1048 = vst [vmem:[#allocation2 + $0x80] sm:$0x1] %v1047_v15  ;;  %v426_v2 = vmax.f32 %v394_v26, 0.0  ;;  %v427_v3 = vmax.f32 %v395_v30, 0.0  ;;  %v7589_v26 = vld [vmem:[%s10470_s3 + $0x18] sm:$0xff]  }
  0x55   : > { %v6363_v4 = vcombine.low %v1219_v48, %v1229_v63  ;;  %v1247_v5 = vor.u32 %v1246_v58, %v1242_v57  ;;  %v482_v7 = vsel %vm7844_vm3, 0, %v481_v47  ;;  %v538_v8 = vsel %vm7852_vm4, 0, %v537_v31  ;;  %v7591_v48 = vld [vmem:[%s10470_s3 + $0x10] sm:$0xff]   ;;  %v463_v50 = vld [vmem:[#allocation2 + $0x3c] sm:$0x1] }
  0x56   : > { %v1238_v9 = vrot.slane %v1237_v1, 4  ;;  %483 = vst [vmem:[#allocation2 + $0x84] sm:$0x1] %v482_v7  ;;  %539 = vst [vmem:[#allocation2 + $0x8c] sm:$0x1] %v538_v8  ;;  %v6682_v11 = vpack.c.bf16 %v426_v2, %v426_v2  ;;  %v6683_v12 = vpack.c.bf16 %v427_v3, %v427_v3  ;;  %7169 = vmatpush3.bf16.msra.mxu1 %v8076_v25  ;;  %v6740_v14 = vunpack.c.l.bf16 %v6872_v40  ;;  %v8134_v1 = vld [vmem:[%s7840_s10 + $0x58] sm:$0xff]  }
  0x57   : > { %7227 = vmatpush3.bf16.msra.mxu0 %v7596_v22  ;;  %7136 = vmatprep.mubr.bf16.mxu0 %v6363_v4  ;;  %v1248_v13 = vrot.slane %v1247_v5, 4  ;;  %v6741_v16 = vunpack.c.h.bf16 %v6872_v40  ;;  %v461_v17 = vsel %vm7844_vm3, 0, %v460_v56  ;;  %v517_v21 = vsel %vm7852_vm4, 0, %v516_v62  ;;  %v519_v63 = vld [vmem:[#allocation2 + $0x44] sm:$0x1]  ;;  %v7593_v2 = vld [vmem:[%s10470_s3 + $0x8] sm:$0xff]  }
  0x58   : > { %7170 = vmatprep.subr.bf16.mxu1 %v7587_v51  ;;  %v1243_v25 = vsel %vm7915_vm9, %v1238_v9, %v1242_v57  ;;  %v827_v28 = vshrl.u32 %v6682_v11, 16  ;;  %v830_v29 = vshll.u32 %v6682_v11, 16  ;;  %v835_v32 = vshrl.u32 %v6683_v12, 16  ;;  %462 = vst [vmem:[#allocation2 + $0x30] sm:$0x1] %v461_v17  ;;  %7308 = vmatprep.subr.bf16.mxu0 %v7600_v60 }
  0x59   : > { %518 = vst [vmem:[#allocation2 + $0x38] sm:$0x1] %v517_v21  ;;  %v1253_v34 = vsel %vm7915_vm9, %v1248_v13, %v1252_v55  ;;  %v838_v36 = vshll.u32 %v6683_v12, 16  ;;  %v341_v37 = vmul.f32 %v6740_v14, %v7865_v18  ;;  %v342_v39 = vmul.f32 %v6741_v16, %v7865_v18  ;;  %v1111_v43 = vld [vmem:[#allocation2 + $0x78] sm:$0xf]  ;;  %v7595_v16 = vld [vmem:[%s10470_s3] sm:$0xff]  }
  0x5a   : > { %v1112_v22 = vld [vmem:[#allocation2 + $0x7c] sm:$0xf]  ;;  %v6364_v41 = vcombine.low %v1243_v25, %v1253_v34  ;;  %v829_v38 = vrot.slane %v827_v28, 7  ;;  %7171 = vmatpush3.bf16.msra.mxu1 %v7587_v51  ;;  %v837_v44 = vrot.slane %v835_v32, 7  ;;  %v6744_v31 = vunpack.c.l.bf16 %v8117_v33  ;;  %v8145_v11 = vld [vmem:[%s10468_s1] ss:$0 sm:$0xff] }
  0x5b   : > { %v1408_v24 = vshll.u32 %v1112_v22, 16  ;;  %v1412_v30 = vshrl.u32 %v1112_v22, 16  ;;  %v1149_v20 = vld [vmem:[#allocation2 + $0x80] sm:$0x1]  ;;  %v380_v45 = vadd.f32 %v7870_v19, %v341_v37  ;;  %v381_v47 = vadd.f32 %v7870_v19, %v342_v39  ;;  %7172 = vmatprep.subr.bf16.mxu1 %v7589_v26  ;;  %v484_v13 = vld [vmem:[#allocation2 + $0x90] sm:$0x1] }
  0x5c   : > { %7137 = vmatmul.mubr.bf16.gmra.mxu0 %v6364_v41  ;;  %v1399_v18 = vshrl.u32 %v1111_v43, 16  ;;  %v1402_v46 = vshll.u32 %v1111_v43, 16  ;;  %v1418_v51 = vshll.u32 %v1149_v20, 16  ;;  %v832_v52 = vor.u32 %v830_v29, %v829_v38  ;;  %v7598_v20 = vld [vmem:[%s10470_s3 + $0x138] sm:$0xff]   ;;  %v8700_v6 = vld [vmem:[#allocation2 + $0x28] sm:$0xf] }
  0x5d   : > { %v1410_v49 = vrot.slane %v1408_v24, 5  ;;  %v1414_v42 = vrot.slane %v1412_v30, 4  ;;  %v833_v53 = vrot.slane %v829_v38, 4  ;;  %v840_v35 = vor.u32 %v838_v36, %v837_v44  ;;  %v1049_v55 = vld [vmem:[#allocation2 + $0x84] sm:$0xf] }
  0x5e   : > { %v1053_v19 = vld [vmem:[#allocation2 + $0x8c] sm:$0x1]  ;;  %v1401_v56 = vrot.slane %v1399_v18, 4  ;;  %v1404_v57 = vrot.slane %v1402_v46, 5  ;;  %v842_v59 = vrot.slane %v837_v44, 4  ;;  %7173 = vmatpush3.bf16.msra.mxu1 %v7589_v26  ;;  %v1420_v15 = vrot.slane %v1418_v51, 5 }
  0x5f   : > { %v1415_v58 = vor.u32 %v1414_v42, %v1410_v49  ;;  %v841_v40 = vsel %vm7934_vm11, %v833_v53, %v840_v35  ;;  %v1050_v62 = vsel %vm7928_vm10, %v832_v52, %v1049_v55  ;;  %v412_v60 = vmax.f32 %v380_v45, 0.0  ;;  %7174 = vmatprep.subr.bf16.mxu1 %v7591_v48  ;;  %v1000_v30 = vld [vmem:[#allocation2 + $0x30] sm:$0xf] }
  0x60   : > { %v1405_v3 = vor.u32 %v1404_v57, %v1401_v56  ;;  %1051 = vst [vmem:[#allocation2 + $0x84] sm:$0xf] %v1050_v62  ;;  %1052 = vst [vmem:[#allocation2 + $0x88] sm:$0xf] %v841_v40  ;;  %v1054_v5 = vsel %vm7844_vm3, %v842_v59, %v1053_v19  ;;  %v413_v7 = vmax.f32 %v381_v47, 0.0  ;;  %v6745_v9 = vunpack.c.h.bf16 %v8117_v33 }
  0x61   : > { %v1416_v4 = vrot.slane %v1415_v58, 4  ;;  %1055 = vst [vmem:[#allocation2 + $0x8c] sm:$0x1] %v1054_v5  ;;  %v6668_v8 = vpack.c.bf16 %v412_v60, %v412_v60  ;;  %v343_v12 = vmul.f32 %v8145_v11, %v6744_v31  ;;  %v464_v14 = vsel %vm7844_vm3, 0, %v463_v50  ;;  %v8161_v33 = vld [vmem:[%s10469_s2] ss:$0 sm:$0xff] }
  0x62   : > { %v1406_v17 = vrot.slane %v1405_v3, 4  ;;  %v6669_v26 = vpack.c.bf16 %v413_v7, %v413_v7  ;;  %465 = vst [vmem:[#allocation2 + $0x3c] sm:$0x1] %v464_v14  ;;  %v520_v25 = vsel %vm7852_vm4, 0, %v519_v63  ;;  %7175 = vmatpush3.bf16.msra.mxu1 %v7591_v48  ;;  %v344_v32 = vmul.f32 %v8145_v11, %v6745_v9  ;;  %v1004_v45 = vld [vmem:[#allocation2 + $0x38] sm:$0x1] }
  0x63   : > { %v1421_v21 = vsel %vm7915_vm9, %v1416_v4, %v1420_v15  ;;  %v708_v28 = vshrl.u32 %v6668_v8, 16  ;;  %v711_v29 = vshll.u32 %v6668_v8, 16  ;;  %v382_v34 = vadd.f32 %v8161_v33, %v343_v12  ;;  %521 = vst [vmem:[#allocation2 + $0x44] sm:$0x1] %v520_v25  ;;  %7176 = vmatprep.subr.bf16.mxu1 %v7593_v2  ;;  %v540_v63 = vld [vmem:[#allocation2 + $0x98] sm:$0x1] }
  0x64   : > { %v1411_v22 = vsel %vm7915_vm9, %v1406_v17, %v1410_v49  ;;  %v716_v36 = vshrl.u32 %v6669_v26, 16  ;;  %v719_v37 = vshll.u32 %v6669_v26, 16  ;;  %v6772_v39 = vunpack.c.l.bf16 %v8134_v1  ;;  %v6881_v12 = vld [vmem:[%s7840_s10 + $0x60] sm:$0xff]  }
  0x65   : > { %v6371_v41 = vcombine.low %v1411_v22, %v1421_v21  ;;  %v710_v24 = vrot.slane %v708_v28, 7  ;;  %v383_v38 = vadd.f32 %v8161_v33, %v344_v32  ;;  %v414_v43 = vmax.f32 %v382_v34, 0.0 }
  0x66   : > { %v718_v44 = vrot.slane %v716_v36, 7  ;;  %v6773_v47 = vunpack.c.h.bf16 %v8134_v1  ;;  %v357_v31 = vmul.f32 %v8145_v11, %v6772_v39  ;;  %v485_v48 = vsel %vm7844_vm3, 0, %v484_v13  ;;  %7177 = vmatpush3.bf16.msra.mxu1 %v7593_v2 }
  0x67   : > { %7152 = vmatprep.mubr.bf16.mxu1 %v6371_v41  ;;  %v1113_v18 = vld [vmem:[#allocation2 + $0x84] sm:$0xf]  ;;  %v1114_v46 = vld [vmem:[#allocation2 + $0x88] sm:$0xf]  ;;  %v713_v49 = vor.u32 %v711_v29, %v710_v24  ;;  %v714_v42 = vrot.slane %v710_v24, 4  ;;  %v415_v50 = vmax.f32 %v383_v38, 0.0  ;;  %v6670_v51 = vpack.c.bf16 %v414_v43, %v414_v43  ;;  %7178 = vmatprep.subr.bf16.mxu1 %v7595_v16 }
  0x68   : > { %486 = vst [vmem:[#allocation2 + $0x90] sm:$0x1] %v485_v48  ;;  %v1150_v52 = vld [vmem:[#allocation2 + $0x8c] sm:$0x1]  ;;  %v1423_v53 = vshrl.u32 %v1113_v18, 16  ;;  %v1426_v35 = vshll.u32 %v1113_v18, 16  ;;  %v721_v57 = vor.u32 %v719_v37, %v718_v44  ;;  %v396_v21 = vadd.f32 %v8161_v33, %v357_v31 }
  0x69   : > { %v1432_v55 = vshll.u32 %v1114_v46, 16  ;;  %v1436_v19 = vshrl.u32 %v1114_v46, 16  ;;  %v1442_v56 = vshll.u32 %v1150_v52, 16  ;;  %v723_v58 = vrot.slane %v718_v44, 4  ;;  %v1007_v17 = vld [vmem:[#allocation2 + $0x3c] sm:$0xf] }
  0x6a   : > { %v1001_v59 = vsel %vm7928_vm10, %v713_v49, %v1000_v30  ;;  %v1425_v15 = vrot.slane %v1423_v53, 4  ;;  %v1428_v40 = vrot.slane %v1426_v35, 5  ;;  %7179 = vmatpush3.bf16.msra.mxu1 %v7595_v16  ;;  %v722_v2 = vsel %vm7934_vm11, %v714_v42, %v721_v57  ;;  %v1011_v29 = vld [vmem:[#allocation2 + $0x44] sm:$0x1] }
  0x6b   : > { %v1434_v62 = vrot.slane %v1432_v55, 5  ;;  %v1438_v60 = vrot.slane %v1436_v19, 4  ;;  %1002 = vst [vmem:[#allocation2 + $0x30] sm:$0xf] %v1001_v59  ;;  %v1444_v1 = vrot.slane %v1442_v56, 5  ;;  %v1005_v3 = vsel %vm7844_vm3, %v723_v58, %v1004_v45  ;;  %7260 = vmatprep.subr.bf16.mxu1 %v7598_v20 }
  0x6c   : > { %v6671_v4 = vpack.c.bf16 %v415_v50, %v415_v50  ;;  %v1429_v5 = vor.u32 %v1428_v40, %v1425_v15  ;;  %1003 = vst [vmem:[#allocation2 + $0x34] sm:$0xf] %v722_v2  ;;  %1006 = vst [vmem:[#allocation2 + $0x38] sm:$0x1] %v1005_v3  ;;  %v725_v8 = vshrl.u32 %v6670_v51, 16  ;;  %v728_v9 = vshll.u32 %v6670_v51, 16 }
  0x6d   : > { %v1439_v7 = vor.u32 %v1438_v60, %v1434_v62  ;;  %v358_v16 = vmul.f32 %v8145_v11, %v6773_v47  ;;  %v541_v32 = vsel %vm7852_vm4, 0, %v540_v63  ;;  %v428_v36 = vmax.f32 %v396_v21, 0.0  ;;  %v487_v15 = vld [vmem:[#allocation2 + $0x9c] sm:$0x1] }
  0x6e   : > { %v733_v14 = vshrl.u32 %v6671_v4, 16  ;;  %v736_v13 = vshll.u32 %v6671_v4, 16  ;;  %v1430_v26 = vrot.slane %v1429_v5, 4  ;;  %v727_v28 = vrot.slane %v725_v8, 7  ;;  %542 = vst [vmem:[#allocation2 + $0x98] sm:$0x1] %v541_v32 }
  0x6f   : > { %v1440_v25 = vrot.slane %v1439_v7, 4  ;;  %v397_v22 = vadd.f32 %v8161_v33, %v358_v16  ;;  %v6776_v37 = vunpack.c.l.bf16 %v6881_v12  ;;  %v6684_v18 = vpack.c.bf16 %v428_v36, %v428_v36 }
  0x70   : > { %v735_v34 = vrot.slane %v733_v14, 7  ;;  %v1435_v39 = vsel %vm7915_vm9, %v1430_v26, %v1434_v62  ;;  %v730_v24 = vor.u32 %v728_v9, %v727_v28  ;;  %v731_v30 = vrot.slane %v727_v28, 4 }
  0x71   : > { %v1445_v41 = vsel %vm7915_vm9, %v1440_v25, %v1444_v1  ;;  %v429_v45 = vmax.f32 %v397_v22, 0.0  ;;  %v6777_v52 = vunpack.c.h.bf16 %v6881_v12  ;;  %v844_v57 = vshrl.u32 %v6684_v18, 16  ;;  %v1056_v1 = vld [vmem:[#allocation2 + $0x90] sm:$0xf] }
  0x72   : > { %v6372_v38 = vcombine.low %v1435_v39, %v1445_v41  ;;  %v8191_v43 = vld [vmem:[#allocation2 + $0x30] sm:$0xf]  ;;  %v738_v20 = vor.u32 %v736_v13, %v735_v34  ;;  %v740_v44 = vrot.slane %v735_v34, 4  ;;  %v1008_v48 = vsel %vm7928_vm10, %v730_v24, %v1007_v17  ;;  %v543_v34 = vld [vmem:[#allocation2 + $0xa4] sm:$0x1] }
  0x73   : > { %v1255_v47 = vshrl.u32 %v8191_v43, 16  ;;  %v1258_v31 = vshll.u32 %v8191_v43, 16  ;;  %v8197_v46 = vld [vmem:[#allocation2 + $0x34] sm:$0xf]  ;;  %v8199_v49 = vld [vmem:[#allocation2 + $0x38] sm:$0x1]  ;;  %v6685_v51 = vpack.c.bf16 %v429_v45, %v429_v45  ;;  %v359_v5 = vmul.f32 %v8145_v11, %v6776_v37 }
  0x74   : > { %7153 = vmatmul.mubr.bf16.gmra.mxu1 %v6372_v38  ;;  %v739_v42 = vsel %vm7934_vm11, %v731_v30, %v738_v20  ;;  %1009 = vst [vmem:[#allocation2 + $0x3c] sm:$0xf] %v1008_v48  ;;  %v1012_v50 = vsel %vm7844_vm3, %v740_v44, %v1011_v29  ;;  %v1264_v55 = vshll.u32 %v8197_v46, 16  ;;  %v1268_v19 = vshrl.u32 %v8197_v46, 16  ;;  %v466_v30 = vld [vmem:[#allocation2 + $0x48] sm:$0x1] }
  0x75   : > { %v1257_v53 = vrot.slane %v1255_v47, 4  ;;  %v1260_v35 = vrot.slane %v1258_v31, 5  ;;  %1010 = vst [vmem:[#allocation2 + $0x40] sm:$0xf] %v739_v42  ;;  %1013 = vst [vmem:[#allocation2 + $0x44] sm:$0x1] %v1012_v50  ;;  %v360_v9 = vmul.f32 %v8145_v11, %v6777_v52  ;;  %v398_v29 = vadd.f32 %v8161_v33, %v359_v5 }
  0x76   : > { %v1274_v56 = vshll.u32 %v8199_v49, 16  ;;  %v847_v58 = vshll.u32 %v6684_v18, 16  ;;  %v852_v59 = vshrl.u32 %v6685_v51, 16  ;;  %v1266_v62 = vrot.slane %v1264_v55, 5  ;;  %v1060_v28 = vld [vmem:[#allocation2 + $0x98] sm:$0x1] }
  0x77   : > { %v1261_v40 = vor.u32 %v1260_v35, %v1257_v53  ;;  %v1270_v60 = vrot.slane %v1268_v19, 4  ;;  %v855_v63 = vshll.u32 %v6685_v51, 16  ;;  %v846_v3 = vrot.slane %v844_v57, 7  ;;  %v6874_v47 = vld [vmem:[%s7840_s10 + $0x28] sm:$0xff]   ;;  %v522_v50 = vld [vmem:[#allocation2 + $0x50] sm:$0x1] }
  0x78   : > { %v1276_v2 = vrot.slane %v1274_v56, 5  ;;  %v854_v4 = vrot.slane %v852_v59, 7  ;;  %v488_v12 = vsel %vm7844_vm3, 0, %v487_v15  ;;  %v399_v32 = vadd.f32 %v8161_v33, %v360_v9 }
  0x79   : > { %v1262_v7 = vrot.slane %v1261_v40, 4  ;;  %v1271_v8 = vor.u32 %v1270_v60, %v1266_v62  ;;  %v849_v14 = vor.u32 %v847_v58, %v846_v3  ;;  %v850_v13 = vrot.slane %v846_v3, 4  ;;  %489 = vst [vmem:[#allocation2 + $0x9c] sm:$0x1] %v488_v12 }
  0x7a   : > { %v857_v17 = vor.u32 %v855_v63, %v854_v4  ;;  %v859_v16 = vrot.slane %v854_v4, 4  ;;  %v430_v35 = vmax.f32 %v398_v29, 0.0  ;;  %v431_v19 = vmax.f32 %v399_v32, 0.0 }
  0x7b   : > { %v1267_v21 = vsel %vm7915_vm9, %v1262_v7, %v1266_v62  ;;  %v1272_v26 = vrot.slane %v1271_v8, 4  ;;  %v8214_v25 = vld [vmem:[#allocation2 + $0x3c] sm:$0xf]  ;;  %v1057_v24 = vsel %vm7928_vm10, %v849_v14, %v1056_v1  ;;  %v544_v56 = vsel %vm7852_vm4, 0, %v543_v34 }
  0x7c   : > { %v8218_v22 = vld [vmem:[#allocation2 + $0x40] sm:$0xf]  ;;  %v8220_v36 = vld [vmem:[#allocation2 + $0x44] sm:$0x1]  ;;  %v1279_v37 = vshrl.u32 %v8214_v25, 16  ;;  %v1282_v39 = vshll.u32 %v8214_v25, 16  ;;  %v858_v41 = vsel %vm7934_vm11, %v850_v13, %v857_v17  ;;  %v1061_v42 = vsel %vm7844_vm3, %v859_v16, %v1060_v28 }
  0x7d   : > { %v1277_v38 = vsel %vm7915_vm9, %v1272_v26, %v1276_v2  ;;  %v1288_v20 = vshll.u32 %v8218_v22, 16  ;;  %v1292_v44 = vshrl.u32 %v8218_v22, 16  ;;  %v1298_v45 = vshll.u32 %v8220_v36, 16  ;;  %1058 = vst [vmem:[#allocation2 + $0x90] sm:$0xf] %v1057_v24 }
  0x7e   : > { %1059 = vst [vmem:[#allocation2 + $0x94] sm:$0xf] %v858_v41  ;;  %v6365_v31 = vcombine.low %v1267_v21, %v1277_v38  ;;  %v1281_v48 = vrot.slane %v1279_v37, 4  ;;  %v1284_v18 = vrot.slane %v1282_v39, 5  ;;  %1062 = vst [vmem:[#allocation2 + $0x98] sm:$0x1] %v1061_v42  ;;  %v6748_v57 = vunpack.c.l.bf16 %v6874_v47 }
  0x7f   : > { %v1290_v51 = vrot.slane %v1288_v20, 5  ;;  %v1294_v52 = vrot.slane %v1292_v44, 4  ;;  %v1300_v53 = vrot.slane %v1298_v45, 5  ;;  %545 = vst [vmem:[#allocation2 + $0xa4] sm:$0x1] %v544_v56  ;;  %v6686_v59 = vpack.c.bf16 %v430_v35, %v430_v35 }
  0x80   : > { %7140 = vmatprep.mubr.bf16.mxu0 %v6365_v31  ;;  %v1285_v55 = vor.u32 %v1284_v18, %v1281_v48  ;;  %v6749_v15 = vunpack.c.h.bf16 %v6874_v47  ;;  %v467_v40 = vsel %vm7844_vm3, 0, %v466_v30  ;;  %v6687_v60 = vpack.c.bf16 %v431_v19, %v431_v19  ;;  %v1063_v38 = vld [vmem:[#allocation2 + $0x9c] sm:$0xf]  ;;  %v6875_v48 = vld [vmem:[%s7840_s10 + $0x30] sm:$0xff]  }
  0x81   : > { %v1295_v58 = vor.u32 %v1294_v52, %v1290_v51  ;;  %v345_v63 = vmul.f32 %v8145_v11, %v6748_v57  ;;  %468 = vst [vmem:[#allocation2 + $0x48] sm:$0x1] %v467_v40  ;;  %v523_v1 = vsel %vm7852_vm4, 0, %v522_v50  ;;  %v861_v3 = vshrl.u32 %v6686_v59, 16  ;;  %v469_v52 = vld [vmem:[#allocation2 + $0x54] sm:$0x1] }
  0x82   : > { %v1286_v62 = vrot.slane %v1285_v55, 4  ;;  %v864_v4 = vshll.u32 %v6686_v59, 16  ;;  %v346_v5 = vmul.f32 %v8145_v11, %v6749_v15  ;;  %524 = vst [vmem:[#allocation2 + $0x50] sm:$0x1] %v523_v1  ;;  %v869_v12 = vshrl.u32 %v6687_v60, 16 }
  0x83   : > { %v1296_v2 = vrot.slane %v1295_v58, 4  ;;  %v872_v14 = vshll.u32 %v6687_v60, 16  ;;  %v384_v13 = vadd.f32 %v8161_v33, %v345_v63  ;;  %v863_v34 = vrot.slane %v861_v3, 7  ;;  %v525_v56 = vld [vmem:[#allocation2 + $0x5c] sm:$0x1] }
  0x84   : > { %v1291_v7 = vsel %vm7915_vm9, %v1286_v62, %v1290_v51  ;;  %v8246_v8 = vld [vmem:[#allocation2 + $0x90] sm:$0xf]  ;;  %v871_v37 = vrot.slane %v869_v12, 7  ;;  %v385_v51 = vadd.f32 %v8161_v33, %v346_v5  ;;  %v6752_v15 = vunpack.c.l.bf16 %v6875_v48  ;;  %v6882_v5 = vld [vmem:[%s7840_s10 + $0x68] sm:$0xff]  }
  0x85   : > { %v8248_v9 = vld [vmem:[#allocation2 + $0x94] sm:$0xf]  ;;  %v1301_v17 = vsel %vm7915_vm9, %v1296_v2, %v1300_v53  ;;  %v1447_v16 = vshrl.u32 %v8246_v8, 16  ;;  %v1450_v21 = vshll.u32 %v8246_v8, 16  ;;  %v8256_v29 = vld [vmem:[#allocation2 + $0x98] sm:$0x1]  ;;  %v866_v44 = vor.u32 %v864_v4, %v863_v34 }
  0x86   : > { %v1456_v26 = vshll.u32 %v8248_v9, 16  ;;  %v6366_v28 = vcombine.low %v1291_v7, %v1301_v17  ;;  %v1460_v32 = vshrl.u32 %v8248_v9, 16  ;;  %v1466_v30 = vshll.u32 %v8256_v29, 16  ;;  %v1067_v31 = vld [vmem:[#allocation2 + $0xa4] sm:$0x1] }
  0x87   : > { %v1449_v39 = vrot.slane %v1447_v16, 4  ;;  %v1452_v41 = vrot.slane %v1450_v21, 5  ;;  %v867_v45 = vrot.slane %v863_v34, 4  ;;  %v874_v47 = vor.u32 %v872_v14, %v871_v37  ;;  %v490_v7 = vld [vmem:[#allocation2 + $0xa8] sm:$0x1] }
  0x88   : > { %v1458_v24 = vrot.slane %v1456_v26, 5  ;;  %7141 = vmatmul.mubr.bf16.gmra.mxu0 %v6366_v28  ;;  %v1462_v20 = vrot.slane %v1460_v32, 4  ;;  %v1468_v42 = vrot.slane %v1466_v30, 5  ;;  %v876_v50 = vrot.slane %v871_v37, 4  ;;  %v546_v16 = vld [vmem:[#allocation2 + $0xb0] sm:$0x1] }
  0x89   : > { %v1453_v18 = vor.u32 %v1452_v41, %v1449_v39  ;;  %v875_v35 = vsel %vm7934_vm11, %v867_v45, %v874_v47  ;;  %v1064_v55 = vsel %vm7928_vm10, %v866_v44, %v1063_v38  ;;  %v416_v19 = vmax.f32 %v384_v13, 0.0  ;;  %v1014_v37 = vld [vmem:[#allocation2 + $0x48] sm:$0xf]  ;;  %v1018_v38 = vld [vmem:[#allocation2 + $0x50] sm:$0x1] }
  0x8a   : > { %v1463_v53 = vor.u32 %v1462_v20, %v1458_v24  ;;  %1065 = vst [vmem:[#allocation2 + $0x9c] sm:$0xf] %v1064_v55  ;;  %1066 = vst [vmem:[#allocation2 + $0xa0] sm:$0xf] %v875_v35  ;;  %v1068_v58 = vsel %vm7844_vm3, %v876_v50, %v1067_v31  ;;  %v417_v59 = vmax.f32 %v385_v51, 0.0  ;;  %v6753_v60 = vunpack.c.h.bf16 %v6875_v48 }
  0x8b   : > { %v1454_v57 = vrot.slane %v1453_v18, 4  ;;  %1069 = vst [vmem:[#allocation2 + $0xa4] sm:$0x1] %v1068_v58  ;;  %v6672_v62 = vpack.c.bf16 %v416_v19, %v416_v19  ;;  %v470_v63 = vsel %vm7844_vm3, 0, %v469_v52  ;;  %v347_v3 = vmul.f32 %v8145_v11, %v6752_v15 }
  0x8c   : > { %v1464_v40 = vrot.slane %v1463_v53, 4  ;;  %v6673_v2 = vpack.c.bf16 %v417_v59, %v417_v59  ;;  %471 = vst [vmem:[#allocation2 + $0x54] sm:$0x1] %v470_v63  ;;  %v526_v4 = vsel %vm7852_vm4, 0, %v525_v56  ;;  %v348_v17 = vmul.f32 %v8145_v11, %v6753_v60  ;;  %v6883_v60 = vld [vmem:[%s7840_s10 + $0x70] sm:$0xff]  }
  0x8d   : > { %v1459_v1 = vsel %vm7915_vm9, %v1454_v57, %v1458_v24  ;;  %v742_v14 = vshrl.u32 %v6672_v62, 16  ;;  %v745_v13 = vshll.u32 %v6672_v62, 16  ;;  %527 = vst [vmem:[#allocation2 + $0x5c] sm:$0x1] %v526_v4  ;;  %v386_v32 = vadd.f32 %v8161_v33, %v347_v3 }
  0x8e   : > { %v1469_v12 = vsel %vm7915_vm9, %v1464_v40, %v1468_v42  ;;  %v750_v26 = vshrl.u32 %v6673_v2, 16  ;;  %v753_v28 = vshll.u32 %v6673_v2, 16  ;;  %v387_v39 = vadd.f32 %v8161_v33, %v348_v17 }
  0x8f   : > { %v6373_v21 = vcombine.low %v1459_v1, %v1469_v12  ;;  %v744_v34 = vrot.slane %v742_v14, 7  ;;  %v6780_v41 = vunpack.c.l.bf16 %v6882_v5  ;;  %v6781_v24 = vunpack.c.h.bf16 %v6882_v5 }
  0x90   : > { %v752_v30 = vrot.slane %v750_v26, 7  ;;  %v418_v20 = vmax.f32 %v386_v32, 0.0  ;;  %v491_v44 = vsel %vm7844_vm3, 0, %v490_v7  ;;  %v547_v45 = vsel %vm7852_vm4, 0, %v546_v16 }
  0x91   : > { %7156 = vmatprep.mubr.bf16.mxu1 %v6373_v21  ;;  %v8285_v47 = vld [vmem:[#allocation2 + $0x9c] sm:$0xf]  ;;  %v8287_v31 = vld [vmem:[#allocation2 + $0xa0] sm:$0xf]  ;;  %v747_v48 = vor.u32 %v745_v13, %v744_v34  ;;  %v748_v18 = vrot.slane %v744_v34, 4  ;;  %v419_v42 = vmax.f32 %v387_v39, 0.0  ;;  %v361_v50 = vmul.f32 %v8145_v11, %v6780_v41 }
  0x92   : > { %492 = vst [vmem:[#allocation2 + $0xa8] sm:$0x1] %v491_v44  ;;  %548 = vst [vmem:[#allocation2 + $0xb0] sm:$0x1] %v547_v45  ;;  %v8290_v51 = vld [vmem:[#allocation2 + $0xa4] sm:$0x1]  ;;  %v755_v56 = vor.u32 %v753_v28, %v752_v30  ;;  %v6674_v3 = vpack.c.bf16 %v418_v20, %v418_v20  ;;  %v362_v12 = vmul.f32 %v8145_v11, %v6781_v24  ;;  %v6784_v16 = vunpack.c.l.bf16 %v6883_v60 }
  0x93   : > { %v1471_v52 = vshrl.u32 %v8285_v47, 16  ;;  %v1474_v53 = vshll.u32 %v8285_v47, 16  ;;  %v1480_v35 = vshll.u32 %v8287_v31, 16  ;;  %v1484_v55 = vshrl.u32 %v8287_v31, 16  ;;  %v1021_v20 = vld [vmem:[#allocation2 + $0x54] sm:$0xf] }
  0x94   : > { %v1490_v19 = vshll.u32 %v8290_v51, 16  ;;  %v757_v57 = vrot.slane %v752_v30, 4  ;;  %v1015_v58 = vsel %vm7928_vm10, %v747_v48, %v1014_v37  ;;  %v756_v1 = vsel %vm7934_vm11, %v748_v18, %v755_v56 }
  0x95   : > { %v1473_v59 = vrot.slane %v1471_v52, 4  ;;  %v1476_v15 = vrot.slane %v1474_v53, 5  ;;  %v1482_v40 = vrot.slane %v1480_v35, 5  ;;  %v1486_v62 = vrot.slane %v1484_v55, 4  ;;  %1016 = vst [vmem:[#allocation2 + $0x48] sm:$0xf] %v1015_v58 }
  0x96   : > { %v1492_v63 = vrot.slane %v1490_v19, 5  ;;  %v1019_v2 = vsel %vm7844_vm3, %v757_v57, %v1018_v38  ;;  %1017 = vst [vmem:[#allocation2 + $0x4c] sm:$0xf] %v756_v1  ;;  %v6675_v7 = vpack.c.bf16 %v419_v42, %v419_v42  ;;  %v759_v14 = vshrl.u32 %v6674_v3, 16  ;;  %v1025_v19 = vld [vmem:[#allocation2 + $0x5c] sm:$0x1] }
  0x97   : > { %v1477_v4 = vor.u32 %v1476_v15, %v1473_v59  ;;  %v1487_v5 = vor.u32 %v1486_v62, %v1482_v40  ;;  %1020 = vst [vmem:[#allocation2 + $0x50] sm:$0x1] %v1019_v2  ;;  %v762_v13 = vshll.u32 %v6674_v3, 16  ;;  %v400_v17 = vadd.f32 %v8161_v33, %v361_v50 }
  0x98   : > { %v767_v28 = vshrl.u32 %v6675_v7, 16  ;;  %v770_v32 = vshll.u32 %v6675_v7, 16  ;;  %v761_v34 = vrot.slane %v759_v14, 7  ;;  %v401_v37 = vadd.f32 %v8161_v33, %v362_v12 }
  0x99   : > { %v1478_v21 = vrot.slane %v1477_v4, 4  ;;  %v1488_v26 = vrot.slane %v1487_v5, 4  ;;  %v432_v39 = vmax.f32 %v400_v17, 0.0  ;;  %v6785_v41 = vunpack.c.h.bf16 %v6883_v60 }
  0x9a   : > { %v769_v38 = vrot.slane %v767_v28, 7  ;;  %v363_v44 = vmul.f32 %v8145_v11, %v6784_v16  ;;  %v764_v18 = vor.u32 %v762_v13, %v761_v34  ;;  %v765_v42 = vrot.slane %v761_v34, 4  ;;  %v493_v13 = vld [vmem:[#allocation2 + $0xb4] sm:$0x1]  ;;  %v1070_v34 = vld [vmem:[#allocation2 + $0xa8] sm:$0xf] }
  0x9b   : > { %v1483_v30 = vsel %vm7915_vm9, %v1478_v21, %v1482_v40  ;;  %v1493_v24 = vsel %vm7915_vm9, %v1488_v26, %v1492_v63  ;;  %v433_v50 = vmax.f32 %v401_v37, 0.0  ;;  %v6688_v59 = vpack.c.bf16 %v432_v39, %v432_v39 }
  0x9c   : > { %v6374_v45 = vcombine.low %v1483_v30, %v1493_v24  ;;  %v8312_v48 = vld [vmem:[#allocation2 + $0x48] sm:$0xf]  ;;  %v772_v35 = vor.u32 %v770_v32, %v769_v38  ;;  %v774_v55 = vrot.slane %v769_v38, 4  ;;  %v1022_v58 = vsel %vm7928_vm10, %v764_v18, %v1021_v20 }
  0x9d   : > { %v1303_v52 = vshrl.u32 %v8312_v48, 16  ;;  %v1306_v53 = vshll.u32 %v8312_v48, 16  ;;  %v8316_v56 = vld [vmem:[#allocation2 + $0x4c] sm:$0xf]  ;;  %v6689_v15 = vpack.c.bf16 %v433_v50, %v433_v50  ;;  %v364_v40 = vmul.f32 %v8145_v11, %v6785_v41  ;;  %1023 = vst [vmem:[#allocation2 + $0x54] sm:$0xf] %v1022_v58 }
  0x9e   : > { %7157 = vmatmul.mubr.bf16.gmra.mxu1 %v6374_v45  ;;  %v8318_v57 = vld [vmem:[#allocation2 + $0x50] sm:$0x1]  ;;  %v1312_v63 = vshll.u32 %v8316_v56, 16  ;;  %v1316_v1 = vshrl.u32 %v8316_v56, 16  ;;  %v773_v3 = vsel %vm7934_vm11, %v765_v42, %v772_v35  ;;  %v1026_v4 = vsel %vm7844_vm3, %v774_v55, %v1025_v19  ;;  %v549_v41 = vld [vmem:[#allocation2 + $0xbc] sm:$0x1] }
  0x9f   : > { %v1305_v62 = vrot.slane %v1303_v52, 4  ;;  %v1308_v60 = vrot.slane %v1306_v53, 5  ;;  %v1322_v2 = vshll.u32 %v8318_v57, 16  ;;  %v878_v5 = vshrl.u32 %v6688_v59, 16  ;;  %1024 = vst [vmem:[#allocation2 + $0x58] sm:$0xf] %v773_v3 }
  0xa0   : > { %v1314_v12 = vrot.slane %v1312_v63, 5  ;;  %v1318_v14 = vrot.slane %v1316_v1, 4  ;;  %1027 = vst [vmem:[#allocation2 + $0x5c] sm:$0x1] %v1026_v4  ;;  %v881_v11 = vshll.u32 %v6688_v59, 16  ;;  %v886_v21 = vshrl.u32 %v6689_v15, 16 }
  0xa1   : > { %v1309_v7 = vor.u32 %v1308_v60, %v1305_v62  ;;  %v1324_v17 = vrot.slane %v1322_v2, 5  ;;  %v880_v16 = vrot.slane %v878_v5, 7  ;;  %v889_v26 = vshll.u32 %v6689_v15, 16  ;;  %v1074_v42 = vld [vmem:[#allocation2 + $0xb0] sm:$0x1] }
  0xa2   : > { %v1319_v32 = vor.u32 %v1318_v14, %v1314_v12  ;;  %v402_v37 = vadd.f32 %v8161_v33, %v363_v44  ;;  %v403_v39 = vadd.f32 %v8161_v33, %v364_v40  ;;  %v888_v38 = vrot.slane %v886_v21, 7 }
  0xa3   : > { %v1310_v28 = vrot.slane %v1309_v7, 4  ;;  %v883_v30 = vor.u32 %v881_v11, %v880_v16  ;;  %v884_v24 = vrot.slane %v880_v16, 4  ;;  %v494_v20 = vsel %vm7844_vm3, 0, %v493_v13 }
  0xa4   : > { %v1320_v18 = vrot.slane %v1319_v32, 4  ;;  %v434_v50 = vmax.f32 %v402_v37, 0.0  ;;  %v435_v52 = vmax.f32 %v403_v39, 0.0  ;;  %495 = vst [vmem:[#allocation2 + $0xb4] sm:$0x1] %v494_v20  ;;  %v891_v44 = vor.u32 %v889_v26, %v888_v38 }
  0xa5   : > { %v1315_v45 = vsel %vm7915_vm9, %v1310_v28, %v1314_v12  ;;  %v8336_v53 = vld [vmem:[#allocation2 + $0x54] sm:$0xf]  ;;  %v893_v35 = vrot.slane %v888_v38, 4  ;;  %v1071_v33 = vsel %vm7928_vm10, %v883_v30, %v1070_v34  ;;  %v550_v55 = vsel %vm7852_vm4, 0, %v549_v41 }
  0xa6   : > { %v1325_v19 = vsel %vm7915_vm9, %v1320_v18, %v1324_v17  ;;  %v1327_v58 = vshrl.u32 %v8336_v53, 16  ;;  %v1330_v59 = vshll.u32 %v8336_v53, 16  ;;  %1072 = vst [vmem:[#allocation2 + $0xa8] sm:$0xf] %v1071_v33  ;;  %551 = vst [vmem:[#allocation2 + $0xbc] sm:$0x1] %v550_v55  ;;  %v6690_v15 = vpack.c.bf16 %v434_v50, %v434_v50 }
  0xa7   : > { %v6367_v40 = vcombine.low %v1315_v45, %v1325_v19  ;;  %v8346_v62 = vld [vmem:[#allocation2 + $0x58] sm:$0xf]  ;;  %v8348_v60 = vld [vmem:[#allocation2 + $0x5c] sm:$0x1]  ;;  %v892_v63 = vsel %vm7934_vm11, %v884_v24, %v891_v44  ;;  %v1075_v1 = vsel %vm7844_vm3, %v893_v35, %v1074_v42  ;;  %v6691_v2 = vpack.c.bf16 %v435_v52, %v435_v52  ;;  %v2136_v17 = vld [vmem:[#allocation2] sm:$0xe] }
  0xa8   : > { %v1329_v3 = vrot.slane %v1327_v58, 4  ;;  %v1332_v4 = vrot.slane %v1330_v59, 5  ;;  %v1336_v5 = vshll.u32 %v8346_v62, 16  ;;  %v1340_v7 = vshrl.u32 %v8346_v62, 16  ;;  %1073 = vst [vmem:[#allocation2 + $0xac] sm:$0xf] %v892_v63 }
  0xa9   : > { %1076 = vst [vmem:[#allocation2 + $0xb0] sm:$0x1] %v1075_v1  ;;  %7144 = vmatprep.mubr.bf16.mxu0 %v6367_v40  ;;  %v1346_v12 = vshll.u32 %v8348_v60, 16  ;;  %v895_v14 = vshrl.u32 %v6690_v15, 16  ;;  %v898_v11 = vshll.u32 %v6690_v15, 16  ;;  %v903_v13 = vshrl.u32 %v6691_v2, 16 }
  0xaa   : > { %v1333_v16 = vor.u32 %v1332_v4, %v1329_v3  ;;  %v1338_v21 = vrot.slane %v1336_v5, 5  ;;  %v1342_v26 = vrot.slane %v1340_v7, 4  ;;  %v906_v28 = vshll.u32 %v6691_v2, 16  ;;  %v8379_v63 = vld [vmem:[#allocation2 + $0x4] sm:$0xf] }
  0xab   : > { %v1348_v32 = vrot.slane %v1346_v12, 5  ;;  %v897_v34 = vrot.slane %v895_v14, 7  ;;  %v905_v37 = vrot.slane %v903_v13, 7  ;;  %v1077_v30 = vld [vmem:[#allocation2 + $0xb4] sm:$0xf]  ;;  %v6409_v24 = vrot.slane %v2136_v17, 9 }
  0xac   : > { %v1334_v39 = vrot.slane %v1333_v16, 4  ;;  %v1343_v41 = vor.u32 %v1342_v26, %v1338_v21  ;;  %v2189_v1 = vrot.slane %v8379_v63, 5  ;;  %v2137_v7 = vld [vmem:[#allocation2 + $0xc] sm:$0xe]  ;;  %v2138_v26 = vld [vmem:[#allocation2 + $0x18] sm:$0xe] }
  0xad   : > { %v8357_v38 = vld [vmem:[#allocation2 + $0xa8] sm:$0xf]  ;;  %v900_v20 = vor.u32 %v898_v11, %v897_v34  ;;  %v901_v45 = vrot.slane %v897_v34, 4  ;;  %v908_v18 = vor.u32 %v906_v28, %v905_v37  ;;  %v910_v42 = vrot.slane %v905_v37, 4  ;;  %v1081_v50 = vld [vmem:[#allocation2 + $0xbc] sm:$0x1] }
  0xae   : > { %v1339_v52 = vsel %vm7915_vm9, %v1334_v39, %v1338_v21  ;;  %v1344_v44 = vrot.slane %v1343_v41, 4  ;;  %v1495_v35 = vshrl.u32 %v8357_v38, 16  ;;  %v1498_v33 = vshll.u32 %v8357_v38, 16  ;;  %v7696_v28 = vld [vmem:[#allocation2 + $0x14] sm:$0x1] }
  0xaf   : > { %v8363_v55 = vld [vmem:[#allocation2 + $0xac] sm:$0xf]  ;;  %v909_v58 = vsel %vm7934_vm11, %v901_v45, %v908_v18  ;;  %v1078_v59 = vsel %vm7928_vm10, %v900_v20, %v1077_v30  ;;  %v1082_v15 = vsel %vm7844_vm3, %v910_v42, %v1081_v50  ;;  %v2190_v16 = vsel %vm8375_vm14, %v6409_v24, %v2189_v1  ;;  %v8389_v39 = vld [vmem:[#allocation2 + $0x10] sm:$0xf]  ;;  %v8392_v30 = vld [vmem:[#allocation2 + $0x68] sm:$0x1] }
  0xb0   : > { %v8365_v19 = vld [vmem:[#allocation2 + $0xb0] sm:$0x1]  ;;  %v1349_v2 = vsel %vm7915_vm9, %v1344_v44, %v1348_v32  ;;  %v1497_v3 = vrot.slane %v1495_v35, 4  ;;  %v1500_v4 = vrot.slane %v1498_v33, 5  ;;  %v1504_v5 = vshll.u32 %v8363_v55, 16 }
  0xb1   : > { %1079 = vst [vmem:[#allocation2 + $0xb4] sm:$0xf] %v1078_v59  ;;  %1080 = vst [vmem:[#allocation2 + $0xb8] sm:$0xf] %v909_v58  ;;  %v6368_v12 = vcombine.low %v1339_v52, %v1349_v2  ;;  %v1508_v14 = vshrl.u32 %v8363_v55, 16  ;;  %v1514_v11 = vshll.u32 %v8365_v19, 16 }
  0xb2   : > { %1083 = vst [vmem:[#allocation2 + $0xbc] sm:$0x1] %v1082_v15  ;;  %v1501_v13 = vor.u32 %v1500_v4, %v1497_v3  ;;  %v1506_v17 = vrot.slane %v1504_v5, 5  ;;  %v2191_v21 = vrot.slane %v2189_v1, 4  ;;  %v2199_v32 = vrot.slane %v7696_v28, 5 }
  0xb3   : > { %7145 = vmatmul.mubr.bf16.gmra.mxu0 %v6368_v12  ;;  %v1510_v34 = vrot.slane %v1508_v14, 4  ;;  %v6410_v37 = vrot.slane %v2137_v7, 9  ;;  %v2196_v41 = vrot.slane %v8389_v39, 5  ;;  %v2248_v20 = vrot.slane %v8392_v30, 5  ;;  %v2139_v42 = vld [vmem:[#allocation2 + $0x24] sm:$0xe] }
  0xb4   : > { %v1502_v45 = vrot.slane %v1501_v13, 4  ;;  %v1516_v18 = vrot.slane %v1514_v11, 5  ;;  %v2193_v24 = vsel %vm8375_vm14, %v2191_v21, %v2192_v61  ;;  %v6411_v35 = vrot.slane %v2138_v26, 9  ;;  %v8399_v33 = vld [vmem:[#allocation2] sm:$0xf] }
  0xb5   : > { %v1511_v50 = vor.u32 %v1510_v34, %v1506_v17  ;;  %v6425_v52 = vcombine.low %v2190_v16, %v2193_v24  ;;  %v2198_v44 = vrot.slane %v2196_v41, 4  ;;  %v6385_v58 = vcombine.low %v8399_v33, %v8379_v63  ;;  %v8405_v15 = vld [vmem:[#allocation2 + $0x1c] sm:$0xf]  ;;  %v7701_v1 = vld [vmem:[#allocation2 + $0x20] sm:$0x1]  ;;  %v7604_v34 = vld [vmem:[%s10470_s3 + $0xf0] sm:$0xff]  }
  0xb6   : > { %v2197_v59 = vsel %vm8375_vm14, %v6410_v37, %v2196_v41  ;;  %v2203_v54 = vrot.slane %v8405_v15, 5  ;;  %v2206_v2 = vrot.slane %v7701_v1, 5  ;;  %v1507_v61 = vsel %vm7915_vm9, %v1502_v45, %v1506_v17  ;;  %v2140_v37 = vld [vmem:[#allocation2 + $0x30] sm:$0xe]  ;;  %v7616_v33 = vld [vmem:[%s10470_s3 + $0xd8] sm:$0xff]  }
  0xb7   : > { %v1512_v3 = vrot.slane %v1511_v50, 4  ;;  %7228 = vmatprep.mubr.bf16.mxu0 %v6425_v52  ;;  %v2200_v7 = vsel %vm8375_vm14, %v2198_v44, %v2199_v32  ;;  %v6412_v12 = vrot.slane %v2139_v42, 9 }
  0xb8   : > { %v8410_v4 = vld [vmem:[#allocation2 + $0xb4] sm:$0xf]  ;;  %v8412_v5 = vld [vmem:[#allocation2 + $0xb8] sm:$0xf]  ;;  %v6426_v28 = vcombine.low %v2197_v59, %v2200_v7  ;;  %v2204_v32 = vsel %vm8375_vm14, %v6411_v35, %v2203_v54  ;;  %v2205_v44 = vrot.slane %v2203_v54, 4  ;;  %v6413_v7 = vrot.slane %v2140_v37, 9 }
  0xb9   : > { %10527 = vst [vmem:[#allocation8_spill] sm:$0xff] %v8410_v4  ;;  %10528 = vst [vmem:[#allocation9_spill] sm:$0xff] %v8412_v5  ;;  %v8416_v14 = vld [vmem:[#allocation2 + $0xbc] sm:$0x1]  ;;  %v1519_v11 = vshrl.u32 %v8410_v4, 16  ;;  %v1522_v13 = vshll.u32 %v8410_v4, 16  ;;  %v1517_v21 = vsel %vm7915_vm9, %v1512_v3, %v1516_v18 }
  0xba   : > { %v1528_v16 = vshll.u32 %v8412_v5, 16  ;;  %v1532_v17 = vshrl.u32 %v8412_v5, 16  ;;  %v1538_v26 = vshll.u32 %v8416_v14, 16  ;;  %v6375_v41 = vcombine.low %v1507_v61, %v1517_v21  ;;  %v8430_v18 = vld [vmem:[#allocation2 + $0x28] sm:$0xf]  ;;  %v7703_v35 = vld [vmem:[%s10470_s3 + $0xf8] sm:$0xff]  }
  0xbb   : > { %v1521_v45 = vrot.slane %v1519_v11, 4  ;;  %v1524_v24 = vrot.slane %v1522_v13, 5  ;;  %7229 = vmatmul.mubr.bf16.vlgmr.msra.gmra.mxu0 %v6426_v28  ;;  %v2210_v59 = vrot.slane %v8430_v18, 5  ;;  %v7704_v3 = vld [vmem:[#allocation2 + $0x2c] sm:$0x1]  ;;  %v2217_v11 = vrot.slane %v8197_v46, 5 }
  0xbc   : > { %v1530_v42 = vrot.slane %v1528_v16, 5  ;;  %v1534_v50 = vrot.slane %v1532_v17, 4  ;;  %v1540_v52 = vrot.slane %v1538_v26, 5  ;;  %7160 = vmatprep.mubr.bf16.mxu1 %v6375_v41  ;;  %7309 = vmatpush3.bf16.msra.mxu0 %v7703_v35  ;;  %v2213_v61 = vrot.slane %v7704_v3, 5  ;;  %v2141_v21 = vld [vmem:[#allocation2 + $0x3c] sm:$0xe] }
  0xbd   : > { %v1525_v1 = vor.u32 %v1524_v24, %v1521_v45  ;;  %v2207_v54 = vsel %vm8375_vm14, %v2205_v44, %v2206_v2  ;;  %v2211_v16 = vsel %vm8375_vm14, %v6412_v12, %v2210_v59  ;;  %v2212_v17 = vrot.slane %v2210_v59, 4  ;;  %7310 = vmatprep.subr.bf16.mxu0 %v7604_v34  ;;  %v7608_v26 = vld [vmem:[%s10470_s3 + $0xe8] sm:$0xff]  }
  0xbe   : > { %v1535_v13 = vor.u32 %v1534_v50, %v1530_v42  ;;  %v8444_v41 = vld [vmem:[#allocation2 + $0xc] sm:$0xf]  ;;  %v6427_v45 = vcombine.low %v2204_v32, %v2207_v54  ;;  %v2219_v24 = vrot.slane %v2217_v11, 4  ;;  %v2218_v12 = vsel %vm8375_vm14, %v6413_v7, %v2217_v11  ;;  %v2142_v32 = vld [vmem:[#allocation2 + $0x48] sm:$0xe] }
  0xbf   : > { %v1526_v28 = vrot.slane %v1525_v1, 4  ;;  %v6386_v37 = vcombine.low %v8444_v41, %v8389_v39  ;;  %v2214_v2 = vsel %vm8375_vm14, %v2212_v17, %v2213_v61  ;;  %v2220_v44 = vrot.slane %v8199_v49, 5  ;;  %v8458_v54 = vld [vmem:[#allocation2 + $0x18] sm:$0xf]  ;;  %v2143_v7 = vld [vmem:[#allocation2 + $0x54] sm:$0xe] }
  0xc0   : > { %v1536_v50 = vrot.slane %v1535_v13, 4  ;;  %7232 = vmatprep.mubr.bf16.mxu0 %v6427_v45  ;;  %v6428_v1 = vcombine.low %v2211_v16, %v2214_v2  ;;  %7311 = vmatpush3.bf16.msra.mxu0 %v7604_v34  ;;  %v6414_v35 = vrot.slane %v2141_v21, 9  ;;  %v2224_v3 = vrot.slane %v8218_v22, 5  ;;  %v8465_v11 = vld [vmem:[#allocation2 + $0x24] sm:$0xf] }
  0xc1   : > { %v1531_v59 = vsel %vm7915_vm9, %v1526_v28, %v1530_v42  ;;  %v6387_v61 = vcombine.low %v8458_v54, %v8405_v15  ;;  %v2221_v49 = vsel %vm8375_vm14, %v2219_v24, %v2220_v44  ;;  %v2227_v42 = vrot.slane %v8220_v36, 5  ;;  %7312 = vmatprep.subr.bf16.mxu0 %v7608_v26  ;;  %v7612_v21 = vld [vmem:[%s10470_s3 + $0xe0] sm:$0xff]   ;;  %v8562_v39 = vld [vmem:[#allocation2 + $0x78] sm:$0xf]  ;;  %v8621_v15 = vld [vmem:[#allocation2 + $0xc] sm:$0xf] }
  0xc2   : > { %v1541_v13 = vsel %vm7915_vm9, %v1536_v50, %v1540_v52  ;;  %v6388_v16 = vcombine.low %v8465_v11, %v8430_v18  ;;  %v6429_v17 = vcombine.low %v2218_v12, %v2221_v49  ;;  %v2226_v52 = vrot.slane %v2224_v3, 4  ;;  %v2144_v50 = vld [vmem:[#allocation2 + $0x60] sm:$0xe] }
  0xc3   : > { %v6376_v34 = vcombine.low %v1531_v59, %v1541_v13  ;;  %7233 = vmatmul.mubr.bf16.gmra.mxu0 %v6428_v1  ;;  %v2225_v28 = vsel %vm8375_vm14, %v6414_v35, %v2224_v3  ;;  %v6415_v45 = vrot.slane %v2142_v32, 9  ;;  %v2231_v36 = vrot.slane %v8316_v56, 5  ;;  %v2145_v1 = vld [vmem:[#allocation2 + $0x6c] sm:$0xe]  ;;  %v7710_v13 = vld [vmem:[#allocation2 + $0x74] sm:$0x1] }
  0xc4   : > { %v2234_v24 = vrot.slane %v8318_v57, 5  ;;  %7236 = vmatprep.mubr.bf16.mxu0 %v6429_v17  ;;  %v2228_v2 = vsel %vm8375_vm14, %v2226_v52, %v2227_v42  ;;  %v6416_v12 = vrot.slane %v2143_v7, 9  ;;  %v2238_v44 = vrot.slane %v8346_v62, 5  ;;  %7313 = vmatpush3.bf16.msra.mxu0 %v7608_v26  ;;  %v8491_v42 = vld [vmem:[#allocation2 + $0x64] sm:$0xf] }
  0xc5   : > { %7161 = vmatmul.mubr.bf16.gmra.mxu1 %v6376_v34  ;;  %v2241_v59 = vrot.slane %v8348_v60, 5  ;;  %v6389_v35 = vcombine.low %v8191_v43, %v8197_v46  ;;  %v2232_v3 = vsel %vm8375_vm14, %v6415_v45, %v2231_v36  ;;  %v2233_v32 = vrot.slane %v2231_v36, 4  ;;  %7314 = vmatprep.subr.bf16.mxu0 %v7612_v21  ;;  %v8499_v34 = vld [vmem:[#allocation2 + $0x70] sm:$0xf]  ;;  %v2146_v52 = vld [vmem:[#allocation2 + $0x78] sm:$0xe] }
  0xc6   : > { %7180 = vmatprep.mubr.bf16.mxu1 %v6385_v58  ;;  %v2240_v60 = vrot.slane %v2238_v44, 4  ;;  %v6417_v49 = vrot.slane %v2144_v50, 9  ;;  %v2245_v63 = vrot.slane %v8491_v42, 5  ;;  %v6430_v58 = vcombine.low %v2225_v28, %v2228_v2  ;;  %v8505_v45 = vld [vmem:[%s10470_s3 + $0x130] sm:$0xff]   ;;  %v2149_v2 = vld [vmem:[#allocation2 + $0x9c] sm:$0xe] }
  0xc7   : > { %v2235_v26 = vsel %vm8375_vm14, %v2233_v32, %v2234_v24  ;;  %v6418_v7 = vrot.slane %v2145_v1, 9  ;;  %v2252_v17 = vrot.slane %v8499_v34, 5  ;;  %v8509_v50 = vsel %vm8375_vm14, %v6416_v12, %v2238_v44  ;;  %v8527_v44 = vld [vmem:[#allocation2 + $0x60] sm:$0xf]  ;;  %v7614_v43 = vld [vmem:[%s10470_s3 + $0x118] sm:$0xff]  }
  0xc8   : > { %v6431_v36 = vcombine.low %v2232_v3, %v2235_v26  ;;  %v8513_v28 = vsel %vm8375_vm14, %v2240_v60, %v2241_v59  ;;  %v2247_v24 = vrot.slane %v2245_v63, 4  ;;  %7315 = vmatpush3.bf16.msra.mxu0 %v7612_v21  ;;  %v8519_v1 = vsel %vm8375_vm14, %v6417_v49, %v2245_v63  ;;  %v2147_v26 = vld [vmem:[#allocation2 + $0x84] sm:$0xe]  ;;  %v8531_v60 = vld [vmem:[#allocation2 + $0x7c] sm:$0xf] }
  0xc9   : > { %v2254_v32 = vrot.slane %v2252_v17, 4  ;;  %v2255_v3 = vrot.slane %v7710_v13, 5  ;;  %7316 = vmatprep.subr.bf16.mxu0 %v7616_v33  ;;  %v6419_v21 = vrot.slane %v2146_v52, 9  ;;  %v2259_v49 = vrot.slane %v8531_v60, 5  ;;  %v2148_v63 = vld [vmem:[#allocation2 + $0x90] sm:$0xe] }
  0xca   : > { %v8525_v12 = vsel %vm8375_vm14, %v2247_v24, %v2248_v20  ;;  %v6432_v30 = vcombine.low %v8509_v50, %v8513_v28  ;;  %v8538_v20 = vsel %vm8375_vm14, %v6418_v7, %v2252_v17  ;;  %v7713_v24 = vld [vmem:[#allocation2 + $0x80] sm:$0x1]  ;;  %v7620_v52 = vld [vmem:[%s10470_s3 + $0xd0] sm:$0xff]   ;;  %v8552_v7 = vld [vmem:[#allocation2 + $0x6c] sm:$0xf]  ;;  %v6420_v28 = vrot.slane %v2147_v26, 9 }
  0xcb   : > { %7237 = vmatmul.mubr.bf16.gmra.mxu0 %v6430_v58  ;;  %v8542_v13 = vsel %vm8375_vm14, %v2254_v32, %v2255_v3  ;;  %v2262_v59 = vrot.slane %v7713_v24, 5  ;;  %v6433_v58 = vcombine.low %v8519_v1, %v8525_v12  ;;  %v2261_v50 = vrot.slane %v2259_v49, 4  ;;  %v7715_v32 = vld [vmem:[%s10470_s3 + $0x138] sm:$0xff]   ;;  %v7718_v1 = vld [vmem:[#allocation2 + $0x8c] sm:$0x1] }
  0xcc   : > { %7240 = vmatprep.mubr.bf16.mxu0 %v6431_v36  ;;  %v2269_v3 = vrot.slane %v7718_v1, 5  ;;  %v6421_v26 = vrot.slane %v2148_v63, 9  ;;  %v7606_v12 = vld [vmem:[%s10470_s3 + $0x128] sm:$0xff]   ;;  %7317 = vmatpush3.bf16.msra.mxu0 %v7616_v33  ;;  %v8577_v54 = vsel %vm8375_vm14, %v6419_v21, %v2259_v49  ;;  %v2276_v24 = vrot.slane %v8256_v29, 5  ;;  %v8585_v1 = vld [vmem:[#allocation2 + $0x84] sm:$0xf] }
  0xcd   : > { %7181 = vmatmul.mubr.bf16.vlgmr.msra.gmra.mxu1 %v6386_v37  ;;  %v8566_v37 = vld [vmem:[#allocation2 + $0x88] sm:$0xf]  ;;  %v8583_v63 = vsel %vm8375_vm14, %v2261_v50, %v2262_v59  ;;  %7318 = vmatprep.subr.bf16.mxu0 %v7620_v52  ;;  %v6422_v33 = vrot.slane %v2149_v2, 9  ;;  %v2280_v59 = vrot.slane %v8287_v31, 5  ;;  %v2283_v50 = vrot.slane %v8290_v51, 5  ;;  %v7610_v2 = vld [vmem:[%s10470_s3 + $0x120] sm:$0xff]  }
  0xce   : > { %7261 = vmatpush3.bf16.msra.mxu1 %v7715_v32  ;;  %7184 = vmatprep.mubr.bf16.mxu1 %v6387_v61  ;;  %v2266_v36 = vrot.slane %v8566_v37, 5  ;;  %v2273_v61 = vrot.slane %v8248_v9, 5  ;;  %v7624_v21 = vld [vmem:[%s10470_s3 + $0xc8] sm:$0xff]  }
  0xcf   : > { %7262 = vmatprep.subr.bf16.mxu1 %v8505_v45  ;;  %v2150_v49 = vld [vmem:[#allocation2 + $0xa8] sm:$0xe] }
  0xd0   : > { %v2268_v32 = vrot.slane %v2266_v36, 4  ;;  %v8594_v29 = vsel %vm8375_vm14, %v6420_v28, %v2266_v36  ;;  %v2275_v17 = vrot.slane %v2273_v61, 4  ;;  %v8608_v57 = vsel %vm8375_vm14, %v6421_v26, %v2273_v61  ;;  %7319 = vmatpush3.bf16.msra.mxu0 %v7620_v52  ;;  %v8686_v61 = vld [vmem:[#allocation2 + $0x24] sm:$0xf] }
  0xd1   : > { %v2287_v36 = vrot.slane %v8363_v55, 5  ;;  %v6435_v26 = vcombine.low %v8577_v54, %v8583_v63  ;;  %7320 = vmatprep.subr.bf16.mxu0 %v7624_v21 }
  0xd2   : > { %7263 = vmatpush3.bf16.msra.mxu1 %v8505_v45  ;;  %v8604_v41 = vsel %vm8375_vm14, %v2268_v32, %v2269_v3  ;;  %v8615_v51 = vsel %vm8375_vm14, %v2275_v17, %v2276_v24  ;;  %v8619_v45 = vsel %vm8375_vm14, %v6422_v33, %v2280_v59  ;;  %v2282_v3 = vrot.slane %v2280_v59, 4  ;;  %v7628_v24 = vld [vmem:[%s10470_s3 + $0xc0] sm:$0xff]   ;;  %v8644_v33 = vld [vmem:[#allocation2 + $0x10] sm:$0xf] }
  0xd3   : > { %7264 = vmatprep.subr.bf16.mxu1 %v7606_v12  ;;  %v6423_v32 = vrot.slane %v2150_v49, 9  ;;  %7241 = vmatmul.mubr.bf16.gmra.mxu0 %v6432_v30  ;;  %v2289_v52 = vrot.slane %v2287_v36, 4  ;;  %v2290_v17 = vrot.slane %v8365_v19, 5  ;;  %v8642_v19 = vld [vmem:[#allocation2 + $0xb4] sm:$0xe]  ;;  %v2717_v59 = vshrl.u32 %v8621_v15, 16 }
  0xd4   : > { %7244 = vmatprep.mubr.bf16.mxu0 %v6433_v58  ;;  %v8638_v54 = vsel %vm8375_vm14, %v2282_v3, %v2283_v50  ;;  %v8655_v58 = vld [vmem:[#allocation2 + $0x14] sm:$0x1]  ;;  %v8657_v49 = vld [vmem:[#allocation2 + $0x18] sm:$0xf]  ;;  %7321 = vmatpush3.bf16.msra.mxu0 %v7624_v21  ;;  %v8672_v50 = vld [vmem:[#allocation2 + $0x1c] sm:$0xf] }
  0xd5   : > { %7185 = vmatmul.mubr.bf16.gmra.mxu1 %v6388_v16  ;;  %10529 = vst [vmem:[#allocation10_spill] sm:$0xff] %v8655_v58  ;;  %v8664_v46 = vsel %vm8375_vm14, %v6423_v32, %v2287_v36  ;;  %v6424_v3 = vrot.slane %v8642_v19, 9  ;;  %7322 = vmatprep.subr.bf16.mxu0 %v7628_v24  ;;  %v2720_v16 = vshll.u32 %v8621_v15, 16  ;;  %v2730_v21 = vshrl.u32 %v8644_v33, 16  ;;  %v2701_v32 = vld [vmem:[#allocation2 + $0x20] sm:$0x1] }
  0xd6   : > { %7188 = vmatprep.mubr.bf16.mxu1 %v6389_v35  ;;  %7265 = vmatpush3.bf16.msra.mxu1 %v7606_v12  ;;  %v8668_v35 = vsel %vm8375_vm14, %v2289_v52, %v2290_v17  ;;  %v2294_v12 = vrot.slane %v8412_v5, 5  ;;  %v2726_v36 = vshll.u32 %v8644_v33, 16  ;;  %v8681_v52 = vld [vmem:[%s10470_s3 + $0x1f8] sm:$0xff]   ;;  %v2297_v17 = vrot.slane %v8416_v14, 5 }
  0xd7   : > { %7266 = vmatprep.subr.bf16.mxu1 %v7610_v2  ;;  %v2719_v63 = vrot.slane %v2717_v59, 4  ;;  %v2736_v28 = vshll.u32 %v8655_v58, 16  ;;  %v2741_v19 = vshrl.u32 %v8657_v49, 16  ;;  %v2722_v18 = vrot.slane %v2720_v16, 5 }
  0xd8   : > { %v2728_v30 = vrot.slane %v2726_v36, 5  ;;  %v2732_v27 = vrot.slane %v2730_v21, 4  ;;  %v2296_v14 = vrot.slane %v2294_v12, 4  ;;  %7323 = vmatpush3.bf16.msra.mxu0 %v7628_v24  ;;  %v2744_v58 = vshll.u32 %v8657_v49, 16 }
  0xd9   : > { %v2743_v59 = vrot.slane %v2741_v19, 4  ;;  %v2754_v10 = vshrl.u32 %v8672_v50, 16  ;;  %v2723_v11 = vor.u32 %v2722_v18, %v2719_v63  ;;  %v2738_v36 = vrot.slane %v2736_v28, 5  ;;  %7404 = vmatprep.subr.bf16.mxu0 %v8681_v52 }
  0xda   : > { %7267 = vmatpush3.bf16.msra.mxu1 %v7610_v2  ;;  %v10530_v2 = vcombine.low %v8538_v20, %v8542_v13  ;;  %v2733_v16 = vor.u32 %v2732_v27, %v2728_v30  ;;  %v2750_v21 = vshll.u32 %v8672_v50, 16  ;;  %v10531_v24 = vcombine.low %v8214_v25, %v8218_v22  ;;  %v7622_v25 = vld [vmem:[%s10470_s3 + $0x108] sm:$0xff]  }
  0xdb   : > { %7268 = vmatprep.subr.bf16.mxu1 %v7614_v43  ;;  %v2746_v19 = vrot.slane %v2744_v58, 5  ;;  %v2756_v5 = vrot.slane %v2754_v10, 4  ;;  %v2760_v4 = vshll.u32 %v2701_v32, 16  ;;  %v2765_v20 = vshrl.u32 %v8686_v61, 16  ;;  %v8727_v32 = vld [vmem:[#allocation2 + $0x30] sm:$0xf] }
  0xdc   : > { %7245 = vmatmul.mubr.bf16.gmra.mxu0 %v10530_v2  ;;  %v10532_v27 = vcombine.low %v8312_v48, %v8316_v56  ;;  %v2724_v13 = vrot.slane %v2723_v11, 4  ;;  %v2734_v28 = vrot.slane %v2733_v16, 4  ;;  %v8709_v63 = vrot.slane %v2750_v21, 5  ;;  %v2702_v2 = vld [vmem:[#allocation2 + $0x2c] sm:$0x1] }
  0xdd   : > { %7189 = vmatmul.mubr.bf16.gmra.mxu1 %v10531_v24  ;;  %7248 = vmatprep.mubr.bf16.mxu0 %v6435_v26  ;;  %v2768_v18 = vshll.u32 %v8686_v61, 16  ;;  %v8717_v10 = vsel %vm8375_vm14, %v6424_v3, %v2294_v12  ;;  %v2747_v22 = vor.u32 %v2746_v19, %v2743_v59  ;;  %v2767_v26 = vrot.slane %v2765_v20, 4 }
  0xde   : > { %7192 = vmatprep.mubr.bf16.mxu1 %v10532_v27  ;;  %7269 = vmatpush3.bf16.msra.mxu1 %v7614_v43  ;;  %v2778_v48 = vshrl.u32 %v8700_v6, 16  ;;  %v8722_v56 = vsel %vm8375_vm14, %v2296_v14, %v2297_v17  ;;  %v6473_v11 = vcombine.low %v8621_v15, %v8644_v33  ;;  %v2757_v58 = vor.u32 %v2756_v5, %v8709_v63  ;;  %v8734_v17 = vld [vmem:[#allocation2 + $0x34] sm:$0xf] }
  0xdf   : > { %7270 = vmatprep.subr.bf16.mxu1 %v7618_v23  ;;  %v2770_v43 = vrot.slane %v2768_v18, 5  ;;  %v2729_v12 = vsel %vm7915_vm9, %v2724_v13, %v2728_v30  ;;  %v2739_v3 = vsel %vm7915_vm9, %v2734_v28, %v2738_v36  ;;  %v2762_v59 = vrot.slane %v2760_v4, 5  ;;  %v7626_v30 = vld [vmem:[%s10470_s3 + $0x100] sm:$0xff]  }
  0xe0   : > { %v2774_v16 = vshll.u32 %v8700_v6, 16  ;;  %v2748_v14 = vrot.slane %v2747_v22, 4  ;;  %v2758_v21 = vrot.slane %v2757_v58, 4  ;;  %v2780_v5 = vrot.slane %v2778_v48, 4  ;;  %v2703_v22 = vld [vmem:[#allocation2 + $0x38] sm:$0x1] }
  0xe1   : > { %v2771_v24 = vor.u32 %v2770_v43, %v2767_v26  ;;  %v6440_v19 = vcombine.low %v8717_v10, %v8722_v56  ;;  %v2789_v4 = vshrl.u32 %v8727_v32, 16  ;;  %v2792_v20 = vshll.u32 %v8727_v32, 16  ;;  %v8753_v26 = vld [vmem:[#allocation2 + $0x3c] sm:$0xf] }
  0xe2   : > { %7271 = vmatpush3.bf16.msra.mxu1 %v7618_v23  ;;  %v8741_v36 = vrot.slane %v2774_v16, 5  ;;  %v10533_v23 = vcombine.low %v8594_v29, %v8604_v41  ;;  %v8748_v27 = vcombine.low %v2729_v12, %v2739_v3  ;;  %v6474_v13 = vcombine.low %v8657_v49, %v8672_v50  ;;  %v8764_v41 = vld [vmem:[%s10470_s3 + $0x178] sm:$0xff]  }
  0xe3   : > { %7272 = vmatprep.subr.bf16.mxu1 %v7622_v25  ;;  %v2784_v28 = vshll.u32 %v2702_v2, 16  ;;  %v2802_v18 = vshrl.u32 %v8734_v17, 16  ;;  %v10534_v48 = vcombine.low %v8336_v53, %v8346_v62  ;;  %v10535_v58 = vcombine.low %v8608_v57, %v8615_v51  ;;  %v8769_v2 = vld [vmem:[#allocation2 + $0x40] sm:$0xf] }
  0xe4   : > { %7249 = vmatmul.mubr.bf16.gmra.mxu0 %v10533_v23  ;;  %v8766_v29 = vrot.slane %v2771_v24, 4  ;;  %v2781_v43 = vor.u32 %v2780_v5, %v8741_v36  ;;  %v2791_v12 = vrot.slane %v2789_v4, 4  ;;  %v2794_v3 = vrot.slane %v2792_v20, 5 }
  0xe5   : > { %7193 = vmatmul.mubr.bf16.gmra.mxu1 %v10534_v48  ;;  %7252 = vmatprep.mubr.bf16.mxu0 %v10535_v58  ;;  %v10536_v53 = vcombine.low %v8527_v44, %v8491_v42  ;;  %v2753_v62 = vsel %vm7915_vm9, %v2748_v14, %v8709_v63  ;;  %v2763_v57 = vsel %vm7915_vm9, %v2758_v21, %v2762_v59  ;;  %v2798_v51 = vshll.u32 %v8734_v17, 16  ;;  %v2704_v44 = vld [vmem:[#allocation2 + $0x44] sm:$0x1] }
  0xe6   : > { %7273 = vmatpush3.bf16.msra.mxu1 %v7622_v25  ;;  %v2804_v16 = vrot.slane %v2802_v18, 4  ;;  %v6475_v24 = vcombine.low %v8686_v61, %v8700_v6  ;;  %v2795_v5 = vor.u32 %v2794_v3, %v2791_v12  ;;  %v2808_v4 = vshll.u32 %v2703_v22, 16  ;;  %v8783_v25 = vld [vmem:[#allocation2 + $0x48] sm:$0xf]  ;;  %v8794_v3 = vld [vmem:[#allocation2 + $0x4c] sm:$0xf] }
  0xe7   : > { %7196 = vmatprep.mubr.bf16.mxu1 %v10536_v53  ;;  %7274 = vmatprep.subr.bf16.mxu1 %v7626_v30  ;;  %v2813_v42 = vshrl.u32 %v8753_v26, 16  ;;  %v2786_v20 = vrot.slane %v2784_v28, 5  ;;  %v2800_v23 = vrot.slane %v2798_v51, 5  ;;  %v2816_v63 = vshll.u32 %v8753_v26, 16  ;;  %v8924_v6 = vld [vmem:[#allocation2 + $0x84] sm:$0xf] }
  0xe8   : > { %v2826_v59 = vshrl.u32 %v8769_v2, 16  ;;  %v8787_v14 = vcombine.low %v2753_v62, %v2763_v57  ;;  %v2777_v21 = vsel %vm7915_vm9, %v8766_v29, %v8741_v36  ;;  %v2782_v18 = vrot.slane %v2781_v43, 4 }
  0xe9   : > { %v2815_v22 = vrot.slane %v2813_v42, 4  ;;  %v2796_v48 = vrot.slane %v2795_v5, 4  ;;  %v2805_v58 = vor.u32 %v2804_v16, %v2800_v23  ;;  %v2818_v12 = vrot.slane %v2816_v63, 5  ;;  %v2705_v63 = vld [vmem:[#allocation2 + $0x50] sm:$0x1] }
  0xea   : > { %7275 = vmatpush3.bf16.msra.mxu1 %v7626_v30  ;;  %v2822_v28 = vshll.u32 %v8769_v2, 16  ;;  %v2810_v53 = vrot.slane %v2808_v4, 5  ;;  %v2828_v62 = vrot.slane %v2826_v59, 4  ;;  %v2832_v57 = vshll.u32 %v2704_v44, 16  ;;  %v8817_v59 = vld [vmem:[#allocation2 + $0x54] sm:$0xf] }
  0xeb   : > { %7356 = vmatprep.subr.bf16.mxu1 %v8764_v41  ;;  %v2837_v51 = vshrl.u32 %v8783_v25, 16  ;;  %v10537_v36 = vcombine.low %v8619_v45, %v8638_v54  ;;  %v2806_v29 = vrot.slane %v2805_v58, 4  ;;  %v2819_v30 = vor.u32 %v2818_v12, %v2815_v22 }
  0xec   : > { %v8801_v43 = vrot.slane %v2822_v28, 5  ;;  %v2840_v16 = vshll.u32 %v8783_v25, 16  ;;  %v10538_v5 = vcombine.low %v8552_v7, %v8499_v34  ;;  %v10539_v4 = vcombine.low %v8664_v46, %v8668_v35 }
  0xed   : > { %7253 = vmatmul.mubr.bf16.gmra.mxu0 %v10537_v36  ;;  %v2787_v42 = vsel %vm7915_vm9, %v2782_v18, %v2786_v20  ;;  %v6476_v45 = vcombine.low %v8727_v32, %v8734_v17  ;;  %v6477_v54 = vcombine.low %v8753_v26, %v8769_v2  ;;  %v2850_v44 = vshrl.u32 %v8794_v3, 16  ;;  %v8825_v18 = vld [vmem:[#allocation2 + $0x58] sm:$0xf]  ;;  %v2706_v36 = vld [vmem:[#allocation2 + $0x5c] sm:$0x1] }
  0xee   : > { %7197 = vmatmul.mubr.bf16.gmra.mxu1 %v10538_v5  ;;  %7256 = vmatprep.mubr.bf16.mxu0 %v10539_v4  ;;  %v10540_v34 = vcombine.low %v8562_v39, %v8531_v60  ;;  %v2801_v7 = vsel %vm7915_vm9, %v2796_v48, %v2800_v23  ;;  %v2829_v46 = vor.u32 %v2828_v62, %v8801_v43  ;;  %v2839_v35 = vrot.slane %v2837_v51, 4  ;;  %v8830_v5 = vld [vmem:[#allocation2 + $0x60] sm:$0xf]  ;;  %v7648_v2 = vld [vmem:[%s10470_s3 + $0x1d8] sm:$0xff]  }
  0xef   : > { %v2842_v20 = vrot.slane %v2840_v16, 5  ;;  %v2811_v22 = vsel %vm7915_vm9, %v2806_v29, %v2810_v53  ;;  %v2820_v58 = vrot.slane %v2819_v30, 4  ;;  %v2846_v12 = vshll.u32 %v8794_v3, 16 }
  0xf0   : > { %7200 = vmatprep.mubr.bf16.mxu1 %v10540_v34  ;;  %v2852_v28 = vrot.slane %v2850_v44, 4  ;;  %v8832_v60 = vcombine.low %v2777_v21, %v2787_v42  ;;  %v2834_v39 = vrot.slane %v2832_v57, 5  ;;  %v2856_v23 = vshll.u32 %v2705_v63, 16  ;;  %v8848_v34 = vld [vmem:[#allocation2 + $0x64] sm:$0xf] }
  0xf1   : > { %v2861_v48 = vshrl.u32 %v8817_v59, 16  ;;  %v2830_v62 = vrot.slane %v2829_v46, 4  ;;  %v8835_v51 = vrot.slane %v2846_v12, 5  ;;  %v2864_v16 = vshll.u32 %v8817_v59, 16  ;;  %v8865_v12 = vld [vmem:[#allocation2 + $0x6c] sm:$0xf] }
  0xf2   : > { %v2874_v53 = vshrl.u32 %v8825_v18, 16  ;;  %v8839_v29 = vcombine.low %v2801_v7, %v2811_v22  ;;  %v6478_v30 = vcombine.low %v8783_v25, %v8794_v3  ;;  %v2843_v4 = vor.u32 %v2842_v20, %v2839_v35 }
  0xf3   : > { %v2863_v44 = vrot.slane %v2861_v48, 4  ;;  %v2825_v21 = vsel %vm7915_vm9, %v2820_v58, %v8801_v43  ;;  %v2853_v57 = vor.u32 %v2852_v28, %v8835_v51  ;;  %v2866_v42 = vrot.slane %v2864_v16, 5 }
  0xf4   : > { %v2870_v63 = vshll.u32 %v8825_v18, 16  ;;  %v8853_v7 = vrot.slane %v2856_v23, 5  ;;  %v2876_v46 = vrot.slane %v2874_v53, 4  ;;  %v2880_v35 = vshll.u32 %v2706_v36, 16  ;;  %v8873_v36 = vld [vmem:[#allocation2 + $0x70] sm:$0xf] }
  0xf5   : > { %7257 = vmatmul.mubr.bf16.gmra.mxu0 %v6440_v19  ;;  %v2885_v20 = vshrl.u32 %v8830_v5, 16  ;;  %v10541_v43 = vcombine.low %v8585_v1, %v8566_v37  ;;  %v2835_v22 = vsel %vm7915_vm9, %v2830_v62, %v2834_v39  ;;  %v2867_v58 = vor.u32 %v2866_v42, %v2863_v44  ;;  %v2707_v19 = vld [vmem:[#allocation2 + $0x68] sm:$0x1] }
  0xf6   : > { %7324 = vmatprep.mubr.bf16.mxu0 %v6473_v11  ;;  %v2872_v10 = vrot.slane %v2870_v63, 5  ;;  %v2888_v56 = vshll.u32 %v8830_v5, 16  ;;  %v10542_v28 = vcombine.low %v8246_v8, %v8248_v9  ;;  %v2844_v37 = vrot.slane %v2843_v4, 4  ;;  %v8876_v8 = vld [vmem:[#allocation2 + $0x78] sm:$0xf] }
  0xf7   : > { %7201 = vmatmul.mubr.bf16.gmra.mxu1 %v10541_v43  ;;  %v6479_v1 = vcombine.low %v8817_v59, %v8825_v18  ;;  %v2887_v15 = vrot.slane %v2885_v20, 4  ;;  %v2898_v11 = vshrl.u32 %v8848_v34, 16  ;;  %v2854_v39 = vrot.slane %v2853_v57, 4  ;;  %v7636_v57 = vld [vmem:[%s10470_s3 + $0x1f0] sm:$0xff]   ;;  %v2712_v18 = vld [vmem:[#allocation2 + $0xa4] sm:$0x1] }
  0xf8   : > { %7204 = vmatprep.mubr.bf16.mxu1 %v10542_v28  ;;  %v2877_v23 = vor.u32 %v2876_v46, %v2872_v10  ;;  %v2882_v48 = vrot.slane %v2880_v35, 5  ;;  %v2890_v62 = vrot.slane %v2888_v56, 5  ;;  %v2868_v16 = vrot.slane %v2867_v58, 4  ;;  %v8889_v56 = vld [vmem:[#allocation2 + $0x7c] sm:$0xf] }
  0xf9   : > { %v2894_v53 = vshll.u32 %v8848_v34, 16  ;;  %v2900_v44 = vrot.slane %v2898_v11, 4  ;;  %v2904_v42 = vshll.u32 %v2707_v19, 16  ;;  %v8878_v9 = vcombine.low %v2825_v21, %v2835_v22 }
  0xfa   : > { %v2878_v4 = vrot.slane %v2877_v23, 4  ;;  %v2891_v63 = vor.u32 %v2890_v62, %v2887_v15  ;;  %v2909_v20 = vshrl.u32 %v8865_v12, 16  ;;  %v2849_v46 = vsel %vm7915_vm9, %v2844_v37, %v8835_v51  ;;  %v2708_v15 = vld [vmem:[#allocation2 + $0x74] sm:$0x1] }
  0xfb   : > { %v2896_v35 = vrot.slane %v2894_v53, 5  ;;  %v2912_v43 = vshll.u32 %v8865_v12, 16  ;;  %v2922_v58 = vshrl.u32 %v8873_v36, 16  ;;  %v2859_v21 = vsel %vm7915_vm9, %v2854_v39, %v8853_v7 }
  0xfc   : > { %v6480_v22 = vcombine.low %v8830_v5, %v8848_v34  ;;  %v2906_v19 = vrot.slane %v2904_v42, 5  ;;  %v2911_v28 = vrot.slane %v2909_v20, 4  ;;  %v2873_v51 = vsel %vm7915_vm9, %v2868_v16, %v2872_v10 }
  0xfd   : > { %7325 = vmatmul.mubr.bf16.vlgmr.msra.gmra.mxu0 %v6474_v13  ;;  %v2901_v37 = vor.u32 %v2900_v44, %v2896_v35  ;;  %v2914_v11 = vrot.slane %v2912_v43, 5  ;;  %v2918_v23 = vshll.u32 %v8873_v36, 16  ;;  %v10543_v7 = vcombine.low %v8285_v47, %v8287_v31  ;;  %v7640_v47 = vld [vmem:[%s10470_s3 + $0x1e8] sm:$0xff]  }
  0xfe   : > { %7405 = vmatpush3.bf16.msra.mxu0 %v8681_v52  ;;  %v2883_v39 = vsel %vm7915_vm9, %v2878_v4, %v2882_v48  ;;  %v2892_v62 = vrot.slane %v2891_v63, 4  ;;  %v2924_v53 = vrot.slane %v2922_v58, 4  ;;  %v2933_v49 = vshrl.u32 %v8876_v8, 16  ;;  %7328 = vmatprep.mubr.bf16.mxu0 %v6475_v24  ;;  %v2709_v48 = vld [vmem:[#allocation2 + $0x80] sm:$0x1] }
  0xff   : > { %7205 = vmatmul.mubr.bf16.gmra.mxu1 %v10543_v7  ;;  %v10544_v50 = vcombine.low %v8357_v38, %v8363_v55  ;;  %v2902_v31 = vrot.slane %v2901_v37, 4  ;;  %v2915_v52 = vor.u32 %v2914_v11, %v2911_v28  ;;  %v8918_v13 = vrot.slane %v2918_v23, 5  ;;  %7406 = vmatprep.subr.bf16.mxu0 %v7636_v57  ;;  %v8931_v63 = vld [vmem:[#allocation2 + $0x88] sm:$0xf] }
 0x100   : > { %v2936_v10 = vshll.u32 %v8876_v8, 16  ;;  %v8921_v16 = vcombine.low %v2849_v46, %v2859_v21  ;;  %v2928_v38 = vshll.u32 %v2708_v15, 16  ;;  %v2935_v55 = vrot.slane %v2933_v49, 4  ;;  %v7644_v21 = vld [vmem:[%s10470_s3 + $0x1e0] sm:$0xff]   ;;  %v2710_v49 = vld [vmem:[#allocation2 + $0x8c] sm:$0x1] }
 0x101   : > { %7208 = vmatprep.mubr.bf16.mxu1 %v10544_v50  ;;  %v2946_v44 = vshrl.u32 %v8889_v56, 16  ;;  %v8926_v61 = vcombine.low %v2873_v51, %v2883_v39  ;;  %v6481_v24 = vcombine.low %v8865_v12, %v8873_v36  ;;  %v2925_v42 = vor.u32 %v2924_v53, %v8918_v13  ;;  %v10545_v50 = vld [vmem:[#allocation8_spill] sm:$0xff] }
 0x102   : > { %v2938_v4 = vrot.slane %v2936_v10, 5  ;;  %7407 = vmatpush3.bf16.msra.mxu0 %v7636_v57  ;;  %v2897_v20 = vsel %vm7915_vm9, %v2892_v62, %v2896_v35  ;;  %v2907_v46 = vsel %vm7915_vm9, %v2902_v31, %v2906_v19  ;;  %v2942_v43 = vshll.u32 %v8889_v56, 16  ;;  %v8944_v19 = vld [vmem:[#allocation2 + $0x90] sm:$0xf]  ;;  %v10546_v31 = vld [vmem:[#allocation9_spill] sm:$0xff] }
 0x103   : > { %v2948_v58 = vrot.slane %v2946_v44, 4  ;;  %7408 = vmatprep.subr.bf16.mxu0 %v7640_v47  ;;  %v2916_v28 = vrot.slane %v2915_v52, 4  ;;  %v2952_v51 = vshll.u32 %v2709_v48, 16  ;;  %v2957_v37 = vshrl.u32 %v8924_v6, 16 }
 0x104   : > { %v2939_v15 = vor.u32 %v2938_v4, %v2935_v55  ;;  %v2930_v57 = vrot.slane %v2928_v38, 5  ;;  %v2944_v11 = vrot.slane %v2942_v43, 5  ;;  %v2960_v35 = vshll.u32 %v8924_v6, 16 }
 0x105   : > { %v2970_v23 = vshrl.u32 %v8931_v63, 16  ;;  %7329 = vmatmul.mubr.bf16.gmra.mxu0 %v6476_v45  ;;  %v8949_v7 = vcombine.low %v2897_v20, %v2907_v46  ;;  %v2926_v39 = vrot.slane %v2925_v42, 4  ;;  %v6482_v62 = vcombine.low %v8876_v8, %v8889_v56  ;;  %v8960_v45 = vld [vmem:[#allocation2 + $0x94] sm:$0xf] }
 0x106   : > { %v2959_v53 = vrot.slane %v2957_v37, 4  ;;  %v10547_v52 = vcombine.low %v10545_v50, %v10546_v31  ;;  %7332 = vmatprep.mubr.bf16.mxu0 %v6477_v54  ;;  %v2940_v10 = vrot.slane %v2939_v15, 4  ;;  %v2949_v48 = vor.u32 %v2948_v58, %v2944_v11  ;;  %7409 = vmatpush3.bf16.msra.mxu0 %v7640_v47  ;;  %v2711_v47 = vld [vmem:[#allocation2 + $0x98] sm:$0x1]  ;;  %v8976_v58 = vld [vmem:[#allocation2 + $0x9c] sm:$0xf] }
 0x107   : > { %v2962_v32 = vrot.slane %v2960_v35, 5  ;;  %v2966_v17 = vshll.u32 %v8931_v63, 16  ;;  %v2921_v38 = vsel %vm7915_vm9, %v2916_v28, %v8918_v13  ;;  %v2954_v55 = vrot.slane %v2952_v51, 5  ;;  %7410 = vmatprep.subr.bf16.mxu0 %v7644_v21  ;;  %v8983_v35 = vld [vmem:[#allocation2 + $0xa0] sm:$0xf] }
 0x108   : > { %7209 = vmatmul.mubr.bf16.gmra.mxu1 %v10547_v52  ;;  %v2972_v44 = vrot.slane %v2970_v23, 4  ;;  %v2981_v42 = vshrl.u32 %v8944_v19, 16  ;;  %v2950_v26 = vrot.slane %v2949_v48, 4  ;;  %v2931_v20 = vsel %vm7915_vm9, %v2926_v39, %v2930_v57 }
 0x109   : > { %7276 = vmatprep.mubr.bf16.mxu1 %v8748_v27  ;;  %v2963_v54 = vor.u32 %v2962_v32, %v2959_v53  ;;  %v8970_v4 = vrot.slane %v2966_v17, 5  ;;  %v2984_v27 = vshll.u32 %v8944_v19, 16  ;;  %v2976_v13 = vshll.u32 %v2710_v49, 16 }
 0x10a   : > { %v2983_v46 = vrot.slane %v2981_v42, 4  ;;  %v2994_v43 = vshrl.u32 %v8960_v45, 16  ;;  %v2945_v28 = vsel %vm7915_vm9, %v2940_v10, %v2944_v11  ;;  %v6483_v15 = vcombine.low %v8924_v6, %v8931_v63  ;;  %7411 = vmatpush3.bf16.msra.mxu0 %v7644_v21  ;;  %v7635_v11 = vld [vmem:[%s10470_s3 + $0x170] sm:$0xff]   ;;  %v9024_v42 = vld [vmem:[#allocation2 + $0xac] sm:$0xf] }
 0x10b   : > { %v2973_v51 = vor.u32 %v2972_v44, %v8970_v4  ;;  %v2986_v37 = vrot.slane %v2984_v27, 5  ;;  %v2955_v57 = vsel %vm7915_vm9, %v2950_v26, %v2954_v55  ;;  %v8987_v23 = vrot.slane %v2963_v54, 4  ;;  %7412 = vmatprep.subr.bf16.mxu0 %v7648_v2  ;;  %v7652_v21 = vld [vmem:[%s10470_s3 + $0x1d0] sm:$0xff]  }
 0x10c   : > { %v2990_v39 = vshll.u32 %v8960_v45, 16  ;;  %v2996_v53 = vrot.slane %v2994_v43, 4  ;;  %v8993_v49 = vcombine.low %v2921_v38, %v2931_v20  ;;  %v3000_v31 = vshll.u32 %v2711_v47, 16  ;;  %v9006_v38 = vld [vmem:[#allocation2 + $0xa8] sm:$0xf] }
 0x10d   : > { %v2987_v50 = vor.u32 %v2986_v37, %v2983_v46  ;;  %v3005_v52 = vshrl.u32 %v8976_v58, 16  ;;  %7333 = vmatmul.mubr.bf16.gmra.mxu0 %v6478_v30  ;;  %v2978_v10 = vrot.slane %v2976_v13, 5  ;;  %v3008_v32 = vshll.u32 %v8976_v58, 16  ;;  %v2713_v46 = vld [vmem:[#allocation2 + $0xb0] sm:$0x1]  ;;  %v7656_v43 = vld [vmem:[%s10470_s3 + $0x1c8] sm:$0xff]  }
 0x10e   : > { %v9002_v48 = vrot.slane %v2990_v39, 5  ;;  %v3018_v17 = vshrl.u32 %v8983_v35, 16  ;;  %7336 = vmatprep.mubr.bf16.mxu0 %v6479_v1  ;;  %v9012_v55 = vcombine.low %v2945_v28, %v2955_v57  ;;  %v2974_v44 = vrot.slane %v2973_v51, 4  ;;  %7413 = vmatpush3.bf16.msra.mxu0 %v7648_v2  ;;  %v9039_v57 = vld [vmem:[#allocation2 + $0xb4] sm:$0xf] }
 0x10f   : > { %v6484_v25 = vcombine.low %v8944_v19, %v8960_v45  ;;  %v3007_v3 = vrot.slane %v3005_v52, 4  ;;  %v3010_v59 = vrot.slane %v3008_v32, 5  ;;  %v3014_v1 = vshll.u32 %v8983_v35, 16  ;;  %7414 = vmatprep.subr.bf16.mxu0 %v7652_v21  ;;  %v7643_v52 = vld [vmem:[%s10470_s3 + $0x160] sm:$0xff]  }
 0x110   : > { %7277 = vmatmul.mubr.bf16.vlgmr.msra.gmra.mxu1 %v8787_v14  ;;  %v2969_v14 = vsel %vm7915_vm9, %v8987_v23, %v8970_v4  ;;  %v2997_v30 = vor.u32 %v2996_v53, %v9002_v48  ;;  %v3002_v26 = vrot.slane %v3000_v31, 5  ;;  %v3020_v54 = vrot.slane %v3018_v17, 4  ;;  %v9046_v31 = vld [vmem:[#allocation2 + $0xb8] sm:$0xf] }
 0x111   : > { %7357 = vmatpush3.bf16.msra.mxu1 %v8764_v41  ;;  %7280 = vmatprep.mubr.bf16.mxu1 %v8832_v60  ;;  %v7639_v41 = vld [vmem:[%s10470_s3 + $0x168] sm:$0xff]   ;;  %v2988_v60 = vrot.slane %v2987_v50, 4  ;;  %v3029_v27 = vshrl.u32 %v9006_v38, 16  ;;  %v3011_v47 = vor.u32 %v3010_v59, %v3007_v3  ;;  %v9030_v20 = vrot.slane %v3014_v1, 5  ;;  %v496_v1 = vld [vmem:[#allocation2 + $0xc0] sm:$0x1] }
 0x112   : > { %7358 = vmatprep.subr.bf16.mxu1 %v7635_v11  ;;  %v2998_v4 = vrot.slane %v2997_v30, 4  ;;  %v3032_v13 = vshll.u32 %v9006_v38, 16  ;;  %v2979_v2 = vsel %vm7915_vm9, %v2974_v44, %v2978_v10  ;;  %v3024_v28 = vshll.u32 %v2712_v18, 16  ;;  %7415 = vmatpush3.bf16.msra.mxu0 %v7652_v21 }
 0x113   : > { %v3031_v51 = vrot.slane %v3029_v27, 4  ;;  %v3042_v37 = vshrl.u32 %v9024_v42, 16  ;;  %v6485_v23 = vcombine.low %v8976_v58, %v8983_v35  ;;  %v9043_v39 = vrot.slane %v3011_v47, 4  ;;  %7416 = vmatprep.subr.bf16.mxu0 %v7656_v43  ;;  %v552_v27 = vld [vmem:[#allocation2 + $0xc8] sm:$0x1] }
 0x114   : > { %v3021_v53 = vor.u32 %v3020_v54, %v9030_v20  ;;  %v3034_v50 = vrot.slane %v3032_v13, 5  ;;  %v2993_v10 = vsel %vm7915_vm9, %v2988_v60, %v9002_v48  ;;  %v3038_v32 = vshll.u32 %v9024_v42, 16  ;;  %v7660_v48 = vld [vmem:[%s10470_s3 + $0x1c0] sm:$0xff]   ;;  %v4321_v35 = vld [vmem:[#allocation2 + $0x2c] sm:$0x1] }
 0x115   : > { %7359 = vmatpush3.bf16.msra.mxu1 %v7635_v11  ;;  %v3003_v11 = vsel %vm7915_vm9, %v2998_v4, %v3002_v26  ;;  %v3044_v17 = vrot.slane %v3042_v37, 4  ;;  %7337 = vmatmul.mubr.bf16.gmra.mxu0 %v6480_v22  ;;  %v9060_v44 = vcombine.low %v2969_v14, %v2979_v2  ;;  %v3048_v30 = vshll.u32 %v2713_v46, 16  ;;  %v6884_v14 = vld [vmem:[%s7840_s10 + $0x78] sm:$0xff]  }
 0x116   : > { %7360 = vmatprep.subr.bf16.mxu1 %v7639_v41  ;;  %v3035_v3 = vor.u32 %v3034_v50, %v3031_v51  ;;  %v3053_v59 = vshrl.u32 %v9039_v57, 16  ;;  %7340 = vmatprep.mubr.bf16.mxu0 %v6481_v24  ;;  %v9070_v21 = vrot.slane %v3024_v28, 5  ;;  %v9072_v5 = vrot.slane %v3038_v32, 5  ;;  %v2714_v24 = vld [vmem:[#allocation2 + $0xbc] sm:$0x1] }
 0x117   : > { %v3056_v34 = vshll.u32 %v9039_v57, 16  ;;  %v3066_v22 = vshrl.u32 %v9046_v31, 16  ;;  %v9078_v18 = vcombine.low %v2993_v10, %v3003_v11  ;;  %v9084_v12 = vrot.slane %v3021_v53, 4  ;;  %7417 = vmatpush3.bf16.msra.mxu0 %v7656_v43  ;;  %v9096_v2 = vld [vmem:[%s10470_s3 + $0x238] sm:$0xff]   ;;  %v7720_v10 = vld [vmem:[%s10468_s1] ss:$0 sm:$0xff] }
 0x118   : > { %7281 = vmatmul.mubr.bf16.gmra.mxu1 %v8839_v29  ;;  %v3017_v29 = vsel %vm7915_vm9, %v9043_v39, %v9030_v20  ;;  %v6486_v36 = vcombine.low %v9006_v38, %v9024_v42  ;;  %v3055_v60 = vrot.slane %v3053_v59, 4  ;;  %v3062_v54 = vshll.u32 %v9046_v31, 16  ;;  %7418 = vmatprep.subr.bf16.mxu0 %v7660_v48  ;;  %v4272_v53 = vld [vmem:[#allocation2 + $0x18] sm:$0xf]  ;;  %v4273_v59 = vld [vmem:[#allocation2 + $0x1c] sm:$0xf] }
 0x119   : > { %7284 = vmatprep.mubr.bf16.mxu1 %v8878_v9  ;;  %7361 = vmatpush3.bf16.msra.mxu1 %v7639_v41  ;;  %v7647_v9 = vld [vmem:[%s10470_s3 + $0x158] sm:$0xff]   ;;  %v3045_v41 = vor.u32 %v3044_v17, %v9072_v5  ;;  %v3058_v26 = vrot.slane %v3056_v34, 5  ;;  %v3036_v4 = vrot.slane %v3035_v3, 4  ;;  %v3050_v47 = vrot.slane %v3048_v30, 5 }
 0x11a   : > { %7362 = vmatprep.subr.bf16.mxu1 %v7643_v52  ;;  %v3068_v13 = vrot.slane %v3066_v22, 4  ;;  %v6788_v46 = vunpack.c.l.bf16 %v6884_v14  ;;  %v9098_v51 = vrot.slane %v3062_v54, 5  ;;  %v3072_v37 = vshll.u32 %v2714_v24, 16 }
 0x11b   : > { %v3046_v28 = vrot.slane %v3045_v41, 4  ;;  %v6789_v43 = vunpack.c.h.bf16 %v6884_v14  ;;  %v3027_v50 = vsel %vm7915_vm9, %v9084_v12, %v9070_v21  ;;  %v497_v17 = vsel %vm7844_vm3, 0, %v496_v1  ;;  %7419 = vmatpush3.bf16.msra.mxu0 %v7660_v48  ;;  %v7721_v12 = vld [vmem:[%s10469_s2] ss:$0 sm:$0xff] }
 0x11c   : > { %v365_v11 = vmul.f32 %v7720_v10, %v6788_v46  ;;  %v553_v30 = vsel %vm7852_vm4, 0, %v552_v27  ;;  %v3059_v34 = vor.u32 %v3058_v26, %v3055_v60  ;;  %v3069_v21 = vor.u32 %v3068_v13, %v9098_v51  ;;  %498 = vst [vmem:[#allocation2 + $0xc0] sm:$0x1] %v497_v17  ;;  %7500 = vmatprep.subr.bf16.mxu0 %v9096_v2  ;;  %v4320_v48 = vld [vmem:[#allocation2 + $0x20] sm:$0x1] }
 0x11d   : > { %7363 = vmatpush3.bf16.msra.mxu1 %v7643_v52  ;;  %v7651_v52 = vld [vmem:[%s10470_s3 + $0x150] sm:$0xff]   ;;  %v366_v22 = vmul.f32 %v7720_v10, %v6789_v43  ;;  %554 = vst [vmem:[#allocation2 + $0xc8] sm:$0x1] %v553_v30  ;;  %7341 = vmatmul.mubr.bf16.gmra.mxu0 %v6482_v62  ;;  %v3041_v14 = vsel %vm7915_vm9, %v3036_v4, %v9072_v5  ;;  %v4337_v1 = vshrl.u32 %v4272_v53, 16  ;;  %v4340_v41 = vshll.u32 %v4272_v53, 16 }
 0x11e   : > { %7364 = vmatprep.subr.bf16.mxu1 %v7647_v9  ;;  %v404_v24 = vadd.f32 %v7721_v12, %v365_v11  ;;  %7344 = vmatprep.mubr.bf16.mxu0 %v6483_v15  ;;  %v3051_v8 = vsel %vm7915_vm9, %v3046_v28, %v3050_v47  ;;  %v3074_v56 = vrot.slane %v3072_v37, 5  ;;  %v4346_v5 = vshll.u32 %v4273_v59, 16 }
 0x11f   : > { %v405_v62 = vadd.f32 %v7721_v12, %v366_v22  ;;  %v4339_v26 = vrot.slane %v4337_v1, 4  ;;  %v4342_v54 = vrot.slane %v4340_v41, 5  ;;  %v4350_v27 = vshrl.u32 %v4273_v59, 16  ;;  %v4274_v59 = vld [vmem:[#allocation2 + $0x24] sm:$0xf] }
 0x120   : > { %7285 = vmatmul.mubr.bf16.gmra.mxu1 %v8921_v16  ;;  %v436_v60 = vmax.f32 %v404_v24, 0.0  ;;  %v7655_v16 = vld [vmem:[%s10470_s3 + $0x148] sm:$0xff]   ;;  %v3060_v6 = vrot.slane %v3059_v34, 4  ;;  %v3070_v63 = vrot.slane %v3069_v21, 4  ;;  %v9135_v4 = vrot.slane %v4346_v5, 5 }
 0x121   : > { %7288 = vmatprep.mubr.bf16.mxu1 %v8926_v61  ;;  %7365 = vmatpush3.bf16.msra.mxu1 %v7647_v9  ;;  %v437_v15 = vmax.f32 %v405_v62, 0.0  ;;  %v4343_v13 = vor.u32 %v4342_v54, %v4339_v26  ;;  %v4352_v46 = vrot.slane %v4350_v27, 4  ;;  %v4356_v28 = vshll.u32 %v4320_v48, 16  ;;  %v3694_v61 = vld [vmem:[#allocation2 + $0xc] sm:$0xe] }
 0x122   : > { %7366 = vmatprep.subr.bf16.mxu1 %v7651_v52  ;;  %v6692_v47 = vpack.c.bf16 %v436_v60, %v436_v60  ;;  %v9142_v9 = vcombine.low %v3017_v29, %v3027_v50  ;;  %v9144_v37 = vcombine.low %v3041_v14, %v3051_v8  ;;  %v6487_v43 = vcombine.low %v9039_v57, %v9046_v31  ;;  %v7659_v50 = vld [vmem:[%s10470_s3 + $0x140] sm:$0xff]  }
 0x123   : > { %v6693_v53 = vpack.c.bf16 %v437_v15, %v437_v15  ;;  %v4353_v17 = vor.u32 %v4352_v46, %v9135_v4  ;;  %v3744_v30 = vrot.slane %v8644_v33, 5  ;;  %v3065_v20 = vsel %vm7915_vm9, %v3060_v6, %v9098_v51  ;;  %v4275_v51 = vld [vmem:[#allocation2 + $0x28] sm:$0xf]  ;;  %v1084_v12 = vld [vmem:[#allocation2 + $0xc0] sm:$0xf] }
 0x124   : > { %v912_v10 = vshrl.u32 %v6692_v47, 16  ;;  %v915_v11 = vshll.u32 %v6692_v47, 16  ;;  %v6497_v34 = vrot.slane %v3694_v61, 9  ;;  %v3075_v33 = vsel %vm7915_vm9, %v3070_v63, %v3074_v56  ;;  %v1088_v41 = vld [vmem:[#allocation2 + $0xc8] sm:$0x1] }
 0x125   : > { %7367 = vmatpush3.bf16.msra.mxu1 %v7651_v52  ;;  %v920_v39 = vshrl.u32 %v6693_v53, 16  ;;  %v923_v29 = vshll.u32 %v6693_v53, 16  ;;  %7345 = vmatmul.mubr.bf16.gmra.mxu0 %v6484_v25  ;;  %v9161_v21 = vrot.slane %v4343_v13, 4  ;;  %v9163_v22 = vrot.slane %v4356_v28, 5  ;;  %v10550_v56 = vld [vmem:[#allocation10_spill] sm:$0xff] }
 0x126   : > { %7368 = vmatprep.subr.bf16.mxu1 %v7655_v16  ;;  %v914_v52 = vrot.slane %v912_v10, 7  ;;  %7348 = vmatprep.mubr.bf16.mxu0 %v6485_v23  ;;  %v4354_v24 = vrot.slane %v4353_v17, 4  ;;  %v4361_v19 = vshrl.u32 %v4274_v59, 16  ;;  %v4364_v45 = vshll.u32 %v4274_v59, 16  ;;  %v4276_v46 = vld [vmem:[#allocation2 + $0x30] sm:$0xf] }
 0x127   : > { %v922_v14 = vrot.slane %v920_v39, 7  ;;  %v3746_v8 = vrot.slane %v3744_v30, 4  ;;  %v3747_v62 = vrot.slane %v10550_v56, 5  ;;  %v9171_v48 = vcombine.low %v3065_v20, %v3075_v33  ;;  %v4277_v28 = vld [vmem:[#allocation2 + $0x34] sm:$0xf] }
 0x128   : > { %7289 = vmatmul.mubr.bf16.gmra.mxu1 %v8949_v7  ;;  %v917_v25 = vor.u32 %v915_v11, %v914_v52  ;;  %v918_v1 = vrot.slane %v914_v52, 4  ;;  %v9175_v58 = vsel %vm8375_vm14, %v6497_v34, %v3744_v30  ;;  %v4363_v26 = vrot.slane %v4361_v19, 4  ;;  %v7722_v59 = vld [vmem:[#allocation2 + $0x1c] sm:$0xf] }
 0x129   : > { %7292 = vmatprep.mubr.bf16.mxu1 %v8993_v49  ;;  %7369 = vmatpush3.bf16.msra.mxu1 %v7655_v16  ;;  %v925_v7 = vor.u32 %v923_v29, %v922_v14  ;;  %v927_v5 = vrot.slane %v922_v14, 4  ;;  %v9180_v49 = vld [vmem:[%s10470_s3 + $0x1b8] sm:$0xff]   ;;  %v4366_v54 = vrot.slane %v4364_v45, 5  ;;  %v4370_v27 = vshll.u32 %v4275_v51, 16 }
 0x12a   : > { %7370 = vmatprep.subr.bf16.mxu1 %v7659_v50  ;;  %v1085_v60 = vsel %vm7928_vm10, %v917_v25, %v1084_v12  ;;  %v3695_v16 = vld [vmem:[#allocation2 + $0x18] sm:$0xe]  ;;  %v4349_v47 = vsel %vm7915_vm9, %v9161_v21, %v9135_v4  ;;  %v4374_v13 = vshrl.u32 %v4275_v51, 16  ;;  %v4359_v61 = vsel %vm7915_vm9, %v4354_v24, %v9163_v22  ;;  %v7723_v21 = vld [vmem:[#allocation2 + $0x20] sm:$0x1] }
 0x12b   : > { %v926_v63 = vsel %vm7934_vm11, %v918_v1, %v925_v7  ;;  %1086 = vst [vmem:[#allocation2 + $0xc0] sm:$0xf] %v1085_v60  ;;  %v1089_v15 = vsel %vm7844_vm3, %v927_v5, %v1088_v41  ;;  %v9197_v53 = vsel %vm8375_vm14, %v3746_v8, %v3747_v62  ;;  %v4367_v10 = vor.u32 %v4366_v54, %v4363_v26  ;;  %v4322_v51 = vld [vmem:[#allocation2 + $0x38] sm:$0x1]  ;;  %v3696_v1 = vld [vmem:[#allocation2 + $0x24] sm:$0xe] }
 0x12c   : > { %1087 = vst [vmem:[#allocation2 + $0xc4] sm:$0xf] %v926_v63  ;;  %1090 = vst [vmem:[#allocation2 + $0xc8] sm:$0x1] %v1089_v15  ;;  %v9199_v11 = vrot.slane %v4370_v27, 5  ;;  %v4376_v17 = vrot.slane %v4374_v13, 4  ;;  %v6537_v38 = vcombine.low %v4349_v47, %v4359_v61 }
 0x12d   : > { %7371 = vmatpush3.bf16.msra.mxu1 %v7659_v50  ;;  %v4380_v30 = vshll.u32 %v4321_v35, 16  ;;  %v6498_v4 = vrot.slane %v3695_v16, 9  ;;  %v3751_v20 = vrot.slane %v7722_v59, 5  ;;  %7349 = vmatmul.mubr.bf16.gmra.mxu0 %v6486_v36  ;;  %v9205_v39 = vrot.slane %v4367_v10, 4  ;;  %v7724_v26 = vld [vmem:[#allocation2 + $0x28] sm:$0xf] }
 0x12e   : > { %7452 = vmatprep.subr.bf16.mxu1 %v9180_v49  ;;  %v4385_v29 = vshrl.u32 %v4276_v46, 16  ;;  %v4388_v50 = vshll.u32 %v4276_v46, 16  ;;  %v4394_v34 = vshll.u32 %v4277_v28, 16  ;;  %7352 = vmatprep.mubr.bf16.mxu0 %v6487_v43  ;;  %v4377_v33 = vor.u32 %v4376_v17, %v9199_v11  ;;  %v4278_v15 = vld [vmem:[#allocation2 + $0x3c] sm:$0xf] }
 0x12f   : > { %v3753_v52 = vrot.slane %v3751_v20, 4  ;;  %v3754_v22 = vrot.slane %v7723_v21, 5  ;;  %v4398_v14 = vshrl.u32 %v4277_v28, 16  ;;  %v4382_v24 = vrot.slane %v4380_v30, 5  ;;  %v4279_v61 = vld [vmem:[#allocation2 + $0x40] sm:$0xf] }
 0x130   : > { %7293 = vmatmul.mubr.bf16.gmra.mxu1 %v9012_v55  ;;  %v4387_v42 = vrot.slane %v4385_v29, 4  ;;  %v4390_v36 = vrot.slane %v4388_v50, 5  ;;  %v4396_v12 = vrot.slane %v4394_v34, 5  ;;  %v6513_v55 = vcombine.low %v9175_v58, %v9197_v53  ;;  %v9246_v34 = vld [vmem:[#allocation2 + $0x44] sm:$0x1] }
 0x131   : > { %7296 = vmatprep.mubr.bf16.mxu1 %v9060_v44  ;;  %v9217_v57 = vsel %vm8375_vm14, %v6498_v4, %v3751_v20  ;;  %v4400_v31 = vrot.slane %v4398_v14, 4  ;;  %v4373_v19 = vsel %vm7915_vm9, %v9205_v39, %v9199_v11  ;;  %v4378_v44 = vrot.slane %v4377_v33, 4  ;;  %v7725_v20 = vld [vmem:[#allocation2 + $0x2c] sm:$0x1] }
 0x132   : > { %v2682_v43 = vld [vmem:[#allocation2 + $0xc0] sm:$0xf]  ;;  %v4391_v45 = vor.u32 %v4390_v36, %v4387_v42  ;;  %v4404_v25 = vshll.u32 %v4322_v51, 16  ;;  %v9229_v7 = vsel %vm8375_vm14, %v3753_v52, %v3754_v22  ;;  %v3758_v54 = vrot.slane %v7724_v26, 5 }
 0x133   : > { %v9223_v41 = vld [vmem:[#allocation2 + $0xc4] sm:$0xf]  ;;  %v3077_v8 = vshrl.u32 %v2682_v43, 16  ;;  %v3080_v56 = vshll.u32 %v2682_v43, 16  ;;  %v9225_v62 = vld [vmem:[#allocation2 + $0xc8] sm:$0x1]  ;;  %v4401_v5 = vor.u32 %v4400_v31, %v4396_v12  ;;  %v4383_v11 = vsel %vm7915_vm9, %v4378_v44, %v4382_v24 }
 0x134   : > { %v3090_v35 = vshrl.u32 %v9223_v41, 16  ;;  %v6488_v23 = vcombine.low %v2682_v43, %v9223_v41  ;;  %v3086_v60 = vshll.u32 %v9223_v41, 16  ;;  %v4392_v6 = vrot.slane %v4391_v45, 4  ;;  %v4280_v24 = vld [vmem:[#allocation2 + $0x48] sm:$0xf] }
 0x135   : > { %v3079_v27 = vrot.slane %v3077_v8, 4  ;;  %v3082_v16 = vrot.slane %v3080_v56, 5  ;;  %v6499_v63 = vrot.slane %v3696_v1, 9  ;;  %v3096_v46 = vshll.u32 %v9225_v62, 16  ;;  %v7726_v8 = vld [vmem:[#allocation2 + $0x34] sm:$0xf] }
 0x136   : > { %7353 = vmatmul.mubr.bf16.gmra.mxu0 %v6488_v23  ;;  %v9234_v47 = vrot.slane %v3086_v60, 5  ;;  %v3092_v13 = vrot.slane %v3090_v35, 4  ;;  %v4402_v28 = vrot.slane %v4401_v5, 4  ;;  %v4397_v17 = vsel %vm7915_vm9, %v4392_v6, %v4396_v12  ;;  %v7664_v5 = vld [vmem:[%s10470_s3 + $0x230] sm:$0xff]   ;;  %v9265_v35 = vld [vmem:[#allocation2 + $0x4c] sm:$0xf] }
 0x137   : > { %v3083_v10 = vor.u32 %v3082_v16, %v3079_v27  ;;  %7420 = vmatprep.mubr.bf16.mxu0 %v6537_v38  ;;  %v4406_v30 = vrot.slane %v4404_v25, 5  ;;  %v3760_v59 = vrot.slane %v3758_v54, 4  ;;  %v3761_v39 = vrot.slane %v7725_v20, 5  ;;  %v3697_v38 = vld [vmem:[#allocation2 + $0x30] sm:$0xe] }
 0x138   : > { %7297 = vmatmul.mubr.bf16.gmra.mxu1 %v9078_v18  ;;  %v3093_v4 = vor.u32 %v3092_v13, %v9234_v47  ;;  %v4409_v29 = vshrl.u32 %v4278_v15, 16  ;;  %v4412_v33 = vshll.u32 %v4278_v15, 16  ;;  %v4418_v52 = vshll.u32 %v4279_v61, 16 }
 0x139   : > { %7300 = vmatprep.mubr.bf16.mxu1 %v9142_v9  ;;  %v3084_v50 = vrot.slane %v3083_v10, 4  ;;  %v4407_v18 = vsel %vm7915_vm9, %v4402_v28, %v4406_v30  ;;  %v3098_v22 = vrot.slane %v3096_v46, 5  ;;  %v6538_v51 = vcombine.low %v4373_v19, %v4383_v11  ;;  %v4282_v30 = vld [vmem:[#allocation2 + $0x54] sm:$0xf] }
 0x13a   : > { %v3094_v21 = vrot.slane %v3093_v4, 4  ;;  %v4411_v14 = vrot.slane %v4409_v29, 4  ;;  %v6514_v9 = vcombine.low %v9217_v57, %v9229_v7  ;;  %v6539_v42 = vcombine.low %v4397_v17, %v4407_v18  ;;  %v7665_v57 = vld [vmem:[%s10470_s3 + $0x1a8] sm:$0xff]  }
 0x13b   : > { %v9252_v36 = vsel %vm8375_vm14, %v6499_v63, %v3758_v54  ;;  %v4414_v12 = vrot.slane %v4412_v33, 5  ;;  %v9256_v31 = vsel %vm8375_vm14, %v3760_v59, %v3761_v39  ;;  %v4420_v43 = vrot.slane %v4418_v52, 5  ;;  %v4324_v54 = vld [vmem:[#allocation2 + $0x50] sm:$0x1]  ;;  %v7727_v63 = vld [vmem:[#allocation2 + $0x38] sm:$0x1] }
 0x13c   : > { %v4422_v44 = vshrl.u32 %v4279_v61, 16  ;;  %v4428_v19 = vshll.u32 %v9246_v34, 16  ;;  %v3089_v45 = vsel %vm7915_vm9, %v3084_v50, %v9234_v47  ;;  %v6500_v1 = vrot.slane %v3697_v38, 9  ;;  %v7728_v33 = vld [vmem:[#allocation2 + $0x40] sm:$0xf] }
 0x13d   : > { %v4415_v25 = vor.u32 %v4414_v12, %v4411_v14  ;;  %v3765_v56 = vrot.slane %v7726_v8, 5  ;;  %v3099_v23 = vsel %vm7915_vm9, %v3094_v21, %v3098_v22  ;;  %v4433_v27 = vshrl.u32 %v4280_v24, 16  ;;  %v9287_v21 = vld [vmem:[#allocation2 + $0x58] sm:$0xf]  ;;  %v9291_v38 = vld [vmem:[#allocation2 + $0x5c] sm:$0x1] }
 0x13e   : > { %7421 = vmatmul.mubr.bf16.vlgmr.msra.gmra.mxu0 %v6538_v51  ;;  %v4424_v60 = vrot.slane %v4422_v44, 4  ;;  %v4430_v26 = vrot.slane %v4428_v19, 5  ;;  %v3768_v15 = vrot.slane %v7727_v63, 5  ;;  %v4436_v47 = vshll.u32 %v4280_v24, 16  ;;  %v7729_v44 = vld [vmem:[#allocation2 + $0x44] sm:$0x1] }
 0x13f   : > { %7501 = vmatpush3.bf16.msra.mxu0 %v9096_v2  ;;  %v4416_v16 = vrot.slane %v4415_v25, 4  ;;  %v3767_v6 = vrot.slane %v3765_v56, 4  ;;  %7424 = vmatprep.mubr.bf16.mxu0 %v6539_v42  ;;  %v4435_v46 = vrot.slane %v4433_v27, 4  ;;  %v4442_v28 = vshll.u32 %v9265_v35, 16  ;;  %v3699_v27 = vld [vmem:[#allocation2 + $0x48] sm:$0xe] }
 0x140   : > { %7301 = vmatmul.mubr.bf16.gmra.mxu1 %v9144_v37  ;;  %v4425_v13 = vor.u32 %v4424_v60, %v4420_v43  ;;  %v4446_v61 = vshrl.u32 %v9265_v35, 16  ;;  %v7666_v37 = vld [vmem:[%s10470_s3 + $0x228] sm:$0xff]   ;;  %v6464_v10 = vcombine.low %v3089_v45, %v3099_v23  ;;  %v9279_v2 = vsel %vm8375_vm14, %v6500_v1, %v3765_v56  ;;  %7502 = vmatprep.subr.bf16.mxu0 %v7664_v5  ;;  %v7668_v45 = vld [vmem:[%s10470_s3 + $0x220] sm:$0xff]  }
 0x141   : > { %7304 = vmatprep.mubr.bf16.mxu1 %v9171_v48  ;;  %v4438_v11 = vrot.slane %v4436_v47, 5  ;;  %v4452_v17 = vshll.u32 %v4324_v54, 16  ;;  %v3698_v48 = vld [vmem:[#allocation2 + $0x3c] sm:$0xe]  ;;  %v4421_v4 = vsel %vm7915_vm9, %v4416_v16, %v4420_v43  ;;  %v4444_v20 = vrot.slane %v4442_v28, 5 }
 0x142   : > { %v4426_v59 = vrot.slane %v4425_v13, 4  ;;  %v4448_v39 = vrot.slane %v4446_v61, 4  ;;  %v9285_v29 = vsel %vm8375_vm14, %v3767_v6, %v3768_v15  ;;  %v3772_v52 = vrot.slane %v7728_v33, 5  ;;  %v4284_v63 = vld [vmem:[#allocation2 + $0x60] sm:$0xf] }
 0x143   : > { %7503 = vmatpush3.bf16.msra.mxu0 %v7664_v5  ;;  %v4439_v50 = vor.u32 %v4438_v11, %v4435_v46  ;;  %v4454_v18 = vrot.slane %v4452_v17, 5  ;;  %v6501_v14 = vrot.slane %v3698_v48, 9  ;;  %v4457_v42 = vshrl.u32 %v4282_v30, 16  ;;  %v9297_v5 = vpop.f32.mrf.mxu0  ;;  %v9312_v15 = vld [vmem:[#allocation2 + $0x64] sm:$0xf] }
 0x144   : > { %v4431_v22 = vsel %vm7915_vm9, %v4426_v59, %v4430_v26  ;;  %v4449_v51 = vor.u32 %v4448_v39, %v4444_v20  ;;  %7504 = vmatprep.subr.bf16.mxu0 %v7666_v37  ;;  %v3774_v43 = vrot.slane %v3772_v52, 4  ;;  %v3775_v19 = vrot.slane %v7729_v44, 5  ;;  %v9327_v48 = vld [vmem:[#allocation2 + $0x68] sm:$0x1] }
 0x145   : > { %v6540_v12 = vcombine.low %v4421_v4, %v4431_v22  ;;  %v4440_v24 = vrot.slane %v4439_v50, 4  ;;  %v4459_v1 = vrot.slane %v4457_v42, 4  ;;  %v4460_v8 = vshll.u32 %v4282_v30, 16  ;;  %v9325_v11 = vpop.f32.mrf.mxu0  ;;  %v7731_v50 = vld [vmem:[#allocation2 + $0x50] sm:$0x1] }
 0x146   : > { %v4450_v25 = vrot.slane %v4449_v51, 4  ;;  %v4466_v56 = vshll.u32 %v9287_v21, 16  ;;  %v6515_v23 = vcombine.low %v9252_v36, %v9256_v31  ;;  %v4470_v26 = vshrl.u32 %v9287_v21, 16  ;;  %v7663_v22 = vld [vmem:[%s10470_s3 + $0x1b0] sm:$0xff]  }
 0x147   : > { %7425 = vmatmul.mubr.bf16.gmra.mxu0 %v6540_v12  ;;  %v4445_v60 = vsel %vm7915_vm9, %v4440_v24, %v4444_v20  ;;  %v4476_v54 = vshll.u32 %v9291_v38, 16  ;;  %v6516_v16 = vcombine.low %v9279_v2, %v9285_v29  ;;  %v4462_v36 = vrot.slane %v4460_v8, 5 }
 0x148   : > { %7305 = vmatmul.mubr.bf16.gmra.mxu1 %v6464_v10  ;;  %v4455_v6 = vsel %vm7915_vm9, %v4450_v25, %v4454_v18  ;;  %v4468_v31 = vrot.slane %v4466_v56, 5  ;;  %7505 = vmatpush3.bf16.msra.mxu0 %v7666_v37  ;;  %v9316_v13 = vsel %vm8375_vm14, %v6501_v14, %v3772_v52  ;;  %v9320_v58 = vsel %vm8375_vm14, %v3774_v43, %v3775_v19  ;;  %v7730_v37 = vld [vmem:[#allocation2 + $0x4c] sm:$0xf]  ;;  %v3700_v52 = vld [vmem:[#allocation2 + $0x54] sm:$0xe] }
 0x149   : > { %7372 = vmatprep.mubr.bf16.mxu1 %v6513_v55  ;;  %v6541_v47 = vcombine.low %v4445_v60, %v4455_v6  ;;  %v4472_v53 = vrot.slane %v4470_v26, 4  ;;  %7506 = vmatprep.subr.bf16.mxu0 %v7668_v45  ;;  %v7670_v55 = vld [vmem:[%s10470_s3 + $0x218] sm:$0xff]   ;;  %v4463_v46 = vor.u32 %v4462_v36, %v4459_v1  ;;  %v4478_v28 = vrot.slane %v4476_v54, 5  ;;  %v9339_v25 = vld [vmem:[#allocation2 + $0x6c] sm:$0xf]  ;;  %v9341_v1 = vpop.f32.mrf.mxu0 }
 0x14a   : > { %v6502_v61 = vrot.slane %v3699_v27, 9  ;;  %v3779_v10 = vrot.slane %v7730_v37, 5  ;;  %v4481_v30 = vshrl.u32 %v4284_v63, 16  ;;  %v4484_v4 = vshll.u32 %v4284_v63, 16  ;;  %v9355_v54 = vld [vmem:[#allocation2 + $0x70] sm:$0xf] }
 0x14b   : > { %7428 = vmatprep.mubr.bf16.mxu0 %v6541_v47  ;;  %v4473_v17 = vor.u32 %v4472_v53, %v4468_v31  ;;  %v4490_v59 = vshll.u32 %v9312_v15, 16  ;;  %v6517_v20 = vcombine.low %v9316_v13, %v9320_v58  ;;  %v4464_v39 = vrot.slane %v4463_v46, 4  ;;  %v7732_v6 = vld [vmem:[#allocation2 + $0x58] sm:$0xf]  ;;  %v7733_v63 = vld [vmem:[#allocation2 + $0x5c] sm:$0x1] }
 0x14c   : > { %v3782_v18 = vrot.slane %v7731_v50, 5  ;;  %v4494_v33 = vshrl.u32 %v9312_v15, 16  ;;  %7507 = vmatpush3.bf16.msra.mxu0 %v7668_v45  ;;  %v4483_v14 = vrot.slane %v4481_v30, 4  ;;  %v4486_v42 = vrot.slane %v4484_v4, 5  ;;  %v7672_v45 = vld [vmem:[%s10470_s3 + $0x210] sm:$0xff]   ;;  %v7669_v13 = vld [vmem:[%s10470_s3 + $0x198] sm:$0xff]  }
 0x14d   : > { %v4474_v51 = vrot.slane %v4473_v17, 4  ;;  %v4492_v12 = vrot.slane %v4490_v59, 5  ;;  %7508 = vmatprep.subr.bf16.mxu0 %v7670_v55  ;;  %v4469_v24 = vsel %vm7915_vm9, %v4464_v39, %v4468_v31  ;;  %v3781_v43 = vrot.slane %v3779_v10, 4  ;;  %v9361_v53 = vld [vmem:[#allocation2 + $0x74] sm:$0x1]  ;;  %v7674_v17 = vld [vmem:[%s10470_s3 + $0x208] sm:$0xff]  }
 0x14e   : > { %v4496_v44 = vrot.slane %v4494_v33, 4  ;;  %v4500_v19 = vshll.u32 %v9327_v48, 16  ;;  %v9353_v56 = vsel %vm8375_vm14, %v6502_v61, %v3779_v10  ;;  %v4487_v60 = vor.u32 %v4486_v42, %v4483_v14  ;;  %10553 = vst [vmem:[#allocation8_spill] sm:$0xff] %v9361_v53  ;;  %v9370_v10 = vpop.f32.mrf.mxu0  ;;  %v3701_v39 = vld [vmem:[#allocation2 + $0x60] sm:$0xe] }
 0x14f   : > { %v4479_v8 = vsel %vm7915_vm9, %v4474_v51, %v4478_v28  ;;  %v6503_v26 = vrot.slane %v3700_v52, 9  ;;  %v3786_v36 = vrot.slane %v7732_v6, 5  ;;  %v3789_v47 = vrot.slane %v7733_v63, 5  ;;  %v9385_v51 = vld [vmem:[#allocation2 + $0x78] sm:$0xf] }
 0x150   : > { %7373 = vmatmul.mubr.bf16.vlgmr.msra.gmra.mxu1 %v6514_v9  ;;  %v6542_v27 = vcombine.low %v4469_v24, %v4479_v8  ;;  %v4497_v7 = vor.u32 %v4496_v44, %v4492_v12  ;;  %v4502_v9 = vrot.slane %v4500_v19, 5  ;;  %v4488_v31 = vrot.slane %v4487_v60, 4  ;;  %7509 = vmatpush3.bf16.msra.mxu0 %v7670_v55  ;;  %10554 = vst [vmem:[#allocation9_spill] sm:$0xff] %v9385_v51  ;;  %v7667_v24 = vld [vmem:[%s10470_s3 + $0x1a0] sm:$0xff]   ;;  %v7735_v6 = vld [vmem:[#allocation2 + $0x68] sm:$0x1] }
 0x151   : > { %7453 = vmatpush3.bf16.msra.mxu1 %v9180_v49  ;;  %7376 = vmatprep.mubr.bf16.mxu1 %v6515_v23  ;;  %v4505_v46 = vshrl.u32 %v9339_v25, 16  ;;  %v4508_v49 = vshll.u32 %v9339_v25, 16  ;;  %v9367_v23 = vsel %vm8375_vm14, %v3781_v43, %v3782_v18  ;;  %v3788_v61 = vrot.slane %v3786_v36, 4  ;;  %v9394_v43 = vld [vmem:[#allocation2 + $0x7c] sm:$0xf] }
 0x152   : > { %7454 = vmatprep.subr.bf16.mxu1 %v7663_v22  ;;  %7429 = vmatmul.mubr.bf16.gmra.mxu0 %v6542_v27  ;;  %v4498_v28 = vrot.slane %v4497_v7, 4  ;;  %v4514_v37 = vshll.u32 %v9355_v54, 16  ;;  %v4493_v30 = vsel %vm7915_vm9, %v4488_v31, %v4492_v12  ;;  %v4518_v59 = vshrl.u32 %v9355_v54, 16  ;;  %v7734_v60 = vld [vmem:[#allocation2 + $0x64] sm:$0xf]  ;;  %v9398_v27 = vpop.f32.mrf.mxu0 }
 0x153   : > { %7510 = vmatprep.subr.bf16.mxu0 %v7672_v45  ;;  %v4507_v55 = vrot.slane %v4505_v46, 4  ;;  %v4510_v4 = vrot.slane %v4508_v49, 5  ;;  %v9382_v18 = vsel %vm8375_vm14, %v6503_v26, %v3786_v36  ;;  %v4524_v52 = vshll.u32 %v9361_v53, 16  ;;  %v7676_v7 = vld [vmem:[%s10470_s3 + $0x200] sm:$0xff]   ;;  %v3702_v49 = vld [vmem:[#allocation2 + $0x6c] sm:$0xe] }
 0x154   : > { %v4503_v50 = vsel %vm7915_vm9, %v4498_v28, %v4502_v9  ;;  %v4516_v33 = vrot.slane %v4514_v37, 5  ;;  %v9389_v42 = vsel %vm8375_vm14, %v3788_v61, %v3789_v47  ;;  %7511 = vmatpush3.bf16.msra.mxu0 %v7672_v45  ;;  %v6518_v44 = vcombine.low %v9353_v56, %v9367_v23  ;;  %v9406_v31 = vld [vmem:[#allocation2 + $0x80] sm:$0x1]  ;;  %v9409_v47 = vpop.f32.mrf.mxu1 }
 0x155   : > { %7455 = vmatpush3.bf16.msra.mxu1 %v7663_v22  ;;  %v6543_v14 = vcombine.low %v4493_v30, %v4503_v50  ;;  %v4511_v12 = vor.u32 %v4510_v4, %v4507_v55  ;;  %v4520_v22 = vrot.slane %v4518_v59, 4  ;;  %v4526_v19 = vrot.slane %v4524_v52, 5  ;;  %7512 = vmatprep.subr.bf16.mxu0 %v7674_v17  ;;  %10555 = vst [vmem:[#allocation4_spill] sm:$0xff] %v9409_v47  ;;  %v9429_v4 = vld [vmem:[#allocation2 + $0x84] sm:$0xf]  ;;  %v9431_v59 = vpop.f32.mrf.mxu0 }
 0x156   : > { %7456 = vmatprep.subr.bf16.mxu1 %v7665_v57  ;;  %v6504_v8 = vrot.slane %v3701_v39, 9  ;;  %v3793_v26 = vrot.slane %v7734_v60, 5  ;;  %v3796_v36 = vrot.slane %v7735_v6, 5  ;;  %v4529_v63 = vshrl.u32 %v9385_v51, 16  ;;  %10556 = vst [vmem:[#allocation5_spill] sm:$0xff] %v9429_v4  ;;  %v9441_v52 = vpop.f32.mrf.mxu1 }
 0x157   : > { %7432 = vmatprep.mubr.bf16.mxu0 %v6543_v14  ;;  %v4512_v45 = vrot.slane %v4511_v12, 4  ;;  %v4521_v9 = vor.u32 %v4520_v22, %v4516_v33  ;;  %v6519_v2 = vcombine.low %v9382_v18, %v9389_v42  ;;  %v4538_v46 = vshll.u32 %v9394_v43, 16  ;;  %10558 = vst [vmem:[#allocation6_spill] sm:$0xff] %v9441_v52  ;;  %v7736_v22 = vld [vmem:[#allocation2 + $0x70] sm:$0xf] }
 0x158   : > { %7377 = vmatmul.mubr.bf16.gmra.mxu1 %v6516_v16  ;;  %v3795_v29 = vrot.slane %v3793_v26, 4  ;;  %v4532_v16 = vshll.u32 %v9385_v51, 16  ;;  %v4531_v37 = vrot.slane %v4529_v63, 4  ;;  %v4542_v30 = vshrl.u32 %v9394_v43, 16  ;;  %7513 = vmatpush3.bf16.msra.mxu0 %v7674_v17  ;;  %v9558_v47 = vld [vmem:[#allocation2 + $0xb8] sm:$0xf] }
 0x159   : > { %7380 = vmatprep.mubr.bf16.mxu1 %v6517_v20  ;;  %7457 = vmatpush3.bf16.msra.mxu1 %v7665_v57  ;;  %v4517_v28 = vsel %vm7915_vm9, %v4512_v45, %v4516_v33  ;;  %v4522_v61 = vrot.slane %v4521_v9, 4  ;;  %v9426_v58 = vsel %vm8375_vm14, %v6504_v8, %v3793_v26  ;;  %v4540_v57 = vrot.slane %v4538_v46, 5  ;;  %v9439_v33 = vld [vmem:[#allocation2 + $0x88] sm:$0xf]  ;;  %v7737_v26 = vld [vmem:[#allocation2 + $0x74] sm:$0x1]  ;;  %v9455_v46 = vpop.f32.mrf.mxu0 }
 0x15a   : > { %7458 = vmatprep.subr.bf16.mxu1 %v7667_v24  ;;  %v4534_v20 = vrot.slane %v4532_v16, 5  ;;  %v4548_v55 = vshll.u32 %v9406_v31, 16  ;;  %7514 = vmatprep.subr.bf16.mxu0 %v7676_v7  ;;  %v9437_v50 = vsel %vm8375_vm14, %v3795_v29, %v3796_v36  ;;  %v4544_v17 = vrot.slane %v4542_v30, 4  ;;  %10557 = vst [vmem:[#allocation10_spill] sm:$0xff] %v9439_v33  ;;  %v7671_v36 = vld [vmem:[%s10470_s3 + $0x190] sm:$0xff]   ;;  %v9461_v30 = vpop.f32.mrf.mxu1  ;;  %10575 = vst [vmem:[#allocation26_spill] sm:$0xff] %v9558_v47 }
 0x15b   : > { %v4527_v39 = vsel %vm7915_vm9, %v4522_v61, %v4526_v19  ;;  %v6505_v18 = vrot.slane %v3702_v49, 9  ;;  %v3800_v8 = vrot.slane %v7736_v22, 5  ;;  %v3803_v45 = vrot.slane %v7737_v26, 5  ;;  %v9443_v19 = vld [vmem:[#allocation2 + $0x8c] sm:$0x1]  ;;  %10560 = vst [vmem:[#allocation11_spill] sm:$0xff] %v9461_v30 }
 0x15c   : > { %v6544_v14 = vcombine.low %v4517_v28, %v4527_v39  ;;  %v4535_v42 = vor.u32 %v4534_v20, %v4531_v37  ;;  %v4550_v12 = vrot.slane %v4548_v55, 5  ;;  %v4545_v60 = vor.u32 %v4544_v17, %v4540_v57  ;;  %10559 = vst [vmem:[#allocation7_spill] sm:$0xff] %v9443_v19  ;;  %7515 = vmatpush3.bf16.msra.mxu0 %v7676_v7  ;;  %v3703_v37 = vld [vmem:[#allocation2 + $0x78] sm:$0xe]  ;;  %v7741_v30 = vld [vmem:[#allocation2 + $0x8c] sm:$0x1] }
 0x15d   : > { %7459 = vmatpush3.bf16.msra.mxu1 %v7667_v24  ;;  %v4553_v9 = vshrl.u32 %v9429_v4, 16  ;;  %v4556_v6 = vshll.u32 %v9429_v4, 16  ;;  %v9452_v63 = vsel %vm8375_vm14, %v6505_v18, %v3800_v8  ;;  %v3802_v29 = vrot.slane %v3800_v8, 4 }
 0x15e   : > { %7460 = vmatprep.subr.bf16.mxu1 %v7669_v13  ;;  %7433 = vmatmul.mubr.bf16.gmra.mxu0 %v6544_v14  ;;  %v4536_v24 = vrot.slane %v4535_v42, 4  ;;  %v4562_v16 = vshll.u32 %v9439_v33, 16  ;;  %v4546_v49 = vrot.slane %v4545_v60, 4  ;;  %v4566_v7 = vshrl.u32 %v9439_v33, 16  ;;  %v9472_v14 = vld [vmem:[#allocation2 + $0x90] sm:$0xf] }
 0x15f   : > { %v4555_v28 = vrot.slane %v4553_v9, 4  ;;  %v4558_v61 = vrot.slane %v4556_v6, 5  ;;  %v3804_v55 = vsel %vm8375_vm14, %v3802_v29, %v3803_v45  ;;  %v4572_v17 = vshll.u32 %v9443_v19, 16  ;;  %v7738_v60 = vld [vmem:[#allocation2 + $0x7c] sm:$0xf]  ;;  %v9482_v6 = vpop.f32.mrf.mxu1 }
 0x160   : > { %7381 = vmatmul.mubr.bf16.gmra.mxu1 %v6518_v44  ;;  %v4541_v20 = vsel %vm7915_vm9, %v4536_v24, %v4540_v57  ;;  %v4564_v39 = vrot.slane %v4562_v16, 5  ;;  %v6520_v56 = vcombine.low %v9426_v58, %v9437_v50  ;;  %v4551_v23 = vsel %vm7915_vm9, %v4546_v49, %v4550_v12  ;;  %v7673_v57 = vld [vmem:[%s10470_s3 + $0x188] sm:$0xff]   ;;  %v9480_v58 = vpop.f32.mrf.mxu0  ;;  %v7739_v45 = vld [vmem:[#allocation2 + $0x80] sm:$0x1]  ;;  %10561 = vst [vmem:[#allocation12_spill] sm:$0xff] %v9482_v6 }
 0x161   : > { %7384 = vmatprep.mubr.bf16.mxu1 %v6519_v2  ;;  %7461 = vmatpush3.bf16.msra.mxu1 %v7669_v13  ;;  %v4559_v44 = vor.u32 %v4558_v61, %v4555_v28  ;;  %v4568_v18 = vrot.slane %v4566_v7, 4  ;;  %v9474_v2 = vld [vmem:[#allocation2 + $0x94] sm:$0xf]  ;;  %v6545_v42 = vcombine.low %v4541_v20, %v4551_v23  ;;  %v6521_v13 = vcombine.low %v9452_v63, %v3804_v55  ;;  %v9484_v24 = vld [vmem:[#allocation2 + $0x98] sm:$0x1] }
 0x162   : > { %7462 = vmatprep.subr.bf16.mxu1 %v7671_v36  ;;  %v4574_v22 = vrot.slane %v4572_v17, 5  ;;  %v6506_v8 = vrot.slane %v3703_v37, 9  ;;  %v3807_v26 = vrot.slane %v7738_v60, 5  ;;  %v3810_v9 = vrot.slane %v7739_v45, 5  ;;  %v3704_v28 = vld [vmem:[#allocation2 + $0x84] sm:$0xe] }
 0x163   : > { %v4560_v50 = vrot.slane %v4559_v44, 4  ;;  %v4569_v12 = vor.u32 %v4568_v18, %v4564_v39  ;;  %7436 = vmatprep.mubr.bf16.mxu0 %v6545_v42  ;;  %v4577_v29 = vshrl.u32 %v9472_v14, 16  ;;  %v4580_v16 = vshll.u32 %v9472_v14, 16  ;;  %v9494_v55 = vld [vmem:[#allocation2 + $0x9c] sm:$0xf]  ;;  %v9496_v42 = vpop.f32.mrf.mxu0 }
 0x164   : > { %v4586_v63 = vshll.u32 %v9474_v2, 16  ;;  %v4590_v49 = vshrl.u32 %v9474_v2, 16  ;;  %v3808_v37 = vsel %vm8375_vm14, %v6506_v8, %v3807_v26  ;;  %v3809_v20 = vrot.slane %v3807_v26, 4  ;;  %10562 = vst [vmem:[#allocation13_spill] sm:$0xff] %v9494_v55  ;;  %v9506_v60 = vld [vmem:[#allocation2 + $0xa0] sm:$0xf]  ;;  %v9508_v26 = vpop.f32.mrf.mxu1 }
 0x165   : > { %7463 = vmatpush3.bf16.msra.mxu1 %v7671_v36  ;;  %v4565_v61 = vsel %vm7915_vm9, %v4560_v50, %v4564_v39  ;;  %v4570_v7 = vrot.slane %v4569_v12, 4  ;;  %v4579_v17 = vrot.slane %v4577_v29, 4  ;;  %v4582_v23 = vrot.slane %v4580_v16, 5  ;;  %v7675_v36 = vld [vmem:[%s10470_s3 + $0x180] sm:$0xff]   ;;  %10563 = vst [vmem:[#allocation14_spill] sm:$0xff] %v9506_v60  ;;  %10564 = vst [vmem:[#allocation15_spill] sm:$0xff] %v9508_v26 }
 0x166   : > { %7464 = vmatprep.subr.bf16.mxu1 %v7673_v57  ;;  %v4588_v44 = vrot.slane %v4586_v63, 5  ;;  %v4592_v18 = vrot.slane %v4590_v49, 4  ;;  %v3811_v8 = vsel %vm8375_vm14, %v3809_v20, %v3810_v9  ;;  %v4596_v50 = vshll.u32 %v9484_v24, 16  ;;  %v9511_v20 = vld [vmem:[#allocation2 + $0xa4] sm:$0x1] }
 0x167   : > { %v4575_v39 = vsel %vm7915_vm9, %v4570_v7, %v4574_v22  ;;  %v6507_v12 = vrot.slane %v3704_v28, 9  ;;  %v6522_v29 = vcombine.low %v3808_v37, %v3811_v8  ;;  %v4583_v16 = vor.u32 %v4582_v23, %v4579_v17  ;;  %10565 = vst [vmem:[#allocation16_spill] sm:$0xff] %v9511_v20  ;;  %v9556_v19 = vld [vmem:[#allocation2 + $0xb4] sm:$0xf]  ;;  %v7744_v33 = vld [vmem:[#allocation2 + $0xa0] sm:$0xf] }
 0x168   : > { %7385 = vmatmul.mubr.bf16.gmra.mxu1 %v6520_v56  ;;  %v6546_v45 = vcombine.low %v4565_v61, %v4575_v39  ;;  %v4593_v63 = vor.u32 %v4592_v18, %v4588_v44  ;;  %v4598_v49 = vrot.slane %v4596_v50, 5  ;;  %v7740_v56 = vld [vmem:[#allocation2 + $0x88] sm:$0xf]  ;;  %v3817_v22 = vrot.slane %v7741_v30, 5  ;;  %v9515_v61 = vpop.f32.mrf.mxu0  ;;  %v9520_v18 = vpop.f32.mrf.mxu1  ;;  %10574 = vst [vmem:[#allocation25_spill] sm:$0xff] %v9556_v19 }
 0x169   : > { %7388 = vmatprep.mubr.bf16.mxu1 %v6521_v13  ;;  %v3814_v6 = vrot.slane %v7740_v56, 5  ;;  %v4601_v7 = vshrl.u32 %v9494_v55, 16  ;;  %7465 = vmatpush3.bf16.msra.mxu1 %v7673_v57  ;;  %v4584_v9 = vrot.slane %v4583_v16, 4  ;;  %v4604_v26 = vshll.u32 %v9494_v55, 16  ;;  %v3705_v57 = vld [vmem:[#allocation2 + $0x90] sm:$0xe] }
 0x16a   : > { %7437 = vmatmul.mubr.bf16.gmra.mxu0 %v6546_v45  ;;  %v4594_v28 = vrot.slane %v4593_v63, 4  ;;  %v4610_v13 = vshll.u32 %v9506_v60, 16  ;;  %7466 = vmatprep.subr.bf16.mxu1 %v7675_v36  ;;  %v4614_v23 = vshrl.u32 %v9506_v60, 16  ;;  %10566 = vst [vmem:[#allocation17_spill] sm:$0xff] %v9520_v18  ;;  %v9529_v56 = vld [vmem:[#allocation2 + $0xa8] sm:$0xf] }
 0x16b   : > { %v3815_v37 = vsel %vm8375_vm14, %v6507_v12, %v3814_v6  ;;  %v3816_v17 = vrot.slane %v3814_v6, 4  ;;  %v4603_v30 = vrot.slane %v4601_v7, 4  ;;  %v4589_v39 = vsel %vm7915_vm9, %v4584_v9, %v4588_v44  ;;  %10567 = vst [vmem:[#allocation18_spill] sm:$0xff] %v9529_v56  ;;  %v9531_v7 = vld [vmem:[#allocation2 + $0xac] sm:$0xf]  ;;  %v9533_v9 = vpop.f32.mrf.mxu0 }
 0x16c   : > { %v4599_v8 = vsel %vm7915_vm9, %v4594_v28, %v4598_v49  ;;  %v4606_v50 = vrot.slane %v4604_v26, 5  ;;  %v4612_v45 = vrot.slane %v4610_v13, 5  ;;  %v4616_v12 = vrot.slane %v4614_v23, 4  ;;  %10568 = vst [vmem:[#allocation19_spill] sm:$0xff] %v9531_v7  ;;  %10569 = vst [vmem:[#allocation20_spill] sm:$0xff] %v9533_v9  ;;  %v9535_v23 = vpop.f32.mrf.mxu1 }
 0x16d   : > { %v6547_v16 = vcombine.low %v4589_v39, %v4599_v8  ;;  %v3818_v63 = vsel %vm8375_vm14, %v3816_v17, %v3817_v22  ;;  %v4620_v6 = vshll.u32 %v9511_v20, 16  ;;  %7467 = vmatpush3.bf16.msra.mxu1 %v7675_v36  ;;  %v6508_v44 = vrot.slane %v3705_v57, 9  ;;  %v7742_v28 = vld [vmem:[#allocation2 + $0x94] sm:$0xf]  ;;  %v7743_v22 = vld [vmem:[#allocation2 + $0x98] sm:$0x1] }
 0x16e   : > { %v6523_v18 = vcombine.low %v3815_v37, %v3818_v63  ;;  %v4607_v52 = vor.u32 %v4606_v50, %v4603_v30  ;;  %v4617_v26 = vor.u32 %v4616_v12, %v4612_v45  ;;  %v3821_v13 = vrot.slane %v7742_v28, 5  ;;  %10570 = vst [vmem:[#allocation21_spill] sm:$0xff] %v9535_v23  ;;  %v9537_v8 = vld [vmem:[#allocation2 + $0xb0] sm:$0x1]  ;;  %v3706_v63 = vld [vmem:[#allocation2 + $0x9c] sm:$0xe]  ;;  %v9547_v28 = vpop.f32.mrf.mxu0  ;;  %v9553_v23 = vpop.f32.mrf.mxu1 }
 0x16f   : > { %7440 = vmatprep.mubr.bf16.mxu0 %v6547_v16  ;;  %v4622_v49 = vrot.slane %v4620_v6, 5  ;;  %v3824_v17 = vrot.slane %v7743_v22, 5  ;;  %10571 = vst [vmem:[#allocation22_spill] sm:$0xff] %v9537_v8  ;;  %v4625_v36 = vshrl.u32 %v9529_v56, 16  ;;  %v4628_v37 = vshll.u32 %v9529_v56, 16  ;;  %10572 = vst [vmem:[#allocation23_spill] sm:$0xff] %v9547_v28 }
 0x170   : > { %7389 = vmatmul.mubr.bf16.gmra.mxu1 %v6522_v29  ;;  %v4608_v39 = vrot.slane %v4607_v52, 4  ;;  %v4634_v30 = vshll.u32 %v9531_v7, 16  ;;  %v4618_v29 = vrot.slane %v4617_v26, 4  ;;  %v3822_v57 = vsel %vm8375_vm14, %v6508_v44, %v3821_v13  ;;  %10573 = vst [vmem:[#allocation24_spill] sm:$0xff] %v9553_v23 }
 0x171   : > { %7392 = vmatprep.mubr.bf16.mxu1 %v6523_v18  ;;  %v3823_v50 = vrot.slane %v3821_v13, 4  ;;  %v4638_v16 = vshrl.u32 %v9531_v7, 16  ;;  %v4627_v52 = vrot.slane %v4625_v36, 4  ;;  %v4630_v12 = vrot.slane %v4628_v37, 5 }
 0x172   : > { %v4613_v18 = vsel %vm7915_vm9, %v4608_v39, %v4612_v45  ;;  %v4636_v6 = vrot.slane %v4634_v30, 5  ;;  %v4623_v22 = vsel %vm7915_vm9, %v4618_v29, %v4622_v49  ;;  %v4644_v13 = vshll.u32 %v9537_v8, 16  ;;  %v7745_v29 = vld [vmem:[#allocation2 + $0xa4] sm:$0x1] }
 0x173   : > { %v3825_v26 = vsel %vm8375_vm14, %v3823_v50, %v3824_v17  ;;  %v4640_v44 = vrot.slane %v4638_v16, 4  ;;  %v6548_v45 = vcombine.low %v4613_v18, %v4623_v22  ;;  %v4631_v36 = vor.u32 %v4630_v12, %v4627_v52  ;;  %v9560_v50 = vld [vmem:[#allocation2 + $0xbc] sm:$0x1]  ;;  %v9565_v18 = vpop.f32.mrf.mxu0  ;;  %v9570_v12 = vpop.f32.mrf.mxu1 }
 0x174   : > { %v6524_v39 = vcombine.low %v3822_v57, %v3825_v26  ;;  %v6509_v37 = vrot.slane %v3706_v63, 9  ;;  %v4646_v4 = vrot.slane %v4644_v13, 5  ;;  %v3828_v49 = vrot.slane %v7744_v33, 5  ;;  %10576 = vst [vmem:[#allocation27_spill] sm:$0xff] %v9565_v18  ;;  %10577 = vst [vmem:[#allocation28_spill] sm:$0xff] %v9570_v12 }
 0x175   : > { %v4641_v30 = vor.u32 %v4640_v44, %v4636_v6  ;;  %v3831_v56 = vrot.slane %v7745_v29, 5  ;;  %7441 = vmatmul.mubr.bf16.gmra.mxu0 %v6548_v45  ;;  %v4632_v17 = vrot.slane %v4631_v36, 4  ;;  %v4649_v16 = vshrl.u32 %v9556_v19, 16  ;;  %v3707_v45 = vld [vmem:[#allocation2 + $0xa8] sm:$0xe]  ;;  %v9574_v36 = vpop.f32.mrf.mxu0 }
 0x176   : > { %v4652_v23 = vshll.u32 %v9556_v19, 16  ;;  %v4658_v8 = vshll.u32 %v9558_v47, 16  ;;  %v3829_v63 = vsel %vm8375_vm14, %v6509_v37, %v3828_v49  ;;  %v3830_v33 = vrot.slane %v3828_v49, 4  ;;  %10578 = vst [vmem:[#allocation29_spill] sm:$0xff] %v9574_v36  ;;  %v9581_v29 = vld [vmem:[#allocation2 + $0xc0] sm:$0xf] }
 0x177   : > { %v4642_v57 = vrot.slane %v4641_v30, 4  ;;  %v4662_v52 = vshrl.u32 %v9558_v47, 16  ;;  %v4637_v22 = vsel %vm7915_vm9, %v4632_v17, %v4636_v6  ;;  %v4651_v26 = vrot.slane %v4649_v16, 4  ;;  %10579 = vst [vmem:[#allocation30_spill] sm:$0xff] %v9581_v29  ;;  %v9583_v17 = vld [vmem:[#allocation2 + $0xc4] sm:$0xf] }
 0x178   : > { %7393 = vmatmul.mubr.bf16.gmra.mxu1 %v6524_v39  ;;  %v4654_v44 = vrot.slane %v4652_v23, 5  ;;  %v4660_v13 = vrot.slane %v4658_v8, 5  ;;  %v3832_v37 = vsel %vm8375_vm14, %v3830_v33, %v3831_v56  ;;  %v4668_v49 = vshll.u32 %v9560_v50, 16  ;;  %10580 = vst [vmem:[#allocation31_spill] sm:$0xff] %v9583_v17  ;;  %v9585_v23 = vpop.f32.mrf.mxu0  ;;  %v7746_v47 = vld [vmem:[#allocation2 + $0xac] sm:$0xf] }
 0x179   : > { %v4647_v39 = vsel %vm7915_vm9, %v4642_v57, %v4646_v4  ;;  %v4664_v30 = vrot.slane %v4662_v52, 4  ;;  %v6525_v19 = vcombine.low %v3829_v63, %v3832_v37  ;;  %10581 = vst [vmem:[#allocation32_spill] sm:$0xff] %v9585_v23  ;;  %v6510_v36 = vrot.slane %v3707_v45, 9  ;;  %v9587_v57 = vpop.f32.mrf.mxu1  ;;  %v7747_v33 = vld [vmem:[#allocation2 + $0xb0] sm:$0x1] }
 0x17a   : > { %v6549_v12 = vcombine.low %v4637_v22, %v4647_v39  ;;  %v4655_v6 = vor.u32 %v4654_v44, %v4651_v26  ;;  %v4670_v16 = vrot.slane %v4668_v49, 5  ;;  %v3835_v4 = vrot.slane %v7746_v47, 5  ;;  %10582 = vst [vmem:[#allocation33_spill] sm:$0xff] %v9587_v57  ;;  %v9589_v18 = vld [vmem:[#allocation2 + $0xc8] sm:$0x1]  ;;  %v9593_v26 = vpop.f32.mrf.mxu0 }
 0x17b   : > { %v4665_v8 = vor.u32 %v4664_v30, %v4660_v13  ;;  %7396 = vmatprep.mubr.bf16.mxu1 %v6525_v19  ;;  %v3838_v52 = vrot.slane %v7747_v33, 5  ;;  %10583 = vst [vmem:[#allocation34_spill] sm:$0xff] %v9589_v18  ;;  %v4673_v63 = vshrl.u32 %v9581_v29, 16  ;;  %v4676_v22 = vshll.u32 %v9581_v29, 16  ;;  %10584 = vst [vmem:[#allocation35_spill] sm:$0xff] %v9593_v26 }
 0x17c   : > { %7444 = vmatprep.mubr.bf16.mxu0 %v6549_v12  ;;  %v4656_v56 = vrot.slane %v4655_v6, 4  ;;  %v3836_v45 = vsel %vm8375_vm14, %v6510_v36, %v3835_v4  ;;  %v3837_v47 = vrot.slane %v3835_v4, 4  ;;  %v4682_v39 = vshll.u32 %v9583_v17, 16  ;;  %v3708_v49 = vld [vmem:[#allocation2 + $0xb4] sm:$0xe]  ;;  %v9601_v6 = vpop.f32.mrf.mxu0  ;;  %v9607_v36 = vpop.f32.mrf.mxu1 }
 0x17d   : > { %v4666_v44 = vrot.slane %v4665_v8, 4  ;;  %v4675_v12 = vrot.slane %v4673_v63, 4  ;;  %v4678_v37 = vrot.slane %v4676_v22, 5  ;;  %v4686_v30 = vshrl.u32 %v9583_v17, 16  ;;  %10585 = vst [vmem:[#allocation36_spill] sm:$0xff] %v9607_v36 }
 0x17e   : > { %v4661_v19 = vsel %vm7915_vm9, %v4656_v56, %v4660_v13  ;;  %v3839_v8 = vsel %vm8375_vm14, %v3837_v47, %v3838_v52  ;;  %v4684_v4 = vrot.slane %v4682_v39, 5  ;;  %v4692_v57 = vshll.u32 %v9589_v18, 16  ;;  %v499_v26 = vld [vmem:[#allocation2 + $0xcc] sm:$0x1]  ;;  %v555_v13 = vld [vmem:[#allocation2 + $0xd4] sm:$0x1]  ;;  %v9612_v17 = vpop.f32.mrf.mxu0 }
 0x17f   : > { %v4671_v33 = vsel %vm7915_vm9, %v4666_v44, %v4670_v16  ;;  %v6526_v63 = vcombine.low %v3836_v45, %v3839_v8  ;;  %v4679_v22 = vor.u32 %v4678_v37, %v4675_v12  ;;  %v4688_v29 = vrot.slane %v4686_v30, 4  ;;  %v9610_v23 = vld [vmem:[#allocation2 + $0xd0] sm:$0xf]  ;;  %v7748_v44 = vld [vmem:[#allocation2 + $0xb8] sm:$0xf]  ;;  %v9620_v37 = vpop.f32.mrf.mxu1 }
 0x180   : > { %v6550_v56 = vcombine.low %v4661_v19, %v4671_v33  ;;  %10586 = vst [vmem:[#allocation37_spill] sm:$0xff] %v9610_v23  ;;  %v4694_v28 = vrot.slane %v4692_v57, 5  ;;  %v6511_v16 = vrot.slane %v3708_v49, 9  ;;  %v3842_v7 = vrot.slane %v7748_v44, 5  ;;  %v7749_v52 = vld [vmem:[#allocation2 + $0xbc] sm:$0x1]  ;;  %v9618_v12 = vpop.f32.mrf.mxu0 }
 0x181   : > { %v3845_v47 = vrot.slane %v7749_v52, 5  ;;  %v3709_v36 = vld [vmem:[#allocation2 + $0xc0] sm:$0xe]  ;;  %7397 = vmatmul.mubr.bf16.gmra.mxu1 %v6526_v63  ;;  %v4680_v39 = vrot.slane %v4679_v22, 4  ;;  %v4689_v18 = vor.u32 %v4688_v29, %v4684_v4  ;;  %v500_v45 = vsel %vm7844_vm3, 0, %v499_v26  ;;  %10587 = vst [vmem:[#allocation38_spill] sm:$0xff] %v9620_v37 }
 0x182   : > { %7445 = vmatmul.mubr.bf16.gmra.mxu0 %v6550_v56  ;;  %v556_v19 = vsel %vm7852_vm4, 0, %v555_v13  ;;  %v3843_v57 = vsel %vm8375_vm14, %v6511_v16, %v3842_v7  ;;  %v3844_v30 = vrot.slane %v3842_v7, 4  ;;  %501 = vst [vmem:[#allocation2 + $0xcc] sm:$0x1] %v500_v45  ;;  %v4706_v49 = vshll.u32 %v9610_v23, 16  ;;  %v9629_v8 = vpop.f32.mrf.mxu0 }
 0x183   : > { %557 = vst [vmem:[#allocation2 + $0xd4] sm:$0x1] %v556_v19  ;;  %v4710_v29 = vshrl.u32 %v9610_v23, 16  ;;  %v4685_v32 = vsel %vm7915_vm9, %v4680_v39, %v4684_v4  ;;  %v4690_v26 = vrot.slane %v4689_v18, 4  ;;  %v6512_v3 = vrot.slane %v3709_v36, 9 }
 0x184   : > { %v3849_v33 = vrot.slane %v9223_v41, 5  ;;  %v3846_v13 = vsel %vm8375_vm14, %v3844_v30, %v3845_v47  ;;  %v9633_v56 = vrot.slane %v4706_v49, 5  ;;  %v3852_v63 = vrot.slane %v9225_v62, 5  ;;  %v5314_v4 = vld [vmem:[#allocation2 + $0x18] sm:$0xe]  ;;  %v9640_v41 = vpop.f32.mrf.mxu0 }
 0x185   : > { %v4712_v7 = vrot.slane %v4710_v29, 4  ;;  %v4695_v22 = vsel %vm7915_vm9, %v4690_v26, %v4694_v28  ;;  %v6527_v16 = vcombine.low %v3843_v57, %v3846_v13  ;;  %v9642_v52 = vpop.f32.mrf.mxu1  ;;  %v7750_v47 = vld [vmem:[#allocation2 + $0x1c] sm:$0xf]  ;;  %v5315_v45 = vld [vmem:[#allocation2 + $0x24] sm:$0xe]  ;;  %v6585_v13 = vrot.slane %v5314_v4, 9 }
 0x186   : > { %v3850_v18 = vsel %vm8375_vm14, %v6512_v3, %v3849_v33  ;;  %v3851_v36 = vrot.slane %v3849_v33, 4  ;;  %v6551_v44 = vcombine.low %v4685_v32, %v4695_v22  ;;  %10588 = vst [vmem:[#allocation39_spill] sm:$0xff] %v9642_v52  ;;  %v5364_v39 = vrot.slane %v7750_v47, 5  ;;  %v7751_v19 = vld [vmem:[#allocation2 + $0x2c] sm:$0x1]  ;;  %v9649_v26 = vpop.f32.mrf.mxu0 }
 0x187   : > { %v5374_v30 = vrot.slane %v7751_v19, 5  ;;  %7400 = vmatprep.mubr.bf16.mxu1 %v6527_v16  ;;  %v7752_v28 = vld [vmem:[#allocation2 + $0x18] sm:$0xf]  ;;  %v9646_v49 = vld [vmem:[#allocation2 + $0x28] sm:$0xf]  ;;  %v4713_v32 = vor.u32 %v4712_v7, %v9633_v56  ;;  %v9652_v33 = vpop.f32.mrf.mxu1 }
 0x188   : > { %v3853_v62 = vsel %vm8375_vm14, %v3851_v36, %v3852_v63  ;;  %v6561_v57 = vcombine.low %v7752_v28, %v7750_v47  ;;  %v5371_v29 = vrot.slane %v9646_v49, 5  ;;  %7448 = vmatprep.mubr.bf16.mxu0 %v6551_v44  ;;  %10589 = vst [vmem:[#allocation40_spill] sm:$0xff] %v9652_v33  ;;  %v7754_v22 = vld [vmem:[#allocation2 + $0x20] sm:$0x1]  ;;  %v5366_v36 = vrot.slane %v5364_v39, 4  ;;  %v9658_v28 = vpop.f32.mrf.mxu0 }
 0x189   : > { %v6528_v3 = vcombine.low %v3850_v18, %v3853_v62  ;;  %v5367_v16 = vrot.slane %v7754_v22, 5  ;;  %v9654_v19 = vld [vmem:[#allocation2 + $0xcc] sm:$0xf]  ;;  %v6586_v47 = vrot.slane %v5315_v45, 9  ;;  %v9663_v18 = vpop.f32.mrf.mxu1  ;;  %v5316_v45 = vld [vmem:[#allocation2 + $0x30] sm:$0xe]  ;;  %v5365_v62 = vsel %vm8375_vm14, %v6585_v13, %v5364_v39 }
 0x18a   : > { %10590 = vst [vmem:[#allocation41_spill] sm:$0xff] %v9654_v19  ;;  %v9656_v63 = vld [vmem:[#allocation2 + $0xd4] sm:$0x1]  ;;  %v4697_v52 = vshrl.u32 %v9654_v19, 16  ;;  %v4700_v44 = vshll.u32 %v9654_v19, 16  ;;  %10591 = vst [vmem:[#allocation42_spill] sm:$0xff] %v9663_v18  ;;  %v9668_v55 = vpop.f32.mrf.mxu0 }
 0x18b   : > { %v4716_v7 = vshll.u32 %v9656_v63, 16  ;;  %7401 = vmatmul.mubr.bf16.gmra.mxu1 %v6528_v3  ;;  %v5373_v4 = vrot.slane %v5371_v29, 4  ;;  %v7755_v37 = vld [vmem:[#allocation2 + $0x34] sm:$0xf]  ;;  %v4714_v51 = vrot.slane %v4713_v32, 4  ;;  %v9670_v3 = vpop.f32.mrf.mxu1  ;;  %v9677_v33 = vsel %vm8375_vm14, %v6586_v47, %v5371_v29 }
 0x18c   : > { %7468 = vmatprep.mubr.bf16.mxu1 %v6561_v57  ;;  %v5378_v23 = vrot.slane %v7755_v37, 5  ;;  %v4699_v60 = vrot.slane %v4697_v52, 4  ;;  %v4702_v19 = vrot.slane %v4700_v44, 5  ;;  %10592 = vst [vmem:[#allocation43_spill] sm:$0xff] %v9670_v3  ;;  %v7756_v57 = vld [vmem:[#allocation2 + $0x24] sm:$0xf]  ;;  %v9680_v53 = vpop.f32.mrf.mxu0  ;;  %v5368_v32 = vsel %vm8375_vm14, %v5366_v36, %v5367_v16 }
 0x18d   : > { %v4718_v9 = vrot.slane %v4716_v7, 5  ;;  %v6562_v22 = vcombine.low %v7756_v57, %v9646_v49  ;;  %v9686_v44 = vsel %vm8375_vm14, %v5373_v4, %v5374_v30  ;;  %v7182_v7 = vpop.f32.mrf.mxu1  ;;  %v6587_v18 = vrot.slane %v5316_v45, 9  ;;  %v7757_v29 = vld [vmem:[#allocation2 + $0x38] sm:$0x1]  ;;  %v7758_v3 = vld [vmem:[#allocation2 + $0x30] sm:$0xf] }
 0x18e   : > { %v4703_v52 = vor.u32 %v4702_v19, %v4699_v60  ;;  %v2018_v39 = vadd.f32 %v7182_v7, %v9297_v5  ;;  %v5380_v13 = vrot.slane %v5378_v23, 4  ;;  %v5381_v47 = vrot.slane %v7757_v29, 5  ;;  %v5317_v49 = vld [vmem:[#allocation2 + $0x3c] sm:$0xe]  ;;  %v9689_v57 = vpop.f32.mrf.mxu0  ;;  %v7759_v36 = vld [vmem:[#allocation2 + $0x40] sm:$0xf] }
 0x18f   : > { %v6563_v20 = vcombine.low %v7758_v3, %v7755_v37  ;;  %v4719_v16 = vsel %vm7915_vm9, %v4714_v51, %v4718_v9  ;;  %v2009_v30 = vpop.f32.mrf.mxu1  ;;  %v5385_v4 = vrot.slane %v7759_v36, 5  ;;  %v6601_v45 = vcombine.low %v5365_v62, %v5368_v32  ;;  %v5318_v29 = vld [vmem:[#allocation2 + $0x48] sm:$0xe] }
 0x190   : > { %v4704_v19 = vrot.slane %v4703_v52, 4  ;;  %v9695_v5 = vadd.f32 %v9601_v6, %v2018_v39  ;;  %v2010_v7 = vadd.f32 %v2009_v30, %v9325_v11  ;;  %v5392_v37 = vrot.slane %v9265_v35, 5  ;;  %v9699_v3 = vpop.f32.mrf.mxu0 }
 0x191   : > { %v7183_v9 = vpop.f32.mrf.mxu1  ;;  %v9708_v6 = vsel %vm8375_vm14, %v6587_v18, %v5378_v23  ;;  %v6588_v62 = vrot.slane %v5317_v49, 9  ;;  %v9716_v0 = vsel %vm8375_vm14, %v5380_v13, %v5381_v47  ;;  %v5387_v30 = vrot.slane %v5385_v4, 4  ;;  %v7760_v18 = vld [vmem:[#allocation2 + $0x50] sm:$0x1] }
 0x192   : > { %v4709_v52 = vsel %vm7915_vm9, %v4704_v19, %v9633_v56  ;;  %v9711_v32 = vadd.f32 %v9612_v17, %v2010_v7  ;;  %v2021_v35 = vadd.f32 %v7183_v9, %v9341_v1  ;;  %v5319_v56 = vld [vmem:[#allocation2 + $0x54] sm:$0xe]  ;;  %v9718_v39 = vpop.f32.mrf.mxu0  ;;  %v6589_v23 = vrot.slane %v5318_v29, 9 }
 0x193   : > { %7469 = vmatmul.mubr.bf16.vlgmr.msra.gmra.mxu1 %v6562_v22  ;;  %v6552_v11 = vcombine.low %v4709_v52, %v4719_v16  ;;  %v5320_v22 = vld [vmem:[#allocation2 + $0x60] sm:$0xe]  ;;  %v2012_v19 = vpop.f32.mrf.mxu1  ;;  %v5395_v49 = vrot.slane %v7760_v18, 5  ;;  %v5399_v16 = vrot.slane %v9287_v21, 5  ;;  %v5394_v13 = vrot.slane %v5392_v37, 4 }
 0x194   : > { %7472 = vmatprep.mubr.bf16.mxu1 %v6563_v20  ;;  %v9722_v17 = vadd.f32 %v9618_v12, %v2021_v35  ;;  %v2013_v1 = vadd.f32 %v2012_v19, %v9370_v10  ;;  %v5406_v20 = vrot.slane %v9312_v15, 5  ;;  %v9726_v47 = vpop.f32.mrf.mxu0  ;;  %v7761_v52 = vld [vmem:[#allocation2 + $0x3c] sm:$0xf]  ;;  %v6590_v29 = vrot.slane %v5319_v56, 9  ;;  %v7763_v35 = vld [vmem:[#allocation2 + $0x4c] sm:$0xf] }
 0x195   : > { %7449 = vmatmul.mubr.bf16.gmra.mxu0 %v6552_v11  ;;  %v7186_v7 = vpop.f32.mrf.mxu1  ;;  %v6564_v9 = vcombine.low %v7761_v52, %v7759_v36  ;;  %v5401_v60 = vrot.slane %v5399_v16, 4  ;;  %v6591_v18 = vrot.slane %v5320_v22, 9  ;;  %v7762_v11 = vld [vmem:[#allocation2 + $0x48] sm:$0xf]  ;;  %v5409_v19 = vrot.slane %v9327_v48, 5 }
 0x196   : > { %7516 = vmatprep.mubr.bf16.mxu0 %v6601_v45  ;;  %v9729_v21 = vadd.f32 %v9629_v8, %v2013_v1  ;;  %v2034_v12 = vadd.f32 %v7186_v7, %v9398_v27  ;;  %v6565_v10 = vcombine.low %v7762_v11, %v7763_v35  ;;  %v5321_v15 = vld [vmem:[#allocation2 + $0x6c] sm:$0xe]  ;;  %v9733_v51 = vpop.f32.mrf.mxu0  ;;  %v6603_v45 = vcombine.low %v9708_v6, %v9716_v0  ;;  %v7764_v11 = vld [vmem:[#allocation2 + $0x54] sm:$0xf]  ;;  %v7765_v35 = vld [vmem:[#allocation2 + $0x58] sm:$0xf] }
 0x197   : > { %v9739_v36 = vsel %vm8375_vm14, %v6588_v62, %v5385_v4  ;;  %v10593_v8 = vrot.slane %v9246_v34, 5  ;;  %v2025_v56 = vpop.f32.mrf.mxu1  ;;  %v5408_v22 = vrot.slane %v5406_v20, 4  ;;  %v9753_v6 = vsel %vm8375_vm14, %v6589_v23, %v5392_v37  ;;  %v5322_v62 = vld [vmem:[#allocation2 + $0x78] sm:$0xe] }
 0x198   : > { %v9748_v48 = vadd.f32 %v9640_v41, %v2034_v12  ;;  %v2026_v1 = vadd.f32 %v2025_v56, %v9431_v59  ;;  %v9757_v4 = vsel %vm8375_vm14, %v5394_v13, %v5395_v49  ;;  %v9759_v34 = vpop.f32.mrf.mxu0  ;;  %v10594_v41 = vrot.slane %v9291_v38, 5 }
 0x199   : > { %v9745_v27 = vsel %vm8375_vm14, %v5387_v30, %v10593_v8  ;;  %v7187_v0 = vpop.f32.mrf.mxu1  ;;  %v9763_v30 = vsel %vm8375_vm14, %v6590_v29, %v5399_v16  ;;  %v9773_v37 = vsel %vm8375_vm14, %v6591_v18, %v5406_v20  ;;  %v6592_v23 = vrot.slane %v5321_v15, 9  ;;  %v5324_v15 = vld [vmem:[#allocation2 + $0x90] sm:$0xe]  ;;  %v7767_v8 = vld [vmem:[#allocation2 + $0x64] sm:$0xf] }
 0x19a   : > { %v9769_v59 = vsel %vm8375_vm14, %v5401_v60, %v10594_v41  ;;  %v9776_v49 = vadd.f32 %v9649_v26, %v2026_v1  ;;  %v2037_v13 = vadd.f32 %v7187_v0, %v9455_v46  ;;  %v9781_v16 = vsel %vm8375_vm14, %v5408_v22, %v5409_v19  ;;  %v9784_v7 = vpop.f32.mrf.mxu0 }
 0x19b   : > { %7473 = vmatmul.mubr.bf16.gmra.mxu1 %v6564_v9  ;;  %v5413_v38 = vrot.slane %v9355_v54, 5  ;;  %v6604_v20 = vcombine.low %v9739_v36, %v9745_v27  ;;  %v2028_v52 = vpop.f32.mrf.mxu1  ;;  %v6593_v9 = vrot.slane %v5322_v62, 9  ;;  %v5420_v26 = vrot.slane %v9394_v43, 5  ;;  %v5328_v36 = vld [vmem:[#allocation2 + $0xc0] sm:$0xe]  ;;  %v10610_v27 = vld [vmem:[#allocation16_spill] sm:$0xff] }
 0x19c   : > { %7476 = vmatprep.mubr.bf16.mxu1 %v6565_v10  ;;  %v10595_v46 = vcombine.low %v9677_v33, %v9686_v44  ;;  %v9794_v29 = vadd.f32 %v9658_v28, %v2037_v13  ;;  %v2029_v18 = vadd.f32 %v2028_v52, %v9480_v58  ;;  %v6605_v12 = vcombine.low %v9753_v6, %v9757_v4  ;;  %v9799_v19 = vpop.f32.mrf.mxu0  ;;  %v7766_v44 = vld [vmem:[#allocation2 + $0x60] sm:$0xf]  ;;  %v5325_v4 = vld [vmem:[#allocation2 + $0x9c] sm:$0xe] }
 0x19d   : > { %v6566_v10 = vcombine.low %v7764_v11, %v7765_v35  ;;  %v7190_v33 = vpop.f32.mrf.mxu1  ;;  %v6567_v58 = vcombine.low %v7766_v44, %v7767_v8  ;;  %v9815_v1 = vrot.slane %v5413_v38, 4  ;;  %v9821_v0 = vsel %vm8375_vm14, %v6593_v9, %v5420_v26 }
 0x19e   : > { %7517 = vmatmul.mubr.bf16.vlgmr.msra.gmra.mxu0 %v10595_v46  ;;  %v9808_v56 = vadd.f32 %v9668_v55, %v2029_v18  ;;  %v2050_v22 = vadd.f32 %v7190_v33, %v9496_v42  ;;  %v9817_v6 = vpop.f32.mrf.mxu0  ;;  %v9823_v41 = vrot.slane %v5420_v26, 4  ;;  %v6595_v55 = vrot.slane %v5324_v15, 9  ;;  %v5326_v18 = vld [vmem:[#allocation2 + $0xa8] sm:$0xe]  ;;  %v10599_v15 = vld [vmem:[#allocation20_spill] sm:$0xff] }
 0x19f   : > { %7520 = vmatprep.mubr.bf16.mxu0 %v6603_v45  ;;  %v9813_v45 = vsel %vm8375_vm14, %v6592_v23, %v5413_v38  ;;  %v2041_v62 = vpop.f32.mrf.mxu1  ;;  %v5434_v13 = vrot.slane %v9474_v2, 5  ;;  %v5437_v52 = vrot.slane %v9484_v24, 5  ;;  %v6596_v35 = vrot.slane %v5325_v4, 9  ;;  %v10600_v24 = vld [vmem:[#allocation9_spill] sm:$0xff] }
 0x1a0   : > { %10596 = vst [vmem:[#allocation44_spill] sm:$0xff] %v9808_v56  ;;  %v9827_v42 = vadd.f32 %v9680_v53, %v2050_v22  ;;  %v2042_v23 = vadd.f32 %v2041_v62, %v9515_v61  ;;  %v9830_v38 = vpop.f32.mrf.mxu0  ;;  %v6569_v44 = vcombine.low %v10600_v24, %v9394_v43  ;;  %v10602_v4 = vld [vmem:[#allocation13_spill] sm:$0xff]  ;;  %v10605_v43 = vld [vmem:[#allocation23_spill] sm:$0xff] }
 0x1a1   : > { %v7191_v9 = vpop.f32.mrf.mxu1  ;;  %v9838_v11 = vsel %vm8375_vm14, %v6595_v55, %v5434_v13  ;;  %v5436_v53 = vrot.slane %v5434_v13, 4 }
 0x1a2   : > { %10597 = vst [vmem:[#allocation45_spill] sm:$0xff] %v9827_v42  ;;  %v9841_v61 = vadd.f32 %v9689_v57, %v2042_v23  ;;  %v2053_v33 = vadd.f32 %v7191_v9, %v10599_v15  ;;  %v9846_v8 = vpop.f32.mrf.mxu0  ;;  %v6597_v57 = vrot.slane %v5326_v18, 9  ;;  %v10603_v23 = vld [vmem:[#allocation19_spill] sm:$0xff]  ;;  %v10620_v42 = vld [vmem:[#allocation34_spill] sm:$0xff] }
 0x1a3   : > { %7477 = vmatmul.mubr.bf16.gmra.mxu1 %v6566_v10  ;;  %v10601_v10 = vld [vmem:[#allocation14_spill] sm:$0xff]  ;;  %v2044_v62 = vpop.f32.mrf.mxu1  ;;  %v9851_v55 = vsel %vm8375_vm14, %v5436_v53, %v5437_v52  ;;  %v5448_v46 = vrot.slane %v10603_v23, 5  ;;  %v5327_v9 = vld [vmem:[#allocation2 + $0xb4] sm:$0xe] }
 0x1a4   : > { %10598 = vst [vmem:[#allocation46_spill] sm:$0xff] %v9841_v61  ;;  %7480 = vmatprep.mubr.bf16.mxu1 %v6567_v58  ;;  %v5441_v22 = vrot.slane %v10601_v10, 5  ;;  %v9857_v58 = vadd.f32 %v9699_v3, %v2053_v33  ;;  %v2045_v15 = vadd.f32 %v2044_v62, %v10605_v43  ;;  %v9862_v60 = vpop.f32.mrf.mxu0  ;;  %v10606_v33 = vld [vmem:[#allocation22_spill] sm:$0xff]  ;;  %v10608_v43 = vld [vmem:[#allocation27_spill] sm:$0xff] }
 0x1a5   : > { %v7194_v18 = vpop.f32.mrf.mxu1  ;;  %v5450_v3 = vrot.slane %v5448_v46, 4  ;;  %v5451_v13 = vrot.slane %v10606_v33, 5 }
 0x1a6   : > { %7521 = vmatmul.mubr.bf16.gmra.mxu0 %v6604_v20  ;;  %10604 = vst [vmem:[#allocation20_spill] sm:$0xff] %v9857_v58  ;;  %v9866_v52 = vsel %vm8375_vm14, %v6596_v35, %v5441_v22  ;;  %v5443_v53 = vrot.slane %v5441_v22, 4  ;;  %v9870_v20 = vsel %vm8375_vm14, %v6597_v57, %v5448_v46  ;;  %v9874_v62 = vadd.f32 %v9718_v39, %v2045_v15  ;;  %v9877_v26 = vpop.f32.mrf.mxu0  ;;  %v10609_v35 = vld [vmem:[#allocation18_spill] sm:$0xff] }
 0x1a7   : > { %7524 = vmatprep.mubr.bf16.mxu0 %v6605_v12  ;;  %v2066_v24 = vadd.f32 %v7194_v18, %v10608_v43  ;;  %v6598_v12 = vrot.slane %v5327_v9, 9  ;;  %v2057_v22 = vpop.f32.mrf.mxu1  ;;  %v10611_v58 = vrot.slane %v10610_v27, 5  ;;  %v9889_v39 = vsel %vm8375_vm14, %v5450_v3, %v5451_v13  ;;  %v10612_v57 = vld [vmem:[#allocation26_spill] sm:$0xff]  ;;  %v10613_v18 = vld [vmem:[#allocation25_spill] sm:$0xff] }
 0x1a8   : > { %10607 = vst [vmem:[#allocation9_spill] sm:$0xff] %v9874_v62  ;;  %v5455_v15 = vrot.slane %v10612_v57, 5  ;;  %v10615_v9 = vld [vmem:[#allocation29_spill] sm:$0xff]  ;;  %v9900_v62 = vpop.f32.mrf.mxu0  ;;  %v5329_v13 = vld [vmem:[#allocation2 + $0xcc] sm:$0xe] }
 0x1a9   : > { %v9885_v46 = vsel %vm8375_vm14, %v5443_v53, %v10611_v58  ;;  %v9895_v43 = vadd.f32 %v9726_v47, %v2066_v24  ;;  %v2058_v28 = vadd.f32 %v2057_v22, %v10615_v9  ;;  %v10616_v53 = vcombine.low %v9339_v25, %v9355_v54  ;;  %v7195_v3 = vpop.f32.mrf.mxu1  ;;  %v10617_v9 = vld [vmem:[#allocation31_spill] sm:$0xff]  ;;  %v10621_v54 = vld [vmem:[#allocation30_spill] sm:$0xff] }
 0x1aa   : > { %v9909_v47 = vsel %vm8375_vm14, %v6598_v12, %v5455_v15  ;;  %v5457_v24 = vrot.slane %v5455_v15, 4  ;;  %v6599_v22 = vrot.slane %v5328_v36, 9  ;;  %v5462_v33 = vrot.slane %v10617_v9, 5  ;;  %v9916_v58 = vpop.f32.mrf.mxu0 }
 0x1ab   : > { %10614 = vst [vmem:[#allocation14_spill] sm:$0xff] %v9895_v43  ;;  %7481 = vmatmul.mubr.bf16.gmra.mxu1 %v10616_v53  ;;  %v9913_v27 = vadd.f32 %v9733_v51, %v2058_v28  ;;  %v10619_v43 = vld [vmem:[#allocation32_spill] sm:$0xff]  ;;  %v5465_v25 = vrot.slane %v10620_v42, 5  ;;  %v2060_v56 = vpop.f32.mrf.mxu1  ;;  %v10622_v12 = vrot.slane %v9560_v50, 5  ;;  %v10623_v15 = vcombine.low %v9763_v30, %v9769_v59  ;;  %v10630_v30 = vld [vmem:[#allocation10_spill] sm:$0xff] }
 0x1ac   : > { %v2069_v61 = vadd.f32 %v7195_v3, %v10619_v43  ;;  %7484 = vmatprep.mubr.bf16.mxu1 %v6569_v44  ;;  %v9929_v51 = vsel %vm8375_vm14, %v6599_v22, %v5462_v33  ;;  %v5464_v28 = vrot.slane %v5462_v33, 4  ;;  %v6600_v44 = vrot.slane %v5329_v13, 9  ;;  %v10625_v43 = vld [vmem:[#allocation35_spill] sm:$0xff]  ;;  %v10628_v13 = vld [vmem:[#allocation8_spill] sm:$0xff] }
 0x1ad   : > { %10618 = vst [vmem:[#allocation13_spill] sm:$0xff] %v9913_v27  ;;  %v9925_v36 = vsel %vm8375_vm14, %v5457_v24, %v10622_v12  ;;  %v2061_v3 = vadd.f32 %v2060_v56, %v10625_v43  ;;  %v9938_v50 = vpop.f32.mrf.mxu0  ;;  %v10626_v12 = vld [vmem:[#allocation37_spill] sm:$0xff]  ;;  %v10627_v33 = vcombine.low %v9773_v37, %v9781_v16  ;;  %v10629_v22 = vrot.slane %v10628_v13, 5 }
 0x1ae   : > { %7525 = vmatmul.mubr.bf16.gmra.mxu0 %v10623_v15  ;;  %v9935_v42 = vadd.f32 %v9759_v34, %v2069_v61  ;;  %v5469_v53 = vrot.slane %v10626_v12, 5  ;;  %v5427_v59 = vrot.slane %v10630_v30, 5  ;;  %v7198_v56 = vpop.f32.mrf.mxu1  ;;  %v10631_v61 = vld [vmem:[#allocation5_spill] sm:$0xff]  ;;  %v9956_v43 = vsel %vm8375_vm14, %v5464_v28, %v5465_v25  ;;  %v10635_v28 = vld [vmem:[#allocation7_spill] sm:$0xff] }
 0x1af   : > { %7528 = vmatprep.mubr.bf16.mxu0 %v10627_v33  ;;  %v5417_v34 = vsel %vm8375_vm14, %v9815_v1, %v10629_v22  ;;  %v6570_v15 = vcombine.low %v10631_v61, %v10630_v30  ;;  %v9959_v24 = vadd.f32 %v9784_v7, %v2061_v3  ;;  %v10633_v37 = vrot.slane %v9406_v31, 5  ;;  %v5323_v1 = vld [vmem:[#allocation2 + $0x84] sm:$0xe]  ;;  %v10634_v33 = vld [vmem:[#allocation4_spill] sm:$0xff]  ;;  %v2557_v22 = vpop.f32.mrf.mxu0 }
 0x1b0   : > { %10624 = vst [vmem:[#allocation19_spill] sm:$0xff] %v9935_v42  ;;  %v2082_v13 = vadd.f32 %v7198_v56, %v10634_v33  ;;  %v2073_v61 = vpop.f32.mrf.mxu1  ;;  %v9971_v25 = vsel %vm8375_vm14, %v6600_v44, %v5469_v53  ;;  %v5471_v7 = vrot.slane %v5469_v53, 4  ;;  %v5430_v3 = vrot.slane %v10635_v28, 5  ;;  %v10641_v28 = vld [vmem:[#allocation15_spill] sm:$0xff] }
 0x1b1   : > { %10632 = vst [vmem:[#allocation23_spill] sm:$0xff] %v9959_v24  ;;  %v5424_v16 = vsel %vm8375_vm14, %v9823_v41, %v10633_v37  ;;  %v6608_v31 = vcombine.low %v9813_v45, %v5417_v34  ;;  %v10636_v41 = vld [vmem:[#allocation6_spill] sm:$0xff]  ;;  %v7255_v56 = vpop.f32.mrf.mxu0  ;;  %v6594_v42 = vrot.slane %v5323_v1, 9  ;;  %v5429_v30 = vrot.slane %v5427_v59, 4  ;;  %v10640_v1 = vld [vmem:[#allocation12_spill] sm:$0xff] }
 0x1b2   : > { %v9976_v24 = vadd.f32 %v9799_v19, %v2082_v13  ;;  %v2074_v37 = vadd.f32 %v2073_v61, %v10636_v41  ;;  %v6609_v33 = vcombine.low %v9821_v0, %v5424_v16  ;;  %v7199_v27 = vpop.f32.mrf.mxu1  ;;  %v10637_v44 = vrot.slane %v9656_v63, 5  ;;  %v10638_v19 = vld [vmem:[#allocation11_spill] sm:$0xff] }
 0x1b3   : > { %7485 = vmatmul.mubr.bf16.gmra.mxu1 %v6570_v15  ;;  %v2085_v34 = vadd.f32 %v7199_v27, %v10638_v19  ;;  %v10639_v13 = vcombine.low %v9472_v14, %v9474_v2  ;;  %v2560_v0 = vpop.f32.mrf.mxu0  ;;  %v5431_v14 = vsel %vm8375_vm14, %v5429_v30, %v5430_v3  ;;  %v10642_v19 = vld [vmem:[#allocation17_spill] sm:$0xff]  ;;  %v10645_v3 = vcombine.low %v10609_v35, %v10603_v23 }
 0x1b4   : > { %v9984_v53 = vsel %vm8375_vm14, %v5471_v7, %v10637_v44  ;;  %v9987_v45 = vadd.f32 %v9817_v6, %v2074_v37  ;;  %v2076_v16 = vpop.f32.mrf.mxu1  ;;  %v5428_v6 = vsel %vm8375_vm14, %v6594_v42, %v5427_v59  ;;  %v10643_v42 = vcombine.low %v10602_v4, %v10601_v10 }
 0x1b5   : > { %7488 = vmatprep.mubr.bf16.mxu1 %v10639_v13  ;;  %v6616_v15 = vcombine.low %v9971_v25, %v9984_v53  ;;  %v9996_v63 = vadd.f32 %v9830_v38, %v2085_v34  ;;  %v2077_v61 = vadd.f32 %v2076_v16, %v10640_v1  ;;  %v7258_v7 = vpop.f32.mrf.mxu0  ;;  %v6610_v38 = vcombine.low %v5428_v6, %v5431_v14  ;;  %v10646_v1 = vld [vmem:[#allocation24_spill] sm:$0xff] }
 0x1b6   : > { %7529 = vmatmul.mubr.bf16.gmra.mxu0 %v6608_v31  ;;  %v10647_v4 = vcombine.low %v9838_v11, %v9851_v55  ;;  %v10648_v14 = vld [vmem:[#allocation28_spill] sm:$0xff] }
 0x1b7   : > { %7532 = vmatprep.mubr.bf16.mxu0 %v6609_v33  ;;  %v7202_v2 = vpop.f32.mrf.mxu1  ;;  %v10004_v27 = vadd.f32 %v9846_v8, %v2077_v61  ;;  %v2573_v31 = vpop.f32.mrf.mxu0  ;;  %v10644_v8 = vld [vmem:[#allocation21_spill] sm:$0xff] }
 0x1b8   : > { %v2098_v41 = vadd.f32 %v7202_v2, %v10641_v28 }
 0x1b9   : > { %v2089_v37 = vpop.f32.mrf.mxu1  ;;  %v7259_v34 = vpop.f32.mrf.mxu0 }
 0x1ba   : > { %v10008_v44 = vadd.f32 %v9862_v60, %v2098_v41  ;;  %v2090_v33 = vadd.f32 %v2089_v37, %v10642_v19  ;;  %v10651_v19 = vld [vmem:[#allocation36_spill] sm:$0xff] }
 0x1bb   : > { %7489 = vmatmul.mubr.bf16.gmra.mxu1 %v10643_v42  ;;  %v7203_v40 = vpop.f32.mrf.mxu1  ;;  %v2576_v13 = vpop.f32.mrf.mxu0 }
 0x1bc   : > { %v10015_v59 = vadd.f32 %v9877_v26, %v2090_v33  ;;  %v2101_v30 = vadd.f32 %v7203_v40, %v10644_v8  ;;  %7492 = vmatprep.mubr.bf16.mxu1 %v10645_v3  ;;  %v10652_v33 = vcombine.low %v10621_v54, %v10617_v9 }
 0x1bd   : > { %v2092_v60 = vpop.f32.mrf.mxu1  ;;  %v7326_v10 = vpop.f32.mrf.mxu0 }
 0x1be   : > { %7533 = vmatmul.mubr.bf16.gmra.mxu0 %v6610_v38  ;;  %v10022_v16 = vadd.f32 %v9900_v62, %v2101_v30  ;;  %v2093_v61 = vadd.f32 %v2092_v60, %v10646_v1  ;;  %v10649_v62 = vld [vmem:[#allocation33_spill] sm:$0xff]  ;;  %v10650_v38 = vcombine.low %v10613_v18, %v10612_v57  ;;  %v10654_v30 = vld [vmem:[#allocation38_spill] sm:$0xff]  ;;  %v10657_v1 = vld [vmem:[#allocation39_spill] sm:$0xff] }
 0x1bf   : > { %7536 = vmatprep.mubr.bf16.mxu0 %v10647_v4  ;;  %v7206_v26 = vpop.f32.mrf.mxu1  ;;  %v3567_v35 = vpop.f32.mrf.mxu0  ;;  %v10656_v60 = vld [vmem:[#allocation41_spill] sm:$0xff] }
 0x1c0   : > { %v10029_v6 = vadd.f32 %v9916_v58, %v2093_v61  ;;  %v2114_v23 = vadd.f32 %v7206_v26, %v10648_v14  ;;  %v6576_v9 = vcombine.low %v10656_v60, %v10626_v12  ;;  %v10662_v12 = vcombine.low %v9909_v47, %v9925_v36 }
 0x1c1   : > { %v2105_v2 = vpop.f32.mrf.mxu1  ;;  %v7327_v37 = vpop.f32.mrf.mxu0 }
 0x1c2   : > { %v10033_v28 = vadd.f32 %v9938_v50, %v2114_v23  ;;  %v2106_v41 = vadd.f32 %v2105_v2, %v10649_v62  ;;  %v10653_v50 = vcombine.low %v9866_v52, %v9885_v46 }
 0x1c3   : > { %7493 = vmatmul.mubr.bf16.gmra.mxu1 %v10650_v38  ;;  %v7207_v11 = vpop.f32.mrf.mxu1  ;;  %v3570_v42 = vpop.f32.mrf.mxu0  ;;  %v10664_v38 = vld [vmem:[#allocation43_spill] sm:$0xff] }
 0x1c4   : > { %v10039_v55 = vadd.f32 %v2557_v22, %v2106_v41  ;;  %v2117_v58 = vadd.f32 %v7207_v11, %v10651_v19  ;;  %7496 = vmatprep.mubr.bf16.mxu1 %v10652_v33  ;;  %v10655_v22 = vcombine.low %v9870_v20, %v9889_v39  ;;  %v10661_v20 = vld [vmem:[#allocation42_spill] sm:$0xff]  ;;  %v10665_v19 = vcombine.low %v9929_v51, %v9956_v43 }
 0x1c5   : > { %v2108_v40 = vpop.f32.mrf.mxu1  ;;  %v7330_v18 = vpop.f32.mrf.mxu0 }
 0x1c6   : > { %7537 = vmatmul.mubr.bf16.gmra.mxu0 %v10653_v50  ;;  %v10048_v8 = vadd.f32 %v7255_v56, %v2117_v58  ;;  %v2109_v57 = vadd.f32 %v2108_v40, %v10654_v30  ;;  %v10659_v56 = vld [vmem:[#allocation40_spill] sm:$0xff] }
 0x1c7   : > { %7540 = vmatprep.mubr.bf16.mxu0 %v10655_v22  ;;  %v3583_v4 = vpop.f32.mrf.mxu0 }
 0x1c8   : > { %v7210_v3 = vpop.f32.mrf.mxu1  ;;  %v10056_v54 = vadd.f32 %v2560_v0, %v2109_v57 }
 0x1c9   : > { %v2130_v61 = vadd.f32 %v7210_v3, %v10657_v1  ;;  %v7331_v14 = vpop.f32.mrf.mxu0 }
 0x1ca   : > { %v2121_v52 = vpop.f32.mrf.mxu1 }
 0x1cb   : > { %v10059_v46 = vadd.f32 %v7258_v7, %v2130_v61  ;;  %v2122_v26 = vadd.f32 %v2121_v52, %v10659_v56  ;;  %7497 = vmatmul.mubr.bf16.gmra.mxu1 %v6576_v9  ;;  %v3586_v62 = vpop.f32.mrf.mxu0 }
 0x1cc   : > { %v7211_v23 = vpop.f32.mrf.mxu1 }
 0x1cd   : > { %10658 = vst [vmem:[#allocation22_spill] sm:$0xff] %v10059_v46  ;;  %v10062_v2 = vadd.f32 %v2573_v31, %v2122_v26  ;;  %v2133_v39 = vadd.f32 %v7211_v23, %v10661_v20  ;;  %v7334_v11 = vpop.f32.mrf.mxu0 }
 0x1ce   : > { %v2124_v41 = vpop.f32.mrf.mxu1  ;;  %7541 = vmatmul.mubr.bf16.gmra.mxu0 %v10662_v12 }
 0x1cf   : > { %10660 = vst [vmem:[#allocation27_spill] sm:$0xff] %v10062_v2  ;;  %v10068_v0 = vadd.f32 %v7259_v34, %v2133_v39  ;;  %v2125_v7 = vadd.f32 %v2124_v41, %v10664_v38  ;;  %7544 = vmatprep.mubr.bf16.mxu0 %v10665_v19  ;;  %v3599_v40 = vpop.f32.mrf.mxu0 }
 0x1d0   : > { %v7278_v58 = vpop.f32.mrf.mxu1 }
 0x1d1   : > { %10663 = vst [vmem:[#allocation18_spill] sm:$0xff] %v10068_v0  ;;  %v10074_v31 = vadd.f32 %v2576_v13, %v2125_v7  ;;  %v10076_v33 = vadd.f32 %v7326_v10, %v7278_v58  ;;  %v7335_v47 = vpop.f32.mrf.mxu0 }
 0x1d2   : > { %v3262_v50 = vpop.f32.mrf.mxu1 }
 0x1d3   : > { %10666 = vst [vmem:[#allocation16_spill] sm:$0xff] %v10074_v31  ;;  %v10078_v30 = vadd.f32 %v3567_v35, %v3262_v50  ;;  %v3602_v57 = vpop.f32.mrf.mxu0 }
 0x1d4   : > { %v7279_v36 = vpop.f32.mrf.mxu1 }
 0x1d5   : > { %v10080_v34 = vadd.f32 %v7327_v37, %v7279_v36  ;;  %v7338_v43 = vpop.f32.mrf.mxu0 }
 0x1d6   : > { %v3265_v22 = vpop.f32.mrf.mxu1  ;;  %7545 = vmatmul.mubr.bf16.gmra.mxu0 %v6616_v15 }
 0x1d7   : > { %v10085_v51 = vadd.f32 %v3570_v42, %v3265_v22  ;;  %v3615_v3 = vpop.f32.mrf.mxu0 }
 0x1d8   : > { %v7282_v13 = vpop.f32.mrf.mxu1 }
 0x1d9   : > { %v10087_v10 = vadd.f32 %v7330_v18, %v7282_v13  ;;  %v7339_v9 = vpop.f32.mrf.mxu0 }
 0x1da   : > { %v3278_v60 = vpop.f32.mrf.mxu1 }
 0x1db   : > { %v10089_v35 = vadd.f32 %v3583_v4, %v3278_v60  ;;  %v3618_v61 = vpop.f32.mrf.mxu0 }
 0x1dc   : > { %v7283_v1 = vpop.f32.mrf.mxu1 }
 0x1dd   : > { %v10091_v37 = vadd.f32 %v7331_v14, %v7283_v1  ;;  %v7342_v25 = vpop.f32.mrf.mxu0 }
 0x1de   : > { %v3281_v52 = vpop.f32.mrf.mxu1 }
 0x1df   : > { %v10093_v56 = vadd.f32 %v3586_v62, %v3281_v52  ;;  %v3631_v42 = vpop.f32.mrf.mxu0 }
 0x1e0   : > { %v7286_v53 = vpop.f32.mrf.mxu1 }
 0x1e1   : > { %v10095_v15 = vadd.f32 %v7334_v11, %v7286_v53  ;;  %v7343_v23 = vpop.f32.mrf.mxu0 }
 0x1e2   : > { %v3294_v26 = vpop.f32.mrf.mxu1 }
 0x1e3   : > { %v10097_v18 = vadd.f32 %v3599_v40, %v3294_v26  ;;  %v3634_v39 = vpop.f32.mrf.mxu0 }
 0x1e4   : > { %v7287_v20 = vpop.f32.mrf.mxu1 }
 0x1e5   : > { %v10099_v4 = vadd.f32 %v7335_v47, %v7287_v20  ;;  %v7346_v12 = vpop.f32.mrf.mxu0 }
 0x1e6   : > { %v3297_v41 = vpop.f32.mrf.mxu1 }
 0x1e7   : > { %v10101_v14 = vadd.f32 %v3602_v57, %v3297_v41  ;;  %v3647_v7 = vpop.f32.mrf.mxu0 }
 0x1e8   : > { %v7290_v38 = vpop.f32.mrf.mxu1 }
 0x1e9   : > { %v10103_v62 = vadd.f32 %v7338_v43, %v7290_v38  ;;  %v7347_v58 = vpop.f32.mrf.mxu0 }
 0x1ea   : > { %v3310_v19 = vpop.f32.mrf.mxu1 }
 0x1eb   : > { %v10105_v11 = vadd.f32 %v3615_v3, %v3310_v19  ;;  %v3650_v36 = vpop.f32.mrf.mxu0 }
 0x1ec   : > { %v7291_v50 = vpop.f32.mrf.mxu1 }
 0x1ed   : > { %v10107_v40 = vadd.f32 %v7339_v9, %v7291_v50  ;;  %v7350_v13 = vpop.f32.mrf.mxu0 }
 0x1ee   : > { %v3313_v22 = vpop.f32.mrf.mxu1 }
 0x1ef   : > { %v10109_v47 = vadd.f32 %v3618_v61, %v3313_v22  ;;  %v3663_v1 = vpop.f32.mrf.mxu0 }
 0x1f0   : > { %v7294_v60 = vpop.f32.mrf.mxu1 }
 0x1f1   : > { %v10111_v57 = vadd.f32 %v7342_v25, %v7294_v60  ;;  %v7351_v53 = vpop.f32.mrf.mxu0 }
 0x1f2   : > { %v3326_v52 = vpop.f32.mrf.mxu1 }
 0x1f3   : > { %v10113_v43 = vadd.f32 %v3631_v42, %v3326_v52  ;;  %v3666_v20 = vpop.f32.mrf.mxu0 }
 0x1f4   : > { %v7295_v26 = vpop.f32.mrf.mxu1 }
 0x1f5   : > { %v10115_v3 = vadd.f32 %v7343_v23, %v7295_v26 }
 0x1f6   : > { %v3329_v41 = vpop.f32.mrf.mxu1  ;;  %v7354_v38 = vpop.f32.mrf.mxu0 }
 0x1f7   : > { %v10117_v9 = vadd.f32 %v3634_v39, %v3329_v41 }
 0x1f8   : > { %v7298_v19 = vpop.f32.mrf.mxu1  ;;  %v3679_v50 = vpop.f32.mrf.mxu0 }
 0x1f9   : > { %v10119_v61 = vadd.f32 %v7346_v12, %v7298_v19 }
 0x1fa   : > { %v3342_v22 = vpop.f32.mrf.mxu1  ;;  %v7355_v60 = vpop.f32.mrf.mxu0 }
 0x1fb   : > { %v10121_v25 = vadd.f32 %v3647_v7, %v3342_v22 }
 0x1fc   : > { %v7299_v31 = vpop.f32.mrf.mxu1  ;;  %v3682_v52 = vpop.f32.mrf.mxu0 }
 0x1fd   : > { %v10123_v42 = vadd.f32 %v7347_v58, %v7299_v31 }
 0x1fe   : > { %v3345_v0 = vpop.f32.mrf.mxu1  ;;  %v10127_v26 = vpop.f32.mrf.mxu0 }
 0x1ff   : > { %v10125_v23 = vadd.f32 %v3650_v36, %v3345_v0  ;;  %10667 = vst [vmem:[#allocation26_spill] sm:$0xff] %v10127_v26 }
 0x200   : > { %v7302_v39 = vpop.f32.mrf.mxu1  ;;  %v10131_v2 = vpop.f32.mrf.mxu0 }
 0x201   : > { %v10129_v41 = vadd.f32 %v7350_v13, %v7302_v39  ;;  %10668 = vst [vmem:[#allocation25_spill] sm:$0xff] %v10131_v2 }
 0x202   : > { %v3358_v12 = vpop.f32.mrf.mxu1  ;;  %v10135_v7 = vpop.f32.mrf.mxu0 }
 0x203   : > { %v10133_v19 = vadd.f32 %v3663_v1, %v3358_v12  ;;  %10669 = vst [vmem:[#allocation29_spill] sm:$0xff] %v10135_v7 }
 0x204   : > { %v7303_v22 = vpop.f32.mrf.mxu1  ;;  %v10139_v31 = vpop.f32.mrf.mxu0 }
 0x205   : > { %v10137_v46 = vadd.f32 %v7351_v53, %v7303_v22  ;;  %10670 = vst [vmem:[#allocation31_spill] sm:$0xff] %v10139_v31 }
 0x206   : > { %v3361_v58 = vpop.f32.mrf.mxu1 }
 0x207   : > { %v10141_v0 = vadd.f32 %v3666_v20, %v3361_v58  ;;  %v10143_v26 = vpop.f32.mrf.mxu0 }
 0x208   : > { %v7306_v36 = vpop.f32.mrf.mxu1  ;;  %10671 = vst [vmem:[#allocation32_spill] sm:$0xff] %v10143_v26 }
 0x209   : > { %v10145_v13 = vadd.f32 %v7354_v38, %v7306_v36  ;;  %v10147_v2 = vpop.f32.mrf.mxu0 }
 0x20a   : > { %v3374_v39 = vpop.f32.mrf.mxu1  ;;  %10672 = vst [vmem:[#allocation34_spill] sm:$0xff] %v10147_v2 }
 0x20b   : > { %v10149_v1 = vadd.f32 %v3679_v50, %v3374_v39  ;;  %v10151_v7 = vpop.f32.mrf.mxu0 }
 0x20c   : > { %v7307_v12 = vpop.f32.mrf.mxu1 }
 0x20d   : > { %v10153_v53 = vadd.f32 %v7355_v60, %v7307_v12  ;;  %v10157_v20 = vpop.f32.mrf.mxu0 }
 0x20e   : > { %v3377_v22 = vpop.f32.mrf.mxu1  ;;  %10673 = vst [vmem:[#allocation30_spill] sm:$0xff] %v10157_v20 }
 0x20f   : > { %v10155_v31 = vadd.f32 %v3682_v52, %v3377_v22 }
 0x210   : > { %v7374_v58 = vpop.f32.mrf.mxu1 }
 0x211   : > { %v4145_v26 = vadd.f32 %v7374_v58, %v10076_v33 }
 0x212   : > { %v4016_v38 = vpop.f32.mrf.mxu1  ;;  %v10164_v39 = vpop.f32.mrf.mxu0 }
 0x213   : > { %v10161_v36 = vadd.f32 %v4145_v26, %v9695_v5  ;;  %v4143_v50 = vadd.f32 %v4016_v38, %v10078_v30 }
 0x214   : > { %v7375_v2 = vpop.f32.mrf.mxu1  ;;  %v10170_v12 = vpop.f32.mrf.mxu0 }
 0x215   : > { %v10167_v60 = vadd.f32 %v4143_v50, %v9711_v32  ;;  %v4146_v52 = vadd.f32 %v7375_v2, %v10080_v34 }
 0x216   : > { %v4019_v22 = vpop.f32.mrf.mxu1  ;;  %v10176_v5 = vpop.f32.mrf.mxu0 }
 0x217   : > { %v10173_v20 = vadd.f32 %v4146_v52, %v9722_v17  ;;  %v4144_v33 = vadd.f32 %v4019_v22, %v10085_v51 }
 0x218   : > { %v7378_v26 = vpop.f32.mrf.mxu1  ;;  %v10186_v34 = vpop.f32.mrf.mxu0 }
 0x219   : > { %v10179_v30 = vadd.f32 %v4144_v33, %v9729_v21  ;;  %v4149_v58 = vadd.f32 %v7378_v26, %v10087_v10  ;;  %v10675_v33 = vld [vmem:[#allocation44_spill] sm:$0xff] }
 0x21a   : > { %v4032_v32 = vpop.f32.mrf.mxu1 }
 0x21b   : > { %v10183_v38 = vadd.f32 %v4149_v58, %v9748_v48  ;;  %v4147_v2 = vadd.f32 %v4032_v32, %v10089_v35  ;;  %v10677_v32 = vld [vmem:[#allocation45_spill] sm:$0xff] }
 0x21c   : > { %v7379_v17 = vpop.f32.mrf.mxu1 }
 0x21d   : > { %v10189_v50 = vadd.f32 %v4147_v2, %v9776_v49  ;;  %v4150_v51 = vadd.f32 %v7379_v17, %v10091_v37 }
 0x21e   : > { %v4035_v52 = vpop.f32.mrf.mxu1  ;;  %v10196_v22 = vpop.f32.mrf.mxu0 }
 0x21f   : > { %v10193_v21 = vadd.f32 %v4150_v51, %v9794_v29  ;;  %v4148_v10 = vadd.f32 %v4035_v52, %v10093_v56  ;;  %10674 = vst [vmem:[#allocation35_spill] sm:$0xff] %v10196_v22  ;;  %v10679_v56 = vld [vmem:[#allocation46_spill] sm:$0xff] }
 0x220   : > { %v7382_v48 = vpop.f32.mrf.mxu1  ;;  %v10202_v58 = vpop.f32.mrf.mxu0 }
 0x221   : > { %v10199_v26 = vadd.f32 %v4148_v10, %v10675_v33  ;;  %v4153_v35 = vadd.f32 %v7382_v48, %v10095_v15  ;;  %10676 = vst [vmem:[#allocation37_spill] sm:$0xff] %v10202_v58  ;;  %v10680_v33 = vld [vmem:[#allocation20_spill] sm:$0xff] }
 0x222   : > { %v4048_v49 = vpop.f32.mrf.mxu1  ;;  %v10208_v29 = vpop.f32.mrf.mxu0 }
 0x223   : > { %v10205_v2 = vadd.f32 %v4153_v35, %v10677_v32  ;;  %v4151_v37 = vadd.f32 %v4048_v49, %v10097_v18  ;;  %10678 = vst [vmem:[#allocation8_spill] sm:$0xff] %v10208_v29  ;;  %v10682_v32 = vld [vmem:[#allocation9_spill] sm:$0xff]  ;;  %v10683_v29 = vld [vmem:[#allocation14_spill] sm:$0xff] }
 0x224   : > { %v7383_v17 = vpop.f32.mrf.mxu1  ;;  %v10218_v48 = vpop.f32.mrf.mxu0 }
 0x225   : > { %v10211_v51 = vadd.f32 %v4151_v37, %v10679_v56  ;;  %v4154_v52 = vadd.f32 %v7383_v17, %v10099_v4  ;;  %10681 = vst [vmem:[#allocation10_spill] sm:$0xff] %v10218_v48 }
 0x226   : > { %v4051_v10 = vpop.f32.mrf.mxu1 }
 0x227   : > { %v10215_v22 = vadd.f32 %v4154_v52, %v10680_v33  ;;  %v4152_v15 = vadd.f32 %v4051_v10, %v10101_v14  ;;  %v10684_v52 = vld [vmem:[#allocation13_spill] sm:$0xff] }
 0x228   : > { %v7386_v35 = vpop.f32.mrf.mxu1 }
 0x229   : > { %v10221_v58 = vadd.f32 %v4152_v15, %v10682_v32  ;;  %v4157_v18 = vadd.f32 %v7386_v35, %v10103_v62  ;;  %v10685_v32 = vld [vmem:[#allocation19_spill] sm:$0xff] }
 0x22a   : > { %v4064_v49 = vpop.f32.mrf.mxu1  ;;  %v10228_v17 = vpop.f32.mrf.mxu0 }
 0x22b   : > { %v10225_v37 = vadd.f32 %v4157_v18, %v10683_v29  ;;  %v4155_v4 = vadd.f32 %v4064_v49, %v10105_v11  ;;  %v10686_v11 = vld [vmem:[#allocation23_spill] sm:$0xff] }
 0x22c   : > { %v7387_v56 = vpop.f32.mrf.mxu1  ;;  %v10234_v10 = vpop.f32.mrf.mxu0 }
 0x22d   : > { %v10231_v33 = vadd.f32 %v4155_v4, %v10684_v52  ;;  %v4158_v14 = vadd.f32 %v7387_v56, %v10107_v40 }
 0x22e   : > { %v4067_v15 = vpop.f32.mrf.mxu1  ;;  %v10240_v29 = vpop.f32.mrf.mxu0 }
 0x22f   : > { %v10237_v48 = vadd.f32 %v4158_v14, %v10685_v32  ;;  %v4156_v62 = vadd.f32 %v4067_v15, %v10109_v47 }
 0x230   : > { %v7390_v35 = vpop.f32.mrf.mxu1  ;;  %v10250_v56 = vpop.f32.mrf.mxu0 }
 0x231   : > { %v10243_v18 = vadd.f32 %v4156_v62, %v10686_v11  ;;  %v4161_v49 = vadd.f32 %v7390_v35, %v10111_v57 }
 0x232   : > { %v4080_v4 = vpop.f32.mrf.mxu1 }
 0x233   : > { %v10247_v52 = vadd.f32 %v4161_v49, %v9976_v24  ;;  %v4159_v40 = vadd.f32 %v4080_v4, %v10113_v43 }
 0x234   : > { %v7391_v14 = vpop.f32.mrf.mxu1 }
 0x235   : > { %v10253_v32 = vadd.f32 %v4159_v40, %v9987_v45  ;;  %v4162_v47 = vadd.f32 %v7391_v14, %v10115_v3  ;;  %v10260_v35 = vpop.f32.mrf.mxu0 }
 0x236   : > { %v4083_v15 = vpop.f32.mrf.mxu1 }
 0x237   : > { %v10257_v62 = vadd.f32 %v4162_v47, %v9996_v63  ;;  %v4160_v57 = vadd.f32 %v4083_v15, %v10117_v9  ;;  %v10269_v4 = vpop.f32.mrf.mxu0 }
 0x238   : > { %v7394_v24 = vpop.f32.mrf.mxu1 }
 0x239   : > { %v10263_v11 = vadd.f32 %v4160_v57, %v10004_v27  ;;  %v4165_v43 = vadd.f32 %v7394_v24, %v10119_v61  ;;  %v10276_v47 = vpop.f32.mrf.mxu0 }
 0x23a   : > { %v4096_v49 = vpop.f32.mrf.mxu1 }
 0x23b   : > { %v10267_v45 = vadd.f32 %v4165_v43, %v10008_v44  ;;  %v4163_v3 = vadd.f32 %v4096_v49, %v10121_v25  ;;  %v10285_v15 = vpop.f32.mrf.mxu0 }
 0x23c   : > { %v7395_v63 = vpop.f32.mrf.mxu1 }
 0x23d   : > { %v10273_v40 = vadd.f32 %v4163_v3, %v10015_v59  ;;  %v4166_v9 = vadd.f32 %v7395_v63, %v10123_v42 }
 0x23e   : > { %v4099_v14 = vpop.f32.mrf.mxu1 }
 0x23f   : > { %v10279_v27 = vadd.f32 %v4166_v9, %v10022_v16  ;;  %v4164_v61 = vadd.f32 %v4099_v14, %v10125_v23 }
 0x241   : > { %v10283_v44 = vadd.f32 %v4164_v61, %v10029_v6  ;;  %v7398_v25 = vpop.f32.mrf.mxu1 }
 0x242   : > { %v4169_v57 = vadd.f32 %v7398_v25, %v10129_v41  ;;  %v10292_v43 = vpop.f32.mrf.mxu0 }
 0x243   : > { %10687 = vst [vmem:[#allocation5_spill] sm:$0xff] %v10283_v44  ;;  %v4112_v59 = vpop.f32.mrf.mxu1 }
 0x244   : > { %v10289_v24 = vadd.f32 %v4169_v57, %v10033_v28  ;;  %v4167_v42 = vadd.f32 %v4112_v59, %v10133_v19  ;;  %v10302_v63 = vpop.f32.mrf.mxu0  ;;  %v10695_v57 = vld [vmem:[#allocation27_spill] sm:$0xff] }
 0x245   : > { %v7399_v16 = vpop.f32.mrf.mxu1 }
 0x246   : > { %10688 = vst [vmem:[#allocation4_spill] sm:$0xff] %v10289_v24  ;;  %v10295_v49 = vadd.f32 %v4167_v42, %v10039_v55  ;;  %v4170_v6 = vadd.f32 %v7399_v16, %v10137_v46  ;;  %v10308_v61 = vpop.f32.mrf.mxu0  ;;  %v10693_v55 = vld [vmem:[#allocation22_spill] sm:$0xff] }
 0x247   : > { %v4115_v23 = vpop.f32.mrf.mxu1  ;;  %10692 = vst [vmem:[#allocation12_spill] sm:$0xff] %v10308_v61  ;;  %v10698_v16 = vld [vmem:[#allocation18_spill] sm:$0xff] }
 0x248   : > { %10689 = vst [vmem:[#allocation7_spill] sm:$0xff] %v10295_v49  ;;  %v10299_v3 = vadd.f32 %v4170_v6, %v10048_v8  ;;  %v4168_v41 = vadd.f32 %v4115_v23, %v10141_v0  ;;  %v10709_v49 = vld [vmem:[#allocation31_spill] sm:$0xff] }
 0x24a   : > { %10690 = vst [vmem:[#allocation6_spill] sm:$0xff] %v10299_v3  ;;  %v10305_v28 = vadd.f32 %v4168_v41, %v10056_v54  ;;  %v10318_v54 = vpop.f32.mrf.mxu0  ;;  %v10700_v41 = vld [vmem:[#allocation16_spill] sm:$0xff] }
 0x24b   : > { %v7402_v19 = vpop.f32.mrf.mxu1  ;;  %10697 = vst [vmem:[#allocation21_spill] sm:$0xff] %v10318_v54 }
 0x24c   : > { %10691 = vst [vmem:[#allocation11_spill] sm:$0xff] %v10305_v28  ;;  %v4173_v9 = vadd.f32 %v7402_v19, %v10145_v13 }
 0x24d   : > { %v4128_v14 = vpop.f32.mrf.mxu1 }
 0x24e   : > { %v10311_v25 = vadd.f32 %v4173_v9, %v10693_v55  ;;  %v4171_v46 = vadd.f32 %v4128_v14, %v10149_v1 }
 0x24f   : > { %v7403_v8 = vpop.f32.mrf.mxu1 }
 0x250   : > { %10694 = vst [vmem:[#allocation15_spill] sm:$0xff] %v10311_v25  ;;  %v10315_v59 = vadd.f32 %v4171_v46, %v10695_v57  ;;  %v4174_v0 = vadd.f32 %v7403_v8, %v10153_v53  ;;  %v10705_v8 = vld [vmem:[#allocation26_spill] sm:$0xff] }
 0x251   : > { %v4131_v42 = vpop.f32.mrf.mxu1 }
 0x252   : > { %10696 = vst [vmem:[#allocation17_spill] sm:$0xff] %v10315_v59  ;;  %v10321_v6 = vadd.f32 %v4174_v0, %v10698_v16  ;;  %v4172_v13 = vadd.f32 %v4131_v42, %v10155_v31  ;;  %v10707_v16 = vld [vmem:[#allocation25_spill] sm:$0xff] }
 0x253   : > { %v7470_v23 = vpop.f32.mrf.mxu1 }
 0x254   : > { %10699 = vst [vmem:[#allocation24_spill] sm:$0xff] %v10321_v6  ;;  %v10325_v19 = vadd.f32 %v4172_v13, %v10700_v41  ;;  %v5196_v57 = vadd.f32 %v7470_v23, %v10705_v8  ;;  %v10708_v41 = vld [vmem:[#allocation29_spill] sm:$0xff] }
 0x255   : > { %v5187_v9 = vpop.f32.mrf.mxu1  ;;  %v10327_v1 = vpop.f32.mrf.mxu0 }
 0x256   : > { %10701 = vst [vmem:[#allocation28_spill] sm:$0xff] %v10325_v19  ;;  %10702 = vst [vmem:[#allocation33_spill] sm:$0xff] %v10327_v1  ;;  %v5188_v31 = vadd.f32 %v5187_v9, %v10707_v16 }
 0x257   : > { %v7471_v14 = vpop.f32.mrf.mxu1  ;;  %v10329_v55 = vpop.f32.mrf.mxu0 }
 0x258   : > { %10703 = vst [vmem:[#allocation36_spill] sm:$0xff] %v10329_v55  ;;  %v5199_v19 = vadd.f32 %v7471_v14, %v10708_v41  ;;  %v10710_v14 = vld [vmem:[#allocation32_spill] sm:$0xff]  ;;  %v10712_v41 = vld [vmem:[#allocation30_spill] sm:$0xff] }
 0x259   : > { %v5190_v46 = vpop.f32.mrf.mxu1  ;;  %v10331_v53 = vpop.f32.mrf.mxu0 }
 0x25a   : > { %10704 = vst [vmem:[#allocation38_spill] sm:$0xff] %v10331_v53  ;;  %v5191_v55 = vadd.f32 %v5190_v46, %v10709_v49 }
 0x25b   : > { %v7474_v59 = vpop.f32.mrf.mxu1  ;;  %v10334_v0 = vpop.f32.mrf.mxu0 }
 0x25c   : > { %10706 = vst [vmem:[#allocation41_spill] sm:$0xff] %v10334_v0 }
 0x25d   : > { %v5203_v42 = vpop.f32.mrf.mxu1 }
 0x25e   : > { %v7518_v6 = vpop.f32.mrf.mxu0 }
 0x25f   : > { %v5765_v13 = vadd.f32 %v7518_v6, %v5196_v57  ;;  %v7475_v25 = vpop.f32.mrf.mxu1  ;;  %v10344_v6 = vld [vmem:[%s10471_s4] ss:$0 sm:$0xff]  ;;  %v5212_v57 = vadd.f32 %v7474_v59, %v10710_v14 }
 0x260   : > { %v5636_v28 = vpop.f32.mrf.mxu0 }
 0x261   : > { %v5763_v3 = vadd.f32 %v5636_v28, %v5188_v31  ;;  %v5206_v1 = vpop.f32.mrf.mxu1  ;;  %v5829_v53 = vadd.f32 %v5765_v13, %v10161_v36  ;;  %v10711_v31 = vld [vmem:[#allocation34_spill] sm:$0xff] }
 0x262   : > { %v7519_v24 = vpop.f32.mrf.mxu0  ;;  %v5204_v36 = vadd.f32 %v5203_v42, %v10711_v31 }
 0x263   : > { %v5827_v23 = vadd.f32 %v5763_v3, %v10167_v60  ;;  %v5766_v8 = vadd.f32 %v7519_v24, %v5199_v19  ;;  %v7478_v0 = vpop.f32.mrf.mxu1  ;;  %v5932_v60 = vadd.f32 %v10344_v6, %v5829_v53 }
 0x264   : > { %v5639_v9 = vpop.f32.mrf.mxu0 }
 0x265   : > { %v5830_v28 = vadd.f32 %v5766_v8, %v10173_v20  ;;  %v5764_v49 = vadd.f32 %v5639_v9, %v5191_v55  ;;  %v5219_v46 = vpop.f32.mrf.mxu1  ;;  %v5930_v24 = vadd.f32 %v10344_v6, %v5827_v23  ;;  %v5215_v55 = vadd.f32 %v7475_v25, %v10151_v7 }
 0x266   : > { %v7522_v16 = vpop.f32.mrf.mxu0  ;;  %v5207_v23 = vadd.f32 %v5206_v1, %v10712_v41  ;;  %v6161_v44 = vmul.f32 %v5932_v60, %v5932_v60  ;;  %v5220_v61 = vadd.f32 %v5219_v46, %v10170_v12 }
 0x267   : > { %v5933_v3 = vadd.f32 %v10344_v6, %v5830_v28  ;;  %v5828_v19 = vadd.f32 %v5764_v49, %v10179_v30  ;;  %v7479_v13 = vpop.f32.mrf.mxu1  ;;  %v5769_v20 = vadd.f32 %v7522_v16, %v5212_v57  ;;  %v6159_v14 = vmul.f32 %v5930_v24, %v5930_v24 }
 0x268   : > { %v5652_v59 = vpop.f32.mrf.mxu0 }
 0x269   : > { %v6798_v42 = vpack.c.bf16 %v5933_v3, %v5932_v60  ;;  %v5931_v53 = vadd.f32 %v10344_v6, %v5828_v19  ;;  %v5222_v8 = vpop.f32.mrf.mxu1  ;;  %v5767_v30 = vadd.f32 %v5652_v59, %v5204_v36  ;;  %v5833_v57 = vadd.f32 %v5769_v20, %v10183_v38 }
 0x26a   : > { %v7523_v9 = vpop.f32.mrf.mxu0  ;;  %v5228_v19 = vadd.f32 %v7478_v0, %v10164_v39  ;;  %v5231_v38 = vadd.f32 %v7479_v13, %v10176_v5 }
 0x26b   : > { %6885 = vst [vmem:[%s10358_s26 + $0x8] sm:$0xff] %v6798_v42   ;;  %v6793_v28 = vpack.c.bf16 %v5931_v53, %v5930_v24  ;;  %v6122_v49 = vadd.f32 %v5931_v53, %v5930_v24  ;;  %v6160_v31 = vmul.f32 %v5931_v53, %v5931_v53  ;;  %v7482_v54 = vpop.f32.mrf.mxu1  ;;  %v5831_v16 = vadd.f32 %v5767_v30, %v10189_v50 }
 0x26c   : > { %v5770_v7 = vadd.f32 %v7523_v9, %v5215_v55  ;;  %v5655_v25 = vpop.f32.mrf.mxu0  ;;  %v6162_v50 = vmul.f32 %v5933_v3, %v5933_v3 }
 0x26d   : > { %6794 = vst [vmem:[%s10358_s26] sm:$0xff] %v6793_v28   ;;  %v6123_v1 = vadd.f32 %v6122_v49, %v5932_v60  ;;  %v6191_v41 = vadd.f32 %v6160_v31, %v6159_v14  ;;  %v5768_v36 = vadd.f32 %v5655_v25, %v5207_v23  ;;  %v5235_v59 = vpop.f32.mrf.mxu1  ;;  %v5934_v42 = vadd.f32 %v10344_v6, %v5831_v16 }
 0x26e   : > { %v5834_v24 = vadd.f32 %v5770_v7, %v10193_v21  ;;  %v7526_v53 = vpop.f32.mrf.mxu0  ;;  %v5936_v60 = vadd.f32 %v10344_v6, %v5833_v57  ;;  %v5223_v21 = vadd.f32 %v5222_v8, %v10186_v34 }
 0x26f   : > { %v6192_v20 = vadd.f32 %v6191_v41, %v6161_v44  ;;  %v6124_v55 = vadd.f32 %v6123_v1, %v5933_v3  ;;  %v5832_v39 = vadd.f32 %v5768_v36, %v10199_v26  ;;  %v7483_v0 = vpop.f32.mrf.mxu1  ;;  %v5773_v30 = vadd.f32 %v7526_v53, %v5228_v19  ;;  %v10713_v19 = vld [vmem:[#allocation35_spill] sm:$0xff] }
 0x270   : > { %v5937_v23 = vadd.f32 %v10344_v6, %v5834_v24  ;;  %v5668_v9 = vpop.f32.mrf.mxu0  ;;  %v6163_v28 = vmul.f32 %v5934_v42, %v5934_v42  ;;  %v5244_v1 = vadd.f32 %v7482_v54, %v10713_v19  ;;  %v6165_v41 = vmul.f32 %v5936_v60, %v5936_v60 }
 0x271   : > { %v6125_v14 = vadd.f32 %v6124_v55, %v5934_v42  ;;  %v6193_v12 = vadd.f32 %v6192_v20, %v6162_v50  ;;  %v5935_v5 = vadd.f32 %v10344_v6, %v5832_v39  ;;  %v5238_v46 = vpop.f32.mrf.mxu1  ;;  %v5771_v3 = vadd.f32 %v5668_v9, %v5220_v61  ;;  %v10714_v55 = vld [vmem:[#allocation37_spill] sm:$0xff] }
 0x272   : > { %v6808_v44 = vpack.c.bf16 %v5937_v23, %v5936_v60  ;;  %v7527_v26 = vpop.f32.mrf.mxu0  ;;  %v5837_v7 = vadd.f32 %v5773_v30, %v10205_v2  ;;  %v5236_v39 = vadd.f32 %v5235_v59, %v10714_v55  ;;  %v10715_v2 = vld [vmem:[#allocation8_spill] sm:$0xff] }
 0x273   : > { %v6194_v13 = vadd.f32 %v6193_v12, %v6163_v28  ;;  %v6803_v49 = vpack.c.bf16 %v5935_v5, %v5934_v42  ;;  %v6126_v31 = vadd.f32 %v6125_v14, %v5935_v5  ;;  %v6164_v57 = vmul.f32 %v5935_v5, %v5935_v5  ;;  %v7486_v16 = vpop.f32.mrf.mxu1  ;;  %v10716_v5 = vld [vmem:[#allocation10_spill] sm:$0xff] }
 0x274   : > { %6887 = vst [vmem:[%s10358_s26 + $0x18] sm:$0xff] %v6808_v44   ;;  %v5835_v34 = vadd.f32 %v5771_v3, %v10211_v51  ;;  %v5774_v8 = vadd.f32 %v7527_v26, %v5231_v38  ;;  %v5671_v25 = vpop.f32.mrf.mxu0  ;;  %v5247_v30 = vadd.f32 %v7483_v0, %v10715_v2  ;;  %v6166_v51 = vmul.f32 %v5937_v23, %v5937_v23 }
 0x275   : > { %6886 = vst [vmem:[%s10358_s26 + $0x10] sm:$0xff] %v6803_v49   ;;  %v6127_v36 = vadd.f32 %v6126_v31, %v5936_v60  ;;  %v6195_v24 = vadd.f32 %v6194_v13, %v6164_v57  ;;  %v5772_v61 = vadd.f32 %v5671_v25, %v5223_v21  ;;  %v5251_v53 = vpop.f32.mrf.mxu1  ;;  %v5940_v60 = vadd.f32 %v10344_v6, %v5837_v7 }
 0x276   : > { %v5938_v42 = vadd.f32 %v10344_v6, %v5835_v34  ;;  %v5838_v50 = vadd.f32 %v5774_v8, %v10215_v22  ;;  %v7530_v20 = vpop.f32.mrf.mxu0  ;;  %v5239_v22 = vadd.f32 %v5238_v46, %v10716_v5 }
 0x277   : > { %v6196_v38 = vadd.f32 %v6195_v24, %v6165_v41  ;;  %v6128_v9 = vadd.f32 %v6127_v36, %v5937_v23  ;;  %v5836_v54 = vadd.f32 %v5772_v61, %v10221_v58  ;;  %v7487_v14 = vpop.f32.mrf.mxu1  ;;  %v5777_v28 = vadd.f32 %v7530_v20, %v5244_v1 }
 0x278   : > { %v5941_v21 = vadd.f32 %v10344_v6, %v5838_v50  ;;  %v5684_v12 = vpop.f32.mrf.mxu0  ;;  %v6167_v3 = vmul.f32 %v5938_v42, %v5938_v42  ;;  %v5260_v1 = vadd.f32 %v7486_v16, %v10228_v17  ;;  %v6169_v41 = vmul.f32 %v5940_v60, %v5940_v60 }
 0x279   : > { %v6129_v44 = vadd.f32 %v6128_v9, %v5938_v42  ;;  %v6197_v59 = vadd.f32 %v6196_v38, %v6166_v51  ;;  %v5939_v0 = vadd.f32 %v10344_v6, %v5836_v54  ;;  %v5254_v26 = vpop.f32.mrf.mxu1  ;;  %v5775_v13 = vadd.f32 %v5684_v12, %v5236_v39 }
 0x27a   : > { %v6818_v23 = vpack.c.bf16 %v5941_v21, %v5940_v60  ;;  %v7531_v58 = vpop.f32.mrf.mxu0  ;;  %v5841_v8 = vadd.f32 %v5777_v28, %v10225_v37  ;;  %v5252_v39 = vadd.f32 %v5251_v53, %v10234_v10  ;;  %v5263_v37 = vadd.f32 %v7487_v14, %v10240_v29 }
 0x27b   : > { %v6198_v49 = vadd.f32 %v6197_v59, %v6167_v3  ;;  %v6813_v31 = vpack.c.bf16 %v5939_v0, %v5938_v42  ;;  %v6130_v57 = vadd.f32 %v6129_v44, %v5939_v0  ;;  %v6168_v7 = vmul.f32 %v5939_v0, %v5939_v0  ;;  %v7490_v34 = vpop.f32.mrf.mxu1 }
 0x27c   : > { %6889 = vst [vmem:[%s10358_s26 + $0x28] sm:$0xff] %v6818_v23   ;;  %v5839_v46 = vadd.f32 %v5775_v13, %v10231_v33  ;;  %v5778_v25 = vadd.f32 %v7531_v58, %v5247_v30  ;;  %v5687_v19 = vpop.f32.mrf.mxu0  ;;  %v6170_v33 = vmul.f32 %v5941_v21, %v5941_v21  ;;  %v5944_v51 = vadd.f32 %v10344_v6, %v5841_v8 }
 0x27d   : > { %6888 = vst [vmem:[%s10358_s26 + $0x20] sm:$0xff] %v6813_v31   ;;  %v6131_v36 = vadd.f32 %v6130_v57, %v5940_v60  ;;  %v6199_v24 = vadd.f32 %v6198_v49, %v6168_v7  ;;  %v5776_v61 = vadd.f32 %v5687_v19, %v5239_v22  ;;  %v5267_v50 = vpop.f32.mrf.mxu1  ;;  %v5276_v23 = vadd.f32 %v7490_v34, %v10260_v35 }
 0x27e   : > { %v5942_v42 = vadd.f32 %v10344_v6, %v5839_v46  ;;  %v5842_v20 = vadd.f32 %v5778_v25, %v10237_v48  ;;  %v7534_v55 = vpop.f32.mrf.mxu0  ;;  %v5255_v48 = vadd.f32 %v5254_v26, %v10250_v56  ;;  %v6173_v13 = vmul.f32 %v5944_v51, %v5944_v51 }
 0x27f   : > { %v6200_v2 = vadd.f32 %v6199_v24, %v6169_v41  ;;  %v6132_v30 = vadd.f32 %v6131_v36, %v5941_v21  ;;  %v5840_v17 = vadd.f32 %v5776_v61, %v10243_v18  ;;  %v7491_v16 = vpop.f32.mrf.mxu1  ;;  %v5781_v9 = vadd.f32 %v7534_v55, %v5260_v1 }
 0x280   : > { %v5945_v38 = vadd.f32 %v10344_v6, %v5842_v20  ;;  %v5700_v54 = vpop.f32.mrf.mxu0  ;;  %v6171_v28 = vmul.f32 %v5942_v42, %v5942_v42  ;;  %v5268_v25 = vadd.f32 %v5267_v50, %v10269_v4 }
 0x281   : > { %v6133_v60 = vadd.f32 %v6132_v30, %v5942_v42  ;;  %v6201_v10 = vadd.f32 %v6200_v2, %v6170_v33  ;;  %v5943_v29 = vadd.f32 %v10344_v6, %v5840_v17  ;;  %v5270_v53 = vpop.f32.mrf.mxu1  ;;  %v5779_v21 = vadd.f32 %v5700_v54, %v5252_v39 }
 0x282   : > { %v6828_v14 = vpack.c.bf16 %v5945_v38, %v5944_v51  ;;  %v7535_v18 = vpop.f32.mrf.mxu0  ;;  %v5845_v59 = vadd.f32 %v5781_v9, %v10247_v52  ;;  %v5279_v52 = vadd.f32 %v7491_v16, %v10276_v47 }
 0x283   : > { %v6202_v12 = vadd.f32 %v6201_v10, %v6171_v28  ;;  %v6823_v5 = vpack.c.bf16 %v5943_v29, %v5942_v42  ;;  %v6134_v22 = vadd.f32 %v6133_v60, %v5943_v29  ;;  %v6172_v44 = vmul.f32 %v5943_v29, %v5943_v29  ;;  %v7494_v3 = vpop.f32.mrf.mxu1 }
 0x284   : > { %6891 = vst [vmem:[%s10358_s26 + $0x38] sm:$0xff] %v6828_v14   ;;  %v5843_v56 = vadd.f32 %v5779_v21, %v10253_v32  ;;  %v5782_v0 = vadd.f32 %v7535_v18, %v5263_v37  ;;  %v5703_v26 = vpop.f32.mrf.mxu0  ;;  %v6174_v32 = vmul.f32 %v5945_v38, %v5945_v38  ;;  %v5948_v41 = vadd.f32 %v10344_v6, %v5845_v59  ;;  %v10717_v18 = vld [vmem:[#allocation12_spill] sm:$0xff] }
 0x285   : > { %6890 = vst [vmem:[%s10358_s26 + $0x30] sm:$0xff] %v6823_v5   ;;  %v6135_v58 = vadd.f32 %v6134_v22, %v5944_v51  ;;  %v6203_v49 = vadd.f32 %v6202_v12, %v6172_v44  ;;  %v5780_v31 = vadd.f32 %v5703_v26, %v5255_v48  ;;  %v5283_v57 = vpop.f32.mrf.mxu1  ;;  %v5271_v42 = vadd.f32 %v5270_v53, %v10285_v15 }
 0x286   : > { %v5946_v7 = vadd.f32 %v10344_v6, %v5843_v56  ;;  %v5846_v8 = vadd.f32 %v5782_v0, %v10257_v62  ;;  %v7538_v46 = vpop.f32.mrf.mxu0  ;;  %v5292_v37 = vadd.f32 %v7494_v3, %v10292_v43  ;;  %v6177_v51 = vmul.f32 %v5948_v41, %v5948_v41  ;;  %v10719_v0 = vld [vmem:[#allocation21_spill] sm:$0xff] }
 0x287   : > { %v6204_v19 = vadd.f32 %v6203_v49, %v6173_v13  ;;  %v6136_v1 = vadd.f32 %v6135_v58, %v5945_v38  ;;  %v5844_v35 = vadd.f32 %v5780_v31, %v10263_v11  ;;  %v7495_v34 = vpop.f32.mrf.mxu1  ;;  %v5785_v24 = vadd.f32 %v7538_v46, %v5276_v23  ;;  %v10720_v58 = vld [vmem:[#allocation4_spill] sm:$0xff]  ;;  %v10721_v46 = vld [vmem:[#allocation33_spill] sm:$0xff] }
 0x288   : > { %v5949_v36 = vadd.f32 %v10344_v6, %v5846_v8  ;;  %v5716_v61 = vpop.f32.mrf.mxu0  ;;  %v6175_v20 = vmul.f32 %v5946_v7, %v5946_v7  ;;  %v5284_v10 = vadd.f32 %v5283_v57, %v10302_v63  ;;  %v5295_v12 = vadd.f32 %v7495_v34, %v10717_v18  ;;  %v10722_v34 = vld [vmem:[#allocation7_spill] sm:$0xff] }
 0x289   : > { %v6137_v62 = vadd.f32 %v6136_v1, %v5946_v7  ;;  %v6205_v4 = vadd.f32 %v6204_v19, %v6174_v32  ;;  %v5947_v47 = vadd.f32 %v10344_v6, %v5844_v35  ;;  %v5286_v50 = vpop.f32.mrf.mxu1  ;;  %v5783_v39 = vadd.f32 %v5716_v61, %v5268_v25 }
 0x28a   : > { %v6838_v55 = vpack.c.bf16 %v5949_v36, %v5948_v41  ;;  %v7539_v11 = vpop.f32.mrf.mxu0  ;;  %v5849_v15 = vadd.f32 %v5785_v24, %v10267_v45  ;;  %v6178_v29 = vmul.f32 %v5949_v36, %v5949_v36  ;;  %v5287_v26 = vadd.f32 %v5286_v50, %v10719_v0 }
 0x28b   : > { %v6206_v33 = vadd.f32 %v6205_v4, %v6175_v20  ;;  %v6833_v2 = vpack.c.bf16 %v5947_v47, %v5946_v7  ;;  %v6138_v30 = vadd.f32 %v6137_v62, %v5947_v47  ;;  %v6176_v17 = vmul.f32 %v5947_v47, %v5947_v47  ;;  %v7498_v16 = vpop.f32.mrf.mxu1  ;;  %v10723_v20 = vld [vmem:[#allocation36_spill] sm:$0xff] }
 0x28c   : > { %6893 = vst [vmem:[%s10358_s26 + $0x48] sm:$0xff] %v6838_v55   ;;  %v5847_v38 = vadd.f32 %v5783_v39, %v10273_v40  ;;  %v5786_v9 = vadd.f32 %v7539_v11, %v5279_v52  ;;  %v5719_v54 = vpop.f32.mrf.mxu0  ;;  %v10718_v40 = vld [vmem:[#allocation5_spill] sm:$0xff]  ;;  %v5952_v3 = vadd.f32 %v10344_v6, %v5849_v15  ;;  %v5308_v25 = vadd.f32 %v7498_v16, %v10721_v46  ;;  %v10724_v39 = vld [vmem:[#allocation6_spill] sm:$0xff]  ;;  %v10726_v16 = vld [vmem:[#allocation11_spill] sm:$0xff] }
 0x28d   : > { %6892 = vst [vmem:[%s10358_s26 + $0x40] sm:$0xff] %v6833_v2   ;;  %v6139_v48 = vadd.f32 %v6138_v30, %v5948_v41  ;;  %v6207_v60 = vadd.f32 %v6206_v33, %v6176_v17  ;;  %v5784_v28 = vadd.f32 %v5719_v54, %v5271_v42  ;;  %v5299_v43 = vpop.f32.mrf.mxu1  ;;  %v10725_v33 = vld [vmem:[#allocation38_spill] sm:$0xff] }
 0x28e   : > { %v5950_v53 = vadd.f32 %v10344_v6, %v5847_v38  ;;  %v5850_v14 = vadd.f32 %v5786_v9, %v10279_v27  ;;  %v7542_v21 = vpop.f32.mrf.mxu0  ;;  %v6181_v35 = vmul.f32 %v5952_v3, %v5952_v3  ;;  %v5300_v4 = vadd.f32 %v5299_v43, %v10723_v20 }
 0x28f   : > { %v6208_v45 = vadd.f32 %v6207_v60, %v6177_v51  ;;  %v6140_v5 = vadd.f32 %v6139_v48, %v5949_v36  ;;  %v5848_v22 = vadd.f32 %v5784_v28, %v10718_v40  ;;  %v5789_v44 = vadd.f32 %v7542_v21, %v5292_v37  ;;  %v7499_v31 = vpop.f32.mrf.mxu1  ;;  %v10727_v60 = vld [vmem:[#allocation41_spill] sm:$0xff] }
 0x290   : > { %v6179_v59 = vmul.f32 %v5950_v53, %v5950_v53  ;;  %v5953_v56 = vadd.f32 %v10344_v6, %v5850_v14  ;;  %v5732_v63 = vpop.f32.mrf.mxu0  ;;  %v5311_v2 = vadd.f32 %v7499_v31, %v10725_v33 }
 0x291   : > { %v6141_v23 = vadd.f32 %v6140_v5, %v5950_v53  ;;  %v6209_v13 = vadd.f32 %v6208_v45, %v6178_v29  ;;  %v5951_v27 = vadd.f32 %v10344_v6, %v5848_v22  ;;  %v5853_v49 = vadd.f32 %v5789_v44, %v10720_v58  ;;  %v5302_v47 = vpop.f32.mrf.mxu1  ;;  %v10729_v44 = vld [vmem:[#allocation17_spill] sm:$0xff] }
 0x292   : > { %v6848_v57 = vpack.c.bf16 %v5953_v56, %v5952_v3  ;;  %v5787_v7 = vadd.f32 %v5732_v63, %v5284_v10  ;;  %v7543_v8 = vpop.f32.mrf.mxu0  ;;  %v6182_v50 = vmul.f32 %v5953_v56, %v5953_v56  ;;  %v5303_v28 = vadd.f32 %v5302_v47, %v10727_v60 }
 0x293   : > { %v6210_v52 = vadd.f32 %v6209_v13, %v6179_v59  ;;  %v6843_v32 = vpack.c.bf16 %v5951_v27, %v5950_v53  ;;  %v6142_v19 = vadd.f32 %v6141_v23, %v5951_v27  ;;  %v6180_v1 = vmul.f32 %v5951_v27, %v5951_v27  ;;  %v10728_v53 = vld [vmem:[#allocation15_spill] sm:$0xff]  ;;  %v10730_v27 = vld [vmem:[#allocation24_spill] sm:$0xff] }
 0x294   : > { %6895 = vst [vmem:[%s10358_s26 + $0x58] sm:$0xff] %v6848_v57   ;;  %v5851_v41 = vadd.f32 %v5787_v7, %v10722_v34  ;;  %v5790_v36 = vadd.f32 %v7543_v8, %v5295_v12  ;;  %v5735_v24 = vpop.f32.mrf.mxu0  ;;  %v5956_v38 = vadd.f32 %v10344_v6, %v5853_v49  ;;  %v10731_v7 = vld [vmem:[#allocation28_spill] sm:$0xff] }
 0x295   : > { %6894 = vst [vmem:[%s10358_s26 + $0x50] sm:$0xff] %v6843_v32   ;;  %v6143_v61 = vadd.f32 %v6142_v19, %v5952_v3  ;;  %v6211_v42 = vadd.f32 %v6210_v52, %v6180_v1  ;;  %v5788_v62 = vadd.f32 %v5735_v24, %v5287_v26 }
 0x296   : > { %v5954_v55 = vadd.f32 %v10344_v6, %v5851_v41  ;;  %v5854_v11 = vadd.f32 %v5790_v36, %v10724_v39  ;;  %v7546_v37 = vpop.f32.mrf.mxu0  ;;  %v6185_v63 = vmul.f32 %v5956_v38, %v5956_v38 }
 0x297   : > { %v6212_v30 = vadd.f32 %v6211_v42, %v6181_v35  ;;  %v6144_v17 = vadd.f32 %v6143_v61, %v5953_v56  ;;  %v5852_v51 = vadd.f32 %v5788_v62, %v10726_v16  ;;  %v5793_v15 = vadd.f32 %v7546_v37, %v5308_v25 }
 0x298   : > { %v6183_v9 = vmul.f32 %v5954_v55, %v5954_v55  ;;  %v5957_v54 = vadd.f32 %v10344_v6, %v5854_v11  ;;  %v5748_v48 = vpop.f32.mrf.mxu0 }
 0x299   : > { %v6145_v10 = vadd.f32 %v6144_v17, %v5954_v55  ;;  %v6213_v43 = vadd.f32 %v6212_v30, %v6182_v50  ;;  %v5955_v29 = vadd.f32 %v10344_v6, %v5852_v51  ;;  %v5857_v14 = vadd.f32 %v5793_v15, %v10728_v53 }
 0x29a   : > { %v6858_v21 = vpack.c.bf16 %v5957_v54, %v5956_v38  ;;  %v5791_v18 = vadd.f32 %v5748_v48, %v5300_v4  ;;  %v7547_v12 = vpop.f32.mrf.mxu0  ;;  %v6186_v49 = vmul.f32 %v5957_v54, %v5957_v54 }
 0x29b   : > { %v6214_v45 = vadd.f32 %v6213_v43, %v6183_v9  ;;  %v6853_v5 = vpack.c.bf16 %v5955_v29, %v5954_v55  ;;  %v6146_v40 = vadd.f32 %v6145_v10, %v5955_v29  ;;  %v6184_v22 = vmul.f32 %v5955_v29, %v5955_v29 }
 0x29c   : > { %6897 = vst [vmem:[%s10358_s26 + $0x68] sm:$0xff] %v6858_v21   ;;  %v5855_v3 = vadd.f32 %v5791_v18, %v10729_v44  ;;  %v5794_v59 = vadd.f32 %v7547_v12, %v5311_v2  ;;  %v5751_v56 = vpop.f32.mrf.mxu0  ;;  %v5960_v46 = vadd.f32 %v10344_v6, %v5857_v14 }
 0x29d   : > { %6896 = vst [vmem:[%s10358_s26 + $0x60] sm:$0xff] %v6853_v5   ;;  %v6147_v0 = vadd.f32 %v6146_v40, %v5956_v38  ;;  %v6215_v26 = vadd.f32 %v6214_v45, %v6184_v22  ;;  %v5792_v23 = vadd.f32 %v5751_v56, %v5303_v28 }
 0x29e   : > { %v5958_v13 = vadd.f32 %v10344_v6, %v5855_v3  ;;  %v5858_v58 = vadd.f32 %v5794_v59, %v10730_v27  ;;  %v6189_v61 = vmul.f32 %v5960_v46, %v5960_v46 }
 0x29f   : > { %v6216_v31 = vadd.f32 %v6215_v26, %v6185_v63  ;;  %v6148_v57 = vadd.f32 %v6147_v0, %v5957_v54  ;;  %v5856_v8 = vadd.f32 %v5792_v23, %v10731_v7 }
 0x2a0   : > { %v5961_v25 = vadd.f32 %v10344_v6, %v5858_v58  ;;  %v6187_v32 = vmul.f32 %v5958_v13, %v5958_v13 }
 0x2a1   : > { %v6149_v52 = vadd.f32 %v6148_v57, %v5958_v13  ;;  %v6217_v19 = vadd.f32 %v6216_v31, %v6186_v49  ;;  %v5959_v1 = vadd.f32 %v10344_v6, %v5856_v8 }
 0x2a2   : > { %v6868_v35 = vpack.c.bf16 %v5961_v25, %v5960_v46  ;;  %v6190_v20 = vmul.f32 %v5961_v25, %v5961_v25 }
 0x2a3   : > { %v6218_v34 = vadd.f32 %v6217_v19, %v6187_v32  ;;  %v6863_v41 = vpack.c.bf16 %v5959_v1, %v5958_v13  ;;  %v6150_v36 = vadd.f32 %v6149_v52, %v5959_v1  ;;  %v6188_v24 = vmul.f32 %v5959_v1, %v5959_v1 }
 0x2a4   : > { %6899 = vst [vmem:[%s10358_s26 + $0x78] sm:$0xff] %v6868_v35  }
 0x2a5   : > { %6898 = vst [vmem:[%s10358_s26 + $0x70] sm:$0xff] %v6863_v41   ;;  %v6151_v42 = vadd.f32 %v6150_v36, %v5960_v46  ;;  %v6219_v62 = vadd.f32 %v6218_v34, %v6188_v24 }
 0x2a7   : > { %v6152_v4 = vadd.f32 %v6151_v42, %v5961_v25  ;;  %v6220_v47 = vadd.f32 %v6219_v62, %v6189_v61 }
 0x2a9   : > { %v6153_v50 = vrot.slane %v6152_v4, 4  ;;  %v6221_v55 = vadd.f32 %v6220_v47, %v6190_v20 }
 0x2ab   : > { %v6154_v39 = vadd.f32 %v6153_v50, %v6152_v4  ;;  %v6222_v11 = vrot.slane %v6221_v55, 4 }
 0x2ad   : > { %v6155_v37 = vrot.slane %v6154_v39, 2  ;;  %v6223_v6 = vadd.f32 %v6222_v11, %v6221_v55 }
 0x2af   : > { %v6156_v33 = vadd.f32 %v6155_v37, %v6154_v39  ;;  %v6224_v2 = vrot.slane %v6223_v6, 2 }
 0x2b1   : > { %v6157_v30 = vrot.slane %v6156_v33, 1  ;;  %v6225_v17 = vadd.f32 %v6224_v2, %v6223_v6 }
 0x2b3   : > { %v6226_v16 = vrot.slane %v6225_v17, 1  ;;  %v6158_v51 = vadd.f32 %v6157_v30, %v6156_v33 }
 0x2b5   : > { %v6227_v15 = vadd.f32 %v6226_v16, %v6225_v17 }
 0x2b7   : > { %v6229_v38 = vsel %vm445_vm0, %v6158_v51, %v6227_v15 }
 0x2b8   : > { %6230 = vst [vmem:[%s262_s30] sm:$0x3] %v6229_v38 }
 0x2b9 PF: > { %s17_s21 = sadd.s32 1, %s7774_s21  }
 0x2ba   : > { %p14_p4 = scmp.ge.s32.totalorder %s17_s21, 4  }
 0x2bc   :  { %16 = sbr.rel (!%p14_p4) target bundleno = 1 (0x1), region = 85 }

// kernel: resnet_v2_block_bn.3
= control target key start
LH: loop header
LB: loop body
LE: loop exit
PB: predicated region body
PF: predicated region fallthrough
CT: control target
= control target key end

     0   :  { %s7950_s27 = smov 0   ;;  %s10751_s0 = inlined_call_operand.vmem [shape: bf16[2,16,16,128], index: 0, kind: input, shape index: {}]   ;;  %s10752_s1 = inlined_call_operand.vmem [shape: bf16[2,16,16,128], index: 1, kind: input, shape index: {}]   ;;  %s10753_s2 = inlined_call_operand.vmem [shape: f32[1,128], index: 2, kind: input, shape index: {}]   ;;  %s10754_s3 = inlined_call_operand.vmem [shape: f32[1,128], index: 3, kind: input, shape index: {}]   ;;  %s10755_s4 = inlined_call_operand.vmem [shape: bf16[1152,128], index: 4, kind: input, shape index: {}]   ;;  %s10756_s5 = inlined_call_operand.vmem [shape: f32[1,128], index: 5, kind: input, shape index: {}]   ;;  %s10757_s6 = inlined_call_operand.vmem [shape: bf16[128,128], index: 6, kind: input, shape index: {}]   ;;  %s10758_s7 = inlined_call_operand.vmem [shape: f32[1,128], index: 7, kind: input, shape index: {}]   ;;  %s10759_s8 = inlined_call_operand.vmem [shape: f32[2,16,16,128], index: 8, kind: output, shape index: {}]  }
   0x1 LB: > { %s6516_s28 = sadd.s32 4294967295, %s7902_s27   ;;  %p6520_p0 = scmp.ge.s32.totalorder %s7902_s27, 1  ;;  %s7902_s27 = sphi %s7950_s27, %s18_s27  }
   0x2   : > { %p272_p1 = scmp.lt.s32.totalorder %s7902_s27, 3 }
   0x4   : > { %p273_p2 = pnand %p6520_p0, %p272_p1 }
   0x6   : > { %276 = sbr.rel (%p273_p2) target bundleno = 712 (0x2c8), region = 52 }
   0xb   : > { %v7696_v0 = vld [vmem:[%s10755_s4 + $0x38] sm:$0xff]   ;;  %v7904_v2 = vmov 0   ;;  %v7698_v3 = vld [vmem:[%s10755_s4 + $0x30] sm:$0xff]   ;;  %p311_p3 = scmp.lt.s32.totalorder %s6516_s28, 1  ;;  %v7700_v5 = vld [vmem:[%s10755_s4 + $0x28] sm:$0xff]   ;;  %vm508_vm0 = vcmask 1040384  }
   0xc   : > { %v7697_v1 = vld [vmem:[%s10755_s4 + $0x78] sm:$0xff]   ;;  %501 = vst [vmem:[#allocation2] sm:$0xf] %v7904_v2  ;;  %502 = vst [vmem:[#allocation2 + $0x4] sm:$0xf] %v7904_v2  ;;  %7255 = vmatprep.subr.bf16.mxu1 %v7696_v0  ;;  %v7699_v4 = vld [vmem:[%s10755_s4 + $0x70] sm:$0xff]  }
   0xd   : > { %503 = vst [vmem:[#allocation2 + $0x8] sm:$0x1] %v7904_v2  ;;  %505 = vst [vmem:[#allocation2 + $0xcc] sm:$0xf] %v7904_v2  ;;  %7207 = vmatprep.subr.bf16.mxu0 %v7697_v1  ;;  %7256 = vmatpush3.bf16.msra.mxu1 %v7696_v0  ;;  %v7701_v6 = vld [vmem:[%s10755_s4 + $0x68] sm:$0xff]   ;;  %s11166_s28 = smov (!%p311_p3, %s6516_s28), 1 }
   0xe   : > { %506 = vst [vmem:[#allocation2 + $0xd0] sm:$0xf] %v7904_v2  ;;  %507 = vst [vmem:[#allocation2 + $0xd4] sm:$0x1] %v7904_v2  ;;  %7208 = vmatpush3.bf16.msra.mxu0 %v7697_v1  ;;  %7257 = vmatprep.subr.bf16.mxu1 %v7698_v3  ;;  %v7702_v7 = vld [vmem:[%s10755_s4 + $0x20] sm:$0xff]   ;;  %s6853_s23 = sshll.u32 %s11166_s28, 7 }
   0xf   : > { %7209 = vmatprep.subr.bf16.mxu0 %v7699_v4  ;;  %v7703_v8 = vld [vmem:[%s10755_s4 + $0x60] sm:$0xff]   ;;  %v7704_v9 = vld [vmem:[%s10755_s4 + $0x18] sm:$0xff]   ;;  %v7706_v11 = vld [vmem:[%s10755_s4 + $0x10] sm:$0xff]   ;;  %s7999_s12 = scalar_lea.vmem %s10752_s1, %s6853_s23  ;;  %vm509_vm1 = vsmask.f32 256  ;;  %v10788_v15 = vmov 0  ;;  %s8622_s26 = scalar_lea.vmem %s10751_s0, %s6853_s23 }
  0x10   : > { %v7705_v10 = vld [vmem:[%s10755_s4 + $0x58] sm:$0xff]   ;;  %v7707_v12 = vld [vmem:[%s10755_s4 + $0x50] sm:$0xff]   ;;  %vm8008_vm2 = vmand %vm508_vm0, %vm509_vm1  ;;  %vm565_vm3 = vsmask.f32 7938  ;;  %v10791_v31 = vmov 0  ;;  %vm1040_vm6 = vcmask 1043456  }
  0x11   : > { %7258 = vmatpush3.bf16.msra.mxu1 %v7698_v3  ;;  %v10789_v15 = vsel %vm8008_vm2, 4294967295, %v10788_v15  ;;  %v6889_v17 = vld [vmem:[%s7999_s12] sm:$0xff]   ;;  %v7708_v20 = vld [vmem:[%s10755_s4 + $0x8] sm:$0xff]   ;;  %vm8041_vm4 = vmand %vm508_vm0, %vm565_vm3  ;;  %vm717_vm5 = vsmask.f32 4368  ;;  %vm2247_vm12 = vcmask 1042432  }
  0x12   : > { %7210 = vmatpush3.bf16.msra.mxu0 %v7699_v4  ;;  %7259 = vmatprep.subr.bf16.mxu1 %v7700_v5  ;;  %10790 = vst [vmem:[#allocation4_spill] sm:$0xff] %v10789_v15  ;;  %v8017_v18 = vld [vmem:[%s10753_s2] ss:$0 sm:$0xff]  ;;  %v6890_v22 = vunpack.c.l.bf16 %v6889_v17  ;;  %v6891_v23 = vunpack.c.h.bf16 %v6889_v17  ;;  %v514_v24 = vld [vmem:[#allocation2 + $0xc] sm:$0x1]  ;;  %v10792_v31 = vsel %vm8041_vm4, 4294967295, %v10791_v31  ;;  %vm8087_vm9 = vmor %vm509_vm1, %vm717_vm5 }
  0x13   : > { %7211 = vmatprep.subr.bf16.mxu0 %v7701_v6  ;;  %v511_v13 = vld [vmem:[#allocation2] sm:$0x1]  ;;  %v8004_v14 = vld [vmem:[#allocation2 + $0x4] sm:$0xf]  ;;  %v515_v26 = vsel %vm8008_vm2, 0, %v514_v24  ;;  %v7709_v28 = vld [vmem:[%s10755_s4 + $0x48] sm:$0xff]  }
  0x14   : > { %v1235_v16 = vshrl.u32 %v8004_v14, 16  ;;  %v1231_v19 = vshll.u32 %v8004_v14, 16  ;;  %v512_v21 = vsel %vm8008_vm2, 0, %v511_v13  ;;  %v8028_v25 = vld [vmem:[%s10754_s3] ss:$0 sm:$0xff]  ;;  %v398_v29 = vmul.f32 %v6890_v22, %v8017_v18  ;;  %10793 = vst [vmem:[#allocation5_spill] sm:$0xff] %v10792_v31  ;;  %vm8095_vm10 = vmand %vm1040_vm6, %vm565_vm3 }
  0x15   : > { %7260 = vmatpush3.bf16.msra.mxu1 %v7700_v5  ;;  %513 = vst [vmem:[#allocation2] sm:$0x1] %v512_v21  ;;  %v399_v30 = vmul.f32 %v6891_v23, %v8017_v18  ;;  %516 = vst [vmem:[#allocation2 + $0xc] sm:$0x1] %v515_v26  ;;  %v567_v32 = vld [vmem:[#allocation2 + $0x8] sm:$0x1] }
  0x16   : > { %7212 = vmatpush3.bf16.msra.mxu0 %v7701_v6  ;;  %7261 = vmatprep.subr.bf16.mxu1 %v7702_v7  ;;  %v8032_v27 = vrot.slane %v1231_v19, 5  ;;  %v568_v33 = vsel %vm8041_vm4, 0, %v567_v32  ;;  %v1237_v34 = vrot.slane %v1235_v16, 4  ;;  %v7710_v35 = vld [vmem:[%s10755_s4] sm:$0xff]   ;;  %v437_v36 = vadd.f32 %v8028_v25, %v398_v29  ;;  %v570_v38 = vld [vmem:[#allocation2 + $0x14] sm:$0x1] }
  0x17   : > { %7213 = vmatprep.subr.bf16.mxu0 %v7703_v8  ;;  %v438_v37 = vadd.f32 %v8028_v25, %v399_v30  ;;  %569 = vst [vmem:[#allocation2 + $0x8] sm:$0x1] %v568_v33  ;;  %vm1218_vm7 = vsmask.f32 3328  ;;  %v2252_v39 = vrot.slane %v8004_v14, 5  ;;  %v571_v41 = vsel %vm8041_vm4, 0, %v570_v38 }
  0x18   : > { %vm1219_vm8 = vsmask.f32 7440  ;;  %v1238_v40 = vor.u32 %v1237_v34, %v8032_v27  ;;  %v469_v42 = vmax.f32 %v437_v36, 0.0  ;;  %572 = vst [vmem:[#allocation2 + $0x14] sm:$0x1] %v571_v41  ;;  %v6952_v44 = vld [vmem:[%s7999_s12 + $0x8] sm:$0xff]  }
  0x19   : > { %7262 = vmatpush3.bf16.msra.mxu1 %v7702_v7  ;;  %v470_v43 = vmax.f32 %v438_v37, 0.0  ;;  %v517_v45 = vld [vmem:[#allocation2 + $0x18] sm:$0x1]  ;;  %v8058_v46 = vld [vmem:[%s7999_s12 + $0x10] sm:$0xff]   ;;  %v7711_v47 = vld [vmem:[%s10755_s4 + $0x40] sm:$0xff]   ;;  %v6894_v49 = vunpack.c.l.bf16 %v6952_v44  ;;  %v6895_v50 = vunpack.c.h.bf16 %v6952_v44  ;;  %v10798_v29 = vmov 0 }
  0x1a   : > { %7214 = vmatpush3.bf16.msra.mxu0 %v7703_v8  ;;  %7263 = vmatprep.subr.bf16.mxu1 %v7704_v9  ;;  %v8063_v48 = vrot.slane %v1238_v40, 4  ;;  %v518_v51 = vsel %vm8008_vm2, 0, %v517_v45  ;;  %v6856_v53 = vpack.c.bf16 %v469_v42, %v469_v42  ;;  %v6898_v55 = vunpack.c.l.bf16 %v8058_v46  ;;  %v8074_v1 = vld [vmem:[%s10755_s4 + $0xb8] sm:$0xff]   ;;  %vm8103_vm11 = vmor %vm1218_vm7, %vm1219_vm8  ;;  %v573_v41 = vld [vmem:[#allocation2 + $0x20] sm:$0x1]  ;;  %s6855_s25 = sshll.u32 %s11166_s28, 8 }
  0x1b   : > { %7215 = vmatprep.subr.bf16.mxu0 %v7705_v10  ;;  %v6857_v54 = vpack.c.bf16 %v470_v43, %v470_v43  ;;  %519 = vst [vmem:[#allocation2 + $0x18] sm:$0x1] %v518_v51  ;;  %v6899_v56 = vunpack.c.h.bf16 %v8058_v46  ;;  %v400_v60 = vmul.f32 %v6894_v49, %v8017_v18  ;;  %v8079_v2 = vld [vmem:[%s10755_s4 + $0x138] sm:$0xff]   ;;  %v401_v6 = vmul.f32 %v6895_v50, %v8017_v18  ;;  %v576_v46 = vld [vmem:[#allocation2 + $0x2c] sm:$0x1]  ;;  %s10546_s30 = scalar_lea.vmem %s10759_s8, %s6855_s25 }
  0x1c   : > { %v1154_v52 = vld [vmem:[#allocation2] sm:$0xf]  ;;  %v720_v61 = vshrl.u32 %v6856_v53, 16  ;;  %v723_v62 = vshll.u32 %v6856_v53, 16  ;;  %v1042_v16 = vld [vmem:[#allocation2 + $0xc] sm:$0xf]  ;;  %v402_v22 = vmul.f32 %v6898_v55, %v8017_v18 }
  0x1d   : > { %7264 = vmatpush3.bf16.msra.mxu1 %v7704_v9  ;;  %v1222_v57 = vshrl.u32 %v1154_v52, 16  ;;  %v1225_v58 = vshll.u32 %v1154_v52, 16  ;;  %v6585_v59 = vcombine.low %v1154_v52, %v8004_v14  ;;  %v728_v63 = vshrl.u32 %v6857_v54, 16  ;;  %v6954_v52 = vld [vmem:[%s7999_s12 + $0x18] sm:$0xff]   ;;  %v523_v53 = vld [vmem:[#allocation2 + $0x30] sm:$0x1] }
  0x1e   : > { %7216 = vmatpush3.bf16.msra.mxu0 %v7705_v10  ;;  %7265 = vmatprep.subr.bf16.mxu1 %v7706_v11  ;;  %v731_v0 = vshll.u32 %v6857_v54, 16  ;;  %v8081_v5 = vld [vmem:[#allocation2 + $0x8] sm:$0x1]  ;;  %v439_v7 = vadd.f32 %v8028_v25, %v400_v60  ;;  %v722_v9 = vrot.slane %v720_v61, 7  ;;  %v10799_v29 = vsel %vm8103_vm11, 4294967295, %v10798_v29  ;;  %v8132_v61 = vld [vmem:[%s7999_s12 + $0x20] sm:$0xff]  }
  0x1f   : > { %7217 = vmatprep.subr.bf16.mxu0 %v7707_v12  ;;  %v1224_v3 = vrot.slane %v1222_v57, 4  ;;  %v1227_v4 = vrot.slane %v1225_v58, 5  ;;  %7271 = vmatprep.mubr.bf16.mxu1 %v6585_v59  ;;  %v730_v10 = vrot.slane %v728_v63, 7  ;;  %v1046_v19 = vld [vmem:[#allocation2 + $0x14] sm:$0x1]  ;;  %10800 = vst [vmem:[#allocation6_spill] sm:$0xff] %v10799_v29  ;;  %v403_v40 = vmul.f32 %v6899_v56, %v8017_v18 }
  0x20   : > { %v471_v21 = vmax.f32 %v439_v7, 0.0  ;;  %v725_v23 = vor.u32 %v723_v62, %v722_v9  ;;  %v726_v24 = vrot.slane %v722_v9, 4  ;;  %v441_v50 = vadd.f32 %v8028_v25, %v402_v22  ;;  %v8135_v62 = vld [vmem:[%s7999_s12 + $0x28] sm:$0xff]  }
  0x21   : > { %7266 = vmatpush3.bf16.msra.mxu1 %v7706_v11  ;;  %v1241_v11 = vshll.u32 %v8081_v5, 16  ;;  %v1228_v17 = vor.u32 %v1227_v4, %v1224_v3  ;;  %v733_v26 = vor.u32 %v731_v0, %v730_v10  ;;  %v442_v51 = vadd.f32 %v8028_v25, %v403_v40 }
  0x22   : > { %7218 = vmatpush3.bf16.msra.mxu0 %v7707_v12  ;;  %7267 = vmatprep.subr.bf16.mxu1 %v7708_v20  ;;  %v2255_v12 = vrot.slane %v8081_v5, 5  ;;  %v6858_v34 = vpack.c.bf16 %v471_v21, %v471_v21  ;;  %v1043_v37 = vsel %vm8095_vm10, %v725_v23, %v1042_v16  ;;  %v1049_v56 = vld [vmem:[#allocation2 + $0x18] sm:$0xf]  ;;  %v473_v57 = vmax.f32 %v441_v50, 0.0 }
  0x23   : > { %7219 = vmatprep.subr.bf16.mxu0 %v7709_v28  ;;  %v1229_v30 = vrot.slane %v1228_v17, 4  ;;  %v1243_v32 = vrot.slane %v1241_v11, 5  ;;  %v734_v36 = vsel %vm8087_vm9, %v726_v24, %v733_v26  ;;  %1044 = vst [vmem:[#allocation2 + $0xc] sm:$0xf] %v1043_v37  ;;  %v474_v58 = vmax.f32 %v442_v51, 0.0 }
  0x24   : > { %1045 = vst [vmem:[#allocation2 + $0x10] sm:$0xf] %v734_v36  ;;  %v737_v45 = vshrl.u32 %v6858_v34, 16  ;;  %v740_v49 = vshll.u32 %v6858_v34, 16  ;;  %v574_v59 = vsel %vm8041_vm4, 0, %v573_v41  ;;  %v577_v60 = vsel %vm8041_vm4, 0, %v576_v46 }
  0x25   : > { %7268 = vmatpush3.bf16.msra.mxu1 %v7708_v20  ;;  %v440_v20 = vadd.f32 %v8028_v25, %v401_v6  ;;  %v1234_v42 = vsel %vm8103_vm11, %v1229_v30, %v8032_v27  ;;  %v1244_v43 = vsel %vm8103_vm11, %v8063_v48, %v1243_v32  ;;  %575 = vst [vmem:[#allocation2 + $0x20] sm:$0x1] %v574_v59  ;;  %578 = vst [vmem:[#allocation2 + $0x2c] sm:$0x1] %v577_v60  ;;  %vm2248_vm13 = vcmask 1046532  }
  0x26   : > { %7220 = vmatpush3.bf16.msra.mxu0 %v7709_v28  ;;  %7269 = vmatprep.subr.bf16.mxu1 %v7710_v35  ;;  %v735_v28 = vrot.slane %v730_v10, 4  ;;  %v739_v54 = vrot.slane %v737_v45, 7  ;;  %v6902_v4 = vunpack.c.l.bf16 %v6954_v52  ;;  %v6860_v6 = vpack.c.bf16 %v473_v57, %v473_v57  ;;  %vm8489_vm14 = vmor %vm2247_vm12, %vm2248_vm13 }
  0x27   : > { %7221 = vmatprep.subr.bf16.mxu0 %v7711_v47  ;;  %v472_v33 = vmax.f32 %v440_v20, 0.0  ;;  %v8137_v7 = vpack.c.bf16 %v474_v58, %v474_v58  ;;  %v6903_v9 = vunpack.c.h.bf16 %v6954_v52  ;;  %v524_v10 = vsel %vm8008_vm2, 0, %v523_v53 }
  0x28   : > { %v1047_v38 = vsel %vm8008_vm2, %v735_v28, %v1046_v19  ;;  %v742_v63 = vor.u32 %v740_v49, %v739_v54  ;;  %v743_v0 = vrot.slane %v739_v54, 4  ;;  %v404_v19 = vmul.f32 %v6902_v4, %v8017_v18  ;;  %525 = vst [vmem:[#allocation2 + $0x30] sm:$0x1] %v524_v10 }
  0x29   : > { %7270 = vmatpush3.bf16.msra.mxu1 %v7710_v35  ;;  %v520_v35 = vld [vmem:[#allocation2 + $0x24] sm:$0x1]  ;;  %1048 = vst [vmem:[#allocation2 + $0x14] sm:$0x1] %v1047_v38  ;;  %v6859_v44 = vpack.c.bf16 %v472_v33, %v472_v33  ;;  %v405_v23 = vmul.f32 %v6903_v9, %v8017_v18  ;;  %v6906_v24 = vunpack.c.l.bf16 %v8132_v61  ;;  %v6907_v26 = vunpack.c.h.bf16 %v8132_v61 }
  0x2a   : > { %7222 = vmatpush3.bf16.msra.mxu0 %v7711_v47  ;;  %7351 = vmatprep.subr.bf16.mxu1 %v8079_v2  ;;  %v6561_v47 = vcombine.low %v1234_v42, %v1244_v43  ;;  %v521_v48 = vsel %vm8008_vm2, 0, %v520_v35  ;;  %v1050_v17 = vsel %vm8095_vm10, %v742_v63, %v1049_v56  ;;  %v1156_v20 = vld [vmem:[#allocation2 + $0xc] sm:$0xf]  ;;  %v6910_v28 = vunpack.c.l.bf16 %v8135_v62  ;;  %v7719_v35 = vld [vmem:[%s10755_s4 + $0x130] sm:$0xff]  }
  0x2b   : > { %7303 = vmatprep.subr.bf16.mxu0 %v8074_v1  ;;  %v745_v27 = vshrl.u32 %v6859_v44, 16  ;;  %v748_v55 = vshll.u32 %v6859_v44, 16  ;;  %522 = vst [vmem:[#allocation2 + $0x24] sm:$0x1] %v521_v48  ;;  %v8144_v21 = vld [vmem:[#allocation2 + $0x10] sm:$0xf]  ;;  %v443_v58 = vadd.f32 %v8028_v25, %v404_v19 }
  0x2c   : > { %7223 = vmatprep.mubr.bf16.mxu0 %v6561_v47  ;;  %1051 = vst [vmem:[#allocation2 + $0x18] sm:$0xf] %v1050_v17  ;;  %v1246_v30 = vshrl.u32 %v1156_v20, 16  ;;  %v1249_v32 = vshll.u32 %v1156_v20, 16  ;;  %v1259_v33 = vshrl.u32 %v8144_v21, 16  ;;  %v6586_v34 = vcombine.low %v1156_v20, %v8144_v21  ;;  %v7727_v19 = vld [vmem:[%s10755_s4 + $0x120] sm:$0xff]  }
  0x2d   : > { %v747_v3 = vrot.slane %v745_v27, 7  ;;  %v2259_v36 = vrot.slane %v8144_v21, 5  ;;  %v1255_v37 = vshll.u32 %v8144_v21, 16  ;;  %v754_v49 = vshrl.u32 %v6860_v6, 16  ;;  %v1053_v50 = vld [vmem:[#allocation2 + $0x20] sm:$0x1] }
  0x2e   : > { %v1248_v41 = vrot.slane %v1246_v30, 4  ;;  %v1251_v42 = vrot.slane %v1249_v32, 5  ;;  %7272 = vmatmul.mubr.bf16.vlgmr.msra.gmra.mxu1 %v6586_v34  ;;  %v1261_v43 = vrot.slane %v1259_v33, 4  ;;  %v757_v52 = vshll.u32 %v6860_v6, 16  ;;  %v7723_v27 = vld [vmem:[%s10755_s4 + $0x128] sm:$0xff]  }
  0x2f   : > { %v750_v11 = vor.u32 %v748_v55, %v747_v3  ;;  %v752_v16 = vrot.slane %v747_v3, 4  ;;  %v8165_v45 = vrot.slane %v2259_v36, 4  ;;  %v1257_v46 = vrot.slane %v1255_v37, 5  ;;  %7352 = vmatpush3.bf16.msra.mxu1 %v8079_v2  ;;  %v1060_v57 = vld [vmem:[#allocation2 + $0x2c] sm:$0x1] }
  0x30   : > { %v8146_v22 = vld [vmem:[#allocation2 + $0x14] sm:$0x1]  ;;  %v1252_v51 = vor.u32 %v1251_v42, %v1248_v41  ;;  %v762_v53 = vshrl.u32 %v8137_v7, 16  ;;  %v765_v54 = vshll.u32 %v8137_v7, 16  ;;  %7353 = vmatprep.subr.bf16.mxu1 %v7719_v35  ;;  %v756_v56 = vrot.slane %v754_v49, 7 }
  0x31   : > { %v1265_v38 = vshll.u32 %v8146_v22, 16  ;;  %v2262_v40 = vrot.slane %v8146_v22, 5  ;;  %v751_v44 = vsel %vm8087_vm9, %v743_v0, %v750_v11  ;;  %v1262_v55 = vor.u32 %v1261_v43, %v1257_v46  ;;  %v526_v41 = vld [vmem:[#allocation2 + $0x3c] sm:$0x1] }
  0x32   : > { %1052 = vst [vmem:[#allocation2 + $0x1c] sm:$0xf] %v751_v44  ;;  %v1056_v48 = vld [vmem:[#allocation2 + $0x24] sm:$0xf]  ;;  %v1054_v2 = vsel %vm8008_vm2, %v752_v16, %v1053_v50  ;;  %v1253_v59 = vrot.slane %v1252_v51, 4  ;;  %v764_v63 = vrot.slane %v762_v53, 7  ;;  %v444_v0 = vadd.f32 %v8028_v25, %v405_v23 }
  0x33   : > { %v1267_v47 = vrot.slane %v1265_v38, 5  ;;  %v1158_v60 = vld [vmem:[#allocation2 + $0x18] sm:$0xf]  ;;  %1055 = vst [vmem:[#allocation2 + $0x20] sm:$0x1] %v1054_v2  ;;  %v406_v3 = vmul.f32 %v6906_v24, %v8017_v18  ;;  %v1263_v4 = vrot.slane %v1262_v55, 4  ;;  %v759_v9 = vor.u32 %v757_v52, %v756_v56  ;;  %7354 = vmatpush3.bf16.msra.mxu1 %v7719_v35 }
  0x34   : > { %v1270_v6 = vshrl.u32 %v1158_v60, 16  ;;  %v1273_v7 = vshll.u32 %v1158_v60, 16  ;;  %v1258_v10 = vsel %vm8103_vm11, %v1253_v59, %v1257_v46  ;;  %v760_v11 = vrot.slane %v756_v56, 4  ;;  %7355 = vmatprep.subr.bf16.mxu1 %v7723_v27  ;;  %v7718_v35 = vld [vmem:[%s10755_s4 + $0xb0] sm:$0xff]   ;;  %v579_v52 = vld [vmem:[#allocation2 + $0x38] sm:$0x1] }
  0x35   : > { %v767_v16 = vor.u32 %v765_v54, %v764_v63  ;;  %v769_v17 = vrot.slane %v764_v63, 4  ;;  %v1268_v20 = vsel %vm8103_vm11, %v1263_v4, %v1267_v47  ;;  %v1057_v30 = vsel %vm8095_vm10, %v759_v9, %v1056_v48  ;;  %v7731_v53 = vld [vmem:[%s10755_s4 + $0x118] sm:$0xff]  }
  0x36   : > { %v1272_v23 = vrot.slane %v1270_v6, 4  ;;  %v1275_v24 = vrot.slane %v1273_v7, 5  ;;  %v6562_v32 = vcombine.low %v1258_v10, %v1268_v20  ;;  %1058 = vst [vmem:[#allocation2 + $0x24] sm:$0xf] %v1057_v30  ;;  %v475_v38 = vmax.f32 %v443_v58, 0.0  ;;  %v7722_v58 = vld [vmem:[%s10755_s4 + $0xa8] sm:$0xff]  }
  0x37   : > { %v768_v34 = vsel %vm8087_vm9, %v760_v11, %v767_v16  ;;  %v1061_v37 = vsel %vm8008_vm2, %v769_v17, %v1060_v57  ;;  %7356 = vmatpush3.bf16.msra.mxu1 %v7723_v27  ;;  %v476_v47 = vmax.f32 %v444_v0, 0.0  ;;  %v407_v50 = vmul.f32 %v6907_v26, %v8017_v18  ;;  %v7735_v7 = vld [vmem:[%s10755_s4 + $0x110] sm:$0xff]  }
  0x38   : > { %1059 = vst [vmem:[#allocation2 + $0x28] sm:$0xf] %v768_v34  ;;  %v1276_v44 = vor.u32 %v1275_v24, %v1272_v23  ;;  %1062 = vst [vmem:[#allocation2 + $0x2c] sm:$0x1] %v1061_v37  ;;  %7224 = vmatmul.mubr.bf16.vlgmr.msra.gmra.mxu0 %v6562_v32  ;;  %v6862_v49 = vpack.c.bf16 %v475_v38, %v475_v38  ;;  %v445_v51 = vadd.f32 %v8028_v25, %v406_v3 }
  0x39   : > { %v1159_v33 = vld [vmem:[#allocation2 + $0x1c] sm:$0xf]  ;;  %7357 = vmatprep.subr.bf16.mxu1 %v7727_v19  ;;  %7304 = vmatpush3.bf16.msra.mxu0 %v8074_v1  ;;  %v527_v48 = vsel %vm8008_vm2, 0, %v526_v41  ;;  %v6863_v26 = vpack.c.bf16 %v476_v47, %v476_v47  ;;  %v580_v17 = vsel %vm8041_vm4, 0, %v579_v52  ;;  %v1063_v41 = vld [vmem:[#allocation2 + $0x30] sm:$0xf] }
  0x3a   : > { %v1283_v42 = vshrl.u32 %v1159_v33, 16  ;;  %v6587_v43 = vcombine.low %v1158_v60, %v1159_v33  ;;  %v1279_v46 = vshll.u32 %v1159_v33, 16  ;;  %v1204_v54 = vld [vmem:[#allocation2 + $0x20] sm:$0x1]  ;;  %v1277_v27 = vrot.slane %v1276_v44, 4  ;;  %7305 = vmatprep.subr.bf16.mxu0 %v7718_v35  ;;  %v7739_v47 = vld [vmem:[%s10755_s4 + $0x108] sm:$0xff]  }
  0x3b   : > { %v1289_v61 = vshll.u32 %v1204_v54, 16  ;;  %v771_v2 = vshrl.u32 %v6862_v49, 16  ;;  %v774_v57 = vshll.u32 %v6862_v49, 16  ;;  %528 = vst [vmem:[#allocation2 + $0x3c] sm:$0x1] %v527_v48  ;;  %v446_v60 = vadd.f32 %v8028_v25, %v407_v50  ;;  %7358 = vmatpush3.bf16.msra.mxu1 %v7727_v19  ;;  %v7726_v19 = vld [vmem:[%s10755_s4 + $0xa0] sm:$0xff]  }
  0x3c   : > { %7275 = vmatprep.mubr.bf16.mxu1 %v6587_v43  ;;  %v1281_v55 = vrot.slane %v1279_v46, 5  ;;  %v1285_v56 = vrot.slane %v1283_v42, 4  ;;  %v477_v63 = vmax.f32 %v445_v51, 0.0  ;;  %v779_v4 = vshrl.u32 %v6863_v26, 16  ;;  %7359 = vmatprep.subr.bf16.mxu1 %v7731_v53  ;;  %581 = vst [vmem:[#allocation2 + $0x38] sm:$0x1] %v580_v17 }
  0x3d   : > { %v1291_v0 = vrot.slane %v1289_v61, 5  ;;  %v773_v3 = vrot.slane %v771_v2, 7  ;;  %v782_v6 = vshll.u32 %v6863_v26, 16  ;;  %v1160_v9 = vld [vmem:[#allocation2 + $0x24] sm:$0xf]  ;;  %7306 = vmatpush3.bf16.msra.mxu0 %v7718_v35  ;;  %v478_v11 = vmax.f32 %v446_v60, 0.0 }
  0x3e   : > { %v1282_v1 = vsel %vm8103_vm11, %v1277_v27, %v1281_v55  ;;  %v1286_v59 = vor.u32 %v1285_v56, %v1281_v55  ;;  %v8213_v16 = vpack.c.bf16 %v477_v63, %v477_v63  ;;  %v1294_v23 = vshrl.u32 %v1160_v9, 16  ;;  %7307 = vmatprep.subr.bf16.mxu0 %v7722_v58  ;;  %v582_v56 = vld [vmem:[#allocation2 + $0x44] sm:$0x1]  ;;  %v7730_v48 = vld [vmem:[%s10755_s4 + $0x98] sm:$0xff]   ;;  %v529_v63 = vld [vmem:[#allocation2 + $0x48] sm:$0x1] }
  0x3f   : > { %v1161_v20 = vld [vmem:[#allocation2 + $0x28] sm:$0xf]  ;;  %v1297_v24 = vshll.u32 %v1160_v9, 16  ;;  %v1205_v30 = vld [vmem:[#allocation2 + $0x2c] sm:$0x1]  ;;  %v776_v32 = vor.u32 %v774_v57, %v773_v3  ;;  %v6911_v33 = vunpack.c.h.bf16 %v8135_v62  ;;  %7360 = vmatpush3.bf16.msra.mxu1 %v7731_v53  ;;  %v777_v51 = vrot.slane %v773_v3, 4 }
  0x40   : > { %v1287_v10 = vrot.slane %v1286_v59, 4  ;;  %v1307_v34 = vshrl.u32 %v1161_v20, 16  ;;  %v6588_v35 = vcombine.low %v1160_v9, %v1161_v20  ;;  %v1303_v38 = vshll.u32 %v1161_v20, 16  ;;  %7361 = vmatprep.subr.bf16.mxu1 %v7735_v7 }
  0x41   : > { %v1296_v42 = vrot.slane %v1294_v23, 4  ;;  %v1299_v43 = vrot.slane %v1297_v24, 5  ;;  %v1313_v46 = vshll.u32 %v1205_v30, 16  ;;  %v781_v52 = vrot.slane %v779_v4, 7  ;;  %7308 = vmatpush3.bf16.msra.mxu0 %v7722_v58  ;;  %v532_v23 = vld [vmem:[#allocation2 + $0x54] sm:$0x1] }
  0x42   : > { %v1292_v37 = vsel %vm8103_vm11, %v1287_v10, %v1291_v0  ;;  %7276 = vmatmul.mubr.bf16.gmra.mxu1 %v6588_v35  ;;  %v1305_v49 = vrot.slane %v1303_v38, 5  ;;  %v1309_v50 = vrot.slane %v1307_v34, 4  ;;  %v1064_v53 = vsel %vm8095_vm10, %v776_v32, %v1063_v41  ;;  %7309 = vmatprep.subr.bf16.mxu0 %v7726_v19  ;;  %v6957_v10 = vld [vmem:[%s7999_s12 + $0x30] sm:$0xff]  }
  0x43   : > { %v6563_v44 = vcombine.low %v1282_v1, %v1292_v37  ;;  %v1300_v54 = vor.u32 %v1299_v43, %v1296_v42  ;;  %v1315_v27 = vrot.slane %v1313_v46, 5  ;;  %v6865_v55 = vpack.c.bf16 %v478_v11, %v478_v11  ;;  %1065 = vst [vmem:[#allocation2 + $0x30] sm:$0xf] %v1064_v53  ;;  %7362 = vmatpush3.bf16.msra.mxu1 %v7735_v7  ;;  %v1067_v9 = vld [vmem:[#allocation2 + $0x38] sm:$0x1] }
  0x44   : > { %v1310_v61 = vor.u32 %v1309_v50, %v1305_v49  ;;  %v784_v26 = vor.u32 %v782_v6, %v781_v52  ;;  %v786_v2 = vrot.slane %v781_v52, 4  ;;  %v788_v57 = vshrl.u32 %v8213_v16, 16  ;;  %7363 = vmatprep.subr.bf16.mxu1 %v7739_v47  ;;  %v588_v46 = vld [vmem:[#allocation2 + $0x5c] sm:$0x1]  ;;  %v7738_v52 = vld [vmem:[%s10755_s4 + $0x88] sm:$0xff]  }
  0x45   : > { %7227 = vmatprep.mubr.bf16.mxu0 %v6563_v44  ;;  %v1301_v58 = vrot.slane %v1300_v54, 4  ;;  %v791_v1 = vshll.u32 %v8213_v16, 16  ;;  %v796_v59 = vshrl.u32 %v6865_v55, 16  ;;  %v799_v60 = vshll.u32 %v6865_v55, 16  ;;  %7310 = vmatpush3.bf16.msra.mxu0 %v7726_v19  ;;  %v1070_v16 = vld [vmem:[#allocation2 + $0x3c] sm:$0xf] }
  0x46   : > { %v1311_v0 = vrot.slane %v1310_v61, 4  ;;  %v785_v3 = vsel %vm8087_vm9, %v777_v51, %v784_v26  ;;  %v790_v4 = vrot.slane %v788_v57, 7  ;;  %v583_v6 = vsel %vm8041_vm4, 0, %v582_v56  ;;  %7311 = vmatprep.subr.bf16.mxu0 %v7730_v48  ;;  %v7734_v19 = vld [vmem:[%s10755_s4 + $0x90] sm:$0xff]  }
  0x47   : > { %v1306_v7 = vsel %vm8103_vm11, %v1301_v58, %v1305_v49  ;;  %1066 = vst [vmem:[#allocation2 + $0x34] sm:$0xf] %v785_v3  ;;  %v798_v11 = vrot.slane %v796_v59, 7  ;;  %v1068_v17 = vsel %vm8008_vm2, %v786_v2, %v1067_v9  ;;  %584 = vst [vmem:[#allocation2 + $0x44] sm:$0x1] %v583_v6  ;;  %v408_v20 = vmul.f32 %v6910_v28, %v8017_v18  ;;  %v7743_v2 = vld [vmem:[%s10755_s4 + $0x100] sm:$0xff]  }
  0x48   : > { %v1316_v24 = vsel %vm8103_vm11, %v1311_v0, %v1315_v27  ;;  %v793_v30 = vor.u32 %v791_v1, %v790_v4  ;;  %v794_v32 = vrot.slane %v790_v4, 4  ;;  %1069 = vst [vmem:[#allocation2 + $0x38] sm:$0x1] %v1068_v17  ;;  %v409_v34 = vmul.f32 %v6911_v33, %v8017_v18  ;;  %7364 = vmatpush3.bf16.msra.mxu1 %v7739_v47  ;;  %v585_v28 = vld [vmem:[#allocation2 + $0x50] sm:$0x1] }
  0x49   : > { %v6564_v35 = vcombine.low %v1306_v7, %v1316_v24  ;;  %v801_v37 = vor.u32 %v799_v60, %v798_v11  ;;  %v803_v38 = vrot.slane %v798_v11, 4  ;;  %v447_v62 = vadd.f32 %v8028_v25, %v408_v20  ;;  %7312 = vmatpush3.bf16.msra.mxu0 %v7730_v48  ;;  %7365 = vmatprep.subr.bf16.mxu1 %v7743_v2 }
  0x4a   : > { %v1071_v41 = vsel %vm8095_vm10, %v793_v30, %v1070_v16  ;;  %v448_v42 = vadd.f32 %v8028_v25, %v409_v34  ;;  %v530_v43 = vsel %vm8008_vm2, 0, %v529_v63  ;;  %v6914_v44 = vunpack.c.l.bf16 %v6957_v10  ;;  %v1162_v33 = vld [vmem:[#allocation2 + $0x30] sm:$0xf]  ;;  %7313 = vmatprep.subr.bf16.mxu0 %v7734_v19 }
  0x4b   : > { %7228 = vmatmul.mubr.bf16.gmra.mxu0 %v6564_v35  ;;  %v802_v47 = vsel %vm8087_vm9, %v794_v32, %v801_v37  ;;  %1072 = vst [vmem:[#allocation2 + $0x3c] sm:$0xf] %v1071_v41  ;;  %v479_v49 = vmax.f32 %v447_v62, 0.0  ;;  %531 = vst [vmem:[#allocation2 + $0x48] sm:$0x1] %v530_v43  ;;  %v6915_v50 = vunpack.c.h.bf16 %v6957_v10  ;;  %v533_v51 = vsel %vm8008_vm2, 0, %v532_v23 }
  0x4c   : > { %v1318_v54 = vshrl.u32 %v1162_v33, 16  ;;  %v1321_v27 = vshll.u32 %v1162_v33, 16  ;;  %1073 = vst [vmem:[#allocation2 + $0x40] sm:$0xf] %v802_v47  ;;  %v480_v53 = vmax.f32 %v448_v42, 0.0  ;;  %v410_v55 = vmul.f32 %v6914_v44, %v8017_v18  ;;  %v7742_v10 = vld [vmem:[%s10755_s4 + $0x80] sm:$0xff]   ;;  %7366 = vmatpush3.bf16.msra.mxu1 %v7743_v2 }
  0x4d   : > { %534 = vst [vmem:[#allocation2 + $0x54] sm:$0x1] %v533_v51  ;;  %v6866_v56 = vpack.c.bf16 %v479_v49, %v479_v49  ;;  %v411_v48 = vmul.f32 %v6915_v50, %v8017_v18  ;;  %v586_v61 = vsel %vm8041_vm4, 0, %v585_v28  ;;  %v589_v26 = vsel %vm8041_vm4, 0, %v588_v46  ;;  %7314 = vmatpush3.bf16.msra.mxu0 %v7734_v19  ;;  %v7744_v43 = vld [vmem:[%s10755_s4 + $0xf8] sm:$0xff]  }
  0x4e   : > { %v1163_v57 = vld [vmem:[#allocation2 + $0x34] sm:$0xf]  ;;  %v1320_v58 = vrot.slane %v1318_v54, 4  ;;  %v1323_v1 = vrot.slane %v1321_v27, 5  ;;  %v1074_v59 = vld [vmem:[#allocation2 + $0x44] sm:$0x1]  ;;  %v6867_v60 = vpack.c.bf16 %v480_v53, %v480_v53  ;;  %v8274_v63 = vadd.f32 %v8028_v25, %v410_v55  ;;  %7315 = vmatprep.subr.bf16.mxu0 %v7738_v52 }
  0x4f   : > { %587 = vst [vmem:[#allocation2 + $0x50] sm:$0x1] %v586_v61  ;;  %590 = vst [vmem:[#allocation2 + $0x5c] sm:$0x1] %v589_v26  ;;  %v1331_v0 = vshrl.u32 %v1163_v57, 16  ;;  %v6589_v3 = vcombine.low %v1162_v33, %v1163_v57  ;;  %v1327_v9 = vshll.u32 %v1163_v57, 16  ;;  %v1075_v6 = vsel %vm8008_vm2, %v803_v38, %v1074_v59 }
  0x50   : > { %v1206_v4 = vld [vmem:[#allocation2 + $0x38] sm:$0x1]  ;;  %v1324_v7 = vor.u32 %v1323_v1, %v1320_v58  ;;  %1076 = vst [vmem:[#allocation2 + $0x44] sm:$0x1] %v1075_v6  ;;  %v805_v16 = vshrl.u32 %v6866_v56, 16  ;;  %v808_v17 = vshll.u32 %v6866_v56, 16  ;;  %v450_v37 = vadd.f32 %v8028_v25, %v411_v48 }
  0x51   : > { %v1337_v11 = vshll.u32 %v1206_v4, 16  ;;  %7279 = vmatprep.mubr.bf16.mxu1 %v6589_v3  ;;  %v1329_v20 = vrot.slane %v1327_v9, 5  ;;  %v1333_v23 = vrot.slane %v1331_v0, 4  ;;  %v813_v19 = vshrl.u32 %v6867_v60, 16  ;;  %7316 = vmatpush3.bf16.msra.mxu0 %v7738_v52  ;;  %v7745_v61 = vld [vmem:[%s10755_s4 + $0x178] sm:$0xff]  }
  0x52   : > { %v816_v24 = vshll.u32 %v6867_v60, 16  ;;  %v1164_v30 = vld [vmem:[#allocation2 + $0x3c] sm:$0xf]  ;;  %v1325_v32 = vrot.slane %v1324_v7, 4  ;;  %v807_v35 = vrot.slane %v805_v16, 7  ;;  %7317 = vmatprep.subr.bf16.mxu0 %v7742_v10  ;;  %7447 = vmatprep.subr.bf16.mxu1 %v7745_v61  ;;  %v482_v7 = vmax.f32 %v450_v37, 0.0 }
  0x53   : > { %v1339_v34 = vrot.slane %v1337_v11, 5  ;;  %v1165_v38 = vld [vmem:[#allocation2 + $0x40] sm:$0xf]  ;;  %v1342_v62 = vshrl.u32 %v1164_v30, 16  ;;  %v1345_v28 = vshll.u32 %v1164_v30, 16  ;;  %v1334_v41 = vor.u32 %v1333_v23, %v1329_v20  ;;  %v6958_v59 = vld [vmem:[%s7999_s12 + $0x38] sm:$0xff]  }
  0x54   : > { %v815_v42 = vrot.slane %v813_v19, 7  ;;  %v1355_v44 = vshrl.u32 %v1165_v38, 16  ;;  %v6590_v46 = vcombine.low %v1164_v30, %v1165_v38  ;;  %v1330_v33 = vsel %vm8103_vm11, %v1325_v32, %v1329_v20  ;;  %v1077_v49 = vld [vmem:[#allocation2 + $0x48] sm:$0xf]  ;;  %v535_v9 = vld [vmem:[#allocation2 + $0x60] sm:$0x1] }
  0x55   : > { %v1351_v47 = vshll.u32 %v1165_v38, 16  ;;  %v1344_v50 = vrot.slane %v1342_v62, 4  ;;  %v1347_v51 = vrot.slane %v1345_v28, 5  ;;  %v1335_v52 = vrot.slane %v1334_v41, 4  ;;  %7318 = vmatpush3.bf16.msra.mxu0 %v7742_v10  ;;  %v8301_v16 = vld [vmem:[%s7999_s12 + $0x40] sm:$0xff]  }
  0x56   : > { %v810_v54 = vor.u32 %v808_v17, %v807_v35  ;;  %7280 = vmatmul.mubr.bf16.gmra.mxu1 %v6590_v46  ;;  %v1357_v53 = vrot.slane %v1355_v44, 4  ;;  %v811_v55 = vrot.slane %v807_v35, 4  ;;  %v818_v56 = vor.u32 %v816_v24, %v815_v42  ;;  %v1081_v48 = vld [vmem:[#allocation2 + $0x50] sm:$0x1]  ;;  %7399 = vmatprep.subr.bf16.mxu0 %v7744_v43  ;;  %v538_v62 = vld [vmem:[#allocation2 + $0x6c] sm:$0x1] }
  0x57   : > { %v1353_v27 = vrot.slane %v1351_v47, 5  ;;  %v1340_v26 = vsel %vm8103_vm11, %v1335_v52, %v1339_v34  ;;  %v1207_v2 = vld [vmem:[#allocation2 + $0x44] sm:$0x1]  ;;  %v1348_v57 = vor.u32 %v1347_v51, %v1344_v50  ;;  %v820_v58 = vrot.slane %v815_v42, 4  ;;  %v1084_v46 = vld [vmem:[#allocation2 + $0x54] sm:$0xf] }
  0x58   : > { %v1078_v1 = vsel %vm8095_vm10, %v810_v54, %v1077_v49  ;;  %v6565_v60 = vcombine.low %v1330_v33, %v1340_v26  ;;  %v1361_v3 = vshll.u32 %v1207_v2, 16  ;;  %v819_v4 = vsel %vm8087_vm9, %v811_v55, %v818_v56  ;;  %v8318_v52 = vld [vmem:[%s10753_s2] ss:$0 sm:$0xff] }
  0x59   : > { %v1358_v0 = vor.u32 %v1357_v53, %v1353_v27  ;;  %1079 = vst [vmem:[#allocation2 + $0x48] sm:$0xf] %v1078_v1  ;;  %v1349_v6 = vrot.slane %v1348_v57, 4  ;;  %1080 = vst [vmem:[#allocation2 + $0x4c] sm:$0xf] %v819_v4  ;;  %v481_v10 = vmax.f32 %v8274_v63, 0.0  ;;  %v1082_v11 = vsel %vm8008_vm2, %v820_v58, %v1081_v48 }
  0x5a   : > { %7231 = vmatprep.mubr.bf16.mxu0 %v6565_v60  ;;  %v1363_v20 = vrot.slane %v1361_v3, 5  ;;  %1083 = vst [vmem:[#allocation2 + $0x50] sm:$0x1] %v1082_v11  ;;  %v6918_v23 = vunpack.c.l.bf16 %v6958_v59  ;;  %v6919_v19 = vunpack.c.h.bf16 %v6958_v59  ;;  %v6869_v32 = vpack.c.bf16 %v482_v7, %v482_v7  ;;  %v1088_v1 = vld [vmem:[#allocation2 + $0x5c] sm:$0x1] }
  0x5b   : > { %v1359_v17 = vrot.slane %v1358_v0, 4  ;;  %v1354_v24 = vsel %vm8103_vm11, %v1349_v6, %v1353_v27  ;;  %v6868_v30 = vpack.c.bf16 %v481_v10, %v481_v10  ;;  %v536_v63 = vsel %vm8008_vm2, 0, %v535_v9 }
  0x5c   : > { %v412_v35 = vmul.f32 %v6918_v23, %v8017_v18  ;;  %v413_v37 = vmul.f32 %v6919_v19, %v8017_v18  ;;  %537 = vst [vmem:[#allocation2 + $0x60] sm:$0x1] %v536_v63  ;;  %v6922_v38 = vunpack.c.l.bf16 %v8301_v16  ;;  %v830_v43 = vshrl.u32 %v6869_v32, 16 }
  0x5d   : > { %v1364_v34 = vsel %vm8103_vm11, %v1359_v17, %v1363_v20  ;;  %v822_v41 = vshrl.u32 %v6868_v30, 16  ;;  %v825_v42 = vshll.u32 %v6868_v30, 16  ;;  %v833_v44 = vshll.u32 %v6869_v32, 16  ;;  %v591_v30 = vld [vmem:[#allocation2 + $0x68] sm:$0x1] }
  0x5e   : > { %v6566_v28 = vcombine.low %v1354_v24, %v1364_v34  ;;  %v451_v33 = vadd.f32 %v8028_v25, %v412_v35  ;;  %v452_v47 = vadd.f32 %v8028_v25, %v413_v37  ;;  %v6923_v49 = vunpack.c.h.bf16 %v8301_v16  ;;  %v8333_v35 = vld [vmem:[%s10754_s3] ss:$0 sm:$0xff] }
  0x5f   : > { %v824_v51 = vrot.slane %v822_v41, 7  ;;  %v832_v18 = vrot.slane %v830_v43, 7  ;;  %v414_v54 = vmul.f32 %v8318_v52, %v6922_v38  ;;  %v539_v27 = vsel %vm8008_vm2, 0, %v538_v62  ;;  %v594_v38 = vld [vmem:[#allocation2 + $0x74] sm:$0x1]  ;;  %v6960_v43 = vld [vmem:[%s7999_s12 + $0x48] sm:$0xff]  }
  0x60   : > { %7232 = vmatmul.mubr.bf16.gmra.mxu0 %v6566_v28  ;;  %v1166_v50 = vld [vmem:[#allocation2 + $0x48] sm:$0xf]  ;;  %v1167_v53 = vld [vmem:[#allocation2 + $0x4c] sm:$0xf]  ;;  %v483_v25 = vmax.f32 %v451_v33, 0.0  ;;  %v484_v48 = vmax.f32 %v452_v47, 0.0  ;;  %v415_v24 = vmul.f32 %v8318_v52, %v6923_v49 }
  0x61   : > { %v1366_v55 = vshrl.u32 %v1166_v50, 16  ;;  %v1369_v56 = vshll.u32 %v1166_v50, 16  ;;  %540 = vst [vmem:[#allocation2 + $0x6c] sm:$0x1] %v539_v27  ;;  %v1379_v61 = vshrl.u32 %v1167_v53, 16  ;;  %v6591_v26 = vcombine.low %v1166_v50, %v1167_v53 }
  0x62   : > { %v827_v2 = vor.u32 %v825_v42, %v824_v51  ;;  %v828_v57 = vrot.slane %v824_v51, 4  ;;  %v1208_v58 = vld [vmem:[#allocation2 + $0x50] sm:$0x1]  ;;  %v835_v0 = vor.u32 %v833_v44, %v832_v18  ;;  %v837_v3 = vrot.slane %v832_v18, 4 }
  0x63   : > { %v1368_v59 = vrot.slane %v1366_v55, 4  ;;  %v1371_v60 = vrot.slane %v1369_v56, 5  ;;  %7283 = vmatprep.mubr.bf16.mxu1 %v6591_v26  ;;  %v1375_v9 = vshll.u32 %v1167_v53, 16  ;;  %v1381_v6 = vrot.slane %v1379_v61, 4  ;;  %v1091_v33 = vld [vmem:[#allocation2 + $0x60] sm:$0xf] }
  0x64   : > { %v1085_v4 = vsel %vm8095_vm10, %v827_v2, %v1084_v46  ;;  %v1385_v10 = vshll.u32 %v1208_v58, 16  ;;  %v836_v7 = vsel %vm8087_vm9, %v828_v57, %v835_v0  ;;  %v1089_v16 = vsel %vm8008_vm2, %v837_v3, %v1088_v1 }
  0x65   : > { %1086 = vst [vmem:[#allocation2 + $0x54] sm:$0xf] %v1085_v4  ;;  %v1372_v11 = vor.u32 %v1371_v60, %v1368_v59  ;;  %v6870_v17 = vpack.c.bf16 %v483_v25, %v483_v25  ;;  %1087 = vst [vmem:[#allocation2 + $0x58] sm:$0xf] %v836_v7  ;;  %v1377_v20 = vrot.slane %v1375_v9, 5  ;;  %v6871_v19 = vpack.c.bf16 %v484_v48, %v484_v48 }
  0x66   : > { %v1387_v23 = vrot.slane %v1385_v10, 5  ;;  %1090 = vst [vmem:[#allocation2 + $0x5c] sm:$0x1] %v1089_v16  ;;  %v453_v37 = vadd.f32 %v8333_v35, %v414_v54  ;;  %v454_v42 = vadd.f32 %v8333_v35, %v415_v24  ;;  %v592_v49 = vsel %vm8041_vm4, 0, %v591_v30  ;;  %v541_v24 = vld [vmem:[#allocation2 + $0x78] sm:$0x1] }
  0x67   : > { %v1373_v32 = vrot.slane %v1372_v11, 4  ;;  %v839_v63 = vshrl.u32 %v6870_v17, 16  ;;  %v842_v34 = vshll.u32 %v6870_v17, 16  ;;  %v1382_v62 = vor.u32 %v1381_v6, %v1377_v20  ;;  %593 = vst [vmem:[#allocation2 + $0x68] sm:$0x1] %v592_v49 }
  0x68   : > { %v847_v28 = vshrl.u32 %v6871_v19, 16  ;;  %v850_v41 = vshll.u32 %v6871_v19, 16  ;;  %v485_v47 = vmax.f32 %v453_v37, 0.0  ;;  %v486_v18 = vmax.f32 %v454_v42, 0.0 }
  0x69   : > { %v1378_v44 = vsel %vm8103_vm11, %v1373_v32, %v1377_v20  ;;  %v841_v46 = vrot.slane %v839_v63, 7  ;;  %v1383_v50 = vrot.slane %v1382_v62, 4  ;;  %v595_v54 = vsel %vm8041_vm4, 0, %v594_v38  ;;  %v1098_v62 = vld [vmem:[#allocation2 + $0x6c] sm:$0xf] }
  0x6a   : > { %v849_v51 = vrot.slane %v847_v28, 7  ;;  %v6872_v55 = vpack.c.bf16 %v485_v47, %v485_v47  ;;  %596 = vst [vmem:[#allocation2 + $0x74] sm:$0x1] %v595_v54  ;;  %v6926_v56 = vunpack.c.l.bf16 %v6960_v43  ;;  %v6873_v2 = vpack.c.bf16 %v486_v18, %v486_v18 }
  0x6b   : > { %v844_v27 = vor.u32 %v842_v34, %v841_v46  ;;  %v845_v53 = vrot.slane %v841_v46, 4  ;;  %v1388_v48 = vsel %vm8103_vm11, %v1383_v50, %v1387_v23  ;;  %v542_v54 = vsel %vm8008_vm2, 0, %v541_v24 }
  0x6c   : > { %v1168_v25 = vld [vmem:[#allocation2 + $0x54] sm:$0xf]  ;;  %v852_v61 = vor.u32 %v850_v41, %v849_v51  ;;  %v854_v26 = vrot.slane %v849_v51, 4  ;;  %v1169_v57 = vld [vmem:[#allocation2 + $0x58] sm:$0xf]  ;;  %v6567_v59 = vcombine.low %v1378_v44, %v1388_v48  ;;  %v856_v16 = vshrl.u32 %v6872_v55, 16 }
  0x6d   : > { %v1390_v58 = vshrl.u32 %v1168_v25, 16  ;;  %v1393_v1 = vshll.u32 %v1168_v25, 16  ;;  %v1209_v60 = vld [vmem:[#allocation2 + $0x5c] sm:$0x1]  ;;  %v1092_v0 = vsel %vm8095_vm10, %v844_v27, %v1091_v33  ;;  %v1403_v3 = vshrl.u32 %v1169_v57, 16 }
  0x6e   : > { %v6592_v4 = vcombine.low %v1168_v25, %v1169_v57  ;;  %v1399_v9 = vshll.u32 %v1169_v57, 16  ;;  %v1409_v6 = vshll.u32 %v1209_v60, 16  ;;  %1093 = vst [vmem:[#allocation2 + $0x60] sm:$0xf] %v1092_v0  ;;  %7235 = vmatprep.mubr.bf16.mxu0 %v6567_v59  ;;  %v853_v11 = vsel %vm8087_vm9, %v845_v53, %v852_v61  ;;  %v1095_v37 = vld [vmem:[#allocation2 + $0x68] sm:$0x1] }
  0x6f   : > { %v1392_v10 = vrot.slane %v1390_v58, 4  ;;  %v1395_v7 = vrot.slane %v1393_v1, 5  ;;  %v1405_v20 = vrot.slane %v1403_v3, 4  ;;  %1094 = vst [vmem:[#allocation2 + $0x64] sm:$0xf] %v853_v11  ;;  %v859_v19 = vshll.u32 %v6872_v55, 16 }
  0x70   : > { %7284 = vmatmul.mubr.bf16.gmra.mxu1 %v6592_v4  ;;  %v1401_v17 = vrot.slane %v1399_v9, 5  ;;  %v1411_v23 = vrot.slane %v1409_v6, 5  ;;  %v858_v32 = vrot.slane %v856_v16, 7  ;;  %v864_v63 = vshrl.u32 %v6873_v2, 16  ;;  %543 = vst [vmem:[#allocation2 + $0x78] sm:$0x1] %v542_v54 }
  0x71   : > { %v1396_v30 = vor.u32 %v1395_v7, %v1392_v10  ;;  %v867_v34 = vshll.u32 %v6873_v2, 16  ;;  %v1096_v28 = vsel %vm8008_vm2, %v854_v26, %v1095_v37  ;;  %v6927_v41 = vunpack.c.h.bf16 %v6960_v43  ;;  %v1102_v50 = vld [vmem:[#allocation2 + $0x74] sm:$0x1]  ;;  %v544_v0 = vld [vmem:[#allocation2 + $0x84] sm:$0x1] }
  0x72   : > { %v1406_v38 = vor.u32 %v1405_v20, %v1401_v17  ;;  %v416_v42 = vmul.f32 %v8318_v52, %v6926_v56  ;;  %v861_v46 = vor.u32 %v859_v19, %v858_v32  ;;  %v862_v33 = vrot.slane %v858_v32, 4  ;;  %1097 = vst [vmem:[#allocation2 + $0x68] sm:$0x1] %v1096_v28  ;;  %v6961_v25 = vld [vmem:[%s7999_s12 + $0x50] sm:$0xff]  }
  0x73   : > { %v1397_v44 = vrot.slane %v1396_v30, 4  ;;  %v866_v47 = vrot.slane %v864_v63, 7  ;;  %v417_v51 = vmul.f32 %v8318_v52, %v6927_v41  ;;  %v6930_v16 = vunpack.c.l.bf16 %v6961_v25  ;;  %v7892_v15 = vld [vmem:[#allocation2 + $0x54] sm:$0xf] }
  0x74   : > { %v1407_v49 = vrot.slane %v1406_v38, 4  ;;  %v455_v18 = vadd.f32 %v8333_v35, %v416_v42  ;;  %v1099_v56 = vsel %vm8095_vm10, %v861_v46, %v1098_v62  ;;  %v6931_v19 = vunpack.c.h.bf16 %v6961_v25 }
  0x75   : > { %v1402_v43 = vsel %vm8103_vm11, %v1397_v44, %v1401_v17  ;;  %v1170_v27 = vld [vmem:[#allocation2 + $0x60] sm:$0xf]  ;;  %v869_v53 = vor.u32 %v867_v34, %v866_v47  ;;  %v871_v55 = vrot.slane %v866_v47, 4  ;;  %1100 = vst [vmem:[#allocation2 + $0x6c] sm:$0xf] %v1099_v56  ;;  %v456_v2 = vadd.f32 %v8333_v35, %v417_v51 }
  0x76   : > { %v1412_v48 = vsel %vm8103_vm11, %v1407_v49, %v1411_v23  ;;  %v1414_v61 = vshrl.u32 %v1170_v27, 16  ;;  %v1417_v26 = vshll.u32 %v1170_v27, 16  ;;  %v1171_v58 = vld [vmem:[#allocation2 + $0x64] sm:$0xf]  ;;  %v487_v60 = vmax.f32 %v455_v18, 0.0 }
  0x77   : > { %v6568_v57 = vcombine.low %v1402_v43, %v1412_v48  ;;  %v870_v1 = vsel %vm8087_vm9, %v862_v33, %v869_v53  ;;  %v1103_v59 = vsel %vm8008_vm2, %v871_v55, %v1102_v50  ;;  %v1427_v9 = vshrl.u32 %v1171_v58, 16  ;;  %v1105_v18 = vld [vmem:[#allocation2 + $0x78] sm:$0xf] }
  0x78   : > { %v1416_v3 = vrot.slane %v1414_v61, 4  ;;  %v1419_v4 = vrot.slane %v1417_v26, 5  ;;  %v6593_v6 = vcombine.low %v1170_v27, %v1171_v58  ;;  %1101 = vst [vmem:[#allocation2 + $0x70] sm:$0xf] %v870_v1  ;;  %1104 = vst [vmem:[#allocation2 + $0x74] sm:$0x1] %v1103_v59  ;;  %v6874_v11 = vpack.c.bf16 %v487_v60, %v487_v60 }
  0x79   : > { %7236 = vmatmul.mubr.bf16.gmra.mxu0 %v6568_v57  ;;  %v1423_v10 = vshll.u32 %v1171_v58, 16  ;;  %v488_v7 = vmax.f32 %v456_v2, 0.0  ;;  %v1210_v17 = vld [vmem:[#allocation2 + $0x68] sm:$0x1]  ;;  %v1429_v23 = vrot.slane %v1427_v9, 4  ;;  %v545_v24 = vsel %vm8008_vm2, 0, %v544_v0 }
  0x7a   : > { %7287 = vmatprep.mubr.bf16.mxu1 %v6593_v6  ;;  %v1420_v20 = vor.u32 %v1419_v4, %v1416_v3  ;;  %v1433_v32 = vshll.u32 %v1210_v17, 16  ;;  %v873_v34 = vshrl.u32 %v6874_v11, 16  ;;  %546 = vst [vmem:[#allocation2 + $0x84] sm:$0x1] %v545_v24  ;;  %v876_v38 = vshll.u32 %v6874_v11, 16  ;;  %v6962_v6 = vld [vmem:[%s7999_s12 + $0x58] sm:$0xff]  }
  0x7b   : > { %v1425_v30 = vrot.slane %v1423_v10, 5  ;;  %v6875_v63 = vpack.c.bf16 %v488_v7, %v488_v7  ;;  %v418_v62 = vmul.f32 %v8318_v52, %v6930_v16  ;;  %v419_v28 = vmul.f32 %v8318_v52, %v6931_v19  ;;  %v597_v59 = vld [vmem:[#allocation2 + $0x80] sm:$0x1]  ;;  %v600_v9 = vld [vmem:[#allocation2 + $0x8c] sm:$0x1] }
  0x7c   : > { %v1421_v37 = vrot.slane %v1420_v20, 4  ;;  %v1172_v41 = vld [vmem:[#allocation2 + $0x6c] sm:$0xf]  ;;  %v1435_v44 = vrot.slane %v1433_v32, 5  ;;  %v875_v46 = vrot.slane %v873_v34, 7  ;;  %v598_v24 = vsel %vm8041_vm4, 0, %v597_v59 }
  0x7d   : > { %v1430_v42 = vor.u32 %v1429_v23, %v1425_v30  ;;  %v881_v33 = vshrl.u32 %v6875_v63, 16  ;;  %v1438_v47 = vshrl.u32 %v1172_v41, 16  ;;  %v1441_v49 = vshll.u32 %v1172_v41, 16  ;;  %v547_v10 = vld [vmem:[#allocation2 + $0x90] sm:$0x1] }
  0x7e   : > { %v1426_v50 = vsel %vm8103_vm11, %v1421_v37, %v1425_v30  ;;  %v884_v51 = vshll.u32 %v6875_v63, 16  ;;  %v878_v53 = vor.u32 %v876_v38, %v875_v46  ;;  %v879_v55 = vrot.slane %v875_v46, 4  ;;  %v6963_v30 = vld [vmem:[%s7999_s12 + $0x60] sm:$0xff]   ;;  %599 = vst [vmem:[#allocation2 + $0x80] sm:$0x1] %v598_v24 }
  0x7f   : > { %v1173_v54 = vld [vmem:[#allocation2 + $0x70] sm:$0xf]  ;;  %v1431_v43 = vrot.slane %v1430_v42, 4  ;;  %v1211_v27 = vld [vmem:[#allocation2 + $0x74] sm:$0x1]  ;;  %v457_v56 = vadd.f32 %v8333_v35, %v418_v62  ;;  %v1440_v25 = vrot.slane %v1438_v47, 4  ;;  %v458_v23 = vadd.f32 %v8333_v35, %v419_v28 }
  0x80   : > { %v1443_v48 = vrot.slane %v1441_v49, 5  ;;  %v1451_v61 = vshrl.u32 %v1173_v54, 16  ;;  %v6594_v26 = vcombine.low %v1172_v41, %v1173_v54  ;;  %v1447_v57 = vshll.u32 %v1173_v54, 16 }
  0x81   : > { %v1436_v2 = vsel %vm8103_vm11, %v1431_v43, %v1435_v44  ;;  %v1457_v58 = vshll.u32 %v1211_v27, 16  ;;  %v8378_v1 = vrot.slane %v881_v33, 7  ;;  %v1106_v4 = vsel %vm8095_vm10, %v878_v53, %v1105_v18 }
  0x82   : > { %7288 = vmatmul.mubr.bf16.gmra.mxu1 %v6594_v26  ;;  %v6569_v60 = vcombine.low %v1426_v50, %v1436_v2  ;;  %v1444_v0 = vor.u32 %v1443_v48, %v1440_v25  ;;  %v1453_v3 = vrot.slane %v1451_v61, 4  ;;  %v1449_v7 = vrot.slane %v1447_v57, 5  ;;  %1107 = vst [vmem:[#allocation2 + $0x78] sm:$0xf] %v1106_v4 }
  0x83   : > { %v1459_v11 = vrot.slane %v1457_v58, 5  ;;  %v886_v16 = vor.u32 %v884_v51, %v8378_v1  ;;  %v888_v17 = vrot.slane %v8378_v1, 4  ;;  %v489_v19 = vmax.f32 %v457_v56, 0.0 }
  0x84   : > { %7239 = vmatprep.mubr.bf16.mxu0 %v6569_v60  ;;  %v1445_v20 = vrot.slane %v1444_v0, 4  ;;  %v1454_v32 = vor.u32 %v1453_v3, %v1449_v7  ;;  %v601_v34 = vsel %vm8041_vm4, 0, %v600_v9  ;;  %v6934_v37 = vunpack.c.l.bf16 %v6962_v6  ;;  %v1112_v60 = vld [vmem:[#allocation2 + $0x84] sm:$0xf] }
  0x85   : > { %v887_v63 = vsel %vm8087_vm9, %v879_v55, %v886_v16  ;;  %v490_v62 = vmax.f32 %v458_v23, 0.0  ;;  %v6876_v28 = vpack.c.bf16 %v489_v19, %v489_v19  ;;  %602 = vst [vmem:[#allocation2 + $0x8c] sm:$0x1] %v601_v34  ;;  %v6935_v41 = vunpack.c.h.bf16 %v6962_v6  ;;  %v1109_v0 = vld [vmem:[#allocation2 + $0x80] sm:$0x1] }
  0x86   : > { %v1450_v38 = vsel %vm8103_vm11, %v1445_v20, %v1449_v7  ;;  %1108 = vst [vmem:[#allocation2 + $0x7c] sm:$0xf] %v887_v63  ;;  %v1455_v42 = vrot.slane %v1454_v32, 4  ;;  %v420_v44 = vmul.f32 %v8318_v52, %v6934_v37  ;;  %v548_v46 = vsel %vm8008_vm2, 0, %v547_v10  ;;  %v550_v34 = vld [vmem:[#allocation2 + $0x9c] sm:$0x1] }
  0x87   : > { %v6938_v33 = vunpack.c.l.bf16 %v6963_v30  ;;  %v6877_v47 = vpack.c.bf16 %v490_v62, %v490_v62  ;;  %v890_v49 = vshrl.u32 %v6876_v28, 16  ;;  %v893_v50 = vshll.u32 %v6876_v28, 16  ;;  %549 = vst [vmem:[#allocation2 + $0x90] sm:$0x1] %v548_v46  ;;  %v603_v28 = vld [vmem:[#allocation2 + $0x98] sm:$0x1] }
  0x88   : > { %v421_v51 = vmul.f32 %v8318_v52, %v6935_v41  ;;  %v1460_v18 = vsel %vm8103_vm11, %v1455_v42, %v1459_v11  ;;  %v459_v54 = vadd.f32 %v8333_v35, %v420_v44  ;;  %v6939_v43 = vunpack.c.h.bf16 %v6963_v30  ;;  %v606_v41 = vld [vmem:[#allocation2 + $0xa4] sm:$0x1] }
  0x89   : > { %v422_v27 = vmul.f32 %v8318_v52, %v6938_v33  ;;  %v6570_v53 = vcombine.low %v1450_v38, %v1460_v18  ;;  %v1174_v55 = vld [vmem:[#allocation2 + $0x78] sm:$0xf]  ;;  %v892_v56 = vrot.slane %v890_v49, 7  ;;  %v898_v25 = vshrl.u32 %v6877_v47, 16 }
  0x8a   : > { %v901_v48 = vshll.u32 %v6877_v47, 16  ;;  %v1462_v61 = vshrl.u32 %v1174_v55, 16  ;;  %v1465_v26 = vshll.u32 %v1174_v55, 16  ;;  %v460_v2 = vadd.f32 %v8333_v35, %v421_v51 }
  0x8b   : > { %v491_v57 = vmax.f32 %v459_v54, 0.0  ;;  %7240 = vmatmul.mubr.bf16.gmra.mxu0 %v6570_v53  ;;  %v895_v58 = vor.u32 %v893_v50, %v892_v56  ;;  %v896_v1 = vrot.slane %v892_v56, 4  ;;  %v900_v59 = vrot.slane %v898_v25, 7 }
  0x8c   : > { %v423_v3 = vmul.f32 %v8318_v52, %v6939_v43  ;;  %v1464_v9 = vrot.slane %v1462_v61, 4  ;;  %v1467_v6 = vrot.slane %v1465_v26, 5  ;;  %v1110_v10 = vsel %vm8008_vm2, %v888_v17, %v1109_v0  ;;  %v1116_v7 = vld [vmem:[#allocation2 + $0x8c] sm:$0x1] }
  0x8d   : > { %v1175_v4 = vld [vmem:[#allocation2 + $0x7c] sm:$0xf]  ;;  %v6878_v11 = vpack.c.bf16 %v491_v57, %v491_v57  ;;  %v903_v23 = vor.u32 %v901_v48, %v900_v59  ;;  %v905_v19 = vrot.slane %v900_v59, 4  ;;  %1111 = vst [vmem:[#allocation2 + $0x80] sm:$0x1] %v1110_v10  ;;  %v1113_v24 = vsel %vm8095_vm10, %v895_v58, %v1112_v60  ;;  %v6964_v26 = vld [vmem:[%s7999_s12 + $0x68] sm:$0xff]  }
  0x8e   : > { %v1475_v16 = vshrl.u32 %v1175_v4, 16  ;;  %v6595_v20 = vcombine.low %v1174_v55, %v1175_v4  ;;  %v1468_v30 = vor.u32 %v1467_v6, %v1464_v9  ;;  %v1471_v32 = vshll.u32 %v1175_v4, 16  ;;  %1114 = vst [vmem:[#allocation2 + $0x84] sm:$0xf] %v1113_v24  ;;  %v1119_v47 = vld [vmem:[#allocation2 + $0x90] sm:$0xf] }
  0x8f   : > { %v492_v63 = vmax.f32 %v460_v2, 0.0  ;;  %v904_v37 = vsel %vm8087_vm9, %v896_v1, %v903_v23  ;;  %v1117_v38 = vsel %vm8008_vm2, %v905_v19, %v1116_v7  ;;  %v907_v62 = vshrl.u32 %v6878_v11, 16 }
  0x90   : > { %7291 = vmatprep.mubr.bf16.mxu1 %v6595_v20  ;;  %v1477_v17 = vrot.slane %v1475_v16, 4  ;;  %1115 = vst [vmem:[#allocation2 + $0x88] sm:$0xf] %v904_v37  ;;  %v1469_v42 = vrot.slane %v1468_v30, 4  ;;  %v1473_v44 = vrot.slane %v1471_v32, 5  ;;  %v910_v33 = vshll.u32 %v6878_v11, 16 }
  0x91   : > { %1118 = vst [vmem:[#allocation2 + $0x8c] sm:$0x1] %v1117_v38  ;;  %v6879_v46 = vpack.c.bf16 %v492_v63, %v492_v63  ;;  %v909_v49 = vrot.slane %v907_v62, 7  ;;  %v461_v50 = vadd.f32 %v8333_v35, %v422_v27  ;;  %v462_v51 = vadd.f32 %v8333_v35, %v423_v3 }
  0x92   : > { %v551_v18 = vsel %vm8008_vm2, 0, %v550_v34  ;;  %v1474_v54 = vsel %vm8103_vm11, %v1469_v42, %v1473_v44  ;;  %v1478_v43 = vor.u32 %v1477_v17, %v1473_v44  ;;  %v604_v58 = vsel %vm8041_vm4, 0, %v603_v28 }
  0x93   : > { %v915_v53 = vshrl.u32 %v6879_v46, 16  ;;  %v918_v55 = vshll.u32 %v6879_v46, 16  ;;  %552 = vst [vmem:[#allocation2 + $0x9c] sm:$0x1] %v551_v18  ;;  %v912_v56 = vor.u32 %v910_v33, %v909_v49  ;;  %v913_v25 = vrot.slane %v909_v49, 4 }
  0x94   : > { %v493_v48 = vmax.f32 %v461_v50, 0.0  ;;  %v494_v61 = vmax.f32 %v462_v51, 0.0  ;;  %v1212_v2 = vld [vmem:[#allocation2 + $0x80] sm:$0x1]  ;;  %v1479_v57 = vrot.slane %v1478_v43, 4  ;;  %v607_v1 = vsel %vm8041_vm4, 0, %v606_v41 }
  0x95   : > { %v917_v27 = vrot.slane %v915_v53, 7  ;;  %v1481_v59 = vshll.u32 %v1212_v2, 16  ;;  %v1120_v60 = vsel %vm8095_vm10, %v912_v56, %v1119_v47  ;;  %605 = vst [vmem:[#allocation2 + $0x98] sm:$0x1] %v604_v58  ;;  %608 = vst [vmem:[#allocation2 + $0xa4] sm:$0x1] %v607_v1  ;;  %v6942_v10 = vunpack.c.l.bf16 %v6964_v26 }
  0x96   : > { %v6880_v0 = vpack.c.bf16 %v493_v48, %v493_v48  ;;  %v6881_v3 = vpack.c.bf16 %v494_v61, %v494_v61  ;;  %v1176_v4 = vld [vmem:[#allocation2 + $0x84] sm:$0xf]  ;;  %1121 = vst [vmem:[#allocation2 + $0x90] sm:$0xf] %v1120_v60  ;;  %v6943_v7 = vunpack.c.h.bf16 %v6964_v26 }
  0x97   : > { %v920_v9 = vor.u32 %v918_v55, %v917_v27  ;;  %v922_v6 = vrot.slane %v917_v27, 4  ;;  %v1177_v11 = vld [vmem:[#allocation2 + $0x88] sm:$0xf]  ;;  %v1486_v16 = vshrl.u32 %v1176_v4, 16  ;;  %v1489_v20 = vshll.u32 %v1176_v4, 16 }
  0x98   : > { %v1483_v23 = vrot.slane %v1481_v59, 5  ;;  %v924_v19 = vshrl.u32 %v6880_v0, 16  ;;  %v1499_v24 = vshrl.u32 %v1177_v11, 16  ;;  %v6596_v30 = vcombine.low %v1176_v4, %v1177_v11  ;;  %v1213_v32 = vld [vmem:[#allocation2 + $0x8c] sm:$0x1]  ;;  %v6965_v4 = vld [vmem:[%s7999_s12 + $0x70] sm:$0xff]  }
  0x99   : > { %v1495_v63 = vshll.u32 %v1177_v11, 16  ;;  %v921_v34 = vsel %vm8087_vm9, %v913_v25, %v920_v9  ;;  %v1488_v37 = vrot.slane %v1486_v16, 4  ;;  %v1491_v17 = vrot.slane %v1489_v20, 5  ;;  %v556_v16 = vld [vmem:[#allocation2 + $0xb4] sm:$0x1] }
  0x9a   : > { %v1484_v38 = vsel %vm8103_vm11, %v1479_v57, %v1483_v23  ;;  %v1505_v62 = vshll.u32 %v1213_v32, 16  ;;  %1122 = vst [vmem:[#allocation2 + $0x94] sm:$0xf] %v921_v34  ;;  %7292 = vmatmul.mubr.bf16.gmra.mxu1 %v6596_v30  ;;  %v1501_v42 = vrot.slane %v1499_v24, 4  ;;  %v926_v44 = vrot.slane %v924_v19, 7 }
  0x9b   : > { %v6571_v28 = vcombine.low %v1474_v54, %v1484_v38  ;;  %v1497_v41 = vrot.slane %v1495_v63, 5  ;;  %v1492_v46 = vor.u32 %v1491_v17, %v1488_v37  ;;  %v927_v47 = vshll.u32 %v6880_v0, 16  ;;  %v1126_v43 = vld [vmem:[#allocation2 + $0x9c] sm:$0xf]  ;;  %v609_v20 = vld [vmem:[#allocation2 + $0xb0] sm:$0x1] }
  0x9c   : > { %v1507_v33 = vrot.slane %v1505_v62, 5  ;;  %v932_v49 = vshrl.u32 %v6881_v3, 16  ;;  %v930_v51 = vrot.slane %v926_v44, 4  ;;  %v935_v18 = vshll.u32 %v6881_v3, 16  ;;  %v1123_v53 = vld [vmem:[#allocation2 + $0x98] sm:$0x1] }
  0x9d   : > { %7243 = vmatprep.mubr.bf16.mxu0 %v6571_v28  ;;  %v1502_v50 = vor.u32 %v1501_v42, %v1497_v41  ;;  %v424_v55 = vmul.f32 %v8318_v52, %v6942_v10  ;;  %v1493_v56 = vrot.slane %v1492_v46, 4  ;;  %v1178_v25 = vld [vmem:[#allocation2 + $0x90] sm:$0xf]  ;;  %v929_v48 = vor.u32 %v927_v47, %v926_v44  ;;  %v1130_v0 = vld [vmem:[#allocation2 + $0xa4] sm:$0x1] }
  0x9e   : > { %v934_v54 = vrot.slane %v932_v49, 7  ;;  %v1124_v61 = vsel %vm8008_vm2, %v922_v6, %v1123_v53  ;;  %v1510_v2 = vshrl.u32 %v1178_v25, 16  ;;  %v1513_v57 = vshll.u32 %v1178_v25, 16  ;;  %v553_v3 = vld [vmem:[#allocation2 + $0xa8] sm:$0x1] }
  0x9f   : > { %v1503_v26 = vrot.slane %v1502_v50, 4  ;;  %1125 = vst [vmem:[#allocation2 + $0x98] sm:$0x1] %v1124_v61  ;;  %v425_v27 = vmul.f32 %v8318_v52, %v6943_v7  ;;  %v1498_v58 = vsel %vm8103_vm11, %v1493_v56, %v1497_v41  ;;  %v1127_v60 = vsel %vm8095_vm10, %v929_v48, %v1126_v43 }
  0xa0   : > { %v937_v1 = vor.u32 %v935_v18, %v934_v54  ;;  %v939_v59 = vrot.slane %v934_v54, 4  ;;  %v1512_v10 = vrot.slane %v1510_v2, 4  ;;  %v1515_v11 = vrot.slane %v1513_v57, 5  ;;  %1128 = vst [vmem:[#allocation2 + $0x9c] sm:$0xf] %v1127_v60 }
  0xa1   : > { %v1508_v9 = vsel %vm8103_vm11, %v1503_v26, %v1507_v33  ;;  %v1179_v6 = vld [vmem:[#allocation2 + $0x94] sm:$0xf]  ;;  %v463_v7 = vadd.f32 %v8333_v35, %v424_v55  ;;  %v464_v37 = vadd.f32 %v8333_v35, %v425_v27  ;;  %v554_v62 = vsel %vm8008_vm2, 0, %v553_v3 }
  0xa2   : > { %v6572_v23 = vcombine.low %v1498_v58, %v1508_v9  ;;  %v1523_v19 = vshrl.u32 %v1179_v6, 16  ;;  %v6597_v24 = vcombine.low %v1178_v25, %v1179_v6  ;;  %v938_v30 = vsel %vm8087_vm9, %v930_v51, %v937_v1  ;;  %555 = vst [vmem:[#allocation2 + $0xa8] sm:$0x1] %v554_v62 }
  0xa3   : > { %1129 = vst [vmem:[#allocation2 + $0xa0] sm:$0xf] %v938_v30  ;;  %v1516_v32 = vor.u32 %v1515_v11, %v1512_v10  ;;  %v1519_v63 = vshll.u32 %v1179_v6, 16  ;;  %v1131_v34 = vsel %vm8008_vm2, %v939_v59, %v1130_v0  ;;  %v495_v38 = vmax.f32 %v463_v7, 0.0 }
  0xa4   : > { %7244 = vmatmul.mubr.bf16.gmra.mxu0 %v6572_v23  ;;  %7295 = vmatprep.mubr.bf16.mxu1 %v6597_v24  ;;  %v1525_v17 = vrot.slane %v1523_v19, 4  ;;  %1132 = vst [vmem:[#allocation2 + $0xa4] sm:$0x1] %v1131_v34  ;;  %v6946_v28 = vunpack.c.l.bf16 %v6965_v4  ;;  %v496_v44 = vmax.f32 %v464_v37, 0.0  ;;  %v6947_v46 = vunpack.c.h.bf16 %v6965_v4  ;;  %v612_v23 = vld [vmem:[#allocation2 + $0xbc] sm:$0x1] }
  0xa5   : > { %v1517_v41 = vrot.slane %v1516_v32, 4  ;;  %v1521_v42 = vrot.slane %v1519_v63, 5  ;;  %v6882_v47 = vpack.c.bf16 %v495_v38, %v495_v38  ;;  %v557_v50 = vsel %vm8008_vm2, 0, %v556_v16  ;;  %v2715_v63 = vld [vmem:[#allocation2 + $0xc] sm:$0xf] }
  0xa6   : > { %v1214_v33 = vld [vmem:[#allocation2 + $0x98] sm:$0x1]  ;;  %v426_v49 = vmul.f32 %v8318_v52, %v6946_v28  ;;  %v610_v51 = vsel %vm8041_vm4, 0, %v609_v20  ;;  %v6883_v55 = vpack.c.bf16 %v496_v44, %v496_v44  ;;  %558 = vst [vmem:[#allocation2 + $0xb4] sm:$0x1] %v557_v50  ;;  %v427_v54 = vmul.f32 %v8318_v52, %v6947_v46 }
  0xa7   : > { %v1522_v18 = vsel %vm8103_vm11, %v1517_v41, %v1521_v42  ;;  %v1526_v43 = vor.u32 %v1525_v17, %v1521_v42  ;;  %v1529_v53 = vshll.u32 %v1214_v33, 16  ;;  %611 = vst [vmem:[#allocation2 + $0xb0] sm:$0x1] %v610_v51  ;;  %v1180_v56 = vld [vmem:[#allocation2 + $0x9c] sm:$0xf]  ;;  %v941_v25 = vshrl.u32 %v6882_v47, 16 }
  0xa8   : > { %v944_v48 = vshll.u32 %v6882_v47, 16  ;;  %v465_v61 = vadd.f32 %v8333_v35, %v426_v49  ;;  %v1534_v26 = vshrl.u32 %v1180_v56, 16  ;;  %v1537_v2 = vshll.u32 %v1180_v56, 16  ;;  %v2716_v44 = vld [vmem:[#allocation2 + $0x10] sm:$0xf] }
  0xa9   : > { %v1527_v57 = vrot.slane %v1526_v43, 4  ;;  %v1531_v27 = vrot.slane %v1529_v53, 5  ;;  %v943_v1 = vrot.slane %v941_v25, 7  ;;  %v949_v59 = vshrl.u32 %v6883_v55, 16  ;;  %v1133_v20 = vld [vmem:[#allocation2 + $0xa8] sm:$0xf] }
  0xaa   : > { %v1181_v58 = vld [vmem:[#allocation2 + $0xa0] sm:$0xf]  ;;  %v952_v60 = vshll.u32 %v6883_v55, 16  ;;  %v466_v0 = vadd.f32 %v8333_v35, %v427_v54  ;;  %v1536_v3 = vrot.slane %v1534_v26, 4  ;;  %v1539_v4 = vrot.slane %v1537_v2, 5 }
  0xab   : > { %v1547_v9 = vshrl.u32 %v1181_v58, 16  ;;  %v6598_v6 = vcombine.low %v1180_v56, %v1181_v58  ;;  %v1215_v10 = vld [vmem:[#allocation2 + $0xa4] sm:$0x1]  ;;  %v1532_v52 = vsel %vm8103_vm11, %v1527_v57, %v1531_v27  ;;  %v1543_v11 = vshll.u32 %v1181_v58, 16  ;;  %v2763_v49 = vld [vmem:[#allocation2 + $0x14] sm:$0x1] }
  0xac   : > { %v1553_v7 = vshll.u32 %v1215_v10, 16  ;;  %v946_v16 = vor.u32 %v944_v48, %v943_v1  ;;  %v6573_v19 = vcombine.low %v1522_v18, %v1532_v52  ;;  %v1540_v24 = vor.u32 %v1539_v4, %v1536_v3  ;;  %v8467_v55 = vld [vmem:[#allocation2 + $0x18] sm:$0xf] }
  0xad   : > { %7296 = vmatmul.mubr.bf16.gmra.mxu1 %v6598_v6  ;;  %v1549_v30 = vrot.slane %v1547_v9, 4  ;;  %v947_v32 = vrot.slane %v943_v1, 4  ;;  %v1545_v35 = vrot.slane %v1543_v11, 5  ;;  %v951_v37 = vrot.slane %v949_v59, 7  ;;  %v1140_v58 = vld [vmem:[#allocation2 + $0xb4] sm:$0xf] }
  0xae   : > { %v1555_v34 = vrot.slane %v1553_v7, 5  ;;  %v1134_v17 = vsel %vm8095_vm10, %v946_v16, %v1133_v20  ;;  %7247 = vmatprep.mubr.bf16.mxu0 %v6573_v19  ;;  %v1541_v38 = vrot.slane %v1540_v24, 4  ;;  %v497_v62 = vmax.f32 %v465_v61, 0.0  ;;  %v1137_v41 = vld [vmem:[#allocation2 + $0xb0] sm:$0x1] }
  0xaf   : > { %1135 = vst [vmem:[#allocation2 + $0xa8] sm:$0xf] %v1134_v17  ;;  %v498_v28 = vmax.f32 %v466_v0, 0.0  ;;  %v613_v42 = vsel %vm8041_vm4, 0, %v612_v23  ;;  %v1550_v46 = vor.u32 %v1549_v30, %v1545_v35  ;;  %v954_v33 = vor.u32 %v952_v60, %v951_v37 }
  0xb0   : > { %v956_v47 = vrot.slane %v951_v37, 4  ;;  %614 = vst [vmem:[#allocation2 + $0xbc] sm:$0x1] %v613_v42  ;;  %v2780_v50 = vshrl.u32 %v2715_v63, 16  ;;  %v1546_v51 = vsel %vm8103_vm11, %v1541_v38, %v1545_v35  ;;  %v6884_v18 = vpack.c.bf16 %v497_v62, %v497_v62 }
  0xb1   : > { %v6885_v43 = vpack.c.bf16 %v498_v28, %v498_v28  ;;  %v2783_v53 = vshll.u32 %v2715_v63, 16  ;;  %v1551_v56 = vrot.slane %v1550_v46, 4  ;;  %v955_v25 = vsel %vm8087_vm9, %v947_v32, %v954_v33 }
  0xb2   : > { %v1138_v48 = vsel %vm8008_vm2, %v956_v47, %v1137_v41  ;;  %v2782_v54 = vrot.slane %v2780_v50, 4  ;;  %1136 = vst [vmem:[#allocation2 + $0xac] sm:$0xf] %v955_v25  ;;  %v958_v61 = vshrl.u32 %v6884_v18, 16  ;;  %v961_v26 = vshll.u32 %v6884_v18, 16 }
  0xb3   : > { %v966_v2 = vshrl.u32 %v6885_v43, 16  ;;  %v969_v57 = vshll.u32 %v6885_v43, 16  ;;  %1139 = vst [vmem:[#allocation2 + $0xb0] sm:$0x1] %v1138_v48  ;;  %v1556_v27 = vsel %vm8103_vm11, %v1551_v56, %v1555_v34  ;;  %v2785_v1 = vrot.slane %v2783_v53, 5 }
  0xb4   : > { %v2789_v59 = vshll.u32 %v2716_v44, 16  ;;  %v2793_v60 = vshrl.u32 %v2716_v44, 16  ;;  %v6574_v0 = vcombine.low %v1546_v51, %v1556_v27  ;;  %v960_v3 = vrot.slane %v958_v61, 7  ;;  %v2718_v51 = vld [vmem:[#allocation2 + $0x1c] sm:$0xf] }
  0xb5   : > { %v968_v4 = vrot.slane %v966_v2, 7  ;;  %v2799_v9 = vshll.u32 %v2763_v49, 16  ;;  %v2786_v10 = vor.u32 %v2785_v1, %v2782_v54  ;;  %v2804_v7 = vshrl.u32 %v8467_v55, 16  ;;  %v2764_v53 = vld [vmem:[#allocation2 + $0x20] sm:$0x1] }
  0xb6   : > { %v1182_v6 = vld [vmem:[#allocation2 + $0xa8] sm:$0xf]  ;;  %v2791_v52 = vrot.slane %v2789_v59, 5  ;;  %v2795_v11 = vrot.slane %v2793_v60, 4  ;;  %7248 = vmatmul.mubr.bf16.gmra.mxu0 %v6574_v0  ;;  %v963_v23 = vor.u32 %v961_v26, %v960_v3  ;;  %v964_v19 = vrot.slane %v960_v3, 4 }
  0xb7   : > { %v1558_v16 = vshrl.u32 %v1182_v6, 16  ;;  %v1561_v20 = vshll.u32 %v1182_v6, 16  ;;  %v1144_v24 = vld [vmem:[#allocation2 + $0xbc] sm:$0x1]  ;;  %v971_v30 = vor.u32 %v969_v57, %v968_v4  ;;  %v973_v32 = vrot.slane %v968_v4, 4 }
  0xb8   : > { %v2787_v63 = vrot.slane %v2786_v10, 4  ;;  %v2796_v35 = vor.u32 %v2795_v11, %v2791_v52  ;;  %v1141_v17 = vsel %vm8095_vm10, %v963_v23, %v1140_v58  ;;  %v2801_v38 = vrot.slane %v2799_v9, 5  ;;  %v2199_v2 = vld [vmem:[#allocation2] sm:$0xe] }
  0xb9   : > { %v1560_v34 = vrot.slane %v1558_v16, 4  ;;  %v1563_v37 = vrot.slane %v1561_v20, 5  ;;  %v1183_v62 = vld [vmem:[#allocation2 + $0xac] sm:$0xf]  ;;  %v972_v28 = vsel %vm8087_vm9, %v964_v19, %v971_v30  ;;  %1142 = vst [vmem:[#allocation2 + $0xb4] sm:$0xf] %v1141_v17  ;;  %v1145_v42 = vsel %vm8008_vm2, %v973_v32, %v1144_v24 }
  0xba   : > { %v1216_v41 = vld [vmem:[#allocation2 + $0xb0] sm:$0x1]  ;;  %v2792_v44 = vsel %vm8103_vm11, %v2787_v63, %v2791_v52  ;;  %v2797_v46 = vrot.slane %v2796_v35, 4  ;;  %v1571_v33 = vshrl.u32 %v1183_v62, 16  ;;  %v6599_v47 = vcombine.low %v1182_v6, %v1183_v62  ;;  %1143 = vst [vmem:[#allocation2 + $0xb8] sm:$0xf] %v972_v28 }
  0xbb   : > { %v1564_v49 = vor.u32 %v1563_v37, %v1560_v34  ;;  %v1567_v50 = vshll.u32 %v1183_v62, 16  ;;  %1146 = vst [vmem:[#allocation2 + $0xbc] sm:$0x1] %v1145_v42  ;;  %v1577_v18 = vshll.u32 %v1216_v41, 16  ;;  %v2806_v56 = vrot.slane %v2804_v7, 4 }
  0xbc   : > { %v2802_v43 = vsel %vm8103_vm11, %v2797_v46, %v2801_v38  ;;  %v2807_v25 = vshll.u32 %v8467_v55, 16  ;;  %7299 = vmatprep.mubr.bf16.mxu1 %v6599_v47  ;;  %v1573_v61 = vrot.slane %v1571_v33, 4  ;;  %v2813_v58 = vshll.u32 %v2718_v51, 16  ;;  %v2200_v28 = vld [vmem:[#allocation2 + $0xc] sm:$0xe] }
  0xbd   : > { %v1565_v48 = vrot.slane %v1564_v49, 4  ;;  %v1569_v54 = vrot.slane %v1567_v50, 5  ;;  %v6649_v26 = vcombine.low %v2792_v44, %v2802_v43  ;;  %v1579_v57 = vrot.slane %v1577_v18, 5  ;;  %v2719_v46 = vld [vmem:[#allocation2 + $0x24] sm:$0xf] }
  0xbe   : > { %v2809_v27 = vrot.slane %v2807_v25, 5  ;;  %v2817_v1 = vshrl.u32 %v2718_v51, 16  ;;  %v2823_v0 = vshll.u32 %v2764_v53, 16  ;;  %v2815_v4 = vrot.slane %v2813_v58, 5  ;;  %v2720_v49 = vld [vmem:[#allocation2 + $0x28] sm:$0xf] }
  0xbf   : > { %v1570_v59 = vsel %vm8103_vm11, %v1565_v48, %v1569_v54  ;;  %v1574_v60 = vor.u32 %v1573_v61, %v1569_v54  ;;  %v10801_v52 = vmov 0  ;;  %v6609_v11 = vrot.slane %v2199_v2, 9  ;;  %v2765_v50 = vld [vmem:[#allocation2 + $0x2c] sm:$0x1]  ;;  %v2722_v54 = vld [vmem:[#allocation2 + $0x34] sm:$0xf] }
  0xc0   : > { %v2810_v3 = vor.u32 %v2809_v27, %v2806_v56  ;;  %v2819_v9 = vrot.slane %v2817_v1, 4  ;;  %v1184_v55 = vld [vmem:[#allocation2 + $0xb4] sm:$0xf]  ;;  %v2825_v10 = vrot.slane %v2823_v0, 5  ;;  %v10802_v52 = vsel %vm8489_vm14, 4294967295, %v10801_v52 }
  0xc1   : > { %v1575_v6 = vrot.slane %v1574_v60, 4  ;;  %10803 = vst [vmem:[#allocation7_spill] sm:$0xff] %v10802_v52  ;;  %v2254_v7 = vrot.slane %v2252_v39, 4  ;;  %v1185_v16 = vld [vmem:[#allocation2 + $0xb8] sm:$0xf]  ;;  %v1582_v20 = vshrl.u32 %v1184_v55, 16  ;;  %v8500_v30 = vsel %vm8489_vm14, %v8165_v45, %v2262_v40 }
  0xc2   : > { %v1585_v23 = vshll.u32 %v1184_v55, 16  ;;  %v1217_v19 = vld [vmem:[#allocation2 + $0xbc] sm:$0x1]  ;;  %v2820_v24 = vor.u32 %v2819_v9, %v2815_v4  ;;  %v1595_v32 = vshrl.u32 %v1185_v16, 16  ;;  %v6600_v63 = vcombine.low %v1184_v55, %v1185_v16  ;;  %v2721_v56 = vld [vmem:[#allocation2 + $0x30] sm:$0xf] }
  0xc3   : > { %v1580_v35 = vsel %vm8103_vm11, %v1575_v6, %v1579_v57  ;;  %v1591_v34 = vshll.u32 %v1185_v16, 16  ;;  %v1584_v37 = vrot.slane %v1582_v20, 4  ;;  %v1601_v62 = vshll.u32 %v1217_v19, 16  ;;  %v2766_v2 = vld [vmem:[#allocation2 + $0x38] sm:$0x1]  ;;  %v7747_v60 = vld [vmem:[%s10755_s4 + $0x170] sm:$0xff]  }
  0xc4   : > { %v1587_v17 = vrot.slane %v1585_v23, 5  ;;  %v6575_v38 = vcombine.low %v1570_v59, %v1580_v35  ;;  %7300 = vmatmul.mubr.bf16.gmra.mxu1 %v6600_v63  ;;  %v1597_v42 = vrot.slane %v1595_v32, 4  ;;  %v2811_v22 = vrot.slane %v2810_v3, 4  ;;  %v2201_v59 = vld [vmem:[#allocation2 + $0x18] sm:$0xe]  ;;  %v7749_v35 = vld [vmem:[%s10755_s4 + $0x168] sm:$0xff]  }
  0xc5   : > { %v1593_v41 = vrot.slane %v1591_v34, 5  ;;  %v2821_v44 = vrot.slane %v2820_v24, 4  ;;  %v1603_v45 = vrot.slane %v1601_v62, 5  ;;  %7367 = vmatprep.mubr.bf16.mxu1 %v6649_v26  ;;  %v2253_v33 = vsel %vm8489_vm14, %v6609_v11, %v2252_v39  ;;  %v7842_v23 = vld [vmem:[%s10755_s4 + $0x178] sm:$0xff]  }
  0xc6   : > { %7251 = vmatprep.mubr.bf16.mxu0 %v6575_v38  ;;  %v1588_v40 = vor.u32 %v1587_v17, %v1584_v37  ;;  %v2256_v47 = vsel %vm8489_vm14, %v2254_v7, %v2255_v12  ;;  %v2816_v18 = vsel %vm8103_vm11, %v2811_v22, %v2815_v4  ;;  %v6610_v48 = vrot.slane %v2200_v28, 9  ;;  %v7844_v22 = vld [vmem:[#allocation2 + $0x20] sm:$0x1] }
  0xc7   : > { %v1598_v51 = vor.u32 %v1597_v42, %v1593_v41  ;;  %v2826_v43 = vsel %vm8103_vm11, %v2821_v44, %v2825_v10  ;;  %v6625_v53 = vcombine.low %v2253_v33, %v2256_v47  ;;  %v2828_v39 = vshrl.u32 %v2719_v46, 16  ;;  %v2202_v10 = vld [vmem:[#allocation2 + $0x24] sm:$0xe]  ;;  %v2723_v47 = vld [vmem:[#allocation2 + $0x3c] sm:$0xf] }
  0xc8   : > { %v1589_v14 = vrot.slane %v1588_v40, 4  ;;  %v6650_v25 = vcombine.low %v2816_v18, %v2826_v43  ;;  %v2831_v61 = vshll.u32 %v2719_v46, 16  ;;  %v2837_v26 = vshll.u32 %v2720_v49, 16  ;;  %v7845_v43 = vld [vmem:[#allocation2 + $0x28] sm:$0xf] }
  0xc9   : > { %v1599_v5 = vrot.slane %v1598_v51, 4  ;;  %v2841_v12 = vshrl.u32 %v2720_v49, 16  ;;  %v8522_v27 = vsel %vm8489_vm14, %v6610_v48, %v2259_v36  ;;  %v2830_v58 = vrot.slane %v2828_v39, 4  ;;  %v2724_v49 = vld [vmem:[#allocation2 + $0x40] sm:$0xf]  ;;  %v7746_v39 = vld [vmem:[%s10755_s4 + $0xf0] sm:$0xff]  }
  0xca   : > { %v1594_v57 = vsel %vm8103_vm11, %v1589_v14, %v1593_v41  ;;  %v2847_v1 = vshll.u32 %v2765_v50, 16  ;;  %v6626_v3 = vcombine.low %v8522_v27, %v8500_v30  ;;  %v2833_v4 = vrot.slane %v2831_v61, 5  ;;  %v7843_v41 = vld [vmem:[#allocation2 + $0x1c] sm:$0xf]  ;;  %v2725_v61 = vld [vmem:[#allocation2 + $0x48] sm:$0xf] }
  0xcb   : > { %v1604_v0 = vsel %vm8103_vm11, %v1599_v5, %v1603_v45  ;;  %v2839_v9 = vrot.slane %v2837_v26, 5  ;;  %v2843_v55 = vrot.slane %v2841_v12, 4  ;;  %v2852_v36 = vshrl.u32 %v2721_v56, 16  ;;  %v2726_v26 = vld [vmem:[#allocation2 + $0x4c] sm:$0xf] }
  0xcc   : > { %v6576_v21 = vcombine.low %v1594_v57, %v1604_v0  ;;  %v2849_v6 = vrot.slane %v2847_v1, 5  ;;  %7368 = vmatmul.mubr.bf16.vlgmr.msra.gmra.mxu1 %v6650_v25  ;;  %v2834_v11 = vor.u32 %v2833_v4, %v2830_v58  ;;  %v2855_v7 = vshll.u32 %v2721_v56, 16  ;;  %v2767_v56 = vld [vmem:[#allocation2 + $0x44] sm:$0x1]  ;;  %v2768_v4 = vld [vmem:[#allocation2 + $0x50] sm:$0x1] }
  0xcd   : > { %v2861_v16 = vshll.u32 %v2722_v54, 16  ;;  %v2865_v20 = vshrl.u32 %v2722_v54, 16  ;;  %7448 = vmatpush3.bf16.msra.mxu1 %v7842_v23  ;;  %v2844_v19 = vor.u32 %v2843_v55, %v2839_v9  ;;  %v2854_v24 = vrot.slane %v2852_v36, 4  ;;  %v7846_v54 = vld [vmem:[#allocation2 + $0x2c] sm:$0x1] }
  0xce   : > { %7252 = vmatmul.mubr.bf16.gmra.mxu0 %v6576_v21  ;;  %v2871_v32 = vshll.u32 %v2766_v2, 16  ;;  %v6611_v63 = vrot.slane %v2201_v59, 9  ;;  %v2835_v34 = vrot.slane %v2834_v11, 4  ;;  %v2857_v37 = vrot.slane %v2855_v7, 5  ;;  %7449 = vmatprep.subr.bf16.mxu1 %v7747_v60  ;;  %v7748_v11 = vld [vmem:[%s10755_s4 + $0xe8] sm:$0xff]   ;;  %v7847_v7 = vld [vmem:[%s10755_s4 + $0xf8] sm:$0xff]  }
  0xcf   : > { %7319 = vmatprep.mubr.bf16.mxu0 %v6625_v53  ;;  %v2863_v17 = vrot.slane %v2861_v16, 5  ;;  %v2867_v38 = vrot.slane %v2865_v20, 4  ;;  %v2845_v62 = vrot.slane %v2844_v19, 4  ;;  %v2266_v42 = vrot.slane %v7843_v41, 5  ;;  %v7753_v20 = vld [vmem:[%s10755_s4 + $0x158] sm:$0xff]  }
  0xd0   : > { %v2873_v28 = vrot.slane %v2871_v32, 5  ;;  %v2269_v44 = vrot.slane %v7844_v22, 5  ;;  %v2840_v46 = vsel %vm8103_vm11, %v2835_v34, %v2839_v9  ;;  %v2858_v40 = vor.u32 %v2857_v37, %v2854_v24  ;;  %v7751_v9 = vld [vmem:[%s10755_s4 + $0x160] sm:$0xff]   ;;  %v2204_v41 = vld [vmem:[#allocation2 + $0x3c] sm:$0xe] }
  0xd1   : > { %v2868_v45 = vor.u32 %v2867_v38, %v2863_v17  ;;  %v6612_v33 = vrot.slane %v2202_v10, 9  ;;  %v2850_v50 = vsel %vm8103_vm11, %v2845_v62, %v2849_v6  ;;  %v2267_v51 = vsel %vm8489_vm14, %v6611_v63, %v2266_v42  ;;  %7450 = vmatpush3.bf16.msra.mxu1 %v7747_v60  ;;  %v2203_v10 = vld [vmem:[#allocation2 + $0x30] sm:$0xe] }
  0xd2   : > { %v2268_v18 = vrot.slane %v2266_v42, 4  ;;  %v2273_v53 = vrot.slane %v7845_v43, 5  ;;  %v6651_v14 = vcombine.low %v2840_v46, %v2850_v50  ;;  %v2859_v25 = vrot.slane %v2858_v40, 4  ;;  %7451 = vmatprep.subr.bf16.mxu1 %v7749_v35  ;;  %v2727_v40 = vld [vmem:[#allocation2 + $0x54] sm:$0xf]  ;;  %v7750_v43 = vld [vmem:[%s10755_s4 + $0xe0] sm:$0xff]  }
  0xd3   : > { %v2869_v48 = vrot.slane %v2868_v45, 4  ;;  %v2276_v5 = vrot.slane %v7846_v54, 5  ;;  %v2876_v58 = vshrl.u32 %v2723_v47, 16  ;;  %v2879_v0 = vshll.u32 %v2723_v47, 16  ;;  %v7755_v45 = vld [vmem:[%s10755_s4 + $0x150] sm:$0xff]  }
  0xd4   : > { %v2270_v12 = vsel %vm8489_vm14, %v2268_v18, %v2269_v44  ;;  %v8550_v2 = vsel %vm8489_vm14, %v6612_v33, %v2273_v53  ;;  %v2275_v57 = vrot.slane %v2273_v53, 4  ;;  %7371 = vmatprep.mubr.bf16.mxu1 %v6651_v14  ;;  %v2864_v1 = vsel %vm8103_vm11, %v2859_v25, %v2863_v17 }
  0xd5   : > { %v2874_v59 = vsel %vm8103_vm11, %v2869_v48, %v2873_v28  ;;  %v6627_v60 = vcombine.low %v2267_v51, %v2270_v12  ;;  %v2878_v6 = vrot.slane %v2876_v58, 4  ;;  %v2885_v36 = vshll.u32 %v2724_v49, 16  ;;  %7452 = vmatpush3.bf16.msra.mxu1 %v7749_v35  ;;  %v7849_v51 = vld [vmem:[#allocation2 + $0x38] sm:$0x1]  ;;  %v8586_v12 = vld [vmem:[#allocation2 + $0x5c] sm:$0x1] }
  0xd6   : > { %7320 = vmatmul.mubr.bf16.vlgmr.msra.gmra.mxu0 %v6626_v3  ;;  %v6652_v21 = vcombine.low %v2864_v1, %v2874_v59  ;;  %v2277_v55 = vsel %vm8489_vm14, %v2275_v57, %v2276_v5  ;;  %v2881_v27 = vrot.slane %v2879_v0, 5  ;;  %v2889_v3 = vshrl.u32 %v2724_v49, 16  ;;  %7453 = vmatprep.subr.bf16.mxu1 %v7751_v9  ;;  %v7848_v49 = vld [vmem:[#allocation2 + $0x34] sm:$0xf]  ;;  %v8582_v48 = vld [vmem:[#allocation2 + $0x58] sm:$0xf] }
  0xd7   : > { %7400 = vmatpush3.bf16.msra.mxu0 %v7847_v7  ;;  %7323 = vmatprep.mubr.bf16.mxu0 %v6627_v60  ;;  %v6628_v30 = vcombine.low %v8550_v2, %v2277_v55  ;;  %v2895_v16 = vshll.u32 %v2767_v56, 16  ;;  %v2887_v23 = vrot.slane %v2885_v36, 5  ;;  %v2900_v19 = vshrl.u32 %v2725_v61, 16  ;;  %v2729_v2 = vld [vmem:[#allocation2 + $0x60] sm:$0xf]  ;;  %v7752_v0 = vld [vmem:[%s10755_s4 + $0xd8] sm:$0xff]  }
  0xd8   : > { %7372 = vmatmul.mubr.bf16.gmra.mxu1 %v6652_v21  ;;  %7401 = vmatprep.subr.bf16.mxu0 %v7746_v39  ;;  %v2903_v24 = vshll.u32 %v2725_v61, 16  ;;  %v2909_v32 = vshll.u32 %v2726_v26, 16  ;;  %v2882_v63 = vor.u32 %v2881_v27, %v2878_v6  ;;  %v2891_v35 = vrot.slane %v2889_v3, 4  ;;  %v7850_v61 = vld [vmem:[#allocation2 + $0x40] sm:$0xf] }
  0xd9   : > { %v2897_v34 = vrot.slane %v2895_v16, 5  ;;  %v2913_v37 = vshrl.u32 %v2726_v26, 16  ;;  %v2902_v17 = vrot.slane %v2900_v19, 4  ;;  %v2919_v28 = vshll.u32 %v2768_v4, 16  ;;  %7454 = vmatpush3.bf16.msra.mxu1 %v7751_v9  ;;  %v7851_v1 = vld [vmem:[#allocation2 + $0x44] sm:$0x1] }
  0xda   : > { %v2905_v38 = vrot.slane %v2903_v24, 5  ;;  %v2911_v62 = vrot.slane %v2909_v32, 5  ;;  %v2883_v42 = vrot.slane %v2882_v63, 4  ;;  %v2892_v22 = vor.u32 %v2891_v35, %v2887_v23  ;;  %7455 = vmatprep.subr.bf16.mxu1 %v7753_v20  ;;  %v8601_v7 = vld [vmem:[#allocation2 + $0x64] sm:$0xf] }
  0xdb   : > { %7402 = vmatpush3.bf16.msra.mxu0 %v7746_v39  ;;  %v2915_v44 = vrot.slane %v2913_v37, 4  ;;  %v6613_v46 = vrot.slane %v2203_v10, 9  ;;  %v2921_v47 = vrot.slane %v2919_v28, 5  ;;  %v2280_v50 = vrot.slane %v7848_v49, 5  ;;  %v2205_v19 = vld [vmem:[#allocation2 + $0x48] sm:$0xe] }
  0xdc   : > { %v2906_v33 = vor.u32 %v2905_v38, %v2902_v17  ;;  %v2283_v18 = vrot.slane %v7849_v51, 5  ;;  %7403 = vmatprep.subr.bf16.mxu0 %v7748_v11  ;;  %v2888_v53 = vsel %vm8103_vm11, %v2883_v42, %v2887_v23  ;;  %v2893_v56 = vrot.slane %v2892_v22, 4  ;;  %v2770_v23 = vld [vmem:[#allocation2 + $0x68] sm:$0x1]  ;;  %v7754_v28 = vld [vmem:[%s10755_s4 + $0xd0] sm:$0xff]  }
  0xdd   : > { %v2916_v14 = vor.u32 %v2915_v44, %v2911_v62  ;;  %v6614_v25 = vrot.slane %v2204_v41, 9  ;;  %v2281_v54 = vsel %vm8489_vm14, %v6613_v46, %v2280_v50  ;;  %v2282_v5 = vrot.slane %v2280_v50, 4  ;;  %7456 = vmatpush3.bf16.msra.mxu1 %v7753_v20  ;;  %v2206_v46 = vld [vmem:[#allocation2 + $0x54] sm:$0xe]  ;;  %v7756_v49 = vld [vmem:[%s10755_s4 + $0xc8] sm:$0xff]  }
  0xde   : > { %7324 = vmatmul.mubr.bf16.gmra.mxu0 %v6628_v30  ;;  %v2907_v39 = vrot.slane %v2906_v33, 4  ;;  %v2287_v26 = vrot.slane %v7850_v61, 5  ;;  %v2898_v57 = vsel %vm8103_vm11, %v2893_v56, %v2897_v34  ;;  %v2290_v59 = vrot.slane %v7851_v1, 5  ;;  %7457 = vmatprep.subr.bf16.mxu1 %v7755_v45  ;;  %v7757_v30 = vld [vmem:[%s10755_s4 + $0x148] sm:$0xff]   ;;  %v7759_v34 = vld [vmem:[%s10755_s4 + $0x140] sm:$0xff]   ;;  %v8632_v56 = vld [vmem:[%s10755_s4 + $0x1b8] sm:$0xff]  }
  0xdf   : > { %v2917_v58 = vrot.slane %v2916_v14, 4  ;;  %7404 = vmatpush3.bf16.msra.mxu0 %v7748_v11  ;;  %v2924_v60 = vshrl.u32 %v2727_v40, 16  ;;  %v6653_v4 = vcombine.low %v2888_v53, %v2898_v57  ;;  %v2284_v21 = vsel %vm8489_vm14, %v2282_v5, %v2283_v18 }
  0xe0   : > { %v2912_v9 = vsel %vm8103_vm11, %v2907_v39, %v2911_v62  ;;  %v2288_v55 = vsel %vm8489_vm14, %v6614_v25, %v2287_v26  ;;  %7405 = vmatprep.subr.bf16.mxu0 %v7750_v43  ;;  %v6629_v36 = vcombine.low %v2281_v54, %v2284_v21  ;;  %v2289_v10 = vrot.slane %v2287_v26, 4 }
  0xe1   : > { %v2922_v6 = vsel %vm8103_vm11, %v2917_v58, %v2921_v47  ;;  %v2926_v11 = vrot.slane %v2924_v60, 4  ;;  %7375 = vmatprep.mubr.bf16.mxu1 %v6653_v4  ;;  %v2927_v3 = vshll.u32 %v2727_v40, 16  ;;  %v2933_v16 = vshll.u32 %v8582_v48, 16  ;;  %7458 = vmatpush3.bf16.msra.mxu1 %v7755_v45  ;;  %v8636_v58 = vld [vmem:[#allocation2 + $0x6c] sm:$0xf] }
  0xe2   : > { %v6654_v27 = vcombine.low %v2912_v9, %v2922_v6  ;;  %v2937_v20 = vshrl.u32 %v8582_v48, 16  ;;  %7327 = vmatprep.mubr.bf16.mxu0 %v6629_v36  ;;  %v2291_v24 = vsel %vm8489_vm14, %v2289_v10, %v2290_v59  ;;  %v2943_v32 = vshll.u32 %v8586_v12, 16  ;;  %7459 = vmatprep.subr.bf16.mxu1 %v7757_v30  ;;  %v8642_v4 = vld [vmem:[#allocation2 + $0x70] sm:$0xf]  ;;  %v8644_v9 = vld [vmem:[#allocation2 + $0x74] sm:$0x1] }
  0xe3   : > { %v2948_v63 = vshrl.u32 %v2729_v2, 16  ;;  %v2951_v35 = vshll.u32 %v2729_v2, 16  ;;  %7406 = vmatpush3.bf16.msra.mxu0 %v7750_v43  ;;  %v6630_v37 = vcombine.low %v2288_v55, %v2291_v24  ;;  %v2929_v17 = vrot.slane %v2927_v3, 5  ;;  %v7852_v43 = vld [vmem:[#allocation2 + $0x4c] sm:$0xf] }
  0xe4   : > { %7376 = vmatmul.mubr.bf16.gmra.mxu1 %v6654_v27  ;;  %v2935_v38 = vrot.slane %v2933_v16, 5  ;;  %v2939_v62 = vrot.slane %v2937_v20, 4  ;;  %7407 = vmatprep.subr.bf16.mxu0 %v7752_v0  ;;  %v2945_v41 = vrot.slane %v2943_v32, 5  ;;  %v2957_v44 = vshll.u32 %v8601_v7, 16  ;;  %v7853_v2 = vld [vmem:[#allocation2 + $0x50] sm:$0x1] }
  0xe5   : > { %v2950_v42 = vrot.slane %v2948_v63, 4  ;;  %v2953_v22 = vrot.slane %v2951_v35, 5  ;;  %v2930_v40 = vor.u32 %v2929_v17, %v2926_v11  ;;  %v2961_v33 = vshrl.u32 %v8601_v7, 16  ;;  %7460 = vmatpush3.bf16.msra.mxu1 %v7757_v30  ;;  %v7854_v36 = vld [vmem:[#allocation2 + $0x58] sm:$0xf] }
  0xe6   : > { %7328 = vmatmul.mubr.bf16.gmra.mxu0 %v6630_v37  ;;  %v2940_v45 = vor.u32 %v2939_v62, %v2935_v38  ;;  %v2967_v47 = vshll.u32 %v2770_v23, 16  ;;  %v2959_v51 = vrot.slane %v2957_v44, 5  ;;  %v6615_v18 = vrot.slane %v2205_v19, 9  ;;  %7461 = vmatprep.subr.bf16.mxu1 %v7759_v34  ;;  %v8650_v11 = vld [vmem:[#allocation2 + $0x78] sm:$0xf]  ;;  %v7758_v19 = vld [vmem:[%s10755_s4 + $0xc0] sm:$0xff]  }
  0xe7   : > { %v2954_v50 = vor.u32 %v2953_v22, %v2950_v42  ;;  %v2294_v53 = vrot.slane %v7852_v43, 5  ;;  %7408 = vmatpush3.bf16.msra.mxu0 %v7752_v0  ;;  %v2931_v14 = vrot.slane %v2930_v40, 4  ;;  %v2963_v39 = vrot.slane %v2961_v33, 4  ;;  %v7855_v3 = vld [vmem:[#allocation2 + $0x5c] sm:$0x1] }
  0xe8   : > { %v2941_v25 = vrot.slane %v2940_v45, 4  ;;  %v2969_v54 = vrot.slane %v2967_v47, 5  ;;  %7409 = vmatprep.subr.bf16.mxu0 %v7754_v28  ;;  %v2297_v57 = vrot.slane %v7853_v2, 5  ;;  %v6616_v0 = vrot.slane %v2206_v46, 9  ;;  %v8654_v23 = vld [vmem:[#allocation2 + $0x7c] sm:$0xf] }
  0xe9   : > { %v2955_v5 = vrot.slane %v2954_v50, 4  ;;  %v2295_v61 = vsel %vm8489_vm14, %v6615_v18, %v2294_v53  ;;  %v2296_v26 = vrot.slane %v2294_v53, 4  ;;  %v2936_v1 = vsel %vm8103_vm11, %v2931_v14, %v2935_v38  ;;  %7462 = vmatpush3.bf16.msra.mxu1 %v7759_v34  ;;  %v8663_v34 = vld [vmem:[#allocation2 + $0x80] sm:$0x1]  ;;  %v2207_v37 = vld [vmem:[#allocation2 + $0x60] sm:$0xe] }
  0xea   : > { %v2946_v59 = vsel %vm8103_vm11, %v2941_v25, %v2945_v41  ;;  %v2964_v60 = vor.u32 %v2963_v39, %v2959_v51  ;;  %v2301_v10 = vrot.slane %v7854_v36, 5  ;;  %7543 = vmatprep.subr.bf16.mxu1 %v8632_v56  ;;  %v2304_v16 = vrot.slane %v7855_v3, 5  ;;  %v8675_v47 = vld [vmem:[%s10755_s4 + $0x1f8] sm:$0xff]   ;;  %v2208_v39 = vld [vmem:[#allocation2 + $0x6c] sm:$0xe] }
  0xeb   : > { %v6655_v21 = vcombine.low %v2936_v1, %v2946_v59  ;;  %v2960_v55 = vsel %vm8103_vm11, %v2955_v5, %v2959_v51  ;;  %v2298_v6 = vsel %vm8489_vm14, %v2296_v26, %v2297_v57  ;;  %7410 = vmatpush3.bf16.msra.mxu0 %v7754_v28  ;;  %v2972_v20 = vshrl.u32 %v8636_v58, 16  ;;  %v8681_v2 = vld [vmem:[#allocation2 + $0x84] sm:$0xf] }
  0xec   : > { %v2965_v30 = vrot.slane %v2964_v60, 4  ;;  %v6631_v27 = vcombine.low %v2295_v61, %v2298_v6  ;;  %7411 = vmatprep.subr.bf16.mxu0 %v7756_v49  ;;  %v2302_v24 = vsel %vm8489_vm14, %v6616_v0, %v2301_v10  ;;  %v2303_v32 = vrot.slane %v2301_v10, 4  ;;  %v7856_v59 = vld [vmem:[#allocation2 + $0x64] sm:$0xf]  ;;  %v7857_v0 = vld [vmem:[#allocation2 + $0x68] sm:$0x1] }
  0xed   : > { %7379 = vmatprep.mubr.bf16.mxu1 %v6655_v21  ;;  %v2975_v63 = vshll.u32 %v8636_v58, 16  ;;  %v2981_v35 = vshll.u32 %v8642_v4, 16  ;;  %v2974_v38 = vrot.slane %v2972_v20, 4  ;;  %v2985_v62 = vshrl.u32 %v8642_v4, 16 }
  0xee   : > { %v2970_v17 = vsel %vm8103_vm11, %v2965_v30, %v2969_v54  ;;  %7331 = vmatprep.mubr.bf16.mxu0 %v6631_v27  ;;  %v2991_v28 = vshll.u32 %v8644_v9, 16  ;;  %v2305_v42 = vsel %vm8489_vm14, %v2303_v32, %v2304_v16  ;;  %v2996_v33 = vshrl.u32 %v8650_v11, 16  ;;  %v7858_v16 = vld [vmem:[#allocation2 + $0x70] sm:$0xf] }
  0xef   : > { %v6656_v41 = vcombine.low %v2960_v55, %v2970_v17  ;;  %v2977_v22 = vrot.slane %v2975_v63, 5  ;;  %v2983_v44 = vrot.slane %v2981_v35, 5  ;;  %7412 = vmatpush3.bf16.msra.mxu0 %v7756_v49  ;;  %v6632_v46 = vcombine.low %v2302_v24, %v2305_v42  ;;  %v7859_v35 = vld [vmem:[#allocation2 + $0x74] sm:$0x1]  ;;  %v8692_v17 = vld [vmem:[#allocation2 + $0x8c] sm:$0x1] }
  0xf0   : > { %v2987_v40 = vrot.slane %v2985_v62, 4  ;;  %v2993_v45 = vrot.slane %v2991_v28, 5  ;;  %7413 = vmatprep.subr.bf16.mxu0 %v7758_v19  ;;  %v2999_v51 = vshll.u32 %v8650_v11, 16  ;;  %v3005_v18 = vshll.u32 %v8654_v23, 16  ;;  %v8699_v42 = vld [vmem:[#allocation2 + $0x90] sm:$0xf] }
  0xf1   : > { %7380 = vmatmul.mubr.bf16.gmra.mxu1 %v6656_v41  ;;  %v2978_v50 = vor.u32 %v2977_v22, %v2974_v38  ;;  %v3009_v43 = vshrl.u32 %v8654_v23, 16  ;;  %7332 = vmatmul.mubr.bf16.gmra.mxu0 %v6632_v46  ;;  %v2998_v53 = vrot.slane %v2996_v33, 4  ;;  %v3015_v14 = vshll.u32 %v8663_v34, 16 }
  0xf2   : > { %v2988_v49 = vor.u32 %v2987_v40, %v2983_v44  ;;  %v6617_v25 = vrot.slane %v2207_v37, 9  ;;  %v3001_v5 = vrot.slane %v2999_v51, 5  ;;  %v3007_v61 = vrot.slane %v3005_v18, 5 }
  0xf3   : > { %v2979_v54 = vrot.slane %v2978_v50, 4  ;;  %v3011_v26 = vrot.slane %v3009_v43, 4  ;;  %7414 = vmatpush3.bf16.msra.mxu0 %v7758_v19  ;;  %v3017_v1 = vrot.slane %v3015_v14, 5  ;;  %v2308_v60 = vrot.slane %v7856_v59, 5  ;;  %v8690_v19 = vld [vmem:[#allocation2 + $0x88] sm:$0xf] }
  0xf4   : > { %v2989_v57 = vrot.slane %v2988_v49, 4  ;;  %v2311_v21 = vrot.slane %v7857_v0, 5  ;;  %7495 = vmatprep.subr.bf16.mxu0 %v8675_v47  ;;  %v3002_v6 = vor.u32 %v3001_v5, %v2998_v53  ;;  %v6618_v10 = vrot.slane %v2208_v39, 9  ;;  %v2209_v43 = vld [vmem:[#allocation2 + $0x78] sm:$0xe] }
  0xf5   : > { %v2984_v55 = vsel %vm8103_vm11, %v2979_v54, %v2983_v44  ;;  %v3012_v36 = vor.u32 %v3011_v26, %v3007_v61  ;;  %v2309_v27 = vsel %vm8489_vm14, %v6617_v25, %v2308_v60  ;;  %v2310_v3 = vrot.slane %v2308_v60, 4  ;;  %v8713_v39 = vld [vmem:[#allocation2 + $0x98] sm:$0x1] }
  0xf6   : > { %v2994_v30 = vsel %vm8103_vm11, %v2989_v57, %v2993_v45  ;;  %v2315_v20 = vrot.slane %v7858_v16, 5  ;;  %v3003_v32 = vrot.slane %v3002_v6, 4  ;;  %v2318_v37 = vrot.slane %v7859_v35, 5  ;;  %v8706_v45 = vld [vmem:[#allocation2 + $0x94] sm:$0xf] }
  0xf7   : > { %v6657_v24 = vcombine.low %v2984_v55, %v2994_v30  ;;  %v3013_v63 = vrot.slane %v3012_v36, 4  ;;  %v2312_v38 = vsel %vm8489_vm14, %v2310_v3, %v2311_v21  ;;  %v3020_v41 = vshrl.u32 %v8681_v2, 16  ;;  %v2210_v36 = vld [vmem:[#allocation2 + $0x84] sm:$0xe] }
  0xf8   : > { %v2316_v62 = vsel %vm8489_vm14, %v6618_v10, %v2315_v20  ;;  %v2317_v28 = vrot.slane %v2315_v20, 4  ;;  %v3008_v22 = vsel %vm8103_vm11, %v3003_v32, %v3007_v61  ;;  %v6633_v46 = vcombine.low %v2309_v27, %v2312_v38 }
  0xf9   : > { %7383 = vmatprep.mubr.bf16.mxu1 %v6657_v24  ;;  %v3018_v44 = vsel %vm8103_vm11, %v3013_v63, %v3017_v1  ;;  %v3023_v40 = vshll.u32 %v8681_v2, 16  ;;  %v3022_v51 = vrot.slane %v3020_v41, 4  ;;  %v3029_v18 = vshll.u32 %v8690_v19, 16  ;;  %v7860_v24 = vld [vmem:[#allocation2 + $0x7c] sm:$0xf] }
  0xfa   : > { %v6658_v33 = vcombine.low %v3008_v22, %v3018_v44  ;;  %v2319_v50 = vsel %vm8489_vm14, %v2317_v28, %v2318_v37  ;;  %7335 = vmatprep.mubr.bf16.mxu0 %v6633_v46  ;;  %v3033_v14 = vshrl.u32 %v8690_v19, 16  ;;  %v3039_v25 = vshll.u32 %v8692_v17, 16  ;;  %v7861_v63 = vld [vmem:[#allocation2 + $0x80] sm:$0x1]  ;;  %v8720_v37 = vld [vmem:[#allocation2 + $0x9c] sm:$0xf] }
  0xfb   : > { %v6634_v49 = vcombine.low %v2316_v62, %v2319_v50  ;;  %v3025_v53 = vrot.slane %v3023_v40, 5  ;;  %v3031_v54 = vrot.slane %v3029_v18, 5  ;;  %v3044_v5 = vshrl.u32 %v8699_v42, 16  ;;  %v8724_v22 = vld [vmem:[#allocation2 + $0xa0] sm:$0xf] }
  0xfc   : > { %7384 = vmatmul.mubr.bf16.gmra.mxu1 %v6658_v33  ;;  %v3047_v61 = vshll.u32 %v8699_v42, 16  ;;  %v3053_v26 = vshll.u32 %v8706_v45, 16  ;;  %v3035_v1 = vrot.slane %v3033_v14, 4  ;;  %v3041_v59 = vrot.slane %v3039_v25, 5  ;;  %v7862_v33 = vld [vmem:[#allocation2 + $0x88] sm:$0xf] }
  0xfd   : > { %7336 = vmatmul.mubr.bf16.gmra.mxu0 %v6634_v49  ;;  %v3026_v57 = vor.u32 %v3025_v53, %v3022_v51  ;;  %v3057_v60 = vshrl.u32 %v8706_v45, 16  ;;  %v3046_v0 = vrot.slane %v3044_v5, 4  ;;  %v3063_v6 = vshll.u32 %v8713_v39, 16  ;;  %v8728_v51 = vld [vmem:[#allocation2 + $0xa4] sm:$0x1] }
  0xfe   : > { %v3049_v21 = vrot.slane %v3047_v61, 5  ;;  %v3055_v55 = vrot.slane %v3053_v26, 5  ;;  %v3036_v30 = vor.u32 %v3035_v1, %v3031_v54  ;;  %v6619_v3 = vrot.slane %v2209_v43, 9  ;;  %v7863_v49 = vld [vmem:[#allocation2 + $0x8c] sm:$0x1] }
  0xff   : > { %v3027_v10 = vrot.slane %v3026_v57, 4  ;;  %v3059_v27 = vrot.slane %v3057_v60, 4  ;;  %v3065_v20 = vrot.slane %v3063_v6, 5  ;;  %v2322_v32 = vrot.slane %v7860_v24, 5  ;;  %v8733_v25 = vld [vmem:[#allocation2 + $0xa8] sm:$0xf] }
 0x100   : > { %v3050_v16 = vor.u32 %v3049_v21, %v3046_v0  ;;  %v2325_v35 = vrot.slane %v7861_v63, 5  ;;  %v3037_v62 = vrot.slane %v3036_v30, 4  ;;  %v6620_v41 = vrot.slane %v2210_v36, 9  ;;  %v8746_v36 = vld [vmem:[#allocation2 + $0xac] sm:$0xf] }
 0x101   : > { %v3032_v38 = vsel %vm8103_vm11, %v3027_v10, %v3031_v54  ;;  %v3060_v28 = vor.u32 %v3059_v27, %v3055_v55  ;;  %v2323_v46 = vsel %vm8489_vm14, %v6619_v3, %v2322_v32  ;;  %v2324_v40 = vrot.slane %v2322_v32, 4  ;;  %v8751_v27 = vld [vmem:[#allocation2 + $0xb0] sm:$0x1] }
 0x102   : > { %v3051_v44 = vrot.slane %v3050_v16, 4  ;;  %v2329_v50 = vrot.slane %v7862_v33, 5  ;;  %v3042_v18 = vsel %vm8103_vm11, %v3037_v62, %v3041_v59  ;;  %v2332_v53 = vrot.slane %v7863_v49, 5 }
 0x103   : > { %v3061_v43 = vrot.slane %v3060_v28, 4  ;;  %v3068_v14 = vshrl.u32 %v8720_v37, 16  ;;  %v6659_v54 = vcombine.low %v3032_v38, %v3042_v18  ;;  %v2326_v61 = vsel %vm8489_vm14, %v2324_v40, %v2325_v35  ;;  %v2211_v35 = vld [vmem:[#allocation2 + $0x90] sm:$0xe] }
 0x104   : > { %v3056_v5 = vsel %vm8103_vm11, %v3051_v44, %v3055_v55  ;;  %v2330_v26 = vsel %vm8489_vm14, %v6620_v41, %v2329_v50  ;;  %v6635_v1 = vcombine.low %v2323_v46, %v2326_v61  ;;  %v2331_v59 = vrot.slane %v2329_v50, 4  ;;  %v2212_v50 = vld [vmem:[#allocation2 + $0x9c] sm:$0xe] }
 0x105   : > { %v3066_v57 = vsel %vm8103_vm11, %v3061_v43, %v3065_v20  ;;  %v3070_v60 = vrot.slane %v3068_v14, 4  ;;  %7387 = vmatprep.mubr.bf16.mxu1 %v6659_v54  ;;  %v3071_v21 = vshll.u32 %v8720_v37, 16  ;;  %v3077_v6 = vshll.u32 %v8724_v22, 16  ;;  %v8758_v54 = vld [vmem:[#allocation2 + $0xb4] sm:$0xf] }
 0x106   : > { %v6660_v0 = vcombine.low %v3056_v5, %v3066_v57  ;;  %v3081_v55 = vshrl.u32 %v8724_v22, 16  ;;  %7339 = vmatprep.mubr.bf16.mxu0 %v6635_v1  ;;  %v2333_v10 = vsel %vm8489_vm14, %v2331_v59, %v2332_v53  ;;  %v3087_v30 = vshll.u32 %v8728_v51, 16  ;;  %v7864_v53 = vld [vmem:[#allocation2 + $0x94] sm:$0xf] }
 0x107   : > { %v3092_v3 = vshrl.u32 %v8733_v25, 16  ;;  %v3095_v16 = vshll.u32 %v8733_v25, 16  ;;  %v6636_v20 = vcombine.low %v2330_v26, %v2333_v10  ;;  %v3073_v24 = vrot.slane %v3071_v21, 5 }
 0x108   : > { %7388 = vmatmul.mubr.bf16.gmra.mxu1 %v6660_v0  ;;  %v3079_v32 = vrot.slane %v3077_v6, 5  ;;  %v3083_v63 = vrot.slane %v3081_v55, 4  ;;  %v3089_v38 = vrot.slane %v3087_v30, 5  ;;  %v3101_v41 = vshll.u32 %v8746_v36, 16  ;;  %v7865_v0 = vld [vmem:[#allocation2 + $0x98] sm:$0x1] }
 0x109   : > { %v3094_v62 = vrot.slane %v3092_v3, 4  ;;  %v3097_v28 = vrot.slane %v3095_v16, 5  ;;  %7340 = vmatmul.mubr.bf16.gmra.mxu0 %v6636_v20  ;;  %v3074_v44 = vor.u32 %v3073_v24, %v3070_v60  ;;  %v3105_v40 = vshrl.u32 %v8746_v36, 16  ;;  %v8766_v3 = vld [vmem:[#allocation2 + $0xb8] sm:$0xf] }
 0x10a   : > { %v3084_v46 = vor.u32 %v3083_v63, %v3079_v32  ;;  %v3111_v33 = vshll.u32 %v8751_v27, 16  ;;  %v3103_v43 = vrot.slane %v3101_v41, 5  ;;  %v6621_v49 = vrot.slane %v2211_v35, 9  ;;  %v7866_v63 = vld [vmem:[#allocation2 + $0xa0] sm:$0xf] }
 0x10b   : > { %v3098_v18 = vor.u32 %v3097_v28, %v3094_v62  ;;  %v2336_v14 = vrot.slane %v7864_v53, 5  ;;  %v3075_v5 = vrot.slane %v3074_v44, 4  ;;  %v3107_v26 = vrot.slane %v3105_v40, 4  ;;  %v8772_v62 = vld [vmem:[#allocation2 + $0xbc] sm:$0x1] }
 0x10c   : > { %v3085_v61 = vrot.slane %v3084_v46, 4  ;;  %v3113_v57 = vrot.slane %v3111_v33, 5  ;;  %v2339_v21 = vrot.slane %v7865_v0, 5  ;;  %v6622_v30 = vrot.slane %v2212_v50, 9  ;;  %v7867_v41 = vld [vmem:[#allocation2 + $0xa4] sm:$0x1] }
 0x10d   : > { %v3099_v1 = vrot.slane %v3098_v18, 4  ;;  %v2337_v59 = vsel %vm8489_vm14, %v6621_v49, %v2336_v14  ;;  %v2338_v60 = vrot.slane %v2336_v14, 4  ;;  %v3080_v6 = vsel %vm8103_vm11, %v3075_v5, %v3079_v32  ;;  %v559_v46 = vld [vmem:[#allocation2 + $0xc0] sm:$0x1]  ;;  %v615_v49 = vld [vmem:[#allocation2 + $0xc8] sm:$0x1] }
 0x10e   : > { %v3090_v55 = vsel %vm8103_vm11, %v3085_v61, %v3089_v38  ;;  %v3108_v10 = vor.u32 %v3107_v26, %v3103_v43  ;;  %v2343_v35 = vrot.slane %v7866_v63, 5  ;;  %v2346_v38 = vrot.slane %v7867_v41, 5  ;;  %v2213_v26 = vld [vmem:[#allocation2 + $0xa8] sm:$0xe] }
 0x10f   : > { %v6661_v16 = vcombine.low %v3080_v6, %v3090_v55  ;;  %v3104_v20 = vsel %vm8103_vm11, %v3099_v1, %v3103_v43  ;;  %v2340_v24 = vsel %vm8489_vm14, %v2338_v60, %v2339_v21  ;;  %v3116_v44 = vshrl.u32 %v8758_v54, 16  ;;  %v6966_v43 = vld [vmem:[%s7999_s12 + $0x78] sm:$0xff]   ;;  %v2214_v21 = vld [vmem:[#allocation2 + $0xb4] sm:$0xe] }
 0x110   : > { %v3109_v32 = vrot.slane %v3108_v10, 4  ;;  %v6637_v28 = vcombine.low %v2337_v59, %v2340_v24  ;;  %v2344_v40 = vsel %vm8489_vm14, %v6622_v30, %v2343_v35  ;;  %v2345_v33 = vrot.slane %v2343_v35, 4 }
 0x111   : > { %7391 = vmatprep.mubr.bf16.mxu1 %v6661_v16  ;;  %v3119_v50 = vshll.u32 %v8758_v54, 16  ;;  %v3125_v18 = vshll.u32 %v8766_v3, 16  ;;  %v3118_v14 = vrot.slane %v3116_v44, 4  ;;  %v3129_v5 = vshrl.u32 %v8766_v3, 16 }
 0x112   : > { %v3114_v53 = vsel %vm8103_vm11, %v3109_v32, %v3113_v57  ;;  %7343 = vmatprep.mubr.bf16.mxu0 %v6637_v28  ;;  %v3135_v61 = vshll.u32 %v8772_v62, 16  ;;  %v2347_v59 = vsel %vm8489_vm14, %v2345_v33, %v2346_v38  ;;  %v6950_v30 = vunpack.c.l.bf16 %v6966_v43  ;;  %v7868_v32 = vld [vmem:[%s10753_s2] ss:$0 sm:$0xff]  ;;  %v7869_v38 = vld [vmem:[#allocation2 + $0xac] sm:$0xf] }
 0x113   : > { %v6662_v1 = vcombine.low %v3104_v20, %v3114_v53  ;;  %v3121_v60 = vrot.slane %v3119_v50, 5  ;;  %v3127_v0 = vrot.slane %v3125_v18, 5  ;;  %v6638_v6 = vcombine.low %v2344_v40, %v2347_v59  ;;  %v8790_v20 = vpop.f32.mrf.mxu1 }
 0x114   : > { %v3131_v55 = vrot.slane %v3129_v5, 4  ;;  %v3137_v10 = vrot.slane %v3135_v61, 5  ;;  %v6951_v16 = vunpack.c.h.bf16 %v6966_v43  ;;  %v560_v24 = vsel %vm8008_vm2, 0, %v559_v46  ;;  %10804 = vst [vmem:[#allocation8_spill] sm:$0xff] %v8790_v20  ;;  %v7870_v46 = vld [vmem:[#allocation2 + $0xb0] sm:$0x1] }
 0x115   : > { %7392 = vmatmul.mubr.bf16.gmra.mxu1 %v6662_v1  ;;  %v3122_v57 = vor.u32 %v3121_v60, %v3118_v14  ;;  %v616_v63 = vsel %vm8041_vm4, 0, %v615_v49  ;;  %7344 = vmatmul.mubr.bf16.gmra.mxu0 %v6638_v6  ;;  %v428_v28 = vmul.f32 %v7868_v32, %v6950_v30  ;;  %561 = vst [vmem:[#allocation2 + $0xc0] sm:$0x1] %v560_v24  ;;  %v6623_v41 = vrot.slane %v2213_v26, 9  ;;  %v7871_v49 = vld [vmem:[%s10754_s3] ss:$0 sm:$0xff]  ;;  %v8802_v60 = vpop.f32.mrf.mxu1 }
 0x116   : > { %v3132_v35 = vor.u32 %v3131_v55, %v3127_v0  ;;  %617 = vst [vmem:[#allocation2 + $0xc8] sm:$0x1] %v616_v63  ;;  %v2350_v44 = vrot.slane %v7869_v38, 5  ;;  %v429_v33 = vmul.f32 %v7868_v32, %v6951_v16  ;;  %v2353_v50 = vrot.slane %v7870_v46, 5  ;;  %v7872_v1 = vld [vmem:[#allocation2 + $0xb8] sm:$0xf] }
 0x117   : > { %v3123_v40 = vrot.slane %v3122_v57, 4  ;;  %v6624_v18 = vrot.slane %v2214_v21, 9  ;;  %v467_v53 = vadd.f32 %v7871_v49, %v428_v28  ;;  %v2357_v59 = vrot.slane %v7872_v1, 5  ;;  %10805 = vst [vmem:[#allocation9_spill] sm:$0xff] %v8802_v60  ;;  %v7873_v30 = vld [vmem:[#allocation2 + $0xbc] sm:$0x1] }
 0x118   : > { %v3133_v43 = vrot.slane %v3132_v35, 4  ;;  %v2351_v14 = vsel %vm8489_vm14, %v6623_v41, %v2350_v44  ;;  %v2352_v5 = vrot.slane %v2350_v44, 4  ;;  %v468_v26 = vadd.f32 %v7871_v49, %v429_v33  ;;  %v8810_v41 = vpop.f32.mrf.mxu1  ;;  %v8814_v33 = vld [vmem:[#allocation2 + $0x10] sm:$0xf] }
 0x119   : > { %v3128_v61 = vsel %vm8103_vm11, %v3123_v40, %v3127_v0  ;;  %v499_v6 = vmax.f32 %v467_v53, 0.0  ;;  %v2360_v57 = vrot.slane %v7873_v30, 5  ;;  %v2358_v0 = vsel %vm8489_vm14, %v6624_v18, %v2357_v59  ;;  %10806 = vst [vmem:[#allocation10_spill] sm:$0xff] %v8810_v41  ;;  %v7874_v40 = vld [vmem:[#allocation2 + $0xc] sm:$0xf] }
 0x11a   : > { %v3138_v21 = vsel %vm8103_vm11, %v3133_v43, %v3137_v10  ;;  %v2354_v55 = vsel %vm8489_vm14, %v2352_v5, %v2353_v50  ;;  %v500_v24 = vmax.f32 %v468_v26, 0.0  ;;  %v2359_v32 = vrot.slane %v2357_v59, 4  ;;  %v8817_v50 = vpop.f32.mrf.mxu0  ;;  %v3757_v30 = vld [vmem:[#allocation2 + $0xc] sm:$0xe] }
 0x11b   : > { %v6663_v16 = vcombine.low %v3128_v61, %v3138_v21  ;;  %v6639_v63 = vcombine.low %v2351_v14, %v2354_v55  ;;  %v6886_v35 = vpack.c.bf16 %v499_v6, %v499_v6  ;;  %v6673_v46 = vcombine.low %v7874_v40, %v8814_v33  ;;  %10807 = vst [vmem:[#allocation11_spill] sm:$0xff] %v8817_v50  ;;  %v8819_v61 = vpop.f32.mrf.mxu1  ;;  %v3759_v40 = vld [vmem:[#allocation2 + $0x24] sm:$0xe] }
 0x11c   : > { %v6887_v28 = vpack.c.bf16 %v500_v24, %v500_v24  ;;  %v2361_v44 = vsel %vm8489_vm14, %v2359_v32, %v2360_v57  ;;  %v1147_v5 = vld [vmem:[#allocation2 + $0xc0] sm:$0xf]  ;;  %10808 = vst [vmem:[#allocation12_spill] sm:$0xff] %v8819_v61  ;;  %v8821_v21 = vpop.f32.mrf.mxu0  ;;  %v3807_v57 = vrot.slane %v8814_v33, 5  ;;  %v8830_v33 = vld [vmem:[#allocation2 + $0x34] sm:$0xf]  ;;  %v6681_v29 = vcombine.low %v8636_v58, %v8642_v4 }
 0x11d   : > { %7395 = vmatprep.mubr.bf16.mxu1 %v6663_v16  ;;  %7347 = vmatprep.mubr.bf16.mxu0 %v6639_v63  ;;  %v975_v10 = vshrl.u32 %v6886_v35, 16  ;;  %v978_v38 = vshll.u32 %v6886_v35, 16  ;;  %v6640_v49 = vcombine.low %v2358_v0, %v2361_v44  ;;  %v1151_v59 = vld [vmem:[#allocation2 + $0xc8] sm:$0x1]  ;;  %10809 = vst [vmem:[#allocation13_spill] sm:$0xff] %v8821_v21  ;;  %v8833_v13 = vpop.f32.mrf.mxu1 }
 0x11e   : > { %v983_v43 = vshrl.u32 %v6887_v28, 16  ;;  %v986_v18 = vshll.u32 %v6887_v28, 16  ;;  %v7876_v16 = vld [vmem:[#allocation2 + $0x1c] sm:$0xf]  ;;  %v3758_v35 = vld [vmem:[#allocation2 + $0x18] sm:$0xe] }
 0x11f   : > { %v977_v53 = vrot.slane %v975_v10, 7  ;;  %7348 = vmatmul.mubr.bf16.gmra.mxu0 %v6640_v49  ;;  %v3814_v24 = vrot.slane %v7876_v16, 5  ;;  %v7877_v0 = vld [vmem:[#allocation2 + $0x28] sm:$0xf]  ;;  %10810 = vst [vmem:[#allocation14_spill] sm:$0xff] %v8833_v13  ;;  %v8840_v61 = vpop.f32.mrf.mxu1 }
 0x120   : > { %v985_v14 = vrot.slane %v983_v43, 7  ;;  %7415 = vmatprep.mubr.bf16.mxu0 %v6673_v46  ;;  %v3821_v32 = vrot.slane %v7877_v0, 5  ;;  %v3760_v46 = vld [vmem:[#allocation2 + $0x30] sm:$0xe]  ;;  %v3828_v43 = vrot.slane %v8830_v33, 5  ;;  %10812 = vst [vmem:[#allocation16_spill] sm:$0xff] %v8840_v61 }
 0x121   : > { %v980_v26 = vor.u32 %v978_v38, %v977_v53  ;;  %v981_v1 = vrot.slane %v977_v53, 4  ;;  %v7878_v38 = vld [vmem:[#allocation2 + $0x18] sm:$0xf]  ;;  %v7880_v49 = vld [vmem:[#allocation2 + $0x14] sm:$0x1] }
 0x122   : > { %v988_v6 = vor.u32 %v986_v18, %v985_v14  ;;  %v990_v55 = vrot.slane %v985_v14, 4  ;;  %v6674_v44 = vcombine.low %v7878_v38, %v7876_v16  ;;  %v6697_v18 = vrot.slane %v3757_v30, 9  ;;  %v7881_v53 = vld [vmem:[#allocation2 + $0x24] sm:$0xf]  ;;  %v7765_v16 = vld [vmem:[%s10755_s4 + $0x1f0] sm:$0xff]  }
 0x123   : > { %v1148_v63 = vsel %vm8095_vm10, %v980_v26, %v1147_v5  ;;  %v3810_v8 = vrot.slane %v7880_v49, 5  ;;  %v6675_v14 = vcombine.low %v7881_v53, %v7877_v0  ;;  %v8835_v5 = vpop.f32.mrf.mxu0  ;;  %v3809_v26 = vrot.slane %v3807_v57, 4  ;;  %v7884_v13 = vld [vmem:[#allocation2 + $0x38] sm:$0x1]  ;;  %v3761_v53 = vld [vmem:[#allocation2 + $0x3c] sm:$0xe] }
 0x124   : > { %v989_v28 = vsel %vm8087_vm9, %v981_v1, %v988_v6  ;;  %1149 = vst [vmem:[#allocation2 + $0xc0] sm:$0xf] %v1148_v63  ;;  %v1152_v10 = vsel %vm8008_vm2, %v990_v55, %v1151_v59  ;;  %10811 = vst [vmem:[#allocation15_spill] sm:$0xff] %v8835_v5  ;;  %v6698_v1 = vrot.slane %v3758_v35, 9  ;;  %v3816_v59 = vrot.slane %v3814_v24, 4 }
 0x125   : > { %1150 = vst [vmem:[#allocation2 + $0xc4] sm:$0xf] %v989_v28  ;;  %1153 = vst [vmem:[#allocation2 + $0xc8] sm:$0x1] %v1152_v10  ;;  %v7882_v6 = vld [vmem:[#allocation2 + $0x20] sm:$0x1]  ;;  %v8844_v35 = vsel %vm8489_vm14, %v6697_v18, %v3807_v57 }
 0x126   : > { %v3817_v55 = vrot.slane %v7882_v6, 5  ;;  %v6699_v63 = vrot.slane %v3759_v40, 9  ;;  %v3823_v38 = vrot.slane %v3821_v32, 4  ;;  %v7883_v28 = vld [vmem:[#allocation2 + $0x2c] sm:$0x1]  ;;  %v6700_v30 = vrot.slane %v3760_v46, 9  ;;  %v8847_v6 = vpop.f32.mrf.mxu0 }
 0x127   : > { %v3824_v10 = vrot.slane %v7883_v28, 5  ;;  %7416 = vmatmul.mubr.bf16.vlgmr.msra.gmra.mxu0 %v6674_v44  ;;  %v3830_v49 = vrot.slane %v3828_v43, 4  ;;  %v3831_v0 = vrot.slane %v7884_v13, 5  ;;  %10813 = vst [vmem:[#allocation17_spill] sm:$0xff] %v8847_v6  ;;  %v8851_v40 = vsel %vm8489_vm14, %v3809_v26, %v3810_v8  ;;  %v7885_v57 = vld [vmem:[#allocation2 + $0x40] sm:$0xf] }
 0x128   : > { %7496 = vmatpush3.bf16.msra.mxu0 %v8675_v47  ;;  %7419 = vmatprep.mubr.bf16.mxu0 %v6675_v14  ;;  %v8855_v44 = vsel %vm8489_vm14, %v6698_v1, %v3814_v24  ;;  %v8859_v46 = vsel %vm8489_vm14, %v3816_v59, %v3817_v55  ;;  %v3835_v13 = vrot.slane %v7885_v57, 5  ;;  %v7769_v47 = vld [vmem:[%s10755_s4 + $0x1e8] sm:$0xff]   ;;  %v8868_v8 = vsel %vm8489_vm14, %v6699_v63, %v3821_v32  ;;  %v7886_v63 = vld [vmem:[#allocation2 + $0x30] sm:$0xf]  ;;  %v7887_v6 = vld [vmem:[#allocation2 + $0x3c] sm:$0xf]  ;;  %v8894_v5 = vpop.f32.mrf.mxu0 }
 0x129   : > { %7497 = vmatprep.subr.bf16.mxu0 %v7765_v16  ;;  %v8872_v24 = vsel %vm8489_vm14, %v3823_v38, %v3824_v10  ;;  %v8876_v14 = vsel %vm8489_vm14, %v6700_v30, %v3828_v43  ;;  %v6701_v26 = vrot.slane %v3761_v53, 9  ;;  %v8886_v32 = vsel %vm8489_vm14, %v3830_v49, %v3831_v0  ;;  %v8889_v10 = vpop.f32.mrf.mxu1  ;;  %v3762_v61 = vld [vmem:[#allocation2 + $0x48] sm:$0xe]  ;;  %10815 = vst [vmem:[#allocation19_spill] sm:$0xff] %v8894_v5  ;;  %v7888_v21 = vld [vmem:[#allocation2 + $0x44] sm:$0x1] }
 0x12a   : > { %v6676_v38 = vcombine.low %v7886_v63, %v8830_v33  ;;  %10814 = vst [vmem:[#allocation18_spill] sm:$0xff] %v8889_v10  ;;  %v6677_v41 = vcombine.low %v7887_v6, %v7885_v57  ;;  %v3837_v0 = vrot.slane %v3835_v13, 4  ;;  %v3838_v20 = vrot.slane %v7888_v21, 5  ;;  %v7773_v33 = vld [vmem:[%s10755_s4 + $0x1e0] sm:$0xff]  }
 0x12b   : > { %v8864_v18 = vld [vmem:[#allocation2 + $0xc0] sm:$0xf]  ;;  %v6702_v57 = vrot.slane %v3762_v61, 9  ;;  %v8903_v5 = vpop.f32.mrf.mxu1  ;;  %v8915_v61 = vsel %vm8489_vm14, %v6701_v26, %v3835_v13  ;;  %v7891_v13 = vld [vmem:[#allocation2 + $0x48] sm:$0xf] }
 0x12c   : > { %v8878_v1 = vld [vmem:[#allocation2 + $0xc4] sm:$0xf]  ;;  %v8880_v59 = vld [vmem:[#allocation2 + $0xc8] sm:$0x1]  ;;  %v3140_v55 = vshrl.u32 %v8864_v18, 16  ;;  %v3143_v28 = vshll.u32 %v8864_v18, 16  ;;  %7498 = vmatpush3.bf16.msra.mxu0 %v7765_v16 }
 0x12d   : > { %v3149_v43 = vshll.u32 %v8878_v1, 16  ;;  %v3153_v30 = vshrl.u32 %v8878_v1, 16  ;;  %v3159_v53 = vshll.u32 %v8880_v59, 16  ;;  %7499 = vmatprep.subr.bf16.mxu0 %v7769_v47  ;;  %10816 = vst [vmem:[#allocation20_spill] sm:$0xff] %v8903_v5 }
 0x12e   : > { %v3142_v60 = vrot.slane %v3140_v55, 4  ;;  %v3145_v49 = vrot.slane %v3143_v28, 5  ;;  %v7889_v55 = vld [vmem:[#allocation2 + $0x4c] sm:$0xf] }
 0x12f   : > { %v3151_v63 = vrot.slane %v3149_v43, 5  ;;  %v3155_v10 = vrot.slane %v3153_v30, 4  ;;  %7420 = vmatmul.mubr.bf16.gmra.mxu0 %v6676_v38  ;;  %v3842_v28 = vrot.slane %v7889_v55, 5  ;;  %v3161_v31 = vrot.slane %v3159_v53, 5  ;;  %v8911_v30 = vpop.f32.mrf.mxu0  ;;  %v8927_v43 = vld [vmem:[#allocation2 + $0x50] sm:$0x1]  ;;  %v8940_v53 = vpop.f32.mrf.mxu1 }
 0x130   : > { %v3146_v50 = vor.u32 %v3145_v49, %v3142_v60  ;;  %7423 = vmatprep.mubr.bf16.mxu0 %v6677_v41  ;;  %7500 = vmatpush3.bf16.msra.mxu0 %v7769_v47  ;;  %v8909_v60 = vld [vmem:[#allocation2 + $0x54] sm:$0xe]  ;;  %10817 = vst [vmem:[#allocation21_spill] sm:$0xff] %v8911_v30  ;;  %v8922_v49 = vld [vmem:[#allocation2 + $0x60] sm:$0xe]  ;;  %v7777_v41 = vld [vmem:[%s10755_s4 + $0x1d8] sm:$0xff]   ;;  %v6678_v26 = vcombine.low %v7891_v13, %v7889_v55 }
 0x131   : > { %v3156_v21 = vor.u32 %v3155_v10, %v3151_v63  ;;  %v8919_v10 = vsel %vm8489_vm14, %v3837_v0, %v3838_v20  ;;  %7501 = vmatprep.subr.bf16.mxu0 %v7773_v33  ;;  %v3767_v20 = vld [vmem:[#allocation2 + $0x84] sm:$0xe]  ;;  %v8935_v6 = vsel %vm8489_vm14, %v6702_v57, %v3842_v28  ;;  %v8937_v16 = vrot.slane %v3842_v28, 4  ;;  %10818 = vst [vmem:[#allocation22_spill] sm:$0xff] %v8940_v53  ;;  %v3768_v57 = vld [vmem:[#allocation2 + $0x90] sm:$0xe]  ;;  %v8947_v5 = vpop.f32.mrf.mxu0 }
 0x132   : > { %v3147_v38 = vrot.slane %v3146_v50, 4  ;;  %10819 = vst [vmem:[#allocation23_spill] sm:$0xff] %v8947_v5  ;;  %v7894_v13 = vld [vmem:[#allocation2 + $0x60] sm:$0xf]  ;;  %v3887_v53 = vrot.slane %v8713_v39, 5 }
 0x133   : > { %v3157_v47 = vrot.slane %v3156_v21, 4  ;;  %v10820_v21 = vrot.slane %v8582_v48, 5  ;;  %v3770_v5 = vld [vmem:[#allocation2 + $0xa8] sm:$0xe]  ;;  %v8980_v39 = vpop.f32.mrf.mxu0 }
 0x134   : > { %v3152_v0 = vsel %vm8103_vm11, %v3147_v38, %v3151_v63  ;;  %v7893_v63 = vld [vmem:[#allocation2 + $0x58] sm:$0xf]  ;;  %7502 = vmatpush3.bf16.msra.mxu0 %v7773_v33  ;;  %v3877_v33 = vrot.slane %v8690_v19, 5  ;;  %10824 = vst [vmem:[#allocation25_spill] sm:$0xff] %v8980_v39 }
 0x135   : > { %v3162_v50 = vsel %vm8103_vm11, %v3157_v47, %v3161_v31  ;;  %v6679_v38 = vcombine.low %v7892_v15, %v7893_v63  ;;  %v8951_v30 = vrot.slane %v10820_v21, 4  ;;  %7503 = vmatprep.subr.bf16.mxu0 %v7777_v41  ;;  %v6707_v31 = vrot.slane %v3767_v20, 9 }
 0x136   : > { %v6664_v28 = vcombine.low %v3152_v0, %v3162_v50  ;;  %v10821_v47 = vrot.slane %v8601_v7, 5  ;;  %v6680_v15 = vcombine.low %v7894_v13, %v8601_v7  ;;  %v3880_v63 = vrot.slane %v8692_v17, 5  ;;  %v7781_v50 = vld [vmem:[%s10755_s4 + $0x1d0] sm:$0xff]   ;;  %v3769_v0 = vld [vmem:[#allocation2 + $0x9c] sm:$0xe]  ;;  %v8967_v13 = vpop.f32.mrf.mxu1 }
 0x137   : > { %7424 = vmatmul.mubr.bf16.gmra.mxu0 %v6678_v26  ;;  %v6708_v21 = vrot.slane %v3768_v57, 9  ;;  %10822 = vst [vmem:[#allocation24_spill] sm:$0xff] %v8967_v13  ;;  %v10823_v17 = vcombine.low %v8844_v35, %v8851_v40  ;;  %v8976_v26 = vsel %vm8489_vm14, %v6707_v31, %v3877_v33  ;;  %v3879_v57 = vrot.slane %v3877_v33, 4  ;;  %v3772_v13 = vld [vmem:[#allocation2 + $0xc0] sm:$0xe] }
 0x138   : > { %v8956_v55 = vrot.slane %v10821_v47, 4  ;;  %7396 = vmatmul.mubr.bf16.gmra.mxu1 %v6664_v28  ;;  %v3884_v47 = vrot.slane %v8706_v45, 5  ;;  %7427 = vmatprep.mubr.bf16.mxu0 %v6679_v38  ;;  %v6709_v40 = vrot.slane %v3769_v0, 9  ;;  %v3891_v38 = vrot.slane %v8724_v22, 5 }
 0x139   : > { %7463 = vmatprep.mubr.bf16.mxu1 %v10823_v17  ;;  %7504 = vmatpush3.bf16.msra.mxu0 %v7777_v41  ;;  %v8989_v58 = vsel %vm8489_vm14, %v3879_v57, %v3880_v63  ;;  %v3894_v31 = vrot.slane %v8728_v51, 5  ;;  %v6710_v33 = vrot.slane %v3770_v5, 9  ;;  %v3898_v17 = vrot.slane %v8746_v36, 5  ;;  %v7785_v41 = vld [vmem:[%s10755_s4 + $0x1c8] sm:$0xff]   ;;  %v9006_v5 = vpop.f32.mrf.mxu1 }
 0x13a   : > { %v8984_v20 = vsel %vm8489_vm14, %v6708_v21, %v3884_v47  ;;  %v3886_v35 = vrot.slane %v3884_v47, 4  ;;  %7505 = vmatprep.subr.bf16.mxu0 %v7781_v50  ;;  %v3771_v21 = vld [vmem:[#allocation2 + $0xb4] sm:$0xe]  ;;  %v9004_v63 = vsel %vm8489_vm14, %v6709_v40, %v3891_v38  ;;  %v3893_v51 = vrot.slane %v3891_v38, 4  ;;  %10825 = vst [vmem:[#allocation26_spill] sm:$0xff] %v9006_v5 }
 0x13b   : > { %v9012_v28 = vsel %vm8489_vm14, %v6710_v33, %v3898_v17  ;;  %v3900_v39 = vrot.slane %v3898_v17, 4  ;;  %v3901_v0 = vrot.slane %v8751_v27, 5  ;;  %v6711_v17 = vrot.slane %v3771_v21, 9  ;;  %v9028_v27 = vld [vmem:[#allocation2 + $0x6c] sm:$0xe] }
 0x13c   : > { %v9000_v47 = vsel %vm8489_vm14, %v3886_v35, %v3887_v53  ;;  %v9015_v53 = vpop.f32.mrf.mxu0  ;;  %v7767_v35 = vld [vmem:[%s10755_s4 + $0x1b0] sm:$0xff]   ;;  %v9022_v40 = vsel %vm8489_vm14, %v3893_v51, %v3894_v31  ;;  %v3908_v31 = vrot.slane %v8772_v62, 5  ;;  %v10827_v51 = vcombine.low %v8855_v44, %v8859_v46  ;;  %v9041_v21 = vld [vmem:[#allocation2 + $0x78] sm:$0xe]  ;;  %v9050_v62 = vpop.f32.mrf.mxu1  ;;  %v7895_v33 = vld [vmem:[#allocation2 + $0x68] sm:$0x1] }
 0x13d   : > { %7506 = vmatpush3.bf16.msra.mxu0 %v7781_v50  ;;  %v9034_v5 = vsel %vm8489_vm14, %v3900_v39, %v3901_v0  ;;  %v3905_v50 = vrot.slane %v8766_v3, 5  ;;  %v6712_v57 = vrot.slane %v3772_v13, 9  ;;  %v3912_v38 = vrot.slane %v8878_v1, 5  ;;  %v7789_v0 = vld [vmem:[%s10755_s4 + $0x1c0] sm:$0xff]   ;;  %10828 = vst [vmem:[#allocation28_spill] sm:$0xff] %v9050_v62 }
 0x13e   : > { %10826 = vst [vmem:[#allocation27_spill] sm:$0xff] %v9034_v5  ;;  %7507 = vmatprep.subr.bf16.mxu0 %v7785_v41  ;;  %v3915_v39 = vrot.slane %v8880_v59, 5  ;;  %v10829_v44 = vcombine.low %v8868_v8, %v8872_v24  ;;  %v3870_v46 = vrot.slane %v8654_v23, 5  ;;  %v3859_v8 = vrot.slane %v7895_v33, 5 }
 0x13f   : > { %7428 = vmatmul.mubr.bf16.gmra.mxu0 %v6680_v15  ;;  %v9059_v15 = vsel %vm8489_vm14, %v6711_v17, %v3905_v50  ;;  %v3907_v13 = vrot.slane %v3905_v50, 4  ;;  %v6705_v24 = vrot.slane %v9028_v27, 9  ;;  %v9071_v17 = vsel %vm8489_vm14, %v6712_v57, %v3912_v38 }
 0x140   : > { %7464 = vmatmul.mubr.bf16.vlgmr.msra.gmra.mxu1 %v10827_v51  ;;  %10830 = vst [vmem:[#allocation29_spill] sm:$0xff] %v9059_v15  ;;  %v9063_v51 = vpop.f32.mrf.mxu0  ;;  %7431 = vmatprep.mubr.bf16.mxu0 %v6681_v29  ;;  %10832 = vst [vmem:[#allocation31_spill] sm:$0xff] %v9071_v17  ;;  %v3914_v50 = vrot.slane %v3912_v38, 4  ;;  %v10834_v59 = vrot.slane %v8642_v4, 5  ;;  %v6706_v5 = vrot.slane %v9041_v21, 9  ;;  %v3873_v57 = vrot.slane %v8663_v34, 5 }
 0x141   : > { %7544 = vmatpush3.bf16.msra.mxu1 %v8632_v56  ;;  %7467 = vmatprep.mubr.bf16.mxu1 %v10829_v44  ;;  %10831 = vst [vmem:[#allocation30_spill] sm:$0xff] %v9063_v51  ;;  %v7771_v56 = vld [vmem:[%s10755_s4 + $0x1a8] sm:$0xff]   ;;  %v9073_v44 = vld [vmem:[#allocation2 + $0x18] sm:$0xf]  ;;  %v3866_v51 = vrot.slane %v8644_v9, 5  ;;  %v9081_v33 = vsel %vm8489_vm14, %v3907_v13, %v3908_v31  ;;  %v6682_v38 = vcombine.low %v8650_v11, %v8654_v23  ;;  %v3872_v31 = vrot.slane %v3870_v46, 4 }
 0x142   : > { %7545 = vmatprep.subr.bf16.mxu1 %v7767_v35  ;;  %10833 = vst [vmem:[#allocation32_spill] sm:$0xff] %v9073_v44  ;;  %v3865_v62 = vrot.slane %v10834_v59, 4  ;;  %7508 = vmatpush3.bf16.msra.mxu0 %v7785_v41  ;;  %10835 = vst [vmem:[#allocation33_spill] sm:$0xff] %v9081_v33  ;;  %v9083_v29 = vld [vmem:[#allocation2 + $0x1c] sm:$0xf]  ;;  %v9092_v9 = vsel %vm8489_vm14, %v3914_v50, %v3915_v39  ;;  %v9094_v41 = vpop.f32.mrf.mxu1  ;;  %v4400_v34 = vshrl.u32 %v9073_v44, 16  ;;  %v9102_v23 = vpop.f32.mrf.mxu0 }
 0x143   : > { %10836 = vst [vmem:[#allocation34_spill] sm:$0xff] %v9083_v29  ;;  %10837 = vst [vmem:[#allocation35_spill] sm:$0xff] %v9092_v9  ;;  %7509 = vmatprep.subr.bf16.mxu0 %v7789_v0  ;;  %v4403_v13 = vshll.u32 %v9073_v44, 16  ;;  %v9100_v11 = vld [vmem:[#allocation2 + $0x24] sm:$0xf]  ;;  %v10840_v59 = vrot.slane %v8927_v43, 5  ;;  %v6683_v50 = vcombine.low %v8681_v2, %v8690_v19 }
 0x144   : > { %10838 = vst [vmem:[#allocation36_spill] sm:$0xff] %v9100_v11  ;;  %10839 = vst [vmem:[#allocation37_spill] sm:$0xff] %v9102_v23  ;;  %v4413_v21 = vshrl.u32 %v9083_v29, 16  ;;  %v4409_v27 = vshll.u32 %v9083_v29, 16  ;;  %v10841_v23 = vrot.slane %v8582_v48, 5  ;;  %v10842_v43 = vrot.slane %v8909_v60, 9 }
 0x145   : > { %7546 = vmatpush3.bf16.msra.mxu1 %v7767_v35  ;;  %v9109_v39 = vsel %vm8489_vm14, %v8937_v16, %v10840_v59  ;;  %v7775_v35 = vld [vmem:[%s10755_s4 + $0x1a0] sm:$0xff]   ;;  %v10843_v59 = vrot.slane %v8586_v12, 5  ;;  %v10844_v2 = vrot.slane %v8601_v7, 5  ;;  %v10845_v19 = vrot.slane %v8922_v49, 9  ;;  %v9146_v12 = vld [vmem:[#allocation2 + $0x28] sm:$0xf] }
 0x146   : > { %7547 = vmatprep.subr.bf16.mxu1 %v7771_v56  ;;  %v9124_v16 = vsel %vm8489_vm14, %v10842_v43, %v10841_v23  ;;  %v9144_v60 = vsel %vm8489_vm14, %v8956_v55, %v3859_v8  ;;  %7510 = vmatpush3.bf16.msra.mxu0 %v7789_v0  ;;  %10846 = vst [vmem:[#allocation38_spill] sm:$0xff] %v9146_v12  ;;  %v10848_v49 = vrot.slane %v8642_v4, 5  ;;  %v4424_v0 = vshrl.u32 %v9100_v11, 16  ;;  %v9168_v43 = vpop.f32.mrf.mxu1 }
 0x147   : > { %v9131_v9 = vsel %vm8489_vm14, %v8951_v30, %v10843_v59  ;;  %v9139_v48 = vsel %vm8489_vm14, %v10845_v19, %v10844_v2  ;;  %v9151_v30 = vld [vmem:[%s10755_s4 + $0x238] sm:$0xff]   ;;  %v10847_v7 = vcombine.low %v8876_v14, %v8886_v32  ;;  %v9164_v55 = vsel %vm8489_vm14, %v3865_v62, %v3866_v51  ;;  %7432 = vmatmul.mubr.bf16.gmra.mxu0 %v6682_v38  ;;  %v9184_v38 = vld [vmem:[#allocation2 + $0x30] sm:$0xf]  ;;  %v9186_v59 = vpop.f32.mrf.mxu0 }
 0x148   : > { %v9160_v23 = vsel %vm8489_vm14, %v6705_v24, %v10848_v49  ;;  %v4427_v8 = vshll.u32 %v9100_v11, 16  ;;  %v10849_v14 = vcombine.low %v8915_v61, %v8919_v10  ;;  %v9175_v4 = vsel %vm8489_vm14, %v6706_v5, %v3870_v46  ;;  %v7779_v62 = vld [vmem:[%s10755_s4 + $0x198] sm:$0xff]   ;;  %10850 = vst [vmem:[#allocation39_spill] sm:$0xff] %v9186_v59  ;;  %7435 = vmatprep.mubr.bf16.mxu0 %v6683_v50  ;;  %v9189_v10 = vld [vmem:[#allocation2 + $0x20] sm:$0x1] }
 0x149   : > { %7468 = vmatmul.mubr.bf16.gmra.mxu1 %v10847_v7  ;;  %v9179_v32 = vsel %vm8489_vm14, %v3872_v31, %v3873_v57  ;;  %v4402_v51 = vrot.slane %v4400_v34, 4  ;;  %v4405_v24 = vrot.slane %v4403_v13, 5  ;;  %v4437_v61 = vshrl.u32 %v9146_v12, 16  ;;  %10851 = vst [vmem:[#allocation40_spill] sm:$0xff] %v9189_v10  ;;  %7591 = vmatprep.subr.bf16.mxu0 %v9151_v30  ;;  %v9203_v50 = vld [vmem:[#allocation2 + $0x34] sm:$0xf] }
 0x14a   : > { %7471 = vmatprep.mubr.bf16.mxu1 %v10849_v14  ;;  %7548 = vmatpush3.bf16.msra.mxu1 %v7771_v56  ;;  %v9191_v5 = vrot.slane %v4409_v27, 5  ;;  %v4415_v46 = vrot.slane %v4413_v21, 4  ;;  %v4433_v56 = vshll.u32 %v9146_v12, 16  ;;  %v6718_v57 = vcombine.low %v8935_v6, %v9109_v39  ;;  %v9205_v27 = vld [vmem:[#allocation2 + $0x3c] sm:$0xf] }
 0x14b   : > { %7549 = vmatprep.subr.bf16.mxu1 %v7775_v35  ;;  %v6719_v31 = vcombine.low %v9124_v16, %v9131_v9  ;;  %v4426_v21 = vrot.slane %v4424_v0, 4  ;;  %v4429_v2 = vrot.slane %v4427_v8, 5  ;;  %v4448_v19 = vshrl.u32 %v9184_v38, 16  ;;  %v9209_v39 = vld [vmem:[#allocation2 + $0x40] sm:$0xf]  ;;  %v9211_v9 = vpop.f32.mrf.mxu1  ;;  %v9218_v0 = vpop.f32.mrf.mxu0  ;;  %v7783_v8 = vld [vmem:[%s10755_s4 + $0x190] sm:$0xff]  }
 0x14c   : > { %v4451_v6 = vshll.u32 %v9184_v38, 16  ;;  %v4406_v49 = vor.u32 %v4405_v24, %v4402_v51  ;;  %v4419_v14 = vshll.u32 %v9189_v10, 16  ;;  %v4416_v13 = vor.u32 %v4415_v46, %v9191_v5  ;;  %v9224_v34 = vld [vmem:[#allocation2 + $0x2c] sm:$0x1] }
 0x14d   : > { %v4439_v16 = vrot.slane %v4437_v61, 4  ;;  %v4461_v59 = vshrl.u32 %v9203_v50, 16  ;;  %v4472_v24 = vshrl.u32 %v9205_v27, 16  ;;  %v4475_v7 = vshll.u32 %v9205_v27, 16  ;;  %v9238_v33 = vpop.f32.mrf.mxu1 }
 0x14e   : > { %7550 = vmatpush3.bf16.msra.mxu1 %v7775_v35  ;;  %v9226_v35 = vrot.slane %v4433_v56, 5  ;;  %v4485_v10 = vshrl.u32 %v9209_v39, 16  ;;  %v10852_v46 = vcombine.low %v8699_v42, %v8706_v45  ;;  %v10775_v56 = vrot.slane %v9146_v12, 5  ;;  %10853 = vst [vmem:[#allocation41_spill] sm:$0xff] %v9238_v33  ;;  %v7787_v45 = vld [vmem:[%s10755_s4 + $0x188] sm:$0xff]  }
 0x14f   : > { %7551 = vmatprep.subr.bf16.mxu1 %v7779_v62  ;;  %v4430_v52 = vor.u32 %v4429_v2, %v4426_v21  ;;  %v4450_v61 = vrot.slane %v4448_v19, 4  ;;  %v4453_v17 = vrot.slane %v4451_v6, 5  ;;  %v4407_v51 = vrot.slane %v4406_v49, 4  ;;  %v9251_v2 = vld [vmem:[#allocation2 + $0x38] sm:$0x1] }
 0x150   : > { %7436 = vmatmul.mubr.bf16.gmra.mxu0 %v10852_v46  ;;  %v4421_v29 = vrot.slane %v4419_v14, 5  ;;  %v4443_v44 = vshll.u32 %v9224_v34, 16  ;;  %v4457_v15 = vshll.u32 %v9203_v50, 16  ;;  %v10854_v42 = vcombine.low %v8720_v37, %v8724_v22  ;;  %10855 = vst [vmem:[#allocation42_spill] sm:$0xff] %v9251_v2 }
 0x151   : > { %7472 = vmatmul.mubr.bf16.gmra.mxu1 %v6718_v57  ;;  %v9242_v57 = vpop.f32.mrf.mxu0  ;;  %v4417_v21 = vrot.slane %v4416_v13, 4  ;;  %v4463_v19 = vrot.slane %v4461_v59, 4  ;;  %v4477_v6 = vrot.slane %v4475_v7, 5  ;;  %v4481_v14 = vshll.u32 %v9209_v39, 16  ;;  %v9266_v59 = vpop.f32.mrf.mxu1 }
 0x152   : > { %7475 = vmatprep.mubr.bf16.mxu1 %v6719_v31  ;;  %7552 = vmatpush3.bf16.msra.mxu1 %v7779_v62  ;;  %v4440_v62 = vor.u32 %v4439_v16, %v9226_v35  ;;  %v4474_v31 = vrot.slane %v4472_v24, 4  ;;  %v9253_v49 = vrot.slane %v4457_v15, 5  ;;  %v4487_v46 = vrot.slane %v4485_v10, 4  ;;  %v9262_v16 = vld [vmem:[#allocation2 + $0x44] sm:$0x1] }
 0x153   : > { %7553 = vmatprep.subr.bf16.mxu1 %v7783_v8  ;;  %7439 = vmatprep.mubr.bf16.mxu0 %v10854_v42  ;;  %v9260_v22 = vrot.slane %v10775_v56, 4  ;;  %v4431_v13 = vrot.slane %v4430_v52, 4  ;;  %v4454_v42 = vor.u32 %v4453_v17, %v4450_v61  ;;  %10857 = vst [vmem:[#allocation44_spill] sm:$0xff] %v9262_v16  ;;  %v9264_v24 = vld [vmem:[#allocation2 + $0x48] sm:$0xf]  ;;  %v4412_v10 = vsel %vm8103_vm11, %v4407_v51, %v9191_v5  ;;  %v9275_v56 = vpop.f32.mrf.mxu0  ;;  %v7791_v52 = vld [vmem:[%s10755_s4 + $0x180] sm:$0xff]  }
 0x154   : > { %v4464_v7 = vor.u32 %v4463_v19, %v9253_v49  ;;  %v4467_v37 = vshll.u32 %v9251_v2, 16  ;;  %v9273_v33 = vrot.slane %v4481_v14, 5  ;;  %v4422_v17 = vsel %vm8103_vm11, %v4417_v21, %v4421_v29  ;;  %v9283_v51 = vld [vmem:[#allocation2 + $0x54] sm:$0xf] }
 0x155   : > { %10856 = vst [vmem:[#allocation43_spill] sm:$0xff] %v9260_v22  ;;  %v4445_v61 = vrot.slane %v4443_v44, 5  ;;  %v4478_v19 = vor.u32 %v4477_v6, %v4474_v31  ;;  %v4491_v2 = vshll.u32 %v9262_v16, 16  ;;  %v9287_v22 = vld [vmem:[#allocation2 + $0x4c] sm:$0xf]  ;;  %v4496_v12 = vshrl.u32 %v9264_v24, 16  ;;  %v9302_v6 = vpop.f32.mrf.mxu1 }
 0x156   : > { %7554 = vmatpush3.bf16.msra.mxu1 %v7783_v8  ;;  %v4441_v8 = vrot.slane %v4440_v62, 4  ;;  %v4488_v14 = vor.u32 %v4487_v46, %v9273_v33  ;;  %v10859_v11 = vcombine.low %v9139_v48, %v9144_v60  ;;  %v10860_v44 = vcombine.low %v8733_v25, %v8746_v36 }
 0x157   : > { %7555 = vmatprep.subr.bf16.mxu1 %v7787_v45  ;;  %v4436_v29 = vsel %vm8103_vm11, %v4431_v13, %v9226_v35  ;;  %v4455_v62 = vrot.slane %v4454_v42, 4  ;;  %v4499_v31 = vshll.u32 %v9264_v24, 16  ;;  %v10861_v48 = vcombine.low %v9160_v23, %v9164_v55  ;;  %v9309_v35 = vpop.f32.mrf.mxu0  ;;  %v9319_v23 = vld [vmem:[%s10757_s6 + $0x38] sm:$0xff]   ;;  %v9361_v55 = vld [vmem:[#allocation2 + $0x64] sm:$0xf] }
 0x158   : > { %7440 = vmatmul.mubr.bf16.gmra.mxu0 %v10860_v44  ;;  %v4469_v25 = vrot.slane %v4467_v37, 5  ;;  %v4520_v36 = vshrl.u32 %v9283_v51, 16  ;;  %v4523_v60 = vshll.u32 %v9283_v51, 16  ;;  %10862 = vst [vmem:[#allocation6_spill] sm:$0xff] %v9309_v35  ;;  %v10863_v46 = vcombine.low %v8758_v54, %v8766_v3  ;;  %v9324_v37 = vld [vmem:[#allocation2 + $0x58] sm:$0xf] }
 0x159   : > { %7476 = vmatmul.mubr.bf16.gmra.mxu1 %v10859_v11  ;;  %v4465_v11 = vrot.slane %v4464_v7, 4  ;;  %v6737_v13 = vcombine.low %v4412_v10, %v4422_v17  ;;  %v4446_v42 = vsel %vm8103_vm11, %v4441_v8, %v4445_v61  ;;  %v4479_v7 = vrot.slane %v4478_v19, 4  ;;  %v9327_v61 = vpop.f32.mrf.mxu1 }
 0x15a   : > { %7479 = vmatprep.mubr.bf16.mxu1 %v10861_v48  ;;  %7556 = vmatpush3.bf16.msra.mxu1 %v7787_v45  ;;  %v4509_v45 = vshrl.u32 %v9287_v22, 16  ;;  %v4489_v54 = vrot.slane %v4488_v14, 4  ;;  %v4493_v3 = vrot.slane %v4491_v2, 5  ;;  %v4498_v44 = vrot.slane %v4496_v12, 4  ;;  %v9335_v14 = vld [vmem:[#allocation2 + $0x50] sm:$0x1]  ;;  %v9338_v2 = vpop.f32.mrf.mxu0 }
 0x15b   : > { %7443 = vmatprep.mubr.bf16.mxu0 %v10863_v46  ;;  %7557 = vmatprep.subr.bf16.mxu1 %v7791_v52  ;;  %v4501_v10 = vrot.slane %v4499_v31, 5  ;;  %v4522_v17 = vrot.slane %v4520_v36, 4  ;;  %v4525_v48 = vrot.slane %v4523_v60, 5  ;;  %v4505_v8 = vshll.u32 %v9287_v22, 16  ;;  %10864 = vst [vmem:[#allocation45_spill] sm:$0xff] %v9335_v14 }
 0x15c   : > { %v4460_v46 = vsel %vm8103_vm11, %v4455_v62, %v9253_v49  ;;  %v4470_v5 = vsel %vm8103_vm11, %v4465_v11, %v4469_v25  ;;  %v4533_v19 = vshrl.u32 %v9324_v37, 16  ;;  %v4529_v12 = vshll.u32 %v9324_v37, 16  ;;  %v9344_v49 = vld [vmem:[#allocation2 + $0x60] sm:$0xf] }
 0x15d   : > { %v6738_v31 = vcombine.low %v4436_v29, %v4446_v42  ;;  %v9342_v36 = vrot.slane %v4505_v8, 5  ;;  %v4511_v60 = vrot.slane %v4509_v45, 4  ;;  %v4484_v62 = vsel %vm8103_vm11, %v4479_v7, %v9273_v33  ;;  %v9400_v29 = vld [vmem:[#allocation2 + $0x68] sm:$0x1] }
 0x15e   : > { %7558 = vmatpush3.bf16.msra.mxu1 %v7791_v52  ;;  %v4494_v11 = vsel %vm8103_vm11, %v4489_v54, %v4493_v3  ;;  %v10865_v42 = vcombine.low %v9175_v4, %v9179_v32  ;;  %v10866_v45 = vcombine.low %v8864_v18, %v8878_v1  ;;  %v6739_v8 = vcombine.low %v4460_v46, %v4470_v5  ;;  %v9363_v54 = vld [vmem:[#allocation2 + $0x6c] sm:$0xf]  ;;  %v9365_v3 = vpop.f32.mrf.mxu1  ;;  %v9374_v5 = vld [vmem:[#allocation2 + $0x70] sm:$0xf] }
 0x15f   : > { %7639 = vmatprep.subr.bf16.mxu1 %v9319_v23  ;;  %v4502_v52 = vor.u32 %v4501_v10, %v4498_v44  ;;  %v4515_v33 = vshll.u32 %v9335_v14, 16  ;;  %v4526_v7 = vor.u32 %v4525_v48, %v4522_v17  ;;  %10867 = vst [vmem:[#allocation46_spill] sm:$0xff] %v9365_v3  ;;  %v10868_v25 = vcombine.low %v8976_v26, %v8989_v58  ;;  %v9376_v44 = vpop.f32.mrf.mxu0 }
 0x160   : > { %7444 = vmatmul.mubr.bf16.gmra.mxu0 %v10866_v45  ;;  %v9370_v4 = vrot.slane %v4529_v12, 5  ;;  %v4535_v18 = vrot.slane %v4533_v19, 4  ;;  %v4544_v1 = vshrl.u32 %v9344_v49, 16  ;;  %v4547_v32 = vshll.u32 %v9344_v49, 16  ;;  %v9394_v26 = vpop.f32.mrf.mxu1 }
 0x161   : > { %7480 = vmatmul.mubr.bf16.gmra.mxu1 %v10865_v42  ;;  %7511 = vmatprep.mubr.bf16.mxu0 %v6737_v13  ;;  %v9378_v10 = vcombine.low %v4484_v62, %v4494_v11  ;;  %v4512_v58 = vor.u32 %v4511_v60, %v9342_v36  ;;  %v9384_v13 = vld [vmem:[#allocation2 + $0x5c] sm:$0x1]  ;;  %v4557_v19 = vshrl.u32 %v9361_v55, 16  ;;  %v4568_v12 = vshrl.u32 %v9363_v54, 16  ;;  %v10870_v42 = vld [vmem:[#allocation22_spill] sm:$0xff] }
 0x162   : > { %7483 = vmatprep.mubr.bf16.mxu1 %v10868_v25  ;;  %10869 = vst [vmem:[#allocation47_spill] sm:$0xff] %v9384_v13  ;;  %v4546_v48 = vrot.slane %v4544_v1, 4  ;;  %v4549_v46 = vrot.slane %v4547_v32, 5  ;;  %v4503_v25 = vrot.slane %v4502_v52, 4  ;;  %v9390_v62 = vadd.f32 %v10870_v42, %v9015_v53  ;;  %v9402_v52 = vpop.f32.mrf.mxu0  ;;  %v7798_v53 = vld [vmem:[%s10755_s4 + $0x230] sm:$0xff]  }
 0x163   : > { %v4571_v11 = vshll.u32 %v9363_v54, 16  ;;  %v4581_v45 = vshrl.u32 %v9374_v5, 16  ;;  %v4517_v60 = vrot.slane %v4515_v33, 5  ;;  %v9396_v17 = vrot.slane %v4526_v7, 4 }
 0x164   : > { %10871 = vst [vmem:[#allocation22_spill] sm:$0xff] %v9390_v62  ;;  %v4536_v1 = vor.u32 %v4535_v18, %v9370_v4  ;;  %v4539_v32 = vshll.u32 %v9384_v13, 16  ;;  %v4513_v42 = vrot.slane %v4512_v58, 4  ;;  %v4570_v21 = vrot.slane %v4568_v12, 4  ;;  %v9412_v62 = vld [vmem:[#allocation2 + $0x74] sm:$0x1] }
 0x165   : > { %v4550_v3 = vor.u32 %v4549_v46, %v4546_v48  ;;  %v4553_v35 = vshll.u32 %v9361_v55, 16  ;;  %v4573_v33 = vrot.slane %v4571_v11, 5  ;;  %v4559_v7 = vrot.slane %v4557_v19, 4  ;;  %v9422_v12 = vld [vmem:[#allocation2 + $0x78] sm:$0xf] }
 0x166   : > { %v9410_v18 = vadd.f32 %v9094_v41, %v9218_v0  ;;  %v4577_v14 = vshll.u32 %v9374_v5, 16  ;;  %v10873_v16 = vcombine.low %v8984_v20, %v9000_v47  ;;  %v4563_v46 = vshll.u32 %v9400_v29, 16  ;;  %v9424_v41 = vpop.f32.mrf.mxu1  ;;  %v9481_v58 = vld [vmem:[#allocation2 + $0x80] sm:$0x1] }
 0x167   : > { %v9419_v48 = vrot.slane %v4553_v35, 5  ;;  %v4583_v19 = vrot.slane %v4581_v45, 4  ;;  %v10874_v0 = vcombine.low %v9004_v63, %v9022_v40  ;;  %v4508_v20 = vsel %vm8103_vm11, %v4503_v25, %v9342_v36  ;;  %v7802_v63 = vld [vmem:[%s10755_s4 + $0x228] sm:$0xff]  }
 0x168   : > { %10872 = vst [vmem:[#allocation48_spill] sm:$0xff] %v9410_v18  ;;  %7512 = vmatmul.mubr.bf16.vlgmr.msra.gmra.mxu0 %v6738_v31  ;;  %v4537_v47 = vrot.slane %v4536_v1, 4  ;;  %v9433_v35 = vrot.slane %v4577_v14, 5  ;;  %v9435_v31 = vpop.f32.mrf.mxu0  ;;  %v4518_v11 = vsel %vm8103_vm11, %v4513_v42, %v4517_v60  ;;  %v4551_v40 = vrot.slane %v4550_v3, 4  ;;  %v9447_v14 = vld [vmem:[#allocation2 + $0x7c] sm:$0xf] }
 0x169   : > { %7484 = vmatmul.mubr.bf16.gmra.mxu1 %v10873_v16  ;;  %7592 = vmatpush3.bf16.msra.mxu0 %v9151_v30  ;;  %v4541_v16 = vrot.slane %v4539_v32, 5  ;;  %10875 = vst [vmem:[#allocation49_spill] sm:$0xff] %v9435_v31  ;;  %v4560_v30 = vor.u32 %v4559_v7, %v9419_v48  ;;  %v9445_v36 = vadd.f32 %v9168_v43, %v9242_v57  ;;  %v4592_v60 = vshrl.u32 %v9422_v12, 16  ;;  %v9455_v1 = vld [vmem:[#allocation2 + $0x84] sm:$0xf]  ;;  %v9461_v7 = vpop.f32.mrf.mxu1 }
 0x16a   : > { %7487 = vmatprep.mubr.bf16.mxu1 %v10874_v0  ;;  %7515 = vmatprep.mubr.bf16.mxu0 %v6739_v8  ;;  %v4574_v25 = vor.u32 %v4573_v33, %v4570_v21  ;;  %v4587_v8 = vshll.u32 %v9412_v62, 16  ;;  %v9452_v45 = vadd.f32 %v9211_v9, %v9275_v56  ;;  %v4565_v32 = vrot.slane %v4563_v46, 5  ;;  %v9459_v57 = vld [vmem:[#allocation2 + $0x88] sm:$0xf]  ;;  %v9468_v0 = vpop.f32.mrf.mxu0 }
 0x16b   : > { %7593 = vmatprep.subr.bf16.mxu0 %v7798_v53  ;;  %10876 = vst [vmem:[#allocation50_spill] sm:$0xff] %v9445_v36  ;;  %v4561_v3 = vrot.slane %v4560_v30, 4  ;;  %v4584_v42 = vor.u32 %v4583_v19, %v9433_v35  ;;  %v4595_v43 = vshll.u32 %v9422_v12, 16  ;;  %v6741_v21 = vcombine.low %v4508_v20, %v4518_v11 }
 0x16c   : > { %10877 = vst [vmem:[#allocation51_spill] sm:$0xff] %v9452_v45  ;;  %v4532_v9 = vsel %vm8103_vm11, %v9396_v17, %v9370_v4  ;;  %v4594_v56 = vrot.slane %v4592_v60, 4  ;;  %v4605_v33 = vshrl.u32 %v9447_v14, 16  ;;  %v4542_v46 = vsel %vm8103_vm11, %v4537_v47, %v4541_v16  ;;  %v7806_v4 = vld [vmem:[%s10755_s4 + $0x220] sm:$0xff]   ;;  %v10878_v47 = vld [vmem:[#allocation27_spill] sm:$0xff]  ;;  %v9489_v45 = vpop.f32.mrf.mxu1 }
 0x16d   : > { %7594 = vmatpush3.bf16.msra.mxu0 %v7798_v53  ;;  %v4597_v19 = vrot.slane %v4595_v43, 5  ;;  %v4616_v30 = vshrl.u32 %v9455_v1, 16  ;;  %v4619_v53 = vshll.u32 %v9455_v1, 16  ;;  %v4556_v20 = vsel %vm8103_vm11, %v4551_v40, %v9419_v48  ;;  %10880 = vst [vmem:[#allocation27_spill] sm:$0xff] %v9489_v45 }
 0x16e   : > { %7595 = vmatprep.subr.bf16.mxu0 %v7802_v63  ;;  %v4575_v17 = vrot.slane %v4574_v25, 4  ;;  %v4589_v11 = vrot.slane %v4587_v8, 5  ;;  %v4629_v60 = vshrl.u32 %v9459_v57, 16  ;;  %v10879_v16 = vcombine.low %v9012_v28, %v10878_v47  ;;  %v10881_v25 = vld [vmem:[#allocation29_spill] sm:$0xff]  ;;  %v9499_v47 = vld [vmem:[#allocation2 + $0x90] sm:$0xf] }
 0x16f   : > { %v4566_v43 = vsel %vm8103_vm11, %v4561_v3, %v4565_v32  ;;  %v4585_v48 = vrot.slane %v4584_v42, 4  ;;  %v4618_v40 = vrot.slane %v4616_v30, 4  ;;  %v4621_v31 = vrot.slane %v4619_v53, 5  ;;  %v10882_v8 = vld [vmem:[#allocation33_spill] sm:$0xff]  ;;  %v9501_v3 = vpop.f32.mrf.mxu0 }
 0x170   : > { %7516 = vmatmul.mubr.bf16.gmra.mxu0 %v9378_v10  ;;  %v10883_v36 = vcombine.low %v10881_v25, %v10882_v8  ;;  %v4598_v18 = vor.u32 %v4597_v19, %v4594_v56  ;;  %v4601_v13 = vshll.u32 %v9447_v14, 16  ;;  %v4607_v28 = vrot.slane %v4605_v33, 4  ;;  %v9528_v19 = vpop.f32.mrf.mxu1  ;;  %v7814_v8 = vld [vmem:[%s10755_s4 + $0x210] sm:$0xff]  }
 0x171   : > { %7488 = vmatmul.mubr.bf16.gmra.mxu1 %v10879_v16  ;;  %7519 = vmatprep.mubr.bf16.mxu0 %v6741_v21  ;;  %v9497_v10 = vadd.f32 %v9266_v59, %v9338_v2  ;;  %v6742_v32 = vcombine.low %v4532_v9, %v4542_v46  ;;  %v4611_v42 = vshll.u32 %v9481_v58, 16  ;;  %v4622_v30 = vor.u32 %v4621_v31, %v4618_v40  ;;  %v7810_v59 = vld [vmem:[%s10755_s4 + $0x218] sm:$0xff]   ;;  %v9513_v2 = vld [vmem:[#allocation2 + $0x8c] sm:$0x1]  ;;  %v9539_v40 = vld [vmem:[#allocation2 + $0xa0] sm:$0xf] }
 0x172   : > { %7491 = vmatprep.mubr.bf16.mxu1 %v10883_v36  ;;  %7596 = vmatpush3.bf16.msra.mxu0 %v7802_v63  ;;  %v4625_v36 = vshll.u32 %v9459_v57, 16  ;;  %v4580_v21 = vsel %vm8103_vm11, %v4575_v17, %v9433_v35  ;;  %v9508_v56 = vrot.slane %v4601_v13, 5  ;;  %10885 = vst [vmem:[#allocation33_spill] sm:$0xff] %v9513_v2  ;;  %v4631_v9 = vrot.slane %v4629_v60, 4  ;;  %v9525_v13 = vld [vmem:[#allocation2 + $0x94] sm:$0xf]  ;;  %v7246_v60 = vpop.f32.mrf.mxu0 }
 0x173   : > { %10884 = vst [vmem:[#allocation29_spill] sm:$0xff] %v9497_v10  ;;  %7597 = vmatprep.subr.bf16.mxu0 %v7806_v4  ;;  %v9517_v63 = vadd.f32 %v9302_v6, %v9376_v44  ;;  %v6743_v31 = vcombine.low %v4556_v20, %v4566_v43  ;;  %v9523_v46 = vadd.f32 %v9327_v61, %v9402_v52  ;;  %v4640_v35 = vshrl.u32 %v9499_v47, 16  ;;  %v9534_v20 = vld [vmem:[#allocation2 + $0x9c] sm:$0xf] }
 0x174   : > { %v9519_v33 = vrot.slane %v4625_v36, 5  ;;  %v4590_v53 = vsel %vm8103_vm11, %v4585_v48, %v4589_v11  ;;  %v4599_v17 = vrot.slane %v4598_v18, 4  ;;  %v4608_v6 = vor.u32 %v4607_v28, %v9508_v56  ;;  %v10889_v28 = vld [vmem:[#allocation35_spill] sm:$0xff]  ;;  %v10892_v36 = vld [vmem:[#allocation24_spill] sm:$0xff] }
 0x175   : > { %10886 = vst [vmem:[#allocation52_spill] sm:$0xff] %v9517_v63  ;;  %10887 = vst [vmem:[#allocation53_spill] sm:$0xff] %v9523_v46  ;;  %v4643_v44 = vshll.u32 %v9499_v47, 16  ;;  %v4613_v61 = vrot.slane %v4611_v42, 5  ;;  %v9536_v52 = vrot.slane %v4622_v30, 4  ;;  %v4635_v16 = vshll.u32 %v9513_v2, 16 }
 0x176   : > { %7598 = vmatpush3.bf16.msra.mxu0 %v7806_v4  ;;  %v4642_v43 = vrot.slane %v4640_v35, 4  ;;  %v4609_v25 = vrot.slane %v4608_v6, 4  ;;  %v4632_v18 = vor.u32 %v4631_v9, %v9519_v33  ;;  %v4653_v48 = vshrl.u32 %v9525_v13, 16  ;;  %v10888_v4 = vld [vmem:[#allocation31_spill] sm:$0xff]  ;;  %v10891_v30 = vld [vmem:[#allocation30_spill] sm:$0xff]  ;;  %v10894_v46 = vld [vmem:[#allocation32_spill] sm:$0xff] }
 0x177   : > { %7599 = vmatprep.subr.bf16.mxu0 %v7810_v59  ;;  %v4645_v11 = vrot.slane %v4643_v44, 5  ;;  %v10890_v42 = vcombine.low %v10888_v4, %v10889_v28  ;;  %v9551_v35 = vadd.f32 %v10892_v36, %v10891_v30  ;;  %v6744_v6 = vcombine.low %v4580_v21, %v4590_v53  ;;  %v9555_v44 = vpop.f32.mrf.mxu1  ;;  %v10895_v63 = vld [vmem:[#allocation34_spill] sm:$0xff]  ;;  %v9564_v28 = vld [vmem:[#allocation2 + $0x98] sm:$0x1]  ;;  %v9573_v36 = vld [vmem:[#allocation2 + $0xa4] sm:$0x1] }
 0x178   : > { %7520 = vmatmul.mubr.bf16.gmra.mxu0 %v6742_v32  ;;  %v4664_v45 = vshrl.u32 %v9534_v20, 16  ;;  %v4667_v9 = vshll.u32 %v9534_v20, 16  ;;  %v10896_v10 = vcombine.low %v10894_v46, %v10895_v63  ;;  %v4604_v32 = vsel %vm8103_vm11, %v4599_v17, %v9508_v56  ;;  %10897 = vst [vmem:[#allocation35_spill] sm:$0xff] %v9564_v28  ;;  %10899 = vst [vmem:[#allocation24_spill] sm:$0xff] %v9573_v36  ;;  %v9659_v2 = vld [vmem:[#allocation2 + $0xbc] sm:$0x1] }
 0x179   : > { %7492 = vmatmul.mubr.bf16.gmra.mxu1 %v10890_v42  ;;  %10893 = vst [vmem:[#allocation31_spill] sm:$0xff] %v9551_v35  ;;  %7523 = vmatprep.mubr.bf16.mxu0 %v6743_v31  ;;  %v4677_v4 = vshrl.u32 %v9539_v40, 16  ;;  %v4646_v21 = vor.u32 %v4645_v11, %v4642_v43  ;;  %v4649_v53 = vshll.u32 %v9525_v13, 16  ;;  %v9567_v42 = vpop.f32.mrf.mxu0  ;;  %v4628_v46 = vsel %vm8103_vm11, %v9536_v52, %v9519_v33 }
 0x17a   : > { %7559 = vmatprep.mubr.bf16.mxu1 %v10896_v10  ;;  %10898 = vst [vmem:[#allocation30_spill] sm:$0xff] %v9567_v42  ;;  %v4637_v10 = vrot.slane %v4635_v16, 5  ;;  %7600 = vmatpush3.bf16.msra.mxu0 %v7810_v59  ;;  %v4666_v31 = vrot.slane %v4664_v45, 4  ;;  %v4669_v30 = vrot.slane %v4667_v9, 5  ;;  %v4614_v56 = vsel %vm8103_vm11, %v4609_v25, %v4613_v61  ;;  %v7818_v42 = vld [vmem:[%s10755_s4 + $0x208] sm:$0xff]   ;;  %v9590_v61 = vpop.f32.mrf.mxu1 }
 0x17b   : > { %v4633_v17 = vrot.slane %v4632_v18, 4  ;;  %v9577_v43 = vrot.slane %v4649_v53, 5  ;;  %v4655_v11 = vrot.slane %v4653_v48, 4  ;;  %7601 = vmatprep.subr.bf16.mxu0 %v7814_v8  ;;  %v4659_v33 = vshll.u32 %v9564_v28, 16  ;;  %v9588_v16 = vld [vmem:[#allocation2 + $0xa8] sm:$0xf]  ;;  %v7249_v35 = vpop.f32.mrf.mxu0 }
 0x17c   : > { %v9585_v45 = vadd.f32 %v9394_v26, %v9468_v0  ;;  %v4670_v59 = vor.u32 %v4669_v30, %v4666_v31  ;;  %v4673_v52 = vshll.u32 %v9539_v40, 16  ;;  %v4647_v25 = vrot.slane %v4646_v21, 4  ;;  %v9594_v53 = vld [vmem:[#allocation2 + $0xac] sm:$0xf]  ;;  %v7799_v26 = vld [vmem:[%s10757_s6 + $0x30] sm:$0xff]  }
 0x17d   : > { %v4656_v18 = vor.u32 %v4655_v11, %v9577_v43  ;;  %v4679_v48 = vrot.slane %v4677_v4, 4  ;;  %v4683_v9 = vshll.u32 %v9573_v36, 16  ;;  %v6745_v0 = vcombine.low %v4604_v32, %v4614_v56  ;;  %v9611_v28 = vld [vmem:[#allocation2 + $0xb4] sm:$0xf]  ;;  %v10903_v32 = vld [vmem:[#allocation36_spill] sm:$0xff]  ;;  %v10904_v56 = vld [vmem:[#allocation38_spill] sm:$0xff] }
 0x17e   : > { %10900 = vst [vmem:[#allocation32_spill] sm:$0xff] %v9585_v45  ;;  %v4661_v31 = vrot.slane %v4659_v33, 5  ;;  %v9599_v30 = vrot.slane %v4673_v52, 5  ;;  %7602 = vmatpush3.bf16.msra.mxu0 %v7814_v8  ;;  %v9603_v21 = vadd.f32 %v9424_v41, %v9501_v3  ;;  %v4638_v4 = vsel %vm8103_vm11, %v4633_v17, %v4637_v10  ;;  %v7822_v17 = vld [vmem:[%s10755_s4 + $0x200] sm:$0xff]   ;;  %v10909_v52 = vld [vmem:[#allocation26_spill] sm:$0xff] }
 0x17f   : > { %v4657_v11 = vrot.slane %v4656_v18, 4  ;;  %v9608_v45 = vadd.f32 %v9461_v7, %v7246_v60  ;;  %v4688_v36 = vshrl.u32 %v9588_v16, 16  ;;  %7603 = vmatprep.subr.bf16.mxu0 %v7818_v42  ;;  %v10905_v33 = vcombine.low %v10903_v32, %v10904_v56  ;;  %v9621_v7 = vld [vmem:[#allocation2 + $0xb8] sm:$0xf]  ;;  %v9623_v60 = vpop.f32.mrf.mxu1 }
 0x180   : > { %10901 = vst [vmem:[#allocation34_spill] sm:$0xff] %v9603_v21  ;;  %7524 = vmatmul.mubr.bf16.gmra.mxu0 %v6744_v6  ;;  %v9616_v8 = vrot.slane %v4670_v59, 4  ;;  %v4680_v41 = vor.u32 %v4679_v48, %v9599_v30  ;;  %v4691_v3 = vshll.u32 %v9588_v16, 16  ;;  %v4701_v10 = vshrl.u32 %v9594_v53, 16  ;;  %10906 = vst [vmem:[#allocation36_spill] sm:$0xff] %v9623_v60  ;;  %v10908_v59 = vld [vmem:[#allocation37_spill] sm:$0xff]  ;;  %v1863_v60 = vpop.f32.mrf.mxu0 }
 0x181   : > { %10902 = vst [vmem:[#allocation54_spill] sm:$0xff] %v9608_v45  ;;  %7560 = vmatmul.mubr.bf16.vlgmr.msra.gmra.mxu1 %v10905_v33  ;;  %v10907_v6 = vcombine.low %v9184_v38, %v9203_v50  ;;  %v9634_v18 = vadd.f32 %v10909_v52, %v10908_v59  ;;  %v4652_v48 = vsel %vm8103_vm11, %v4647_v25, %v9577_v43  ;;  %v4685_v32 = vrot.slane %v4683_v9, 5  ;;  %v9645_v52 = vld [vmem:[#allocation2 + $0xb0] sm:$0x1] }
 0x182   : > { %7640 = vmatpush3.bf16.msra.mxu1 %v9319_v23  ;;  %v4690_v33 = vrot.slane %v4688_v36, 4  ;;  %v7803_v23 = vld [vmem:[%s10757_s6 + $0x28] sm:$0xff]   ;;  %7527 = vmatprep.mubr.bf16.mxu0 %v6745_v0  ;;  %v4662_v38 = vsel %vm8103_vm11, %v4657_v11, %v4661_v31  ;;  %v4693_v45 = vrot.slane %v4691_v3, 5  ;;  %v4712_v59 = vshrl.u32 %v9611_v28, 16  ;;  %10911 = vst [vmem:[#allocation37_spill] sm:$0xff] %v9645_v52 }
 0x183   : > { %7563 = vmatprep.mubr.bf16.mxu1 %v10907_v6  ;;  %10910 = vst [vmem:[#allocation38_spill] sm:$0xff] %v9634_v18  ;;  %7641 = vmatprep.subr.bf16.mxu1 %v7799_v26  ;;  %v4681_v6 = vrot.slane %v4680_v41, 4  ;;  %v6746_v21 = vcombine.low %v4628_v46, %v4638_v4  ;;  %v4715_v43 = vshll.u32 %v9611_v28, 16  ;;  %v4725_v36 = vshrl.u32 %v9621_v7, 16 }
 0x184   : > { %v4697_v25 = vshll.u32 %v9594_v53, 16  ;;  %7604 = vmatpush3.bf16.msra.mxu0 %v7818_v42  ;;  %v4676_v9 = vsel %vm8103_vm11, %v9616_v8, %v9599_v30  ;;  %v4714_v0 = vrot.slane %v4712_v59, 4  ;;  %v4694_v31 = vor.u32 %v4693_v45, %v4690_v33  ;;  %v9654_v41 = vpop.f32.mrf.mxu1  ;;  %v7250_v42 = vpop.f32.mrf.mxu0  ;;  %v7807_v30 = vld [vmem:[%s10757_s6 + $0x20] sm:$0xff]  }
 0x185   : > { %v4703_v11 = vrot.slane %v4701_v10, 4  ;;  %7605 = vmatprep.subr.bf16.mxu0 %v7822_v17  ;;  %v6747_v46 = vcombine.low %v4652_v48, %v4662_v38  ;;  %v4717_v4 = vrot.slane %v4715_v43, 5  ;;  %v4707_v18 = vshll.u32 %v9645_v52, 16  ;;  %v9670_v48 = vld [vmem:[#allocation2 + $0xc0] sm:$0xf] }
 0x186   : > { %7642 = vmatpush3.bf16.msra.mxu1 %v7799_v26  ;;  %v9656_v3 = vrot.slane %v4697_v25, 5  ;;  %v4686_v45 = vsel %vm8103_vm11, %v4681_v6, %v4685_v32  ;;  %v9667_v8 = vadd.f32 %v9528_v19, %v7249_v35  ;;  %v4721_v26 = vshll.u32 %v9621_v7, 16  ;;  %v9672_v33 = vpop.f32.mrf.mxu1  ;;  %v9675_v52 = vld [vmem:[#allocation2 + $0xc4] sm:$0xf] }
 0x187   : > { %7643 = vmatprep.subr.bf16.mxu1 %v7803_v23  ;;  %v4727_v10 = vrot.slane %v4725_v36, 4  ;;  %v4695_v38 = vrot.slane %v4694_v31, 4  ;;  %v4709_v43 = vrot.slane %v4707_v18, 5  ;;  %v4718_v25 = vor.u32 %v4717_v4, %v4714_v0  ;;  %v9702_v0 = vpop.f32.mrf.mxu0  ;;  %v562_v31 = vld [vmem:[#allocation2 + $0xcc] sm:$0x1] }
 0x188   : > { %10912 = vst [vmem:[#allocation26_spill] sm:$0xff] %v9667_v8  ;;  %v4704_v59 = vor.u32 %v4703_v11, %v9656_v3  ;;  %7606 = vmatpush3.bf16.msra.mxu0 %v7822_v17  ;;  %v10913_v32 = vcombine.low %v9205_v27, %v9209_v39  ;;  %v9680_v19 = vrot.slane %v4721_v26, 5  ;;  %v4731_v35 = vshll.u32 %v9659_v2, 16  ;;  %v9689_v18 = vpop.f32.mrf.mxu1  ;;  %10917 = vst [vmem:[#allocation57_spill] sm:$0xff] %v9702_v0  ;;  %v9707_v4 = vld [vmem:[#allocation2 + $0xd0] sm:$0xf] }
 0x189   : > { %7528 = vmatmul.mubr.bf16.gmra.mxu0 %v6746_v21  ;;  %v9684_v6 = vadd.f32 %v9555_v44, %v1863_v60  ;;  %v9687_v36 = vadd.f32 %v9590_v61, %v7250_v42  ;;  %v10916_v17 = vcombine.low %v9264_v24, %v9287_v22  ;;  %v6767_v27 = vcombine.low %v9344_v49, %v9361_v55  ;;  %v7811_v44 = vld [vmem:[%s10757_s6 + $0x18] sm:$0xff]   ;;  %v9709_v42 = vld [vmem:[#allocation2 + $0xc8] sm:$0x1] }
 0x18a   : > { %7564 = vmatmul.mubr.bf16.gmra.mxu1 %v10913_v32  ;;  %v4705_v60 = vrot.slane %v4704_v59, 4  ;;  %v4736_v61 = vshrl.u32 %v9670_v48, 16  ;;  %7531 = vmatprep.mubr.bf16.mxu0 %v6747_v46  ;;  %v6748_v24 = vcombine.low %v4676_v9, %v4686_v45  ;;  %v4739_v49 = vshll.u32 %v9670_v48, 16  ;;  %10918 = vst [vmem:[#allocation58_spill] sm:$0xff] %v9709_v42  ;;  %v9711_v26 = vpop.f32.mrf.mxu1 }
 0x18b   : > { %10914 = vst [vmem:[#allocation55_spill] sm:$0xff] %v9684_v6  ;;  %10915 = vst [vmem:[#allocation56_spill] sm:$0xff] %v9687_v36  ;;  %7567 = vmatprep.mubr.bf16.mxu1 %v10916_v17  ;;  %7644 = vmatpush3.bf16.msra.mxu1 %v7803_v23  ;;  %v4728_v23 = vor.u32 %v4727_v10, %v9680_v19  ;;  %v4749_v11 = vshrl.u32 %v9675_v52, 16  ;;  %v4700_v59 = vsel %vm8103_vm11, %v4695_v38, %v9656_v3  ;;  %v618_v10 = vld [vmem:[#allocation2 + $0xd4] sm:$0x1] }
 0x18c   : > { %7645 = vmatprep.subr.bf16.mxu1 %v7807_v30  ;;  %10919 = vst [vmem:[#allocation59_spill] sm:$0xff] %v9711_v26  ;;  %v4710_v46 = vsel %vm8103_vm11, %v4705_v60, %v4709_v43  ;;  %v4719_v9 = vrot.slane %v4718_v25, 4  ;;  %v4738_v45 = vrot.slane %v4736_v61, 4  ;;  %v4733_v17 = vrot.slane %v4731_v35, 5  ;;  %v9720_v6 = vpop.f32.mrf.mxu1  ;;  %v7815_v35 = vld [vmem:[%s10757_s6 + $0x10] sm:$0xff]  }
 0x18d   : > { %v4729_v32 = vrot.slane %v4728_v23, 4  ;;  %v4741_v21 = vrot.slane %v4739_v49, 5  ;;  %v563_v0 = vsel %vm8008_vm2, 0, %v562_v31  ;;  %10921 = vst [vmem:[#allocation4_spill] sm:$0xff] %v9720_v6  ;;  %v4773_v26 = vshrl.u32 %v9707_v4, 16 }
 0x18e   : > { %564 = vst [vmem:[#allocation2 + $0xcc] sm:$0x1] %v563_v0  ;;  %v4745_v3 = vshll.u32 %v9675_v52, 16  ;;  %v4751_v38 = vrot.slane %v4749_v11, 4  ;;  %v4755_v43 = vshll.u32 %v9709_v42, 16  ;;  %v7253_v25 = vpop.f32.mrf.mxu0  ;;  %v6749_v60 = vcombine.low %v4700_v59, %v4710_v46  ;;  %v9733_v31 = vpop.f32.mrf.mxu1 }
 0x18f   : > { %7646 = vmatpush3.bf16.msra.mxu1 %v7807_v30  ;;  %v4742_v36 = vor.u32 %v4741_v21, %v4738_v45  ;;  %v9729_v61 = vadd.f32 %v9654_v41, %v7253_v25  ;;  %v619_v0 = vsel %vm8041_vm4, 0, %v618_v10  ;;  %v4769_v6 = vshll.u32 %v9707_v4, 16  ;;  %v5378_v42 = vld [vmem:[#allocation2 + $0x24] sm:$0xe] }
 0x190   : > { %7647 = vmatprep.subr.bf16.mxu1 %v7811_v44  ;;  %v4747_v11 = vrot.slane %v4745_v3, 5  ;;  %620 = vst [vmem:[#allocation2 + $0xd4] sm:$0x1] %v619_v0  ;;  %v1879_v8 = vpop.f32.mrf.mxu0  ;;  %v10923_v21 = vcombine.low %v9283_v51, %v9324_v37  ;;  %v4724_v41 = vsel %vm8103_vm11, %v4719_v9, %v9680_v19  ;;  %v4775_v46 = vrot.slane %v4773_v26, 4  ;;  %v9747_v10 = vpop.f32.mrf.mxu1  ;;  %v7819_v19 = vld [vmem:[%s10757_s6 + $0x8] sm:$0xff]   ;;  %v10925_v26 = vld [vmem:[#allocation43_spill] sm:$0xff] }
 0x191   : > { %7532 = vmatmul.mubr.bf16.gmra.mxu0 %v6748_v24  ;;  %v4743_v59 = vrot.slane %v4742_v36, 4  ;;  %v9745_v45 = vadd.f32 %v9672_v33, %v1879_v8  ;;  %v4734_v3 = vsel %vm8103_vm11, %v4729_v32, %v4733_v17  ;;  %v4757_v51 = vrot.slane %v4755_v43, 5 }
 0x192   : > { %7568 = vmatmul.mubr.bf16.gmra.mxu1 %v10923_v21  ;;  %v4752_v25 = vor.u32 %v4751_v38, %v4747_v11  ;;  %v9751_v30 = vrot.slane %v4769_v6, 5  ;;  %v7254_v24 = vpop.f32.mrf.mxu0  ;;  %7535 = vmatprep.mubr.bf16.mxu0 %v6749_v60  ;;  %v5427_v33 = vrot.slane %v10895_v63, 5  ;;  %v6769_v32 = vcombine.low %v9422_v12, %v9447_v14  ;;  %v5377_v63 = vld [vmem:[#allocation2 + $0x18] sm:$0xe]  ;;  %v9780_v0 = vpop.f32.mrf.mxu1 }
 0x193   : > { %7571 = vmatprep.mubr.bf16.mxu1 %v6767_v27  ;;  %7648 = vmatpush3.bf16.msra.mxu1 %v7811_v44  ;;  %v9757_v8 = vadd.f32 %v9689_v18, %v7254_v24  ;;  %v6786_v27 = vrot.slane %v5378_v42, 9  ;;  %v10924_v44 = vrot.slane %v9224_v34, 5  ;;  %v4748_v17 = vsel %vm8103_vm11, %v4743_v59, %v4747_v11  ;;  %10927 = vst [vmem:[#allocation5_spill] sm:$0xff] %v9780_v0  ;;  %v5380_v24 = vld [vmem:[#allocation2 + $0x3c] sm:$0xe] }
 0x194   : > { %7649 = vmatprep.subr.bf16.mxu1 %v7815_v35  ;;  %v4753_v38 = vrot.slane %v4752_v25, 4  ;;  %v4776_v18 = vor.u32 %v4775_v46, %v9751_v30  ;;  %v9772_v43 = vpop.f32.mrf.mxu0  ;;  %v6750_v60 = vcombine.low %v4724_v41, %v4734_v3  ;;  %v5441_v12 = vrot.slane %v9203_v50, 5  ;;  %v5379_v3 = vld [vmem:[#allocation2 + $0x30] sm:$0xe] }
 0x195   : > { %v9765_v6 = vsel %vm8489_vm14, %v10925_v26, %v10924_v44  ;;  %v9778_v36 = vld [vmem:[#allocation2 + $0xcc] sm:$0xf]  ;;  %v10928_v25 = vrot.slane %v10904_v56, 5  ;;  %v7823_v44 = vld [vmem:[%s10757_s6] sm:$0xff]   ;;  %v6785_v26 = vrot.slane %v5377_v63, 9 }
 0x196   : > { %v4760_v11 = vshrl.u32 %v9778_v36, 16  ;;  %v4763_v21 = vshll.u32 %v9778_v36, 16  ;;  %v4758_v59 = vsel %vm8103_vm11, %v4753_v38, %v4757_v51  ;;  %v9787_v46 = vpop.f32.mrf.mxu0  ;;  %v5429_v51 = vrot.slane %v5427_v33, 4  ;;  %v10929_v38 = vld [vmem:[#allocation40_spill] sm:$0xff] }
 0x197   : > { %7650 = vmatpush3.bf16.msra.mxu1 %v7815_v35  ;;  %v9793_v41 = vsel %vm8489_vm14, %v6786_v27, %v10928_v25  ;;  %v6751_v50 = vcombine.low %v4748_v17, %v4758_v59  ;;  %v9795_v35 = vld [vmem:[#allocation2 + $0xd4] sm:$0x1]  ;;  %v5430_v49 = vrot.slane %v10929_v38, 5  ;;  %v4777_v42 = vrot.slane %v4776_v18, 4 }
 0x198   : > { %7651 = vmatprep.subr.bf16.mxu1 %v7819_v19  ;;  %v4762_v23 = vrot.slane %v4760_v11, 4  ;;  %v4765_v56 = vrot.slane %v4763_v21, 5  ;;  %v4779_v27 = vshll.u32 %v9795_v35, 16  ;;  %v9802_v25 = vpop.f32.mrf.mxu0  ;;  %v10931_v17 = vcombine.low %v9363_v54, %v9374_v5  ;;  %v9811_v34 = vpop.f32.mrf.mxu1 }
 0x199   : > { %10930 = vst [vmem:[#allocation43_spill] sm:$0xff] %v9802_v25  ;;  %7536 = vmatmul.mubr.bf16.gmra.mxu0 %v6750_v60  ;;  %v6787_v11 = vrot.slane %v5379_v3, 9  ;;  %v5443_v21 = vrot.slane %v5441_v12, 4  ;;  %v10932_v25 = vld [vmem:[#allocation42_spill] sm:$0xff]  ;;  %v5428_v60 = vsel %vm8489_vm14, %v6785_v26, %v5427_v33  ;;  %v5431_v3 = vsel %vm8489_vm14, %v5429_v51, %v5430_v49  ;;  %v5382_v49 = vld [vmem:[#allocation2 + $0x54] sm:$0xe] }
 0x19a   : > { %7572 = vmatmul.mubr.bf16.gmra.mxu1 %v10931_v17  ;;  %v4766_v18 = vor.u32 %v4765_v56, %v4762_v23  ;;  %v4781_v38 = vrot.slane %v4779_v27, 5  ;;  %v9813_v0 = vpop.f32.mrf.mxu0  ;;  %v5444_v54 = vrot.slane %v10932_v25, 5  ;;  %v6788_v17 = vrot.slane %v5380_v24, 9  ;;  %7539 = vmatprep.mubr.bf16.mxu0 %v6751_v50  ;;  %v5381_v26 = vld [vmem:[#allocation2 + $0x48] sm:$0xe] }
 0x19b   : > { %7575 = vmatprep.mubr.bf16.mxu1 %v6769_v32  ;;  %7652 = vmatpush3.bf16.msra.mxu1 %v7819_v19  ;;  %v10933_v19 = vrot.slane %v9209_v39, 5  ;;  %v9838_v51 = vsel %vm8489_vm14, %v6787_v11, %v5441_v12  ;;  %v6801_v11 = vcombine.low %v5428_v60, %v5431_v3  ;;  %v6790_v32 = vrot.slane %v5382_v49, 9  ;;  %v5385_v60 = vld [vmem:[#allocation2 + $0x78] sm:$0xe] }
 0x19c   : > { %7653 = vmatprep.subr.bf16.mxu1 %v7823_v44  ;;  %v4767_v56 = vrot.slane %v4766_v18, 4  ;;  %v4782_v24 = vsel %vm8103_vm11, %v4777_v42, %v4781_v38  ;;  %v9828_v27 = vpop.f32.mrf.mxu0  ;;  %v9842_v25 = vsel %vm8489_vm14, %v5443_v21, %v5444_v54  ;;  %v9844_v18 = vpop.f32.mrf.mxu1  ;;  %v10935_v42 = vld [vmem:[#allocation44_spill] sm:$0xff]  ;;  %v10938_v3 = vcombine.low %v9455_v1, %v9459_v57  ;;  %v10951_v54 = vld [vmem:[#allocation35_spill] sm:$0xff] }
 0x19d   : > { %v5450_v23 = vrot.slane %v10933_v19, 4  ;;  %v10934_v50 = vmov %v10933_v19  ;;  %v10936_v38 = vrot.slane %v10935_v42, 5  ;;  %v5383_v19 = vld [vmem:[#allocation2 + $0x60] sm:$0xe]  ;;  %v5384_v42 = vld [vmem:[#allocation2 + $0x6c] sm:$0xe] }
 0x19e   : > { %v9834_v33 = vsel %vm8489_vm14, %v6788_v17, %v10934_v50  ;;  %v5455_v17 = vrot.slane %v9287_v22, 5  ;;  %v4772_v12 = vsel %vm8103_vm11, %v4767_v56, %v9751_v30  ;;  %v9858_v21 = vpop.f32.mrf.mxu0  ;;  %v10937_v22 = vrot.slane %v9324_v37, 5  ;;  %v9873_v56 = vpop.f32.mrf.mxu1 }
 0x19f   : > { %v9850_v39 = vsel %vm8489_vm14, %v5450_v23, %v10936_v38  ;;  %7654 = vmatpush3.bf16.msra.mxu1 %v7823_v44  ;;  %v6752_v23 = vcombine.low %v4772_v12, %v4782_v24  ;;  %v6789_v38 = vrot.slane %v5381_v26, 9  ;;  %v6803_v50 = vcombine.low %v9838_v51, %v9842_v25  ;;  %v10939_v26 = vld [vmem:[#allocation45_spill] sm:$0xff] }
 0x1a0   : > { %v5464_v59 = vrot.slane %v10937_v22, 4  ;;  %v9866_v63 = vpop.f32.mrf.mxu0  ;;  %v6791_v15 = vrot.slane %v5383_v19, 9  ;;  %v5469_v30 = vrot.slane %v9361_v55, 5  ;;  %v5472_v44 = vrot.slane %v9400_v29, 5  ;;  %v10943_v19 = vld [vmem:[#allocation47_spill] sm:$0xff] }
 0x1a1   : > { %7540 = vmatmul.mubr.bf16.gmra.mxu0 %v6752_v23  ;;  %v5457_v24 = vrot.slane %v5455_v17, 4  ;;  %v5458_v49 = vrot.slane %v10939_v26, 5  ;;  %v10940_v51 = vmov %v10937_v22  ;;  %v6792_v55 = vrot.slane %v5384_v42, 9 }
 0x1a2   : > { %7576 = vmatmul.mubr.bf16.gmra.mxu1 %v10938_v3  ;;  %v9880_v25 = vsel %vm8489_vm14, %v6790_v32, %v10940_v51  ;;  %v10941_v29 = vcombine.low %v9499_v47, %v9525_v13  ;;  %7607 = vmatprep.mubr.bf16.mxu0 %v6801_v11  ;;  %v9885_v1 = vpop.f32.mrf.mxu0  ;;  %v10944_v12 = vrot.slane %v10943_v19, 5  ;;  %v9895_v37 = vsel %vm8489_vm14, %v6791_v15, %v5469_v30  ;;  %v5386_v3 = vld [vmem:[#allocation2 + $0x84] sm:$0xe]  ;;  %v5387_v19 = vld [vmem:[#allocation2 + $0x90] sm:$0xe] }
 0x1a3   : > { %10942 = vst [vmem:[#allocation7_spill] sm:$0xff] %v9885_v1  ;;  %v5471_v32 = vrot.slane %v5469_v30, 4  ;;  %v10945_v42 = vrot.slane %v9374_v5, 5  ;;  %v9901_v47 = vsel %vm8489_vm14, %v6789_v38, %v5455_v17  ;;  %v6793_v15 = vrot.slane %v5385_v60, 9 }
 0x1a4   : > { %7579 = vmatprep.mubr.bf16.mxu1 %v10941_v29  ;;  %v9891_v23 = vsel %vm8489_vm14, %v5464_v59, %v10944_v12  ;;  %v9911_v51 = vpop.f32.mrf.mxu0  ;;  %v10948_v29 = vrot.slane %v9412_v62, 5  ;;  %v5483_v38 = vrot.slane %v9447_v14, 5  ;;  %v5486_v5 = vrot.slane %v9481_v58, 5 }
 0x1a5   : > { %v5478_v22 = vrot.slane %v10945_v42, 4  ;;  %v10946_v26 = vmov %v10945_v42  ;;  %10947 = vst [vmem:[#allocation40_spill] sm:$0xff] %v9911_v51  ;;  %v9915_v30 = vsel %vm8489_vm14, %v5471_v32, %v5472_v44  ;;  %v9929_v60 = vsel %vm8489_vm14, %v5457_v24, %v5458_v49  ;;  %v5388_v32 = vld [vmem:[#allocation2 + $0x9c] sm:$0xe]  ;;  %v10950_v24 = vld [vmem:[#allocation22_spill] sm:$0xff] }
 0x1a6   : > { %v9909_v59 = vsel %vm8489_vm14, %v6792_v55, %v10946_v26  ;;  %v9925_v55 = vpop.f32.mrf.mxu1  ;;  %v6794_v12 = vrot.slane %v5386_v3, 9  ;;  %v7329_v42 = vpop.f32.mrf.mxu0  ;;  %v9937_v14 = vsel %vm8489_vm14, %v6793_v15, %v5483_v38  ;;  %v5485_v58 = vrot.slane %v5483_v38, 4  ;;  %v10949_v26 = vld [vmem:[#allocation33_spill] sm:$0xff]  ;;  %v5389_v3 = vld [vmem:[#allocation2 + $0xa8] sm:$0xe] }
 0x1a7   : > { %v9921_v17 = vsel %vm8489_vm14, %v5478_v22, %v10948_v29  ;;  %v5490_v22 = vrot.slane %v9459_v57, 5  ;;  %v5493_v29 = vrot.slane %v10949_v26, 5  ;;  %v9942_v49 = vadd.f32 %v7329_v42, %v10950_v24 }
 0x1a8   : > { %v6795_v11 = vrot.slane %v5387_v19, 9  ;;  %v5497_v44 = vrot.slane %v9525_v13, 5  ;;  %v5500_v62 = vrot.slane %v10951_v54, 5  ;;  %v2556_v51 = vpop.f32.mrf.mxu0  ;;  %v9948_v1 = vsel %vm8489_vm14, %v5485_v58, %v5486_v5  ;;  %v9960_v54 = vpop.f32.mrf.mxu1  ;;  %v10954_v19 = vld [vmem:[#allocation31_spill] sm:$0xff]  ;;  %v10956_v58 = vld [vmem:[#allocation24_spill] sm:$0xff] }
 0x1a9   : > { %v9952_v15 = vsel %vm8489_vm14, %v6794_v12, %v5490_v22  ;;  %v5492_v57 = vrot.slane %v5490_v22, 4  ;;  %v6796_v38 = vrot.slane %v5388_v32, 9  ;;  %v10952_v42 = vcombine.low %v9534_v20, %v9539_v40 }
 0x1aa   : > { %v10953_v13 = vcombine.low %v9793_v41, %v9765_v6  ;;  %v9963_v26 = vadd.f32 %v2556_v51, %v10954_v19  ;;  %v6809_v5 = vcombine.low %v9937_v14, %v9948_v1  ;;  %v9969_v12 = vsel %vm8489_vm14, %v6795_v11, %v5497_v44  ;;  %v7330_v6 = vpop.f32.mrf.mxu0  ;;  %v10958_v19 = vld [vmem:[#allocation37_spill] sm:$0xff] }
 0x1ab   : > { %7580 = vmatmul.mubr.bf16.gmra.mxu1 %v10952_v42  ;;  %v5499_v32 = vrot.slane %v5497_v44, 4  ;;  %v10955_v20 = vcombine.low %v9588_v16, %v9594_v53  ;;  %v9976_v41 = vsel %vm8489_vm14, %v5492_v57, %v5493_v29  ;;  %v5504_v51 = vrot.slane %v9539_v40, 5  ;;  %v5390_v42 = vld [vmem:[#allocation2 + $0xb4] sm:$0xe]  ;;  %v5391_v29 = vld [vmem:[#allocation2 + $0xc0] sm:$0xe] }
 0x1ac   : > { %7608 = vmatmul.mubr.bf16.vlgmr.msra.gmra.mxu0 %v10953_v13  ;;  %v5507_v22 = vrot.slane %v10956_v58, 5  ;;  %v6797_v24 = vrot.slane %v5389_v3, 9  ;;  %v10957_v13 = vld [vmem:[#allocation38_spill] sm:$0xff]  ;;  %v9999_v58 = vpop.f32.mrf.mxu1  ;;  %v10005_v40 = vpop.f32.mrf.mxu0  ;;  %v10967_v9 = vcombine.low %v9895_v37, %v9915_v30 }
 0x1ad   : > { %7583 = vmatprep.mubr.bf16.mxu1 %v10955_v20  ;;  %7611 = vmatprep.mubr.bf16.mxu0 %v6803_v50  ;;  %v9981_v11 = vadd.f32 %v7330_v6, %v10957_v13  ;;  %v9987_v16 = vsel %vm8489_vm14, %v5499_v32, %v5500_v62  ;;  %v5511_v50 = vrot.slane %v9594_v53, 5  ;;  %v9994_v3 = vsel %vm8489_vm14, %v6796_v38, %v5504_v51  ;;  %v5392_v13 = vld [vmem:[#allocation2 + $0xcc] sm:$0xe] }
 0x1ae   : > { %v5506_v57 = vrot.slane %v5504_v51, 4  ;;  %v5514_v20 = vrot.slane %v10958_v19, 5  ;;  %v6805_v6 = vcombine.low %v9901_v47, %v9929_v60  ;;  %v6798_v32 = vrot.slane %v5390_v42, 9 }
 0x1af   : > { %v10003_v62 = vsel %vm8489_vm14, %v6797_v24, %v5511_v50  ;;  %v5513_v53 = vrot.slane %v5511_v50, 4  ;;  %v5518_v51 = vrot.slane %v9621_v7, 5  ;;  %v5521_v19 = vrot.slane %v9659_v2, 5  ;;  %v10959_v50 = vld [vmem:[#allocation58_spill] sm:$0xff] }
 0x1b0   : > { %v10009_v38 = vsel %vm8489_vm14, %v5506_v57, %v5507_v22  ;;  %v6799_v47 = vrot.slane %v5391_v29, 9  ;;  %v5525_v42 = vrot.slane %v9675_v52, 5  ;;  %v5528_v44 = vrot.slane %v10959_v50, 5 }
 0x1b1   : > { %v10017_v24 = vsel %vm8489_vm14, %v5513_v53, %v5514_v20  ;;  %v10025_v57 = vsel %vm8489_vm14, %v6798_v32, %v5518_v51  ;;  %v5520_v2 = vrot.slane %v5518_v51, 4  ;;  %v6800_v29 = vrot.slane %v5392_v13, 9  ;;  %v10033_v53 = vpop.f32.mrf.mxu1 }
 0x1b2   : > { %v10960_v60 = vcombine.low %v9611_v28, %v9621_v7  ;;  %v10961_v20 = vcombine.low %v9834_v33, %v9850_v39  ;;  %v10037_v50 = vsel %vm8489_vm14, %v6799_v47, %v5525_v42  ;;  %v5527_v22 = vrot.slane %v5525_v42, 4  ;;  %v7333_v28 = vpop.f32.mrf.mxu0  ;;  %v10963_v39 = vld [vmem:[#allocation48_spill] sm:$0xff] }
 0x1b3   : > { %v5532_v32 = vrot.slane %v9707_v4, 5  ;;  %v10962_v13 = vcombine.low %v9670_v48, %v9675_v52  ;;  %v10045_v7 = vsel %vm8489_vm14, %v5520_v2, %v5521_v19  ;;  %v5535_v33 = vrot.slane %v9795_v35, 5  ;;  %v10065_v42 = vpop.f32.mrf.mxu1  ;;  %v10964_v2 = vld [vmem:[#allocation50_spill] sm:$0xff] }
 0x1b4   : > { %7584 = vmatmul.mubr.bf16.gmra.mxu1 %v10960_v60  ;;  %7612 = vmatmul.mubr.bf16.gmra.mxu0 %v10961_v20  ;;  %v10049_v51 = vadd.f32 %v7333_v28, %v10963_v39  ;;  %v10055_v60 = vsel %vm8489_vm14, %v5527_v22, %v5528_v44  ;;  %v2572_v52 = vpop.f32.mrf.mxu0  ;;  %v6776_v19 = vcombine.low %v9778_v36, %v9707_v4  ;;  %v7824_v44 = vld [vmem:[%s8622_s26] sm:$0xff]   ;;  %v10965_v28 = vld [vmem:[#allocation51_spill] sm:$0xff] }
 0x1b5   : > { %7587 = vmatprep.mubr.bf16.mxu1 %v10962_v13  ;;  %7615 = vmatprep.mubr.bf16.mxu0 %v6805_v6  ;;  %v10061_v6 = vsel %vm8489_vm14, %v6800_v29, %v5532_v32  ;;  %v5534_v35 = vrot.slane %v5532_v32, 4  ;;  %v10068_v20 = vadd.f32 %v2572_v52, %v10964_v2  ;;  %v10966_v4 = vcombine.low %v9880_v25, %v9891_v23  ;;  %v10083_v36 = vpop.f32.mrf.mxu1  ;;  %v10968_v2 = vld [vmem:[#allocation29_spill] sm:$0xff]  ;;  %v10970_v23 = vld [vmem:[#allocation52_spill] sm:$0xff] }
 0x1b6   : > { %v7334_v22 = vpop.f32.mrf.mxu0  ;;  %v10977_v1 = vcombine.low %v9969_v12, %v9987_v16  ;;  %v10984_v12 = vld [vmem:[#allocation54_spill] sm:$0xff] }
 0x1b7   : > { %v10073_v13 = vsel %vm8489_vm14, %v5534_v35, %v5535_v33  ;;  %v10076_v29 = vadd.f32 %v7334_v22, %v10965_v28  ;;  %v7825_v33 = vld [vmem:[%s8622_s26 + $0x8] sm:$0xff]   ;;  %v10091_v52 = vpop.f32.mrf.mxu1 }
 0x1b8   : > { %v10085_v39 = vpop.f32.mrf.mxu0 }
 0x1b9   : > { %v10103_v37 = vpop.f32.mrf.mxu1 }
 0x1bc   : > { %7588 = vmatmul.mubr.bf16.gmra.mxu1 %v6776_v19  ;;  %7616 = vmatmul.mubr.bf16.gmra.mxu0 %v10966_v4  ;;  %v7826_v19 = vld [vmem:[%s8622_s26 + $0x10] sm:$0xff]   ;;  %v10973_v4 = vld [vmem:[#allocation53_spill] sm:$0xff] }
 0x1bd   : > { %7655 = vmatprep.mubr.bf16.mxu1 %v7824_v44  ;;  %7619 = vmatprep.mubr.bf16.mxu0 %v10967_v9  ;;  %v7337_v35 = vpop.f32.mrf.mxu0  ;;  %v10972_v44 = vcombine.low %v9909_v59, %v9921_v17  ;;  %v10976_v17 = vcombine.low %v9952_v15, %v9976_v41  ;;  %v7830_v15 = vld [vmem:[%s8622_s26 + $0x30] sm:$0xff]  }
 0x1be   : > { %v10095_v22 = vadd.f32 %v7337_v35, %v10968_v2  ;;  %v7827_v35 = vld [vmem:[%s8622_s26 + $0x18] sm:$0xff]   ;;  %v10112_v2 = vpop.f32.mrf.mxu1 }
 0x1bf   : > { %v2588_v25 = vpop.f32.mrf.mxu0 }
 0x1c0   : > { %10969 = vst [vmem:[#allocation42_spill] sm:$0xff] %v10095_v22  ;;  %v10098_v28 = vadd.f32 %v2588_v25, %v10970_v23  ;;  %v10117_v59 = vpop.f32.mrf.mxu1 }
 0x1c1   : > { %v7338_v30 = vpop.f32.mrf.mxu0 }
 0x1c2   : > { %10971 = vst [vmem:[#allocation44_spill] sm:$0xff] %v10098_v28  ;;  %v10109_v9 = vadd.f32 %v7338_v30, %v10973_v4  ;;  %v10129_v30 = vpop.f32.mrf.mxu1  ;;  %v10980_v4 = vld [vmem:[#allocation34_spill] sm:$0xff] }
 0x1c3   : > { %v10115_v25 = vpop.f32.mrf.mxu0 }
 0x1c4   : > { %7656 = vmatmul.mubr.bf16.vlgmr.msra.gmra.mxu1 %v7825_v33  ;;  %7620 = vmatmul.mubr.bf16.gmra.mxu0 %v10972_v44  ;;  %10974 = vst [vmem:[#allocation45_spill] sm:$0xff] %v10109_v9  ;;  %v7828_v33 = vld [vmem:[%s8622_s26 + $0x20] sm:$0xff]   ;;  %10975 = vst [vmem:[#allocation47_spill] sm:$0xff] %v10115_v25  ;;  %v7829_v44 = vld [vmem:[%s8622_s26 + $0x28] sm:$0xff]  }
 0x1c5   : > { %7659 = vmatprep.mubr.bf16.mxu1 %v7826_v19  ;;  %7623 = vmatprep.mubr.bf16.mxu0 %v6809_v5  ;;  %v10978_v5 = vld [vmem:[#allocation32_spill] sm:$0xff] }
 0x1c9   : > { %v7341_v14 = vpop.f32.mrf.mxu0 }
 0x1ca   : > { %v10126_v19 = vadd.f32 %v7341_v14, %v10978_v5  ;;  %v10140_v14 = vpop.f32.mrf.mxu1  ;;  %v10986_v5 = vcombine.low %v9994_v3, %v10009_v38  ;;  %v10993_v38 = vcombine.low %v10025_v57, %v10045_v7 }
 0x1cb   : > { %v2604_v23 = vpop.f32.mrf.mxu0 }
 0x1cc   : > { %7660 = vmatmul.mubr.bf16.gmra.mxu1 %v7827_v35  ;;  %7624 = vmatmul.mubr.bf16.gmra.mxu0 %v10976_v17  ;;  %10979 = vst [vmem:[#allocation33_spill] sm:$0xff] %v10126_v19  ;;  %v10132_v35 = vadd.f32 %v2604_v23, %v10980_v4  ;;  %v10983_v17 = vld [vmem:[#allocation27_spill] sm:$0xff]  ;;  %v10988_v23 = vcombine.low %v10003_v62, %v10017_v24  ;;  %v7831_v4 = vld [vmem:[%s8622_s26 + $0x38] sm:$0xff]  }
 0x1cd   : > { %7663 = vmatprep.mubr.bf16.mxu1 %v7828_v33  ;;  %7627 = vmatprep.mubr.bf16.mxu0 %v10977_v1  ;;  %v7342_v41 = vpop.f32.mrf.mxu0  ;;  %v10982_v33 = vld [vmem:[#allocation30_spill] sm:$0xff]  ;;  %v10994_v62 = vld [vmem:[#allocation55_spill] sm:$0xff] }
 0x1ce   : > { %10981 = vst [vmem:[#allocation22_spill] sm:$0xff] %v10132_v35  ;;  %v2156_v32 = vadd.f32 %v10983_v17, %v10982_v33  ;;  %v10138_v16 = vadd.f32 %v7342_v41, %v10984_v12  ;;  %v10151_v33 = vpop.f32.mrf.mxu1  ;;  %v7832_v41 = vld [vmem:[%s8622_s26 + $0x40] sm:$0xff]  }
 0x1cf   : > { %v2607_v1 = vpop.f32.mrf.mxu0  ;;  %10989 = vst [vmem:[#allocation24_spill] sm:$0xff] %v10151_v33  ;;  %v11026_v33 = vld [vmem:[#allocation17_spill] sm:$0xff] }
 0x1d0   : > { %10985 = vst [vmem:[#allocation35_spill] sm:$0xff] %v10138_v16  ;;  %v10145_v48 = vadd.f32 %v2607_v1, %v2156_v32  ;;  %v10157_v3 = vpop.f32.mrf.mxu1  ;;  %v10997_v1 = vld [vmem:[#allocation57_spill] sm:$0xff]  ;;  %v11018_v16 = vld [vmem:[#allocation11_spill] sm:$0xff] }
 0x1d1   : > { %10992 = vst [vmem:[#allocation37_spill] sm:$0xff] %v10157_v3 }
 0x1d2   : > { %10987 = vst [vmem:[#allocation31_spill] sm:$0xff] %v10145_v48  ;;  %v10174_v57 = vpop.f32.mrf.mxu1 }
 0x1d3   : > { %11001 = vst [vmem:[#allocation50_spill] sm:$0xff] %v10174_v57 }
 0x1d4   : > { %7664 = vmatmul.mubr.bf16.gmra.mxu1 %v7829_v44  ;;  %7628 = vmatmul.mubr.bf16.gmra.mxu0 %v10986_v5  ;;  %v10990_v44 = vld [vmem:[#allocation26_spill] sm:$0xff]  ;;  %v10998_v5 = vld [vmem:[#allocation36_spill] sm:$0xff] }
 0x1d5   : > { %7667 = vmatprep.mubr.bf16.mxu1 %v7830_v15  ;;  %7631 = vmatprep.mubr.bf16.mxu0 %v10988_v23  ;;  %v7345_v17 = vpop.f32.mrf.mxu0  ;;  %v10996_v15 = vcombine.low %v10037_v50, %v10055_v60  ;;  %v2172_v23 = vadd.f32 %v10998_v5, %v10997_v1  ;;  %v11004_v60 = vcombine.low %v10061_v6, %v10073_v13  ;;  %v11008_v5 = vld [vmem:[#allocation59_spill] sm:$0xff] }
 0x1d6   : > { %v10155_v12 = vadd.f32 %v7345_v17, %v10990_v44 }
 0x1d7   : > { %v2620_v47 = vpop.f32.mrf.mxu0 }
 0x1d8   : > { %10991 = vst [vmem:[#allocation38_spill] sm:$0xff] %v10155_v12  ;;  %v10163_v24 = vadd.f32 %v2620_v47, %v10994_v62  ;;  %v7833_v12 = vld [vmem:[%s8622_s26 + $0x48] sm:$0xff]   ;;  %v7834_v47 = vld [vmem:[%s8622_s26 + $0x50] sm:$0xff]  }
 0x1d9   : > { %v7346_v32 = vpop.f32.mrf.mxu0 }
 0x1da   : > { %10995 = vst [vmem:[#allocation58_spill] sm:$0xff] %v10163_v24  ;;  %v11016_v24 = vld [vmem:[#allocation4_spill] sm:$0xff] }
 0x1db   : > { %v2623_v44 = vpop.f32.mrf.mxu0 }
 0x1dc   : > { %7668 = vmatmul.mubr.bf16.gmra.mxu1 %v7831_v4  ;;  %7632 = vmatmul.mubr.bf16.gmra.mxu0 %v10993_v38  ;;  %v10999_v4 = vld [vmem:[#allocation56_spill] sm:$0xff]  ;;  %v10176_v7 = vadd.f32 %v2623_v44, %v2172_v23  ;;  %v2188_v23 = vadd.f32 %v11008_v5, %v9772_v43 }
 0x1dd   : > { %7671 = vmatprep.mubr.bf16.mxu1 %v7832_v41  ;;  %7635 = vmatprep.mubr.bf16.mxu0 %v10996_v15  ;;  %v10171_v17 = vadd.f32 %v7346_v32, %v10999_v4  ;;  %v10179_v41 = vpop.f32.mrf.mxu1  ;;  %v7835_v15 = vld [vmem:[%s8622_s26 + $0x58] sm:$0xff]   ;;  %v7836_v4 = vld [vmem:[%s8622_s26 + $0x60] sm:$0xff]  }
 0x1de   : > { %11002 = vst [vmem:[#allocation51_spill] sm:$0xff] %v10176_v7  ;;  %11003 = vst [vmem:[#allocation29_spill] sm:$0xff] %v10179_v41  ;;  %v11021_v41 = vld [vmem:[#allocation9_spill] sm:$0xff] }
 0x1df   : > { %11000 = vst [vmem:[#allocation48_spill] sm:$0xff] %v10171_v17  ;;  %v7349_v50 = vpop.f32.mrf.mxu0  ;;  %v10191_v1 = vpop.f32.mrf.mxu1 }
 0x1e0   : > { %v10185_v38 = vadd.f32 %v7349_v50, %v9729_v61  ;;  %11007 = vst [vmem:[#allocation32_spill] sm:$0xff] %v10191_v1  ;;  %v7837_v50 = vld [vmem:[%s8622_s26 + $0x68] sm:$0xff]   ;;  %v11020_v1 = vld [vmem:[#allocation13_spill] sm:$0xff] }
 0x1e1   : > { %v2636_v62 = vpop.f32.mrf.mxu0  ;;  %v10201_v44 = vpop.f32.mrf.mxu1  ;;  %v2073_v9 = vadd.f32 %v11021_v41, %v11020_v1  ;;  %v11027_v41 = vld [vmem:[#allocation12_spill] sm:$0xff] }
 0x1e2   : > { %11005 = vst [vmem:[#allocation52_spill] sm:$0xff] %v10185_v38  ;;  %v10188_v32 = vadd.f32 %v2636_v62, %v9745_v45  ;;  %11011 = vst [vmem:[#allocation27_spill] sm:$0xff] %v10201_v44  ;;  %v2076_v1 = vadd.f32 %v11027_v41, %v11026_v33  ;;  %v11032_v41 = vld [vmem:[#allocation23_spill] sm:$0xff] }
 0x1e4   : > { %7672 = vmatmul.mubr.bf16.gmra.mxu1 %v7833_v12  ;;  %7636 = vmatmul.mubr.bf16.gmra.mxu0 %v11004_v60  ;;  %11006 = vst [vmem:[#allocation53_spill] sm:$0xff] %v10188_v32  ;;  %v7350_v12 = vpop.f32.mrf.mxu0  ;;  %v10204_v60 = vpop.f32.mrf.mxu1  ;;  %v7838_v32 = vld [vmem:[%s8622_s26 + $0x70] sm:$0xff]  }
 0x1e5   : > { %7675 = vmatprep.mubr.bf16.mxu1 %v7834_v47  ;;  %v10197_v6 = vadd.f32 %v7350_v12, %v9757_v8  ;;  %11012 = vst [vmem:[#allocation54_spill] sm:$0xff] %v10204_v60  ;;  %v11019_v60 = vld [vmem:[#allocation8_spill] sm:$0xff] }
 0x1e6   : > { %v2639_v13 = vpop.f32.mrf.mxu0  ;;  %v10207_v5 = vpop.f32.mrf.mxu1  ;;  %v2081_v35 = vadd.f32 %v11019_v60, %v11018_v16  ;;  %v11024_v16 = vld [vmem:[#allocation43_spill] sm:$0xff] }
 0x1e7   : > { %11009 = vst [vmem:[#allocation34_spill] sm:$0xff] %v10197_v6  ;;  %v10199_v61 = vadd.f32 %v2639_v13, %v2188_v23  ;;  %11013 = vst [vmem:[#allocation26_spill] sm:$0xff] %v10207_v5  ;;  %v2651_v60 = vadd.f32 %v11024_v16, %v2073_v9  ;;  %v11029_v9 = vld [vmem:[#allocation14_spill] sm:$0xff]  ;;  %v11030_v16 = vld [vmem:[#allocation21_spill] sm:$0xff] }
 0x1e8   : > { %v7417_v45 = vpop.f32.mrf.mxu0  ;;  %v10209_v23 = vpop.f32.mrf.mxu1  ;;  %v2653_v57 = vadd.f32 %v9787_v46, %v2081_v35 }
 0x1e9   : > { %11010 = vst [vmem:[#allocation30_spill] sm:$0xff] %v10199_v61  ;;  %v3639_v48 = vadd.f32 %v7417_v45, %v11016_v24  ;;  %v11022_v45 = vld [vmem:[#allocation15_spill] sm:$0xff] }
 0x1ea   : > { %v3630_v47 = vpop.f32.mrf.mxu0 }
 0x1eb   : > { %v3631_v44 = vadd.f32 %v3630_v47, %v9733_v31  ;;  %v11025_v47 = vld [vmem:[#allocation5_spill] sm:$0xff] }
 0x1ec   : > { %7676 = vmatmul.mubr.bf16.gmra.mxu1 %v7835_v15  ;;  %v7418_v62 = vpop.f32.mrf.mxu0  ;;  %v7839_v15 = vld [vmem:[%s8622_s26 + $0x78] sm:$0xff]  }
 0x1ed   : > { %7679 = vmatprep.mubr.bf16.mxu1 %v7836_v4  ;;  %v3642_v24 = vadd.f32 %v7418_v62, %v9747_v10 }
 0x1ee   : > { %v3633_v43 = vpop.f32.mrf.mxu0 }
 0x1ef   : > { %v3634_v22 = vadd.f32 %v3633_v43, %v11025_v47  ;;  %v11031_v47 = vld [vmem:[#allocation16_spill] sm:$0xff] }
 0x1f0   : > { %v7421_v8 = vpop.f32.mrf.mxu0 }
 0x1f1   : > { %v3655_v62 = vadd.f32 %v7421_v8, %v9811_v34 }
 0x1f2   : > { %v3646_v12 = vpop.f32.mrf.mxu0 }
 0x1f3   : > { %v3647_v33 = vadd.f32 %v3646_v12, %v9844_v18 }
 0x1f4   : > { %7680 = vmatmul.mubr.bf16.gmra.mxu1 %v7837_v50  ;;  %v7422_v13 = vpop.f32.mrf.mxu0 }
 0x1f5   : > { %7683 = vmatprep.mubr.bf16.mxu1 %v7838_v32 }
 0x1f6   : > { %v3649_v61 = vpop.f32.mrf.mxu0 }
 0x1f8   : > { %v10212_v6 = vpop.f32.mrf.mxu1  ;;  %v7425_v4 = vpop.f32.mrf.mxu0 }
 0x1fa   : > { %v10214_v38 = vpop.f32.mrf.mxu1  ;;  %v3662_v7 = vpop.f32.mrf.mxu0 }
 0x1fb   : > { %11014 = vst [vmem:[#allocation55_spill] sm:$0xff] %v10214_v38 }
 0x1fc   : > { %7684 = vmatmul.mubr.bf16.gmra.mxu1 %v7839_v15  ;;  %v10216_v17 = vpop.f32.mrf.mxu1  ;;  %v10218_v50 = vpop.f32.mrf.mxu0 }
 0x1fd   : > { %11015 = vst [vmem:[#allocation57_spill] sm:$0xff] %v10216_v17 }
 0x1fe   : > { %v10221_v32 = vpop.f32.mrf.mxu1  ;;  %v10223_v5 = vpop.f32.mrf.mxu0 }
 0x1ff   : > { %11017 = vst [vmem:[#allocation36_spill] sm:$0xff] %v10221_v32  ;;  %v11023_v32 = vld [vmem:[#allocation10_spill] sm:$0xff] }
 0x200   : > { %v7465_v15 = vpop.f32.mrf.mxu1  ;;  %v10228_v19 = vpop.f32.mrf.mxu0  ;;  %v2084_v28 = vadd.f32 %v11023_v32, %v11022_v45 }
 0x201   : > { %v4208_v25 = vadd.f32 %v7465_v15, %v3639_v48  ;;  %v11028_v15 = vld [vmem:[#allocation19_spill] sm:$0xff] }
 0x202   : > { %v4079_v17 = vpop.f32.mrf.mxu1  ;;  %v10236_v3 = vpop.f32.mrf.mxu0  ;;  %v2654_v10 = vadd.f32 %v9813_v0, %v2084_v28  ;;  %v2089_v0 = vadd.f32 %v11031_v47, %v11030_v16 }
 0x203   : > { %v4206_v31 = vadd.f32 %v4079_v17, %v3631_v44  ;;  %v10240_v38 = vadd.f32 %v4208_v25, %v2653_v57  ;;  %v2097_v17 = vadd.f32 %v11029_v9, %v11028_v15  ;;  %v2652_v25 = vadd.f32 %v9828_v27, %v2076_v1  ;;  %v11034_v15 = vld [vmem:[#allocation25_spill] sm:$0xff]  ;;  %v11035_v9 = vld [vmem:[#allocation20_spill] sm:$0xff] }
 0x204   : > { %v7466_v46 = vpop.f32.mrf.mxu1  ;;  %v10244_v48 = vpop.f32.mrf.mxu0  ;;  %v2655_v18 = vadd.f32 %v9866_v63, %v2089_v0  ;;  %v11037_v63 = vld [vmem:[#allocation40_spill] sm:$0xff] }
 0x205   : > { %v4209_v35 = vadd.f32 %v7466_v46, %v3642_v24  ;;  %v10248_v32 = vadd.f32 %v4206_v31, %v2651_v60  ;;  %v2657_v34 = vadd.f32 %v9858_v21, %v2097_v17  ;;  %v3658_v60 = vadd.f32 %v7422_v13, %v9873_v56  ;;  %v11033_v46 = vld [vmem:[#allocation18_spill] sm:$0xff]  ;;  %v11036_v56 = vld [vmem:[#allocation7_spill] sm:$0xff] }
 0x206   : > { %v4082_v44 = vpop.f32.mrf.mxu1  ;;  %v3681_v43 = vpop.f32.mrf.mxu0  ;;  %v2100_v27 = vadd.f32 %v11033_v46, %v11032_v41  ;;  %v2092_v21 = vadd.f32 %v11035_v9, %v11034_v15  ;;  %v3674_v41 = vadd.f32 %v10218_v50, %v10033_v53  ;;  %v3687_v53 = vadd.f32 %v10228_v19, %v10083_v36 }
 0x207   : > { %v4207_v57 = vadd.f32 %v4082_v44, %v3634_v22  ;;  %v10254_v45 = vadd.f32 %v4209_v35, %v2654_v10  ;;  %v3650_v10 = vadd.f32 %v3649_v61, %v9925_v55  ;;  %v3663_v55 = vadd.f32 %v3662_v7, %v9999_v58 }
 0x208   : > { %v7433_v24 = vpop.f32.mrf.mxu0  ;;  %v2658_v13 = vadd.f32 %v11036_v56, %v2100_v27  ;;  %v3666_v27 = vadd.f32 %v10223_v5, %v10065_v42  ;;  %v3690_v36 = vadd.f32 %v10244_v48, %v10103_v37 }
 0x209   : > { %v7469_v28 = vpop.f32.mrf.mxu1  ;;  %v10260_v31 = vadd.f32 %v4207_v57, %v2652_v25  ;;  %v3671_v25 = vadd.f32 %v7425_v4, %v9960_v54 }
 0x20a   : > { %v4212_v8 = vadd.f32 %v7469_v28, %v3655_v62  ;;  %v3694_v1 = vpop.f32.mrf.mxu0 }
 0x20b   : > { %v4095_v22 = vpop.f32.mrf.mxu1 }
 0x20c   : > { %v4210_v12 = vadd.f32 %v4095_v22, %v3647_v33  ;;  %v10266_v35 = vadd.f32 %v4212_v8, %v2657_v34  ;;  %v7434_v17 = vpop.f32.mrf.mxu0  ;;  %v2656_v33 = vadd.f32 %v11037_v63, %v2092_v21 }
 0x20d   : > { %v7470_v62 = vpop.f32.mrf.mxu1 }
 0x20e   : > { %v4213_v44 = vadd.f32 %v7470_v62, %v3658_v60  ;;  %v10272_v57 = vadd.f32 %v4210_v12, %v2655_v18  ;;  %v3697_v47 = vpop.f32.mrf.mxu0  ;;  %v11038_v18 = vld [vmem:[#allocation39_spill] sm:$0xff]  ;;  %v11039_v12 = vld [vmem:[#allocation28_spill] sm:$0xff] }
 0x20f   : > { %v4098_v16 = vpop.f32.mrf.mxu1 }
 0x210   : > { %v4211_v0 = vadd.f32 %v4098_v16, %v3650_v10  ;;  %v10276_v61 = vadd.f32 %v4213_v44, %v2658_v13  ;;  %v7437_v34 = vpop.f32.mrf.mxu0  ;;  %v2108_v10 = vadd.f32 %v11039_v12, %v11038_v18 }
 0x211   : > { %v7473_v28 = vpop.f32.mrf.mxu1 }
 0x212   : > { %v4216_v8 = vadd.f32 %v7473_v28, %v3671_v25  ;;  %v10280_v60 = vadd.f32 %v4211_v0, %v2656_v33  ;;  %v3710_v4 = vpop.f32.mrf.mxu0  ;;  %v2660_v42 = vadd.f32 %v10005_v40, %v2108_v10  ;;  %v3682_v40 = vadd.f32 %v3681_v43, %v10112_v2  ;;  %v11046_v10 = vld [vmem:[#allocation24_spill] sm:$0xff] }
 0x213   : > { %v4111_v54 = vpop.f32.mrf.mxu1  ;;  %v3703_v28 = vadd.f32 %v7433_v24, %v10117_v59  ;;  %v3695_v2 = vadd.f32 %v3694_v1, %v10129_v30  ;;  %v3706_v59 = vadd.f32 %v7434_v17, %v10140_v14  ;;  %v3698_v30 = vadd.f32 %v3697_v47, %v11046_v10  ;;  %v11047_v1 = vld [vmem:[#allocation55_spill] sm:$0xff]  ;;  %v11052_v17 = vld [vmem:[#allocation37_spill] sm:$0xff] }
 0x214   : > { %v4214_v46 = vadd.f32 %v4111_v54, %v3663_v55  ;;  %v10285_v22 = vadd.f32 %v4216_v8, %v9942_v49  ;;  %v10287_v7 = vpop.f32.mrf.mxu0  ;;  %v3679_v49 = vadd.f32 %v10236_v3, %v10091_v52  ;;  %v11041_v52 = vld [vmem:[#allocation6_spill] sm:$0xff]  ;;  %v11042_v3 = vld [vmem:[#allocation41_spill] sm:$0xff] }
 0x215   : > { %v7474_v58 = vpop.f32.mrf.mxu1 }
 0x216   : > { %v4217_v15 = vadd.f32 %v7474_v58, %v3674_v41  ;;  %v10294_v50 = vadd.f32 %v4214_v46, %v9963_v26  ;;  %v3713_v21 = vpop.f32.mrf.mxu0 }
 0x217   : > { %v4114_v9 = vpop.f32.mrf.mxu1 }
 0x218   : > { %v4215_v5 = vadd.f32 %v4114_v9, %v3666_v27  ;;  %v10300_v62 = vadd.f32 %v4217_v15, %v9981_v11  ;;  %v7441_v13 = vpop.f32.mrf.mxu0  ;;  %v2124_v11 = vadd.f32 %v11042_v3, %v11041_v52  ;;  %v11048_v15 = vld [vmem:[#allocation42_spill] sm:$0xff] }
 0x219   : > { %v7477_v56 = vpop.f32.mrf.mxu1  ;;  %v11051_v9 = vld [vmem:[#allocation46_spill] sm:$0xff] }
 0x21a   : > { %v4220_v44 = vadd.f32 %v7477_v56, %v3687_v53  ;;  %v10304_v19 = vadd.f32 %v4215_v5, %v2660_v42  ;;  %v3726_v25 = vpop.f32.mrf.mxu0  ;;  %v2664_v48 = vadd.f32 %v10085_v39, %v2124_v11  ;;  %v11053_v56 = vld [vmem:[#allocation57_spill] sm:$0xff]  ;;  %v11057_v11 = vld [vmem:[#allocation50_spill] sm:$0xff] }
 0x21b   : > { %v4127_v26 = vpop.f32.mrf.mxu1 }
 0x21c   : > { %v4218_v16 = vadd.f32 %v4127_v26, %v3679_v49  ;;  %v10308_v63 = vadd.f32 %v4220_v44, %v10049_v51  ;;  %v7442_v0 = vpop.f32.mrf.mxu0 }
 0x21d   : > { %v7478_v33 = vpop.f32.mrf.mxu1 }
 0x21e   : > { %11040 = vst [vmem:[#allocation56_spill] sm:$0xff] %v10308_v63  ;;  %v4221_v55 = vadd.f32 %v7478_v33, %v3690_v36  ;;  %v10314_v37 = vadd.f32 %v4218_v16, %v10068_v20  ;;  %v3729_v41 = vpop.f32.mrf.mxu0  ;;  %v11054_v36 = vld [vmem:[#allocation44_spill] sm:$0xff]  ;;  %v11056_v16 = vld [vmem:[#allocation47_spill] sm:$0xff]  ;;  %v3711_v33 = vadd.f32 %v3710_v4, %v11057_v11 }
 0x21f   : > { %v4130_v8 = vpop.f32.mrf.mxu1  ;;  %v10319_v51 = vadd.f32 %v3729_v41, %v10209_v23 }
 0x220   : > { %11043 = vst [vmem:[#allocation59_spill] sm:$0xff] %v10314_v37  ;;  %v4219_v54 = vadd.f32 %v4130_v8, %v3682_v40  ;;  %v10322_v43 = vadd.f32 %v4221_v55, %v10076_v29  ;;  %v7445_v27 = vpop.f32.mrf.mxu0  ;;  %v11050_v29 = vld [vmem:[#allocation49_spill] sm:$0xff]  ;;  %v11058_v55 = vld [vmem:[#allocation36_spill] sm:$0xff] }
 0x221   : > { %v7481_v46 = vpop.f32.mrf.mxu1  ;;  %v3751_v20 = vadd.f32 %v7445_v27, %v10212_v6  ;;  %v2140_v42 = vadd.f32 %v11051_v9, %v11050_v29  ;;  %v3719_v6 = vadd.f32 %v7437_v34, %v11052_v17  ;;  %v11066_v29 = vld [vmem:[#allocation27_spill] sm:$0xff]  ;;  %v11069_v17 = vld [vmem:[#allocation54_spill] sm:$0xff] }
 0x222   : > { %11044 = vst [vmem:[#allocation4_spill] sm:$0xff] %v10322_v43  ;;  %v4224_v58 = vadd.f32 %v7481_v46, %v3703_v28  ;;  %v10326_v24 = vadd.f32 %v4219_v54, %v2664_v48  ;;  %v3742_v18 = vpop.f32.mrf.mxu0  ;;  %v11059_v48 = vld [vmem:[#allocation45_spill] sm:$0xff]  ;;  %v3735_v9 = vadd.f32 %v7441_v13, %v11066_v29 }
 0x223   : > { %v4143_v39 = vpop.f32.mrf.mxu1  ;;  %v3743_v23 = vadd.f32 %v3742_v18, %v11047_v1  ;;  %v2668_v47 = vadd.f32 %v11056_v16, %v2140_v42  ;;  %v11063_v18 = vld [vmem:[#allocation32_spill] sm:$0xff]  ;;  %v11067_v42 = vld [vmem:[#allocation22_spill] sm:$0xff] }
 0x224   : > { %11045 = vst [vmem:[#allocation11_spill] sm:$0xff] %v10326_v24  ;;  %v4222_v12 = vadd.f32 %v4143_v39, %v3695_v2  ;;  %v10331_v53 = vadd.f32 %v4224_v58, %v11048_v15  ;;  %v7446_v49 = vpop.f32.mrf.mxu0  ;;  %v11061_v2 = vld [vmem:[#allocation29_spill] sm:$0xff]  ;;  %v3714_v4 = vadd.f32 %v3713_v21, %v11063_v18 }
 0x225   : > { %v7482_v5 = vpop.f32.mrf.mxu1  ;;  %v3754_v44 = vadd.f32 %v7446_v49, %v11053_v56  ;;  %v3722_v46 = vadd.f32 %v10287_v7, %v11061_v2  ;;  %v11070_v56 = vld [vmem:[#allocation35_spill] sm:$0xff] }
 0x226   : > { %11049 = vst [vmem:[#allocation8_spill] sm:$0xff] %v10331_v53  ;;  %v4225_v14 = vadd.f32 %v7482_v5, %v3706_v59  ;;  %v10338_v26 = vadd.f32 %v4222_v12, %v11054_v36  ;;  %v3745_v52 = vpop.f32.mrf.mxu0  ;;  %v11064_v12 = vld [vmem:[#allocation33_spill] sm:$0xff] }
 0x227   : > { %v4146_v40 = vpop.f32.mrf.mxu1  ;;  %v3746_v28 = vadd.f32 %v3745_v52, %v11058_v55 }
 0x228   : > { %11055 = vst [vmem:[#allocation13_spill] sm:$0xff] %v10338_v26  ;;  %v4223_v3 = vadd.f32 %v4146_v40, %v3698_v30  ;;  %v10344_v8 = vadd.f32 %v4225_v14, %v11059_v48  ;;  %v10346_v54 = vpop.f32.mrf.mxu0  ;;  %v11072_v40 = vld [vmem:[#allocation26_spill] sm:$0xff] }
 0x229   : > { %v7485_v41 = vpop.f32.mrf.mxu1  ;;  %v3738_v52 = vadd.f32 %v7442_v0, %v11072_v40  ;;  %v11075_v48 = vld [vmem:[#allocation38_spill] sm:$0xff]  ;;  %v11085_v40 = vld [vmem:[#allocation53_spill] sm:$0xff] }
 0x22a   : > { %11060 = vst [vmem:[#allocation9_spill] sm:$0xff] %v10344_v8  ;;  %v4228_v34 = vadd.f32 %v7485_v41, %v3719_v6  ;;  %v10350_v27 = vadd.f32 %v4223_v3, %v2668_v47  ;;  %v10352_v59 = vpop.f32.mrf.mxu0  ;;  %v3727_v6 = vadd.f32 %v3726_v25, %v11069_v17  ;;  %v11073_v3 = vld [vmem:[#allocation31_spill] sm:$0xff] }
 0x22b   : > { %v4159_v58 = vpop.f32.mrf.mxu1 }
 0x22c   : > { %11062 = vst [vmem:[#allocation15_spill] sm:$0xff] %v10350_v27  ;;  %v4226_v39 = vadd.f32 %v4159_v58, %v3711_v33  ;;  %v10356_v10 = vadd.f32 %v4228_v34, %v11064_v12  ;;  %v10358_v1 = vpop.f32.mrf.mxu0 }
 0x22d   : > { %v7486_v30 = vpop.f32.mrf.mxu1 }
 0x22e   : > { %11065 = vst [vmem:[#allocation10_spill] sm:$0xff] %v10356_v10  ;;  %v4229_v15 = vadd.f32 %v7486_v30, %v3722_v46  ;;  %v10362_v5 = vadd.f32 %v4226_v39, %v11067_v42  ;;  %v10364_v49 = vpop.f32.mrf.mxu0  ;;  %v11077_v46 = vld [vmem:[#allocation58_spill] sm:$0xff] }
 0x22f   : > { %v4162_v7 = vpop.f32.mrf.mxu1 }
 0x230   : > { %11068 = vst [vmem:[#allocation43_spill] sm:$0xff] %v10362_v5  ;;  %v4227_v14 = vadd.f32 %v4162_v7, %v3714_v4  ;;  %v10368_v21 = vadd.f32 %v4229_v15, %v11070_v56  ;;  %v10370_v16 = vpop.f32.mrf.mxu0  ;;  %v11079_v4 = vld [vmem:[#allocation48_spill] sm:$0xff] }
 0x231   : > { %v7489_v36 = vpop.f32.mrf.mxu1 }
 0x232   : > { %11071 = vst [vmem:[#allocation5_spill] sm:$0xff] %v10368_v21  ;;  %v4232_v47 = vadd.f32 %v7489_v36, %v3735_v9  ;;  %v10374_v13 = vadd.f32 %v4227_v14, %v11073_v3  ;;  %v10376_v33 = vpop.f32.mrf.mxu0  ;;  %v11081_v9 = vld [vmem:[#allocation51_spill] sm:$0xff] }
 0x233   : > { %v4175_v11 = vpop.f32.mrf.mxu1 }
 0x234   : > { %11074 = vst [vmem:[#allocation17_spill] sm:$0xff] %v10374_v13  ;;  %v4230_v55 = vadd.f32 %v4175_v11, %v3727_v6  ;;  %v10379_v41 = vadd.f32 %v4232_v47, %v11075_v48  ;;  %v10381_v34 = vpop.f32.mrf.mxu0  ;;  %v11083_v6 = vld [vmem:[#allocation52_spill] sm:$0xff] }
 0x235   : > { %v7490_v25 = vpop.f32.mrf.mxu1 }
 0x236   : > { %11076 = vst [vmem:[#allocation12_spill] sm:$0xff] %v10379_v41  ;;  %v4233_v2 = vadd.f32 %v7490_v25, %v3738_v52  ;;  %v10384_v58 = vadd.f32 %v4230_v55, %v11077_v46  ;;  %v10386_v18 = vpop.f32.mrf.mxu0  ;;  %v11087_v55 = vld [vmem:[#allocation34_spill] sm:$0xff] }
 0x237   : > { %v4178_v39 = vpop.f32.mrf.mxu1 }
 0x238   : > { %11078 = vst [vmem:[#allocation19_spill] sm:$0xff] %v10384_v58  ;;  %v4231_v0 = vadd.f32 %v4178_v39, %v10319_v51  ;;  %v10390_v12 = vadd.f32 %v4233_v2, %v11079_v4  ;;  %v10392_v15 = vpop.f32.mrf.mxu0 }
 0x239   : > { %v7493_v30 = vpop.f32.mrf.mxu1 }
 0x23a   : > { %11080 = vst [vmem:[#allocation14_spill] sm:$0xff] %v10390_v12  ;;  %v4236_v29 = vadd.f32 %v7493_v30, %v3751_v20  ;;  %v10395_v42 = vadd.f32 %v4231_v0, %v11081_v9  ;;  %v10397_v14 = vpop.f32.mrf.mxu0 }
 0x23b   : > { %v4191_v7 = vpop.f32.mrf.mxu1 }
 0x23c   : > { %11082 = vst [vmem:[#allocation21_spill] sm:$0xff] %v10395_v42  ;;  %v4234_v17 = vadd.f32 %v4191_v7, %v3743_v23  ;;  %v10400_v56 = vadd.f32 %v4236_v29, %v11083_v6  ;;  %v10402_v47 = vpop.f32.mrf.mxu0  ;;  %v11089_v23 = vld [vmem:[#allocation30_spill] sm:$0xff] }
 0x23d   : > { %v7494_v36 = vpop.f32.mrf.mxu1 }
 0x23e   : > { %11084 = vst [vmem:[#allocation16_spill] sm:$0xff] %v10400_v56  ;;  %v4237_v51 = vadd.f32 %v7494_v36, %v3754_v44  ;;  %v10405_v52 = vadd.f32 %v4234_v17, %v11085_v40  ;;  %v10407_v11 = vpop.f32.mrf.mxu0 }
 0x23f   : > { %v4194_v3 = vpop.f32.mrf.mxu1 }
 0x240   : > { %11086 = vst [vmem:[#allocation23_spill] sm:$0xff] %v10405_v52  ;;  %v4235_v20 = vadd.f32 %v4194_v3, %v3746_v28  ;;  %v10410_v48 = vadd.f32 %v4237_v51, %v11087_v55  ;;  %v10412_v2 = vpop.f32.mrf.mxu0 }
 0x241   : > { %v7561_v25 = vpop.f32.mrf.mxu1 }
 0x242   : > { %11088 = vst [vmem:[#allocation18_spill] sm:$0xff] %v10410_v48  ;;  %v10415_v46 = vadd.f32 %v4235_v20, %v11089_v23  ;;  %v10417_v0 = vpop.f32.mrf.mxu0 }
 0x243   : > { %v5250_v39 = vpop.f32.mrf.mxu1 }
 0x244   : > { %11090 = vst [vmem:[#allocation25_spill] sm:$0xff] %v10415_v46  ;;  %v10419_v4 = vpop.f32.mrf.mxu0 }
 0x245   : > { %v7562_v44 = vpop.f32.mrf.mxu1 }
 0x246   : > { %v10421_v29 = vpop.f32.mrf.mxu0 }
 0x247   : > { %v5253_v30 = vpop.f32.mrf.mxu1 }
 0x249   : > { %v10425_v28 = vpop.f32.mrf.mxu0 }
 0x24a   : > { %v10423_v9 = vpop.f32.mrf.mxu1  ;;  %11091 = vst [vmem:[#allocation20_spill] sm:$0xff] %v10425_v28 }
 0x24b   : > { %v10429_v17 = vpop.f32.mrf.mxu0 }
 0x24c   : > { %v10427_v7 = vpop.f32.mrf.mxu1  ;;  %11092 = vst [vmem:[#allocation7_spill] sm:$0xff] %v10429_v17 }
 0x24d   : > { %v10433_v36 = vpop.f32.mrf.mxu0 }
 0x24e   : > { %v10431_v6 = vpop.f32.mrf.mxu1  ;;  %11093 = vst [vmem:[#allocation40_spill] sm:$0xff] %v10433_v36 }
 0x24f   : > { %v10437_v40 = vpop.f32.mrf.mxu0 }
 0x250   : > { %v10435_v51 = vpop.f32.mrf.mxu1  ;;  %11094 = vst [vmem:[#allocation39_spill] sm:$0xff] %v10437_v40 }
 0x251   : > { %v10441_v20 = vpop.f32.mrf.mxu0 }
 0x252   : > { %v10439_v3 = vpop.f32.mrf.mxu1  ;;  %11095 = vst [vmem:[#allocation28_spill] sm:$0xff] %v10441_v20 }
 0x253   : > { %v10445_v23 = vpop.f32.mrf.mxu0 }
 0x254   : > { %v10443_v55 = vpop.f32.mrf.mxu1  ;;  %11096 = vst [vmem:[#allocation6_spill] sm:$0xff] %v10445_v23 }
 0x255   : > { %v10449_v48 = vpop.f32.mrf.mxu0 }
 0x256   : > { %v10447_v46 = vpop.f32.mrf.mxu1  ;;  %11097 = vst [vmem:[#allocation41_spill] sm:$0xff] %v10449_v48 }
 0x257   : > { %v10453_v56 = vpop.f32.mrf.mxu0 }
 0x258   : > { %v10451_v52 = vpop.f32.mrf.mxu1  ;;  %11098 = vst [vmem:[#allocation24_spill] sm:$0xff] %v10453_v56 }
 0x259   : > { %v10457_v12 = vpop.f32.mrf.mxu0 }
 0x25a   : > { %v10455_v42 = vpop.f32.mrf.mxu1  ;;  %11099 = vst [vmem:[#allocation55_spill] sm:$0xff] %v10457_v12 }
 0x25b   : > { %v10461_v41 = vpop.f32.mrf.mxu0 }
 0x25c   : > { %v10459_v58 = vpop.f32.mrf.mxu1  ;;  %11100 = vst [vmem:[#allocation42_spill] sm:$0xff] %v10461_v41 }
 0x25d   : > { %v10465_v21 = vpop.f32.mrf.mxu0 }
 0x25e   : > { %v10463_v13 = vpop.f32.mrf.mxu1  ;;  %11101 = vst [vmem:[#allocation49_spill] sm:$0xff] %v10465_v21 }
 0x25f   : > { %v10469_v10 = vpop.f32.mrf.mxu0 }
 0x260   : > { %v10467_v5 = vpop.f32.mrf.mxu1  ;;  %11102 = vst [vmem:[#allocation46_spill] sm:$0xff] %v10469_v10 }
 0x261   : > { %v10473_v48 = vpop.f32.mrf.mxu0 }
 0x262   : > { %v10471_v27 = vpop.f32.mrf.mxu1  ;;  %11104 = vst [vmem:[#allocation57_spill] sm:$0xff] %v10473_v48 }
 0x263   : > { %11103 = vst [vmem:[#allocation37_spill] sm:$0xff] %v10471_v27  ;;  %v10477_v8 = vpop.f32.mrf.mxu0 }
 0x264   : > { %v10475_v56 = vpop.f32.mrf.mxu1  ;;  %11106 = vst [vmem:[#allocation47_spill] sm:$0xff] %v10477_v8 }
 0x265   : > { %11105 = vst [vmem:[#allocation44_spill] sm:$0xff] %v10475_v56  ;;  %v10481_v23 = vpop.f32.mrf.mxu0 }
 0x266   : > { %v10479_v12 = vpop.f32.mrf.mxu1  ;;  %11108 = vst [vmem:[#allocation36_spill] sm:$0xff] %v10481_v23 }
 0x267   : > { %11107 = vst [vmem:[#allocation50_spill] sm:$0xff] %v10479_v12  ;;  %v10485_v26 = vpop.f32.mrf.mxu0 }
 0x268   : > { %v10483_v41 = vpop.f32.mrf.mxu1  ;;  %11110 = vst [vmem:[#allocation29_spill] sm:$0xff] %v10485_v26 }
 0x269   : > { %11109 = vst [vmem:[#allocation45_spill] sm:$0xff] %v10483_v41 }
 0x26b   : > { %v10487_v21 = vpop.f32.mrf.mxu1 }
 0x26c   : > { %11111 = vst [vmem:[#allocation32_spill] sm:$0xff] %v10487_v21  ;;  %v7609_v20 = vpop.f32.mrf.mxu0  ;;  %v5259_v21 = vadd.f32 %v7561_v25, %v10346_v54 }
 0x26d   : > { %v10489_v10 = vpop.f32.mrf.mxu1 }
 0x26e   : > { %11112 = vst [vmem:[#allocation33_spill] sm:$0xff] %v10489_v10  ;;  %v5699_v53 = vpop.f32.mrf.mxu0  ;;  %v5828_v17 = vadd.f32 %v7609_v20, %v5259_v21  ;;  %v5291_v20 = vadd.f32 %v10439_v3, %v10392_v15 }
 0x26f   : > { %v10491_v40 = vpop.f32.mrf.mxu1 }
 0x270   : > { %11113 = vst [vmem:[#allocation27_spill] sm:$0xff] %v10491_v40  ;;  %v7610_v48 = vpop.f32.mrf.mxu0  ;;  %v5251_v40 = vadd.f32 %v5250_v39, %v10352_v59  ;;  %v5892_v54 = vadd.f32 %v5828_v17, %v10240_v38  ;;  %v10517_v59 = vld [vmem:[%s10756_s5] ss:$0 sm:$0xff] }
 0x271   : > { %v10493_v24 = vpop.f32.mrf.mxu1  ;;  %v10527_v38 = vld [vmem:[%s10758_s7] ss:$0 sm:$0xff] }
 0x272   : > { %11114 = vst [vmem:[#allocation22_spill] sm:$0xff] %v10493_v24  ;;  %v5702_v8 = vpop.f32.mrf.mxu0  ;;  %v5262_v24 = vadd.f32 %v7562_v44, %v10358_v1  ;;  %v5826_v27 = vadd.f32 %v5699_v53, %v5251_v40  ;;  %v5275_v53 = vadd.f32 %v10423_v9, %v10370_v16  ;;  %v5995_v44 = vadd.f32 %v10517_v59, %v5892_v54 }
 0x273   : > { %v5278_v9 = vadd.f32 %v10431_v6, %v10381_v34 }
 0x274   : > { %v10495_v36 = vpop.f32.mrf.mxu1  ;;  %v7613_v12 = vpop.f32.mrf.mxu0 }
 0x275   : > { %11115 = vst [vmem:[#allocation54_spill] sm:$0xff] %v10495_v36  ;;  %v5832_v16 = vadd.f32 %v7613_v12, %v5275_v53 }
 0x276   : > { %v10497_v23 = vpop.f32.mrf.mxu1  ;;  %v5715_v41 = vpop.f32.mrf.mxu0 }
 0x277   : > { %11116 = vst [vmem:[#allocation35_spill] sm:$0xff] %v10497_v23  ;;  %v5254_v23 = vadd.f32 %v5253_v30, %v10364_v49  ;;  %v5890_v49 = vadd.f32 %v5826_v27, %v10248_v32 }
 0x278   : > { %v10499_v43 = vpop.f32.mrf.mxu1  ;;  %v7614_v26 = vpop.f32.mrf.mxu0 }
 0x279   : > { %11117 = vst [vmem:[#allocation26_spill] sm:$0xff] %v10499_v43  ;;  %v5829_v43 = vadd.f32 %v7610_v48, %v5262_v24  ;;  %v5827_v1 = vadd.f32 %v5702_v8, %v5254_v23  ;;  %v5267_v8 = vadd.f32 %v10427_v7, %v10376_v33  ;;  %v5270_v33 = vadd.f32 %v10435_v51, %v10386_v18 }
 0x27a   : > { %v10502_v56 = vpop.f32.mrf.mxu1  ;;  %v5718_v10 = vpop.f32.mrf.mxu0  ;;  %v5833_v40 = vadd.f32 %v7614_v26, %v5278_v9 }
 0x27b   : > { %v5893_v24 = vadd.f32 %v5829_v43, %v10254_v45  ;;  %v5891_v32 = vadd.f32 %v5827_v1, %v10260_v31  ;;  %v5993_v45 = vadd.f32 %v10517_v59, %v5890_v49  ;;  %v5830_v43 = vadd.f32 %v5715_v41, %v5267_v8 }
 0x27c   : > { %v10506_v37 = vpop.f32.mrf.mxu1  ;;  %v7617_v36 = vpop.f32.mrf.mxu0  ;;  %v5896_v41 = vadd.f32 %v5832_v16, %v10266_v35  ;;  %v5831_v49 = vadd.f32 %v5718_v10, %v5270_v33  ;;  %v5897_v16 = vadd.f32 %v5833_v40, %v10276_v61 }
 0x27d   : > { %v5996_v12 = vadd.f32 %v10517_v59, %v5893_v24  ;;  %v5994_v54 = vadd.f32 %v10517_v59, %v5891_v32  ;;  %v5894_v53 = vadd.f32 %v5830_v43, %v10272_v57  ;;  %v5283_v24 = vadd.f32 %v10443_v55, %v10397_v14 }
 0x27e   : > { %v10509_v28 = vpop.f32.mrf.mxu1  ;;  %v5731_v63 = vpop.f32.mrf.mxu0  ;;  %v5836_v26 = vadd.f32 %v7617_v36, %v5291_v20  ;;  %v5895_v9 = vadd.f32 %v5831_v49, %v10280_v60  ;;  %v6000_v43 = vadd.f32 %v10517_v59, %v5897_v16  ;;  %v11120_v16 = vld [vmem:[#allocation37_spill] sm:$0xff] }
 0x27f   : > { %v5834_v10 = vadd.f32 %v5731_v63, %v5283_v24  ;;  %v5997_v55 = vadd.f32 %v10517_v59, %v5894_v53 }
 0x280   : > { %v10512_v25 = vpop.f32.mrf.mxu1  ;;  %v7618_v21 = vpop.f32.mrf.mxu0 }
 0x282   : > { %v10522_v39 = vpop.f32.mrf.mxu1  ;;  %v10530_v48 = vpop.f32.mrf.mxu0 }
 0x284   : > { %v7657_v30 = vpop.f32.mrf.mxu1  ;;  %v10537_v27 = vpop.f32.mrf.mxu0 }
 0x285   : > { %v6267_v17 = vadd.f32 %v7657_v30, %v10527_v38  ;;  %v5294_v30 = vadd.f32 %v10447_v46, %v10402_v47 }
 0x286   : > { %v6258_v31 = vpop.f32.mrf.mxu1  ;;  %v10551_v7 = vpop.f32.mrf.mxu0 }
 0x287   : > { %v6387_v34 = vadd.f32 %v6267_v17, %v5995_v44  ;;  %v6259_v6 = vadd.f32 %v10527_v38, %v6258_v31  ;;  %v5999_v44 = vadd.f32 %v10517_v59, %v5896_v41  ;;  %v5286_v17 = vadd.f32 %v10451_v52, %v10407_v11 }
 0x288   : > { %v7658_v23 = vpop.f32.mrf.mxu1  ;;  %v7622_v1 = vpop.f32.mrf.mxu0  ;;  %v5837_v33 = vadd.f32 %v7618_v21, %v5294_v30  ;;  %v5307_v31 = vadd.f32 %v10455_v42, %v10412_v2  ;;  %v5299_v21 = vadd.f32 %v10459_v58, %v10417_v0 }
 0x289   : > { %6419 = vst [vmem:[%s10546_s30 + $0x10] sm:$0xff] %v6387_v34  ;;  %v6385_v18 = vadd.f32 %v6259_v6, %v5993_v45  ;;  %v6270_v51 = vadd.f32 %v7658_v23, %v10527_v38  ;;  %v5900_v45 = vadd.f32 %v5836_v26, %v10285_v22  ;;  %v5998_v34 = vadd.f32 %v10517_v59, %v5895_v9 }
 0x28a   : > { %v6261_v35 = vpop.f32.mrf.mxu1  ;;  %v5750_v8 = vpop.f32.mrf.mxu0  ;;  %v5835_v6 = vadd.f32 %v10530_v48, %v5286_v17  ;;  %v5901_v20 = vadd.f32 %v5837_v33, %v10300_v62  ;;  %v5840_v23 = vadd.f32 %v10537_v27, %v5307_v31  ;;  %v5310_v48 = vadd.f32 %v10463_v13, %v10419_v4  ;;  %v11125_v31 = vld [vmem:[#allocation40_spill] sm:$0xff] }
 0x28b   : > { %6417 = vst [vmem:[%s10546_s30] sm:$0xff] %v6385_v18  ;;  %v6388_v15 = vadd.f32 %v6270_v51, %v5996_v12  ;;  %v6262_v3 = vadd.f32 %v10527_v38, %v6261_v35  ;;  %v5898_v12 = vadd.f32 %v5834_v10, %v10294_v50  ;;  %v6003_v42 = vadd.f32 %v10517_v59, %v5900_v45  ;;  %v11121_v10 = vld [vmem:[#allocation59_spill] sm:$0xff] }
 0x28c   : > { %v7661_v57 = vpop.f32.mrf.mxu1  ;;  %v10569_v32 = vpop.f32.mrf.mxu0  ;;  %v5899_v53 = vadd.f32 %v5835_v6, %v10304_v19  ;;  %v5838_v49 = vadd.f32 %v10551_v7, %v5299_v21  ;;  %v5302_v62 = vadd.f32 %v10467_v5, %v10421_v29  ;;  %v5841_v24 = vadd.f32 %v7622_v1, %v5310_v48 }
 0x28d   : > { %6420 = vst [vmem:[%s10546_s30 + $0x18] sm:$0xff] %v6388_v15  ;;  %v6386_v14 = vadd.f32 %v6262_v3, %v5994_v54  ;;  %v6283_v36 = vadd.f32 %v7661_v57, %v10527_v38  ;;  %v6001_v58 = vadd.f32 %v10517_v59, %v5898_v12  ;;  %v6004_v26 = vadd.f32 %v10517_v59, %v5901_v20  ;;  %v11118_v15 = vld [vmem:[#allocation56_spill] sm:$0xff]  ;;  %v11129_v20 = vld [vmem:[#allocation45_spill] sm:$0xff] }
 0x28e   : > { %v6274_v61 = vpop.f32.mrf.mxu1  ;;  %v10578_v47 = vpop.f32.mrf.mxu0  ;;  %v5904_v3 = vadd.f32 %v5840_v23, %v11118_v15  ;;  %v5839_v7 = vadd.f32 %v5750_v8, %v5302_v62  ;;  %v6002_v1 = vadd.f32 %v10517_v59, %v5899_v53  ;;  %v11131_v62 = vld [vmem:[#allocation28_spill] sm:$0xff]  ;;  %v11133_v15 = vld [vmem:[#allocation13_spill] sm:$0xff] }
 0x28f   : > { %6418 = vst [vmem:[%s10546_s30 + $0x8] sm:$0xff] %v6386_v14  ;;  %v6391_v63 = vadd.f32 %v6283_v36, %v5999_v44  ;;  %v6275_v46 = vadd.f32 %v10527_v38, %v6274_v61  ;;  %v11119_v44 = vld [vmem:[#allocation20_spill] sm:$0xff]  ;;  %v5902_v14 = vadd.f32 %v5838_v49, %v11121_v10  ;;  %v11122_v36 = vld [vmem:[#allocation7_spill] sm:$0xff] }
 0x290   : > { %v7662_v60 = vpop.f32.mrf.mxu1  ;;  %v10586_v52 = vpop.f32.mrf.mxu0  ;;  %v5323_v19 = vadd.f32 %v11120_v16, %v11119_v44  ;;  %v11124_v61 = vld [vmem:[#allocation4_spill] sm:$0xff]  ;;  %v11134_v16 = vld [vmem:[#allocation6_spill] sm:$0xff] }
 0x291   : > { %6423 = vst [vmem:[%s10546_s30 + $0x30] sm:$0xff] %v6391_v63  ;;  %v6389_v22 = vadd.f32 %v6275_v46, %v5997_v55  ;;  %v6286_v11 = vadd.f32 %v7662_v60, %v10527_v38  ;;  %v11123_v55 = vld [vmem:[#allocation44_spill] sm:$0xff]  ;;  %v5905_v45 = vadd.f32 %v5841_v24, %v11124_v61  ;;  %v11126_v60 = vld [vmem:[#allocation50_spill] sm:$0xff] }
 0x292   : > { %v6277_v41 = vpop.f32.mrf.mxu1  ;;  %v10595_v2 = vpop.f32.mrf.mxu0  ;;  %v5315_v9 = vadd.f32 %v11123_v55, %v11122_v36  ;;  %v5844_v33 = vadd.f32 %v10569_v32, %v5323_v19  ;;  %v5326_v12 = vadd.f32 %v11126_v60, %v11125_v31  ;;  %v11135_v19 = vld [vmem:[#allocation33_spill] sm:$0xff]  ;;  %v11141_v31 = vld [vmem:[#allocation22_spill] sm:$0xff] }
 0x293   : > { %6421 = vst [vmem:[%s10546_s30 + $0x20] sm:$0xff] %v6389_v22  ;;  %v6392_v50 = vadd.f32 %v6286_v11, %v6000_v43  ;;  %v6278_v40 = vadd.f32 %v10527_v38, %v6277_v41  ;;  %v6007_v43 = vadd.f32 %v10517_v59, %v5904_v3  ;;  %v11127_v11 = vld [vmem:[#allocation11_spill] sm:$0xff]  ;;  %v6008_v48 = vadd.f32 %v10517_v59, %v5905_v45  ;;  %v11137_v55 = vld [vmem:[#allocation41_spill] sm:$0xff] }
 0x294   : > { %v7665_v54 = vpop.f32.mrf.mxu1  ;;  %v7629_v0 = vpop.f32.mrf.mxu0  ;;  %v5845_v49 = vadd.f32 %v10586_v52, %v5326_v12 }
 0x295   : > { %6424 = vst [vmem:[%s10546_s30 + $0x38] sm:$0xff] %v6392_v50  ;;  %v6390_v18 = vadd.f32 %v6278_v40, %v5998_v34  ;;  %v6299_v51 = vadd.f32 %v7665_v54, %v10527_v38  ;;  %v5903_v34 = vadd.f32 %v5839_v7, %v11127_v11  ;;  %v5842_v50 = vadd.f32 %v10578_v47, %v5315_v9  ;;  %v11128_v40 = vld [vmem:[#allocation39_spill] sm:$0xff] }
 0x296   : > { %v6290_v27 = vpop.f32.mrf.mxu1  ;;  %v5779_v35 = vpop.f32.mrf.mxu0  ;;  %v5318_v32 = vadd.f32 %v11129_v20, %v11128_v40  ;;  %v11138_v9 = vld [vmem:[#allocation27_spill] sm:$0xff]  ;;  %v11144_v40 = vld [vmem:[#allocation54_spill] sm:$0xff] }
 0x297   : > { %6422 = vst [vmem:[%s10546_s30 + $0x28] sm:$0xff] %v6390_v18  ;;  %v6395_v13 = vadd.f32 %v6299_v51, %v6003_v42  ;;  %v6291_v4 = vadd.f32 %v10527_v38, %v6290_v27  ;;  %v6005_v42 = vadd.f32 %v10517_v59, %v5902_v14  ;;  %v11130_v51 = vld [vmem:[#allocation8_spill] sm:$0xff]  ;;  %v5906_v3 = vadd.f32 %v5842_v50, %v11133_v15  ;;  %v11136_v14 = vld [vmem:[#allocation9_spill] sm:$0xff]  ;;  %v11143_v50 = vld [vmem:[#allocation55_spill] sm:$0xff] }
 0x298   : > { %v7666_v30 = vpop.f32.mrf.mxu1  ;;  %v10616_v57 = vpop.f32.mrf.mxu0  ;;  %v5908_v53 = vadd.f32 %v5844_v33, %v11130_v51  ;;  %v11132_v27 = vld [vmem:[#allocation32_spill] sm:$0xff]  ;;  %v5843_v44 = vadd.f32 %v10595_v2, %v5318_v32  ;;  %v5909_v36 = vadd.f32 %v5845_v49, %v11136_v14  ;;  %v5355_v20 = vadd.f32 %v11144_v40, %v11143_v50  ;;  %v11146_v49 = vld [vmem:[#allocation42_spill] sm:$0xff] }
 0x299   : > { %6427 = vst [vmem:[%s10546_s30 + $0x50] sm:$0xff] %v6395_v13  ;;  %v6393_v5 = vadd.f32 %v6291_v4, %v6001_v58  ;;  %v6302_v29 = vadd.f32 %v7666_v30, %v10527_v38  ;;  %v5339_v47 = vadd.f32 %v11132_v27, %v11131_v62  ;;  %v6006_v13 = vadd.f32 %v10517_v59, %v5903_v34  ;;  %v11140_v33 = vld [vmem:[#allocation24_spill] sm:$0xff]  ;;  %v11147_v62 = vld [vmem:[#allocation35_spill] sm:$0xff]  ;;  %v11152_v14 = vld [vmem:[#allocation46_spill] sm:$0xff] }
 0x29a   : > { %v6293_v17 = vpop.f32.mrf.mxu1  ;;  %v10625_v63 = vpop.f32.mrf.mxu0  ;;  %v5331_v30 = vadd.f32 %v11135_v19, %v11134_v16  ;;  %v6011_v10 = vadd.f32 %v10517_v59, %v5908_v53  ;;  %v5334_v60 = vadd.f32 %v11141_v31, %v11140_v33  ;;  %v5347_v27 = vadd.f32 %v11147_v62, %v11146_v49  ;;  %v11150_v16 = vld [vmem:[#allocation26_spill] sm:$0xff]  ;;  %v11155_v31 = vld [vmem:[#allocation19_spill] sm:$0xff]  ;;  %v11158_v40 = vld [vmem:[#allocation36_spill] sm:$0xff] }
 0x29b   : > { %6425 = vst [vmem:[%s10546_s30 + $0x40] sm:$0xff] %v6393_v5  ;;  %v6396_v8 = vadd.f32 %v6302_v29, %v6004_v26  ;;  %v6294_v46 = vadd.f32 %v10527_v38, %v6293_v17  ;;  %v5848_v52 = vadd.f32 %v7629_v0, %v5339_v47  ;;  %v5342_v17 = vadd.f32 %v11138_v9, %v11137_v55 }
 0x29c   : > { %v7669_v22 = vpop.f32.mrf.mxu1  ;;  %v10634_v6 = vpop.f32.mrf.mxu0  ;;  %v5846_v2 = vadd.f32 %v5779_v35, %v5331_v30  ;;  %v5847_v53 = vadd.f32 %v10625_v63, %v5334_v60 }
 0x29d   : > { %6428 = vst [vmem:[%s10546_s30 + $0x58] sm:$0xff] %v6396_v8  ;;  %v6394_v21 = vadd.f32 %v6294_v46, %v6002_v1  ;;  %v6315_v41 = vadd.f32 %v7669_v22, %v10527_v38  ;;  %v6009_v8 = vadd.f32 %v10517_v59, %v5906_v3  ;;  %v11139_v46 = vld [vmem:[#allocation15_spill] sm:$0xff]  ;;  %v11142_v22 = vld [vmem:[#allocation10_spill] sm:$0xff]  ;;  %v5852_v3 = vadd.f32 %v10634_v6, %v5355_v20 }
 0x29e   : > { %v6306_v23 = vpop.f32.mrf.mxu1  ;;  %v10643_v54 = vpop.f32.mrf.mxu0  ;;  %v5912_v11 = vadd.f32 %v5848_v52, %v11142_v22  ;;  %v5374_v20 = vadd.f32 %v10512_v25, %v11158_v40 }
 0x29f   : > { %6426 = vst [vmem:[%s10546_s30 + $0x48] sm:$0xff] %v6394_v21  ;;  %v6399_v58 = vadd.f32 %v6315_v41, %v6007_v43  ;;  %v6307_v18 = vadd.f32 %v10527_v38, %v6306_v23  ;;  %v5907_v43 = vadd.f32 %v5843_v44, %v11139_v46  ;;  %v6012_v41 = vadd.f32 %v10517_v59, %v5909_v36  ;;  %v11145_v23 = vld [vmem:[#allocation43_spill] sm:$0xff]  ;;  %v11149_v44 = vld [vmem:[#allocation49_spill] sm:$0xff] }
 0x2a0   : > { %v7670_v24 = vpop.f32.mrf.mxu1  ;;  %v7634_v5 = vpop.f32.mrf.mxu0  ;;  %v5358_v19 = vadd.f32 %v11150_v16, %v11149_v44  ;;  %v5350_v36 = vadd.f32 %v10502_v56, %v11152_v14  ;;  %v11162_v44 = vld [vmem:[#allocation23_spill] sm:$0xff] }
 0x2a1   : > { %6431 = vst [vmem:[%s10546_s30 + $0x70] sm:$0xff] %v6399_v58  ;;  %v6397_v4 = vadd.f32 %v6307_v18, %v6005_v42  ;;  %v6318_v26 = vadd.f32 %v7670_v24, %v10527_v38  ;;  %v5849_v42 = vadd.f32 %v10616_v57, %v5342_v17  ;;  %v6010_v51 = vadd.f32 %v10517_v59, %v5907_v43 }
 0x2a2   : > { %v6309_v7 = vpop.f32.mrf.mxu1  ;;  %v5798_v34 = vpop.f32.mrf.mxu0  ;;  %v6015_v57 = vadd.f32 %v10517_v59, %v5912_v11  ;;  %v5853_v6 = vadd.f32 %v7634_v5, %v5358_v19 }
 0x2a3   : > { %6429 = vst [vmem:[%s10546_s30 + $0x60] sm:$0xff] %v6397_v4  ;;  %v6400_v29 = vadd.f32 %v6318_v26, %v6008_v48  ;;  %v6310_v1 = vadd.f32 %v10527_v38, %v6309_v7  ;;  %v5910_v48 = vadd.f32 %v5846_v2, %v11145_v23  ;;  %v11148_v26 = vld [vmem:[#allocation5_spill] sm:$0xff] }
 0x2a4   : > { %v7673_v61 = vpop.f32.mrf.mxu1  ;;  %v7637_v24 = vpop.f32.mrf.mxu0  ;;  %v5913_v15 = vadd.f32 %v5849_v42, %v11148_v26  ;;  %v11159_v23 = vld [vmem:[#allocation21_spill] sm:$0xff] }
 0x2a5   : > { %6432 = vst [vmem:[%s10546_s30 + $0x78] sm:$0xff] %v6400_v29  ;;  %v6398_v45 = vadd.f32 %v6310_v1, %v6006_v13  ;;  %v6331_v0 = vadd.f32 %v7673_v61, %v10527_v38  ;;  %v6013_v30 = vadd.f32 %v10517_v59, %v5910_v48  ;;  %v11151_v29 = vld [vmem:[#allocation17_spill] sm:$0xff] }
 0x2a6   : > { %v6322_v12 = vpop.f32.mrf.mxu1  ;;  %v5911_v1 = vadd.f32 %v5847_v53, %v11151_v29  ;;  %v5811_v9 = vpop.f32.mrf.mxu0  ;;  %v6016_v2 = vadd.f32 %v10517_v59, %v5913_v15  ;;  %v11160_v53 = vld [vmem:[#allocation29_spill] sm:$0xff]  ;;  %v11163_v29 = vld [vmem:[#allocation18_spill] sm:$0xff] }
 0x2a7   : > { %6430 = vst [vmem:[%s10546_s30 + $0x68] sm:$0xff] %v6398_v45  ;;  %v6403_v21 = vadd.f32 %v6331_v0, %v6011_v10  ;;  %v6323_v35 = vadd.f32 %v10527_v38, %v6322_v12  ;;  %v5850_v10 = vadd.f32 %v10643_v54, %v5347_v27  ;;  %v11153_v45 = vld [vmem:[#allocation12_spill] sm:$0xff]  ;;  %v5851_v54 = vadd.f32 %v5798_v34, %v5350_v36  ;;  %v11156_v12 = vld [vmem:[#allocation47_spill] sm:$0xff] }
 0x2a8   : > { %v7674_v32 = vpop.f32.mrf.mxu1  ;;  %v5916_v0 = vadd.f32 %v5852_v3, %v11153_v45  ;;  %v6014_v5 = vadd.f32 %v10517_v59, %v5911_v1  ;;  %v5363_v22 = vadd.f32 %v10509_v28, %v11156_v12  ;;  %v5366_v49 = vadd.f32 %v10522_v39, %v11160_v53 }
 0x2a9   : > { %6435 = vst [vmem:[%s10546_s30 + $0x90] sm:$0xff] %v6403_v21  ;;  %v6401_v58 = vadd.f32 %v6323_v35, %v6009_v8  ;;  %v6334_v18 = vadd.f32 %v7674_v32, %v10527_v38  ;;  %v11154_v8 = vld [vmem:[#allocation57_spill] sm:$0xff]  ;;  %v5914_v60 = vadd.f32 %v5850_v10, %v11155_v31  ;;  %v11157_v21 = vld [vmem:[#allocation14_spill] sm:$0xff]  ;;  %v5915_v48 = vadd.f32 %v5851_v54, %v11159_v23 }
 0x2aa   : > { %v6325_v47 = vpop.f32.mrf.mxu1  ;;  %v5371_v46 = vadd.f32 %v10506_v37, %v11154_v8  ;;  %v5917_v35 = vadd.f32 %v5853_v6, %v11157_v21  ;;  %v6019_v42 = vadd.f32 %v10517_v59, %v5916_v0  ;;  %v11164_v6 = vld [vmem:[#allocation25_spill] sm:$0xff] }
 0x2ab   : > { %6433 = vst [vmem:[%s10546_s30 + $0x80] sm:$0xff] %v6401_v58  ;;  %v6404_v13 = vadd.f32 %v6334_v18, %v6012_v41  ;;  %v6326_v4 = vadd.f32 %v10527_v38, %v6325_v47  ;;  %v7638_v41 = vpop.f32.mrf.mxu0  ;;  %v6017_v18 = vadd.f32 %v10517_v59, %v5914_v60  ;;  %v6018_v15 = vadd.f32 %v10517_v59, %v5915_v48 }
 0x2ac   : > { %v7677_v63 = vpop.f32.mrf.mxu1  ;;  %v5856_v50 = vadd.f32 %v7637_v24, %v5371_v46  ;;  %v6020_v27 = vadd.f32 %v10517_v59, %v5917_v35  ;;  %v11161_v24 = vld [vmem:[#allocation16_spill] sm:$0xff] }
 0x2ad   : > { %6436 = vst [vmem:[%s10546_s30 + $0x98] sm:$0xff] %v6404_v13  ;;  %v6402_v7 = vadd.f32 %v6326_v4, %v6010_v51  ;;  %v6347_v52 = vadd.f32 %v7677_v63, %v10527_v38  ;;  %v5854_v51 = vadd.f32 %v5811_v9, %v5363_v22  ;;  %v5814_v47 = vpop.f32.mrf.mxu0  ;;  %v5857_v4 = vadd.f32 %v7638_v41, %v5374_v20 }
 0x2ae   : > { %v6338_v55 = vpop.f32.mrf.mxu1  ;;  %v5920_v13 = vadd.f32 %v5856_v50, %v11161_v24  ;;  %v5855_v19 = vadd.f32 %v5814_v47, %v5366_v49 }
 0x2af   : > { %6434 = vst [vmem:[%s10546_s30 + $0x88] sm:$0xff] %v6402_v7  ;;  %v6407_v17 = vadd.f32 %v6347_v52, %v6015_v57  ;;  %v6339_v61 = vadd.f32 %v10527_v38, %v6338_v55  ;;  %v5918_v16 = vadd.f32 %v5854_v51, %v11162_v44  ;;  %v5921_v1 = vadd.f32 %v5857_v4, %v11163_v29 }
 0x2b0   : > { %v7678_v43 = vpop.f32.mrf.mxu1  ;;  %v6023_v52 = vadd.f32 %v10517_v59, %v5920_v13  ;;  %v5919_v9 = vadd.f32 %v5855_v19, %v11164_v6 }
 0x2b1   : > { %6439 = vst [vmem:[%s10546_s30 + $0xb0] sm:$0xff] %v6407_v17  ;;  %v6405_v33 = vadd.f32 %v6339_v61, %v6013_v30  ;;  %v6350_v56 = vadd.f32 %v7678_v43, %v10527_v38  ;;  %v6021_v55 = vadd.f32 %v10517_v59, %v5918_v16  ;;  %v6024_v45 = vadd.f32 %v10517_v59, %v5921_v1 }
 0x2b2   : > { %v6341_v11 = vpop.f32.mrf.mxu1  ;;  %v6022_v43 = vadd.f32 %v10517_v59, %v5919_v9 }
 0x2b3   : > { %6437 = vst [vmem:[%s10546_s30 + $0xa0] sm:$0xff] %v6405_v33  ;;  %v6408_v37 = vadd.f32 %v6350_v56, %v6016_v2  ;;  %v6342_v34 = vadd.f32 %v10527_v38, %v6341_v11 }
 0x2b4   : > { %v7681_v32 = vpop.f32.mrf.mxu1 }
 0x2b5   : > { %6440 = vst [vmem:[%s10546_s30 + $0xb8] sm:$0xff] %v6408_v37  ;;  %v6406_v28 = vadd.f32 %v6342_v34, %v6014_v5  ;;  %v6363_v58 = vadd.f32 %v7681_v32, %v10527_v38 }
 0x2b6   : > { %v6354_v62 = vpop.f32.mrf.mxu1 }
 0x2b7   : > { %6438 = vst [vmem:[%s10546_s30 + $0xa8] sm:$0xff] %v6406_v28  ;;  %v6411_v25 = vadd.f32 %v6363_v58, %v6019_v42  ;;  %v6355_v57 = vadd.f32 %v10527_v38, %v6354_v62 }
 0x2b8   : > { %v7682_v26 = vpop.f32.mrf.mxu1 }
 0x2b9   : > { %6443 = vst [vmem:[%s10546_s30 + $0xd0] sm:$0xff] %v6411_v25  ;;  %v6409_v3 = vadd.f32 %v6355_v57, %v6017_v18  ;;  %v6366_v39 = vadd.f32 %v7682_v26, %v10527_v38 }
 0x2ba   : > { %v6357_v63 = vpop.f32.mrf.mxu1 }
 0x2bb   : > { %6441 = vst [vmem:[%s10546_s30 + $0xc0] sm:$0xff] %v6409_v3  ;;  %v6412_v30 = vadd.f32 %v6366_v39, %v6020_v27  ;;  %v6358_v7 = vadd.f32 %v10527_v38, %v6357_v63 }
 0x2bc   : > { %v7685_v10 = vpop.f32.mrf.mxu1 }
 0x2bd   : > { %6444 = vst [vmem:[%s10546_s30 + $0xd8] sm:$0xff] %v6412_v30  ;;  %v6410_v14 = vadd.f32 %v6358_v7, %v6018_v15  ;;  %v6379_v36 = vadd.f32 %v7685_v10, %v10527_v38 }
 0x2be   : > { %v6370_v17 = vpop.f32.mrf.mxu1 }
 0x2bf   : > { %6442 = vst [vmem:[%s10546_s30 + $0xc8] sm:$0xff] %v6410_v14  ;;  %v6415_v61 = vadd.f32 %v6379_v36, %v6023_v52  ;;  %v6371_v2 = vadd.f32 %v10527_v38, %v6370_v17 }
 0x2c0   : > { %v7686_v0 = vpop.f32.mrf.mxu1 }
 0x2c1   : > { %6447 = vst [vmem:[%s10546_s30 + $0xf0] sm:$0xff] %v6415_v61  ;;  %v6413_v8 = vadd.f32 %v6371_v2, %v6021_v55  ;;  %v6382_v46 = vadd.f32 %v7686_v0, %v10527_v38 }
 0x2c2   : > { %v6373_v54 = vpop.f32.mrf.mxu1 }
 0x2c3   : > { %6445 = vst [vmem:[%s10546_s30 + $0xe0] sm:$0xff] %v6413_v8  ;;  %v6416_v33 = vadd.f32 %v6382_v46, %v6024_v45  ;;  %v6374_v56 = vadd.f32 %v10527_v38, %v6373_v54 }
 0x2c5   : > { %6448 = vst [vmem:[%s10546_s30 + $0xf8] sm:$0xff] %v6416_v33  ;;  %v6414_v5 = vadd.f32 %v6374_v56, %v6022_v43 }
 0x2c7   : > { %6446 = vst [vmem:[%s10546_s30 + $0xe8] sm:$0xff] %v6414_v5 }
 0x2c8 PF: > { %s18_s27 = sadd.s32 1, %s7902_s27  }
 0x2c9   : > { %p15_p4 = scmp.ge.s32.totalorder %s18_s27, 4  }
 0x2cb   :  { %17 = sbr.rel (!%p15_p4) target bundleno = 1 (0x1), region = 88 }

</bundles_post_ra>
